<compile_context>
chip_gen: v7x
topology: tpu7x:2x2x1
jax: 0.10.0
libtpu: 0.0.40
codegen_flags: <defaults>
</compile_context>

<pallas_src>
import functools

import jax
import jax.numpy as jnp
from jax.experimental import pallas as pl
from jax.experimental.pallas import tpu as pltpu


# ------------------------- fused conv trunk kernel -------------------------
#
# Per grid step (= one sample):
#   p1   : (400, 256)  conv1 im2col patches (rows ordered (h, wp, wq), w=2*wq+wp)
#   conv1: (400,256)@(256,32) -> ReLU -> c1 scratch (400, 32)  [rows (h,wp,wq)]
#   conv2: build (81,512) patches in p2 scratch from contiguous c1 row slices,
#          (81,512)@(512,64) -> ReLU -> c2 scratch (81, 64)    [rows (hh,ww)]
#   conv3: build (49,576) patches in p3 scratch, (49,576)@(576,64) -> ReLU
#          -> out rows 0..48; row 49 zeroed (K padding for the heads GEMM).

def _trunk_kernel(p1_ref, w1_ref, b1_ref, w2_ref, b2_ref, w3_ref, b3_ref,
                  out_ref, c1_ref, p2_ref, c2_ref, p3_ref):
    # ---- conv1: one GEMM over the host-built patch matrix ----------------
    y1 = jnp.dot(p1_ref[0], w1_ref[...], preferred_element_type=jnp.float32)
    y1 = jnp.maximum(y1 + b1_ref[...], 0.0)
    c1_ref[...] = y1.astype(jnp.bfloat16)

    # ---- conv2 (4x4, stride 2): in-VMEM im2col + one GEMM ----------------
    # c1 rows are ordered r = h*20 + wp*10 + wq with w = 2*wq + wp, so for a
    # kernel tap (i, j) (j = 2*ja + jb) and output row ohh the 9 needed input
    # pixels are a CONTIGUOUS run of c1 rows starting at
    #   (2*ohh + i)*20 + jb*10 + ja.
    for ohh in range(9):
        pieces = []
        for i in range(4):
            h = 2 * ohh + i
            for j in range(4):
                ja, jb = j // 2, j % 2
                start = h * 20 + jb * 10 + ja
                pieces.append(c1_ref[start:start + 9, :])          # (9, 32)
        # column order (i, j, c) matches the (KH*KW*C, O) weight layout
        p2_ref[ohh * 9:(ohh + 1) * 9, :] = jnp.concatenate(pieces, axis=1)

    y2 = jnp.dot(p2_ref[...], w2_ref[...], preferred_element_type=jnp.float32)
    y2 = jnp.maximum(y2 + b2_ref[...], 0.0)
    c2_ref[...] = y2.astype(jnp.bfloat16)

    # ---- conv3 (3x3, stride 1): in-VMEM im2col + one GEMM ----------------
    for oh in range(7):
        pieces = []
        for i in range(3):
            base = (oh + i) * 9
            for j in range(3):
                pieces.append(c2_ref[base + j:base + j + 7, :])    # (7, 64)
        p3_ref[oh * 7:(oh + 1) * 7, :] = jnp.concatenate(pieces, axis=1)

    y3 = jnp.dot(p3_ref[...], w3_ref[...], preferred_element_type=jnp.float32)
    y3 = jnp.maximum(y3 + b3_ref[...], 0.0)
    out_ref[0, 0:49, :] = y3.astype(out_ref.dtype)
    # Row 49 is the zero-pad that makes the flattened feature length 3200
    # (a multiple of 128) for the K-tiled heads GEMM.
    out_ref[0, 49:50, :] = jnp.zeros((1, 64), out_ref.dtype)


def trunk_pallas(p1, w1c, b1c, w2c, b2c, w3c, b3c):
    """p1: (B, 400, 256) bf16 conv1 patches -> (B, 50, 64) bf16 features."""
    B = p1.shape[0]
    return pl.pallas_call(
        _trunk_kernel,
        out_shape=jax.ShapeDtypeStruct((B, 50, 64), jnp.bfloat16),
        grid_spec=pltpu.PrefetchScalarGridSpec(
            num_scalar_prefetch=0,
            grid=(B,),
            in_specs=[
                pl.BlockSpec((1, 400, 256), lambda b: (b, 0, 0)),   # patches
                pl.BlockSpec((256, 32), lambda b: (0, 0)),          # conv1 w
                pl.BlockSpec((1, 32), lambda b: (0, 0)),            # conv1 b
                pl.BlockSpec((512, 64), lambda b: (0, 0)),          # conv2 w
                pl.BlockSpec((1, 64), lambda b: (0, 0)),            # conv2 b
                pl.BlockSpec((576, 64), lambda b: (0, 0)),          # conv3 w
                pl.BlockSpec((1, 64), lambda b: (0, 0)),            # conv3 b
            ],
            out_specs=pl.BlockSpec((1, 50, 64), lambda b: (b, 0, 0)),
            scratch_shapes=[
                pltpu.VMEM((400, 32), jnp.bfloat16),   # conv1 output
                pltpu.VMEM((81, 512), jnp.bfloat16),   # conv2 patches
                pltpu.VMEM((81, 64), jnp.bfloat16),    # conv2 output
                pltpu.VMEM((49, 576), jnp.bfloat16),   # conv3 patches
            ],
        ),
        compiler_params=pltpu.CompilerParams(
            dimension_semantics=("parallel",),   # batch axis -> both TCs on v7x
        ),
    )(p1, w1c, b1c, w2c, b2c, w3c, b3c)


# ------------------------------ heads kernel -------------------------------
#
# Grid over the fc1 contraction dim (K = 3200, 5 chunks of 640) so the 6.4 MB
# fc1 weight DMA pipelines against MXU work.  The final step applies bias+ReLU,
# the fused block-diagonal [adv|val] second-stage GEMM and the dueling
# aggregation Q = V + (A - A.mean())  (global mean, matching the module).

def _heads_kernel(feat_ref, w1_ref, b1_ref, wav_ref, bav_ref, q_ref, acc_ref,
                  *, num_actions):
    k = pl.program_id(0)

    @pl.when(k == 0)
    def _():
        acc_ref[...] = jnp.zeros_like(acc_ref)

    acc_ref[...] += jnp.dot(feat_ref[...], w1_ref[...],
                            preferred_element_type=jnp.float32)

    @pl.when(k == pl.num_programs(0) - 1)
    def _():
        h = jnp.maximum(acc_ref[...] + b1_ref[...], 0.0)         # (B, 1024) f32
        out2 = jnp.dot(h.astype(jnp.bfloat16), wav_ref[...],
                       preferred_element_type=jnp.float32) + bav_ref[...]
        a = out2[:, :num_actions]                                # (B, A)
        v = out2[:, num_actions:]                                # (B, 1)
        mean_a = jnp.sum(a) * (1.0 / (a.shape[0] * num_actions))
        q_ref[...] = (v + (a - mean_a)).astype(q_ref.dtype)


def heads_pallas(feat, w1, b1, wav, bav, *, tk=640):
    """feat: (B, 3200) bf16 (zero-padded) -> Q: (B, num_actions) f32."""
    B, K = feat.shape
    N1 = w1.shape[1]
    num_actions = wav.shape[1] - 1
    return pl.pallas_call(
        functools.partial(_heads_kernel, num_actions=num_actions),
        out_shape=jax.ShapeDtypeStruct((B, num_actions), jnp.float32),
        grid_spec=pltpu.PrefetchScalarGridSpec(
            num_scalar_prefetch=0,
            grid=(K // tk,),
            in_specs=[
                pl.BlockSpec((B, tk), lambda k: (0, k)),         # feat K-chunk
                pl.BlockSpec((tk, N1), lambda k: (k, 0)),        # fc1 w chunk
                pl.BlockSpec((1, N1), lambda k: (0, 0)),         # fc1 bias
                pl.BlockSpec(wav.shape, lambda k: (0, 0)),       # block-diag w
                pl.BlockSpec((1, num_actions + 1), lambda k: (0, 0)),
            ],
            out_specs=pl.BlockSpec((B, num_actions), lambda k: (0, 0)),
            scratch_shapes=[pltpu.VMEM((B, N1), jnp.float32)],
        ),
        compiler_params=pltpu.CompilerParams(
            dimension_semantics=("arbitrary",),   # reduction axis
        ),
    )(feat, w1, b1, wav, bav)


# ------------------------------ glue (JAX) ---------------------------------

def conv1_patches(x):
    """NCHW f32 input -> (B, 400, 256) bf16 conv1 im2col patches.

    Rows ordered (h, wp, wq) with w = 2*wq + wp so that the in-kernel stride-2
    conv2 patch build only needs contiguous row slices.  Columns ordered
    (kh, kw, c) to match the (KH*KW*C, O) weight layout.  The NCHW->NHWC
    transpose, f32->bf16 cast and the gather all live in one XLA fusion.
    """
    B = x.shape[0]
    xh = jnp.transpose(x, (0, 2, 3, 1)).astype(jnp.bfloat16)      # (B,84,84,4)
    taps = []
    for i in range(8):
        for j in range(8):
            taps.append(xh[:, i:i + 77:4, j:j + 77:4, :])         # (B,20,20,4)
    p = jnp.stack(taps, axis=3)                                   # (B,20,20,64,4)
    p = p.reshape(B, 20, 20, 256)                                 # cols (i,j,c)
    p = p.reshape(B, 20, 10, 2, 256).transpose(0, 1, 3, 2, 4)     # w -> (wp,wq)
    return p.reshape(B, 400, 256)


def init_params(key, num_actions):
    """PyTorch-layout weights, pre-transformed ONCE for the Pallas kernels."""
    ks = jax.random.split(key, 10)
    s = 0.05

    def w(k, shape):
        return (s * jax.random.normal(k, shape)).astype(jnp.float32)

    # PyTorch-layout tensors.
    conv1_w = w(ks[0], (32, 4, 8, 8));     conv1_b = w(ks[1], (32,))
    conv2_w = w(ks[2], (64, 32, 4, 4));    conv2_b = w(ks[3], (64,))
    conv3_w = w(ks[4], (64, 64, 3, 3));    conv3_b = w(ks[5], (64,))
    adv1_w = w(ks[6], (512, 7 * 7 * 64));  adv1_b = jnp.zeros((512,), jnp.float32)
    adv2_w = w(ks[7], (num_actions, 512)); adv2_b = jnp.zeros((num_actions,), jnp.float32)
    val1_w = w(ks[8], (512, 7 * 7 * 64));  val1_b = jnp.zeros((512,), jnp.float32)
    val2_w = w(ks[9], (1, 512));           val2_b = jnp.zeros((1,), jnp.float32)

    def conv_w_to_gemm(cw):
        # (O, C, KH, KW) -> (KH, KW, C, O) -> (KH*KW*C, O), bf16 for the MXU.
        O, C, KH, KW = cw.shape
        return cw.transpose(2, 3, 1, 0).reshape(KH * KW * C, O).astype(jnp.bfloat16)

    def fc1_w_to_gemm(fw):
        # Torch columns are (c, h, w); the features flatten NHWC, so permute
        # columns to (h, w, c), then transpose to (K, N).
        return (fw.reshape(512, 64, 7, 7)
                  .transpose(0, 2, 3, 1)
                  .reshape(512, 7 * 7 * 64)
                  .T)

    # Fused fc1 weight: [advantage | value] along N -> (3136, 1024),
    # zero-padded along K to 3200 (pad rows multiply zero-padded feat cols).
    w1 = jnp.concatenate([fc1_w_to_gemm(adv1_w), fc1_w_to_gemm(val1_w)], axis=1)
    w1 = jnp.concatenate([w1, jnp.zeros((64, 1024), w1.dtype)], axis=0)
    b1 = jnp.concatenate([adv1_b, val1_b]).reshape(1, 1024)

    # Block-diagonal second-stage weight: [[wa, 0], [0, wv]] -> (1024, A+1).
    wav = jnp.zeros((1024, num_actions + 1), jnp.float32)
    wav = wav.at[:512, :num_actions].set(adv2_w.T)
    wav = wav.at[512:, num_actions:].set(val2_w.T)
    bav = jnp.concatenate([adv2_b, val2_b]).reshape(1, num_actions + 1)

    return {
        "conv1_w": conv_w_to_gemm(conv1_w), "conv1_b": conv1_b.reshape(1, 32),
        "conv2_w": conv_w_to_gemm(conv2_w), "conv2_b": conv2_b.reshape(1, 64),
        "conv3_w": conv_w_to_gemm(conv3_w), "conv3_b": conv3_b.reshape(1, 64),
        "w1": w1.astype(jnp.bfloat16), "b1": b1,
        "wav": wav.astype(jnp.bfloat16), "bav": bav,
    }


def dueling_dqn_forward(params, x):
    """x: (B, 4, 84, 84) f32 (PyTorch NCHW) -> Q: (B, num_actions) f32."""
    B = x.shape[0]
    p1 = conv1_patches(x)                                      # (B, 400, 256) bf16
    feat3d = trunk_pallas(p1,
                          params["conv1_w"], params["conv1_b"],
                          params["conv2_w"], params["conv2_b"],
                          params["conv3_w"], params["conv3_b"])  # (B, 50, 64)
    feat = feat3d.reshape(B, 50 * 64)                            # (B, 3200)
    return heads_pallas(feat, params["w1"], params["b1"],
                        params["wav"], params["bav"])


if __name__ == "__main__":
    num_actions = 6
    key = jax.random.PRNGKey(0)
    k_params, k_x = jax.random.split(key)

    params = init_params(k_params, num_actions)
    # batch=2, channels=4, spatial=84x84 (the 7*7*64 Linear implies 84x84 input)
    x = jax.random.normal(k_x, (2, 4, 84, 84), dtype=jnp.float32)

    q = jax.jit(dueling_dqn_forward)(params, x)
    q = jax.block_until_ready(q)
    assert q.shape == (2, num_actions) and q.dtype == jnp.float32
    assert bool(jnp.all(jnp.isfinite(q)))
    print("KERNEL_OK")
</pallas_src>

<mosaic_0001>
module attributes {stable_mosaic.version = 11 : i64} {
  func.func @_trunk_kernel(%arg0: i32, %arg1: memref<1x400x256xbf16, #tpu.memory_space<vmem>>, %arg2: memref<256x32xbf16, #tpu.memory_space<vmem>>, %arg3: memref<1x32xf32, #tpu.memory_space<vmem>>, %arg4: memref<512x64xbf16, #tpu.memory_space<vmem>>, %arg5: memref<1x64xf32, #tpu.memory_space<vmem>>, %arg6: memref<576x64xbf16, #tpu.memory_space<vmem>>, %arg7: memref<1x64xf32, #tpu.memory_space<vmem>>, %arg8: memref<1x50x64xbf16, #tpu.memory_space<vmem>>, %arg9: memref<400x32xbf16, #tpu.memory_space<vmem>>, %arg10: memref<81x512xbf16, #tpu.memory_space<vmem>>, %arg11: memref<81x64xbf16, #tpu.memory_space<vmem>>, %arg12: memref<49x576xbf16, #tpu.memory_space<vmem>>) attributes {dimension_semantics = [#tpu.dimension_semantics<parallel>], iteration_bounds = array<i64: 2>, scalar_prefetch = 0 : i64, scratch_operands = 4 : i64, tpu.core_type = #tpu.core_type<tc>, window_params = [{transform_indices = @transform_0, window_bounds = array<i64: 1, 400, 256>}, {pipeline_mode = #tpu.pipeline_mode<synchronous>, transform_indices = @transform_1, window_bounds = array<i64: 256, 32>}, {pipeline_mode = #tpu.pipeline_mode<synchronous>, transform_indices = @transform_2, window_bounds = array<i64: 1, 32>}, {pipeline_mode = #tpu.pipeline_mode<synchronous>, transform_indices = @transform_3, window_bounds = array<i64: 512, 64>}, {pipeline_mode = #tpu.pipeline_mode<synchronous>, transform_indices = @transform_4, window_bounds = array<i64: 1, 64>}, {pipeline_mode = #tpu.pipeline_mode<synchronous>, transform_indices = @transform_5, window_bounds = array<i64: 576, 64>}, {pipeline_mode = #tpu.pipeline_mode<synchronous>, transform_indices = @transform_6, window_bounds = array<i64: 1, 64>}, {transform_indices = @transform_7, window_bounds = array<i64: 1, 50, 64>}]} {
    %c0 = arith.constant 0 : index
    %c0_0 = arith.constant 0 : index
    %c0_1 = arith.constant 0 : index
    %0 = vector.load %arg1[%c0, %c0_0, %c0_1] : memref<1x400x256xbf16, #tpu.memory_space<vmem>>, vector<1x400x256xbf16>
    %1 = vector.shape_cast %0 : vector<1x400x256xbf16> to vector<400x256xbf16>
    %c0_2 = arith.constant 0 : index
    %c0_3 = arith.constant 0 : index
    %2 = vector.load %arg2[%c0_2, %c0_3] : memref<256x32xbf16, #tpu.memory_space<vmem>>, vector<256x32xbf16>
    %cst = arith.constant dense<0.000000e+00> : vector<400x32xf32>
    %3 = tpu.matmul %1, %2, %cst {dimension_numbers = #tpu.dot_dimension_numbers<[1], [0], [0], [1], [0, 0, 1, 1], [], []>} : vector<400x256xbf16>, vector<256x32xbf16>, vector<400x32xf32> -> vector<400x32xf32>
    %c0_4 = arith.constant 0 : index
    %c0_5 = arith.constant 0 : index
    %4 = vector.load %arg3[%c0_4, %c0_5] : memref<1x32xf32, #tpu.memory_space<vmem>>, vector<1x32xf32>
    %5 = vector.broadcast %4 : vector<1x32xf32> to vector<400x32xf32>
    %6 = arith.addf %3, %5 : vector<400x32xf32>
    %cst_6 = arith.constant 0.000000e+00 : f32
    %7 = vector.broadcast %cst_6 : f32 to vector<400x32xf32>
    %8 = arith.maximumf %6, %7 : vector<400x32xf32>
    %9 = arith.truncf %8 : vector<400x32xf32> to vector<400x32xbf16>
    %c0_7 = arith.constant 0 : index
    %c0_8 = arith.constant 0 : index
    %10 = vector.load %arg9[%c0_7, %c0_8] : memref<400x32xbf16, #tpu.memory_space<vmem>>, vector<400x32xbf16>
    tpu.vector_store %arg9[%c0_7, %c0_8], %9 {strides = array<i32>} : memref<400x32xbf16, #tpu.memory_space<vmem>>, vector<400x32xbf16>,
    %c0_9 = arith.constant 0 : index
    %c0_10 = arith.constant 0 : index
    %11 = vector.load %arg9[%c0_9, %c0_10] : memref<400x32xbf16, #tpu.memory_space<vmem>>, vector<9x32xbf16>
    %c10 = arith.constant 10 : index
    %c0_11 = arith.constant 0 : index
    %12 = vector.load %arg9[%c10, %c0_11] : memref<400x32xbf16, #tpu.memory_space<vmem>>, vector<9x32xbf16>
    %c1 = arith.constant 1 : index
    %c0_12 = arith.constant 0 : index
    %13 = vector.load %arg9[%c1, %c0_12] : memref<400x32xbf16, #tpu.memory_space<vmem>>, vector<9x32xbf16>
    %c11 = arith.constant 11 : index
    %c0_13 = arith.constant 0 : index
    %14 = vector.load %arg9[%c11, %c0_13] : memref<400x32xbf16, #tpu.memory_space<vmem>>, vector<9x32xbf16>
    %c20 = arith.constant 20 : index
    %c0_14 = arith.constant 0 : index
    %15 = vector.load %arg9[%c20, %c0_14] : memref<400x32xbf16, #tpu.memory_space<vmem>>, vector<9x32xbf16>
    %c30 = arith.constant 30 : index
    %c0_15 = arith.constant 0 : index
    %16 = vector.load %arg9[%c30, %c0_15] : memref<400x32xbf16, #tpu.memory_space<vmem>>, vector<9x32xbf16>
    %c21 = arith.constant 21 : index
    %c0_16 = arith.constant 0 : index
    %17 = vector.load %arg9[%c21, %c0_16] : memref<400x32xbf16, #tpu.memory_space<vmem>>, vector<9x32xbf16>
    %c31 = arith.constant 31 : index
    %c0_17 = arith.constant 0 : index
    %18 = vector.load %arg9[%c31, %c0_17] : memref<400x32xbf16, #tpu.memory_space<vmem>>, vector<9x32xbf16>
    %c40 = arith.constant 40 : index
    %c0_18 = arith.constant 0 : index
    %19 = vector.load %arg9[%c40, %c0_18] : memref<400x32xbf16, #tpu.memory_space<vmem>>, vector<9x32xbf16>
    %c50 = arith.constant 50 : index
    %c0_19 = arith.constant 0 : index
    %20 = vector.load %arg9[%c50, %c0_19] : memref<400x32xbf16, #tpu.memory_space<vmem>>, vector<9x32xbf16>
    %c41 = arith.constant 41 : index
    %c0_20 = arith.constant 0 : index
    %21 = vector.load %arg9[%c41, %c0_20] : memref<400x32xbf16, #tpu.memory_space<vmem>>, vector<9x32xbf16>
    %c51 = arith.constant 51 : index
    %c0_21 = arith.constant 0 : index
    %22 = vector.load %arg9[%c51, %c0_21] : memref<400x32xbf16, #tpu.memory_space<vmem>>, vector<9x32xbf16>
    %c60 = arith.constant 60 : index
    %c0_22 = arith.constant 0 : index
    %23 = vector.load %arg9[%c60, %c0_22] : memref<400x32xbf16, #tpu.memory_space<vmem>>, vector<9x32xbf16>
    %c70 = arith.constant 70 : index
    %c0_23 = arith.constant 0 : index
    %24 = vector.load %arg9[%c70, %c0_23] : memref<400x32xbf16, #tpu.memory_space<vmem>>, vector<9x32xbf16>
    %c61 = arith.constant 61 : index
    %c0_24 = arith.constant 0 : index
    %25 = vector.load %arg9[%c61, %c0_24] : memref<400x32xbf16, #tpu.memory_space<vmem>>, vector<9x32xbf16>
    %c71 = arith.constant 71 : index
    %c0_25 = arith.constant 0 : index
    %26 = vector.load %arg9[%c71, %c0_25] : memref<400x32xbf16, #tpu.memory_space<vmem>>, vector<9x32xbf16>
    %27 = tpu.concatenate %11, %12, %13, %14, %15, %16, %17, %18, %19, %20, %21, %22, %23, %24, %25, %26 in 1 : vector<9x32xbf16>, vector<9x32xbf16>, vector<9x32xbf16>, vector<9x32xbf16>, vector<9x32xbf16>, vector<9x32xbf16>, vector<9x32xbf16>, vector<9x32xbf16>, vector<9x32xbf16>, vector<9x32xbf16>, vector<9x32xbf16>, vector<9x32xbf16>, vector<9x32xbf16>, vector<9x32xbf16>, vector<9x32xbf16>, vector<9x32xbf16> -> vector<9x512xbf16>
    %c0_26 = arith.constant 0 : index
    %c0_27 = arith.constant 0 : index
    %28 = vector.load %arg10[%c0_26, %c0_27] : memref<81x512xbf16, #tpu.memory_space<vmem>>, vector<9x512xbf16>
    tpu.vector_store %arg10[%c0_26, %c0_27], %27 {strides = array<i32>} : memref<81x512xbf16, #tpu.memory_space<vmem>>, vector<9x512xbf16>,
    %c40_28 = arith.constant 40 : index
    %c0_29 = arith.constant 0 : index
    %29 = vector.load %arg9[%c40_28, %c0_29] : memref<400x32xbf16, #tpu.memory_space<vmem>>, vector<9x32xbf16>
    %c50_30 = arith.constant 50 : index
    %c0_31 = arith.constant 0 : index
    %30 = vector.load %arg9[%c50_30, %c0_31] : memref<400x32xbf16, #tpu.memory_space<vmem>>, vector<9x32xbf16>
    %c41_32 = arith.constant 41 : index
    %c0_33 = arith.constant 0 : index
    %31 = vector.load %arg9[%c41_32, %c0_33] : memref<400x32xbf16, #tpu.memory_space<vmem>>, vector<9x32xbf16>
    %c51_34 = arith.constant 51 : index
    %c0_35 = arith.constant 0 : index
    %32 = vector.load %arg9[%c51_34, %c0_35] : memref<400x32xbf16, #tpu.memory_space<vmem>>, vector<9x32xbf16>
    %c60_36 = arith.constant 60 : index
    %c0_37 = arith.constant 0 : index
    %33 = vector.load %arg9[%c60_36, %c0_37] : memref<400x32xbf16, #tpu.memory_space<vmem>>, vector<9x32xbf16>
    %c70_38 = arith.constant 70 : index
    %c0_39 = arith.constant 0 : index
    %34 = vector.load %arg9[%c70_38, %c0_39] : memref<400x32xbf16, #tpu.memory_space<vmem>>, vector<9x32xbf16>
    %c61_40 = arith.constant 61 : index
    %c0_41 = arith.constant 0 : index
    %35 = vector.load %arg9[%c61_40, %c0_41] : memref<400x32xbf16, #tpu.memory_space<vmem>>, vector<9x32xbf16>
    %c71_42 = arith.constant 71 : index
    %c0_43 = arith.constant 0 : index
    %36 = vector.load %arg9[%c71_42, %c0_43] : memref<400x32xbf16, #tpu.memory_space<vmem>>, vector<9x32xbf16>
    %c80 = arith.constant 80 : index
    %c0_44 = arith.constant 0 : index
    %37 = vector.load %arg9[%c80, %c0_44] : memref<400x32xbf16, #tpu.memory_space<vmem>>, vector<9x32xbf16>
    %c90 = arith.constant 90 : index
    %c0_45 = arith.constant 0 : index
    %38 = vector.load %arg9[%c90, %c0_45] : memref<400x32xbf16, #tpu.memory_space<vmem>>, vector<9x32xbf16>
    %c81 = arith.constant 81 : index
    %c0_46 = arith.constant 0 : index
    %39 = vector.load %arg9[%c81, %c0_46] : memref<400x32xbf16, #tpu.memory_space<vmem>>, vector<9x32xbf16>
    %c91 = arith.constant 91 : index
    %c0_47 = arith.constant 0 : index
    %40 = vector.load %arg9[%c91, %c0_47] : memref<400x32xbf16, #tpu.memory_space<vmem>>, vector<9x32xbf16>
    %c100 = arith.constant 100 : index
    %c0_48 = arith.constant 0 : index
    %41 = vector.load %arg9[%c100, %c0_48] : memref<400x32xbf16, #tpu.memory_space<vmem>>, vector<9x32xbf16>
    %c110 = arith.constant 110 : index
    %c0_49 = arith.constant 0 : index
    %42 = vector.load %arg9[%c110, %c0_49] : memref<400x32xbf16, #tpu.memory_space<vmem>>, vector<9x32xbf16>
    %c101 = arith.constant 101 : index
    %c0_50 = arith.constant 0 : index
    %43 = vector.load %arg9[%c101, %c0_50] : memref<400x32xbf16, #tpu.memory_space<vmem>>, vector<9x32xbf16>
    %c111 = arith.constant 111 : index
    %c0_51 = arith.constant 0 : index
    %44 = vector.load %arg9[%c111, %c0_51] : memref<400x32xbf16, #tpu.memory_space<vmem>>, vector<9x32xbf16>
    %45 = tpu.concatenate %29, %30, %31, %32, %33, %34, %35, %36, %37, %38, %39, %40, %41, %42, %43, %44 in 1 : vector<9x32xbf16>, vector<9x32xbf16>, vector<9x32xbf16>, vector<9x32xbf16>, vector<9x32xbf16>, vector<9x32xbf16>, vector<9x32xbf16>, vector<9x32xbf16>, vector<9x32xbf16>, vector<9x32xbf16>, vector<9x32xbf16>, vector<9x32xbf16>, vector<9x32xbf16>, vector<9x32xbf16>, vector<9x32xbf16>, vector<9x32xbf16> -> vector<9x512xbf16>
    %c9 = arith.constant 9 : index
    %c0_52 = arith.constant 0 : index
    %46 = vector.load %arg10[%c9, %c0_52] : memref<81x512xbf16, #tpu.memory_space<vmem>>, vector<9x512xbf16>
    tpu.vector_store %arg10[%c9, %c0_52], %45 {strides = array<i32>} : memref<81x512xbf16, #tpu.memory_space<vmem>>, vector<9x512xbf16>,
    %c80_53 = arith.constant 80 : index
    %c0_54 = arith.constant 0 : index
    %47 = vector.load %arg9[%c80_53, %c0_54] : memref<400x32xbf16, #tpu.memory_space<vmem>>, vector<9x32xbf16>
    %c90_55 = arith.constant 90 : index
    %c0_56 = arith.constant 0 : index
    %48 = vector.load %arg9[%c90_55, %c0_56] : memref<400x32xbf16, #tpu.memory_space<vmem>>, vector<9x32xbf16>
    %c81_57 = arith.constant 81 : index
    %c0_58 = arith.constant 0 : index
    %49 = vector.load %arg9[%c81_57, %c0_58] : memref<400x32xbf16, #tpu.memory_space<vmem>>, vector<9x32xbf16>
    %c91_59 = arith.constant 91 : index
    %c0_60 = arith.constant 0 : index
    %50 = vector.load %arg9[%c91_59, %c0_60] : memref<400x32xbf16, #tpu.memory_space<vmem>>, vector<9x32xbf16>
    %c100_61 = arith.constant 100 : index
    %c0_62 = arith.constant 0 : index
    %51 = vector.load %arg9[%c100_61, %c0_62] : memref<400x32xbf16, #tpu.memory_space<vmem>>, vector<9x32xbf16>
    %c110_63 = arith.constant 110 : index
    %c0_64 = arith.constant 0 : index
    %52 = vector.load %arg9[%c110_63, %c0_64] : memref<400x32xbf16, #tpu.memory_space<vmem>>, vector<9x32xbf16>
    %c101_65 = arith.constant 101 : index
    %c0_66 = arith.constant 0 : index
    %53 = vector.load %arg9[%c101_65, %c0_66] : memref<400x32xbf16, #tpu.memory_space<vmem>>, vector<9x32xbf16>
    %c111_67 = arith.constant 111 : index
    %c0_68 = arith.constant 0 : index
    %54 = vector.load %arg9[%c111_67, %c0_68] : memref<400x32xbf16, #tpu.memory_space<vmem>>, vector<9x32xbf16>
    %c120 = arith.constant 120 : index
    %c0_69 = arith.constant 0 : index
    %55 = vector.load %arg9[%c120, %c0_69] : memref<400x32xbf16, #tpu.memory_space<vmem>>, vector<9x32xbf16>
    %c130 = arith.constant 130 : index
    %c0_70 = arith.constant 0 : index
    %56 = vector.load %arg9[%c130, %c0_70] : memref<400x32xbf16, #tpu.memory_space<vmem>>, vector<9x32xbf16>
    %c121 = arith.constant 121 : index
    %c0_71 = arith.constant 0 : index
    %57 = vector.load %arg9[%c121, %c0_71] : memref<400x32xbf16, #tpu.memory_space<vmem>>, vector<9x32xbf16>
    %c131 = arith.constant 131 : index
    %c0_72 = arith.constant 0 : index
    %58 = vector.load %arg9[%c131, %c0_72] : memref<400x32xbf16, #tpu.memory_space<vmem>>, vector<9x32xbf16>
    %c140 = arith.constant 140 : index
    %c0_73 = arith.constant 0 : index
    %59 = vector.load %arg9[%c140, %c0_73] : memref<400x32xbf16, #tpu.memory_space<vmem>>, vector<9x32xbf16>
    %c150 = arith.constant 150 : index
    %c0_74 = arith.constant 0 : index
    %60 = vector.load %arg9[%c150, %c0_74] : memref<400x32xbf16, #tpu.memory_space<vmem>>, vector<9x32xbf16>
    %c141 = arith.constant 141 : index
    %c0_75 = arith.constant 0 : index
    %61 = vector.load %arg9[%c141, %c0_75] : memref<400x32xbf16, #tpu.memory_space<vmem>>, vector<9x32xbf16>
    %c151 = arith.constant 151 : index
    %c0_76 = arith.constant 0 : index
    %62 = vector.load %arg9[%c151, %c0_76] : memref<400x32xbf16, #tpu.memory_space<vmem>>, vector<9x32xbf16>
    %63 = tpu.concatenate %47, %48, %49, %50, %51, %52, %53, %54, %55, %56, %57, %58, %59, %60, %61, %62 in 1 : vector<9x32xbf16>, vector<9x32xbf16>, vector<9x32xbf16>, vector<9x32xbf16>, vector<9x32xbf16>, vector<9x32xbf16>, vector<9x32xbf16>, vector<9x32xbf16>, vector<9x32xbf16>, vector<9x32xbf16>, vector<9x32xbf16>, vector<9x32xbf16>, vector<9x32xbf16>, vector<9x32xbf16>, vector<9x32xbf16>, vector<9x32xbf16> -> vector<9x512xbf16>
    %c18 = arith.constant 18 : index
    %c0_77 = arith.constant 0 : index
    %64 = vector.load %arg10[%c18, %c0_77] : memref<81x512xbf16, #tpu.memory_space<vmem>>, vector<9x512xbf16>
    tpu.vector_store %arg10[%c18, %c0_77], %63 {strides = array<i32>} : memref<81x512xbf16, #tpu.memory_space<vmem>>, vector<9x512xbf16>,
    %c120_78 = arith.constant 120 : index
    %c0_79 = arith.constant 0 : index
    %65 = vector.load %arg9[%c120_78, %c0_79] : memref<400x32xbf16, #tpu.memory_space<vmem>>, vector<9x32xbf16>
    %c130_80 = arith.constant 130 : index
    %c0_81 = arith.constant 0 : index
    %66 = vector.load %arg9[%c130_80, %c0_81] : memref<400x32xbf16, #tpu.memory_space<vmem>>, vector<9x32xbf16>
    %c121_82 = arith.constant 121 : index
    %c0_83 = arith.constant 0 : index
    %67 = vector.load %arg9[%c121_82, %c0_83] : memref<400x32xbf16, #tpu.memory_space<vmem>>, vector<9x32xbf16>
    %c131_84 = arith.constant 131 : index
    %c0_85 = arith.constant 0 : index
    %68 = vector.load %arg9[%c131_84, %c0_85] : memref<400x32xbf16, #tpu.memory_space<vmem>>, vector<9x32xbf16>
    %c140_86 = arith.constant 140 : index
    %c0_87 = arith.constant 0 : index
    %69 = vector.load %arg9[%c140_86, %c0_87] : memref<400x32xbf16, #tpu.memory_space<vmem>>, vector<9x32xbf16>
    %c150_88 = arith.constant 150 : index
    %c0_89 = arith.constant 0 : index
    %70 = vector.load %arg9[%c150_88, %c0_89] : memref<400x32xbf16, #tpu.memory_space<vmem>>, vector<9x32xbf16>
    %c141_90 = arith.constant 141 : index
    %c0_91 = arith.constant 0 : index
    %71 = vector.load %arg9[%c141_90, %c0_91] : memref<400x32xbf16, #tpu.memory_space<vmem>>, vector<9x32xbf16>
    %c151_92 = arith.constant 151 : index
    %c0_93 = arith.constant 0 : index
    %72 = vector.load %arg9[%c151_92, %c0_93] : memref<400x32xbf16, #tpu.memory_space<vmem>>, vector<9x32xbf16>
    %c160 = arith.constant 160 : index
    %c0_94 = arith.constant 0 : index
    %73 = vector.load %arg9[%c160, %c0_94] : memref<400x32xbf16, #tpu.memory_space<vmem>>, vector<9x32xbf16>
    %c170 = arith.constant 170 : index
    %c0_95 = arith.constant 0 : index
    %74 = vector.load %arg9[%c170, %c0_95] : memref<400x32xbf16, #tpu.memory_space<vmem>>, vector<9x32xbf16>
    %c161 = arith.constant 161 : index
    %c0_96 = arith.constant 0 : index
    %75 = vector.load %arg9[%c161, %c0_96] : memref<400x32xbf16, #tpu.memory_space<vmem>>, vector<9x32xbf16>
    %c171 = arith.constant 171 : index
    %c0_97 = arith.constant 0 : index
    %76 = vector.load %arg9[%c171, %c0_97] : memref<400x32xbf16, #tpu.memory_space<vmem>>, vector<9x32xbf16>
    %c180 = arith.constant 180 : index
    %c0_98 = arith.constant 0 : index
    %77 = vector.load %arg9[%c180, %c0_98] : memref<400x32xbf16, #tpu.memory_space<vmem>>, vector<9x32xbf16>
    %c190 = arith.constant 190 : index
    %c0_99 = arith.constant 0 : index
    %78 = vector.load %arg9[%c190, %c0_99] : memref<400x32xbf16, #tpu.memory_space<vmem>>, vector<9x32xbf16>
    %c181 = arith.constant 181 : index
    %c0_100 = arith.constant 0 : index
    %79 = vector.load %arg9[%c181, %c0_100] : memref<400x32xbf16, #tpu.memory_space<vmem>>, vector<9x32xbf16>
    %c191 = arith.constant 191 : index
    %c0_101 = arith.constant 0 : index
    %80 = vector.load %arg9[%c191, %c0_101] : memref<400x32xbf16, #tpu.memory_space<vmem>>, vector<9x32xbf16>
    %81 = tpu.concatenate %65, %66, %67, %68, %69, %70, %71, %72, %73, %74, %75, %76, %77, %78, %79, %80 in 1 : vector<9x32xbf16>, vector<9x32xbf16>, vector<9x32xbf16>, vector<9x32xbf16>, vector<9x32xbf16>, vector<9x32xbf16>, vector<9x32xbf16>, vector<9x32xbf16>, vector<9x32xbf16>, vector<9x32xbf16>, vector<9x32xbf16>, vector<9x32xbf16>, vector<9x32xbf16>, vector<9x32xbf16>, vector<9x32xbf16>, vector<9x32xbf16> -> vector<9x512xbf16>
    %c27 = arith.constant 27 : index
    %c0_102 = arith.constant 0 : index
    %82 = vector.load %arg10[%c27, %c0_102] : memref<81x512xbf16, #tpu.memory_space<vmem>>, vector<9x512xbf16>
    tpu.vector_store %arg10[%c27, %c0_102], %81 {strides = array<i32>} : memref<81x512xbf16, #tpu.memory_space<vmem>>, vector<9x512xbf16>,
    %c160_103 = arith.constant 160 : index
    %c0_104 = arith.constant 0 : index
    %83 = vector.load %arg9[%c160_103, %c0_104] : memref<400x32xbf16, #tpu.memory_space<vmem>>, vector<9x32xbf16>
    %c170_105 = arith.constant 170 : index
    %c0_106 = arith.constant 0 : index
    %84 = vector.load %arg9[%c170_105, %c0_106] : memref<400x32xbf16, #tpu.memory_space<vmem>>, vector<9x32xbf16>
    %c161_107 = arith.constant 161 : index
    %c0_108 = arith.constant 0 : index
    %85 = vector.load %arg9[%c161_107, %c0_108] : memref<400x32xbf16, #tpu.memory_space<vmem>>, vector<9x32xbf16>
    %c171_109 = arith.constant 171 : index
    %c0_110 = arith.constant 0 : index
    %86 = vector.load %arg9[%c171_109, %c0_110] : memref<400x32xbf16, #tpu.memory_space<vmem>>, vector<9x32xbf16>
    %c180_111 = arith.constant 180 : index
    %c0_112 = arith.constant 0 : index
    %87 = vector.load %arg9[%c180_111, %c0_112] : memref<400x32xbf16, #tpu.memory_space<vmem>>, vector<9x32xbf16>
    %c190_113 = arith.constant 190 : index
    %c0_114 = arith.constant 0 : index
    %88 = vector.load %arg9[%c190_113, %c0_114] : memref<400x32xbf16, #tpu.memory_space<vmem>>, vector<9x32xbf16>
    %c181_115 = arith.constant 181 : index
    %c0_116 = arith.constant 0 : index
    %89 = vector.load %arg9[%c181_115, %c0_116] : memref<400x32xbf16, #tpu.memory_space<vmem>>, vector<9x32xbf16>
    %c191_117 = arith.constant 191 : index
    %c0_118 = arith.constant 0 : index
    %90 = vector.load %arg9[%c191_117, %c0_118] : memref<400x32xbf16, #tpu.memory_space<vmem>>, vector<9x32xbf16>
    %c200 = arith.constant 200 : index
    %c0_119 = arith.constant 0 : index
    %91 = vector.load %arg9[%c200, %c0_119] : memref<400x32xbf16, #tpu.memory_space<vmem>>, vector<9x32xbf16>
    %c210 = arith.constant 210 : index
    %c0_120 = arith.constant 0 : index
    %92 = vector.load %arg9[%c210, %c0_120] : memref<400x32xbf16, #tpu.memory_space<vmem>>, vector<9x32xbf16>
    %c201 = arith.constant 201 : index
    %c0_121 = arith.constant 0 : index
    %93 = vector.load %arg9[%c201, %c0_121] : memref<400x32xbf16, #tpu.memory_space<vmem>>, vector<9x32xbf16>
    %c211 = arith.constant 211 : index
    %c0_122 = arith.constant 0 : index
    %94 = vector.load %arg9[%c211, %c0_122] : memref<400x32xbf16, #tpu.memory_space<vmem>>, vector<9x32xbf16>
    %c220 = arith.constant 220 : index
    %c0_123 = arith.constant 0 : index
    %95 = vector.load %arg9[%c220, %c0_123] : memref<400x32xbf16, #tpu.memory_space<vmem>>, vector<9x32xbf16>
    %c230 = arith.constant 230 : index
    %c0_124 = arith.constant 0 : index
    %96 = vector.load %arg9[%c230, %c0_124] : memref<400x32xbf16, #tpu.memory_space<vmem>>, vector<9x32xbf16>
    %c221 = arith.constant 221 : index
    %c0_125 = arith.constant 0 : index
    %97 = vector.load %arg9[%c221, %c0_125] : memref<400x32xbf16, #tpu.memory_space<vmem>>, vector<9x32xbf16>
    %c231 = arith.constant 231 : index
    %c0_126 = arith.constant 0 : index
    %98 = vector.load %arg9[%c231, %c0_126] : memref<400x32xbf16, #tpu.memory_space<vmem>>, vector<9x32xbf16>
    %99 = tpu.concatenate %83, %84, %85, %86, %87, %88, %89, %90, %91, %92, %93, %94, %95, %96, %97, %98 in 1 : vector<9x32xbf16>, vector<9x32xbf16>, vector<9x32xbf16>, vector<9x32xbf16>, vector<9x32xbf16>, vector<9x32xbf16>, vector<9x32xbf16>, vector<9x32xbf16>, vector<9x32xbf16>, vector<9x32xbf16>, vector<9x32xbf16>, vector<9x32xbf16>, vector<9x32xbf16>, vector<9x32xbf16>, vector<9x32xbf16>, vector<9x32xbf16> -> vector<9x512xbf16>
    %c36 = arith.constant 36 : index
    %c0_127 = arith.constant 0 : index
    %100 = vector.load %arg10[%c36, %c0_127] : memref<81x512xbf16, #tpu.memory_space<vmem>>, vector<9x512xbf16>
    tpu.vector_store %arg10[%c36, %c0_127], %99 {strides = array<i32>} : memref<81x512xbf16, #tpu.memory_space<vmem>>, vector<9x512xbf16>,
    %c200_128 = arith.constant 200 : index
    %c0_129 = arith.constant 0 : index
    %101 = vector.load %arg9[%c200_128, %c0_129] : memref<400x32xbf16, #tpu.memory_space<vmem>>, vector<9x32xbf16>
    %c210_130 = arith.constant 210 : index
    %c0_131 = arith.constant 0 : index
    %102 = vector.load %arg9[%c210_130, %c0_131] : memref<400x32xbf16, #tpu.memory_space<vmem>>, vector<9x32xbf16>
    %c201_132 = arith.constant 201 : index
    %c0_133 = arith.constant 0 : index
    %103 = vector.load %arg9[%c201_132, %c0_133] : memref<400x32xbf16, #tpu.memory_space<vmem>>, vector<9x32xbf16>
    %c211_134 = arith.constant 211 : index
    %c0_135 = arith.constant 0 : index
    %104 = vector.load %arg9[%c211_134, %c0_135] : memref<400x32xbf16, #tpu.memory_space<vmem>>, vector<9x32xbf16>
    %c220_136 = arith.constant 220 : index
    %c0_137 = arith.constant 0 : index
    %105 = vector.load %arg9[%c220_136, %c0_137] : memref<400x32xbf16, #tpu.memory_space<vmem>>, vector<9x32xbf16>
    %c230_138 = arith.constant 230 : index
    %c0_139 = arith.constant 0 : index
    %106 = vector.load %arg9[%c230_138, %c0_139] : memref<400x32xbf16, #tpu.memory_space<vmem>>, vector<9x32xbf16>
    %c221_140 = arith.constant 221 : index
    %c0_141 = arith.constant 0 : index
    %107 = vector.load %arg9[%c221_140, %c0_141] : memref<400x32xbf16, #tpu.memory_space<vmem>>, vector<9x32xbf16>
    %c231_142 = arith.constant 231 : index
    %c0_143 = arith.constant 0 : index
    %108 = vector.load %arg9[%c231_142, %c0_143] : memref<400x32xbf16, #tpu.memory_space<vmem>>, vector<9x32xbf16>
    %c240 = arith.constant 240 : index
    %c0_144 = arith.constant 0 : index
    %109 = vector.load %arg9[%c240, %c0_144] : memref<400x32xbf16, #tpu.memory_space<vmem>>, vector<9x32xbf16>
    %c250 = arith.constant 250 : index
    %c0_145 = arith.constant 0 : index
    %110 = vector.load %arg9[%c250, %c0_145] : memref<400x32xbf16, #tpu.memory_space<vmem>>, vector<9x32xbf16>
    %c241 = arith.constant 241 : index
    %c0_146 = arith.constant 0 : index
    %111 = vector.load %arg9[%c241, %c0_146] : memref<400x32xbf16, #tpu.memory_space<vmem>>, vector<9x32xbf16>
    %c251 = arith.constant 251 : index
    %c0_147 = arith.constant 0 : index
    %112 = vector.load %arg9[%c251, %c0_147] : memref<400x32xbf16, #tpu.memory_space<vmem>>, vector<9x32xbf16>
    %c260 = arith.constant 260 : index
    %c0_148 = arith.constant 0 : index
    %113 = vector.load %arg9[%c260, %c0_148] : memref<400x32xbf16, #tpu.memory_space<vmem>>, vector<9x32xbf16>
    %c270 = arith.constant 270 : index
    %c0_149 = arith.constant 0 : index
    %114 = vector.load %arg9[%c270, %c0_149] : memref<400x32xbf16, #tpu.memory_space<vmem>>, vector<9x32xbf16>
    %c261 = arith.constant 261 : index
    %c0_150 = arith.constant 0 : index
    %115 = vector.load %arg9[%c261, %c0_150] : memref<400x32xbf16, #tpu.memory_space<vmem>>, vector<9x32xbf16>
    %c271 = arith.constant 271 : index
    %c0_151 = arith.constant 0 : index
    %116 = vector.load %arg9[%c271, %c0_151] : memref<400x32xbf16, #tpu.memory_space<vmem>>, vector<9x32xbf16>
    %117 = tpu.concatenate %101, %102, %103, %104, %105, %106, %107, %108, %109, %110, %111, %112, %113, %114, %115, %116 in 1 : vector<9x32xbf16>, vector<9x32xbf16>, vector<9x32xbf16>, vector<9x32xbf16>, vector<9x32xbf16>, vector<9x32xbf16>, vector<9x32xbf16>, vector<9x32xbf16>, vector<9x32xbf16>, vector<9x32xbf16>, vector<9x32xbf16>, vector<9x32xbf16>, vector<9x32xbf16>, vector<9x32xbf16>, vector<9x32xbf16>, vector<9x32xbf16> -> vector<9x512xbf16>
    %c45 = arith.constant 45 : index
    %c0_152 = arith.constant 0 : index
    %118 = vector.load %arg10[%c45, %c0_152] : memref<81x512xbf16, #tpu.memory_space<vmem>>, vector<9x512xbf16>
    tpu.vector_store %arg10[%c45, %c0_152], %117 {strides = array<i32>} : memref<81x512xbf16, #tpu.memory_space<vmem>>, vector<9x512xbf16>,
    %c240_153 = arith.constant 240 : index
    %c0_154 = arith.constant 0 : index
    %119 = vector.load %arg9[%c240_153, %c0_154] : memref<400x32xbf16, #tpu.memory_space<vmem>>, vector<9x32xbf16>
    %c250_155 = arith.constant 250 : index
    %c0_156 = arith.constant 0 : index
    %120 = vector.load %arg9[%c250_155, %c0_156] : memref<400x32xbf16, #tpu.memory_space<vmem>>, vector<9x32xbf16>
    %c241_157 = arith.constant 241 : index
    %c0_158 = arith.constant 0 : index
    %121 = vector.load %arg9[%c241_157, %c0_158] : memref<400x32xbf16, #tpu.memory_space<vmem>>, vector<9x32xbf16>
    %c251_159 = arith.constant 251 : index
    %c0_160 = arith.constant 0 : index
    %122 = vector.load %arg9[%c251_159, %c0_160] : memref<400x32xbf16, #tpu.memory_space<vmem>>, vector<9x32xbf16>
    %c260_161 = arith.constant 260 : index
    %c0_162 = arith.constant 0 : index
    %123 = vector.load %arg9[%c260_161, %c0_162] : memref<400x32xbf16, #tpu.memory_space<vmem>>, vector<9x32xbf16>
    %c270_163 = arith.constant 270 : index
    %c0_164 = arith.constant 0 : index
    %124 = vector.load %arg9[%c270_163, %c0_164] : memref<400x32xbf16, #tpu.memory_space<vmem>>, vector<9x32xbf16>
    %c261_165 = arith.constant 261 : index
    %c0_166 = arith.constant 0 : index
    %125 = vector.load %arg9[%c261_165, %c0_166] : memref<400x32xbf16, #tpu.memory_space<vmem>>, vector<9x32xbf16>
    %c271_167 = arith.constant 271 : index
    %c0_168 = arith.constant 0 : index
    %126 = vector.load %arg9[%c271_167, %c0_168] : memref<400x32xbf16, #tpu.memory_space<vmem>>, vector<9x32xbf16>
    %c280 = arith.constant 280 : index
    %c0_169 = arith.constant 0 : index
    %127 = vector.load %arg9[%c280, %c0_169] : memref<400x32xbf16, #tpu.memory_space<vmem>>, vector<9x32xbf16>
    %c290 = arith.constant 290 : index
    %c0_170 = arith.constant 0 : index
    %128 = vector.load %arg9[%c290, %c0_170] : memref<400x32xbf16, #tpu.memory_space<vmem>>, vector<9x32xbf16>
    %c281 = arith.constant 281 : index
    %c0_171 = arith.constant 0 : index
    %129 = vector.load %arg9[%c281, %c0_171] : memref<400x32xbf16, #tpu.memory_space<vmem>>, vector<9x32xbf16>
    %c291 = arith.constant 291 : index
    %c0_172 = arith.constant 0 : index
    %130 = vector.load %arg9[%c291, %c0_172] : memref<400x32xbf16, #tpu.memory_space<vmem>>, vector<9x32xbf16>
    %c300 = arith.constant 300 : index
    %c0_173 = arith.constant 0 : index
    %131 = vector.load %arg9[%c300, %c0_173] : memref<400x32xbf16, #tpu.memory_space<vmem>>, vector<9x32xbf16>
    %c310 = arith.constant 310 : index
    %c0_174 = arith.constant 0 : index
    %132 = vector.load %arg9[%c310, %c0_174] : memref<400x32xbf16, #tpu.memory_space<vmem>>, vector<9x32xbf16>
    %c301 = arith.constant 301 : index
    %c0_175 = arith.constant 0 : index
    %133 = vector.load %arg9[%c301, %c0_175] : memref<400x32xbf16, #tpu.memory_space<vmem>>, vector<9x32xbf16>
    %c311 = arith.constant 311 : index
    %c0_176 = arith.constant 0 : index
    %134 = vector.load %arg9[%c311, %c0_176] : memref<400x32xbf16, #tpu.memory_space<vmem>>, vector<9x32xbf16>
    %135 = tpu.concatenate %119, %120, %121, %122, %123, %124, %125, %126, %127, %128, %129, %130, %131, %132, %133, %134 in 1 : vector<9x32xbf16>, vector<9x32xbf16>, vector<9x32xbf16>, vector<9x32xbf16>, vector<9x32xbf16>, vector<9x32xbf16>, vector<9x32xbf16>, vector<9x32xbf16>, vector<9x32xbf16>, vector<9x32xbf16>, vector<9x32xbf16>, vector<9x32xbf16>, vector<9x32xbf16>, vector<9x32xbf16>, vector<9x32xbf16>, vector<9x32xbf16> -> vector<9x512xbf16>
    %c54 = arith.constant 54 : index
    %c0_177 = arith.constant 0 : index
    %136 = vector.load %arg10[%c54, %c0_177] : memref<81x512xbf16, #tpu.memory_space<vmem>>, vector<9x512xbf16>
    tpu.vector_store %arg10[%c54, %c0_177], %135 {strides = array<i32>} : memref<81x512xbf16, #tpu.memory_space<vmem>>, vector<9x512xbf16>,
    %c280_178 = arith.constant 280 : index
    %c0_179 = arith.constant 0 : index
    %137 = vector.load %arg9[%c280_178, %c0_179] : memref<400x32xbf16, #tpu.memory_space<vmem>>, vector<9x32xbf16>
    %c290_180 = arith.constant 290 : index
    %c0_181 = arith.constant 0 : index
    %138 = vector.load %arg9[%c290_180, %c0_181] : memref<400x32xbf16, #tpu.memory_space<vmem>>, vector<9x32xbf16>
    %c281_182 = arith.constant 281 : index
    %c0_183 = arith.constant 0 : index
    %139 = vector.load %arg9[%c281_182, %c0_183] : memref<400x32xbf16, #tpu.memory_space<vmem>>, vector<9x32xbf16>
    %c291_184 = arith.constant 291 : index
    %c0_185 = arith.constant 0 : index
    %140 = vector.load %arg9[%c291_184, %c0_185] : memref<400x32xbf16, #tpu.memory_space<vmem>>, vector<9x32xbf16>
    %c300_186 = arith.constant 300 : index
    %c0_187 = arith.constant 0 : index
    %141 = vector.load %arg9[%c300_186, %c0_187] : memref<400x32xbf16, #tpu.memory_space<vmem>>, vector<9x32xbf16>
    %c310_188 = arith.constant 310 : index
    %c0_189 = arith.constant 0 : index
    %142 = vector.load %arg9[%c310_188, %c0_189] : memref<400x32xbf16, #tpu.memory_space<vmem>>, vector<9x32xbf16>
    %c301_190 = arith.constant 301 : index
    %c0_191 = arith.constant 0 : index
    %143 = vector.load %arg9[%c301_190, %c0_191] : memref<400x32xbf16, #tpu.memory_space<vmem>>, vector<9x32xbf16>
    %c311_192 = arith.constant 311 : index
    %c0_193 = arith.constant 0 : index
    %144 = vector.load %arg9[%c311_192, %c0_193] : memref<400x32xbf16, #tpu.memory_space<vmem>>, vector<9x32xbf16>
    %c320 = arith.constant 320 : index
    %c0_194 = arith.constant 0 : index
    %145 = vector.load %arg9[%c320, %c0_194] : memref<400x32xbf16, #tpu.memory_space<vmem>>, vector<9x32xbf16>
    %c330 = arith.constant 330 : index
    %c0_195 = arith.constant 0 : index
    %146 = vector.load %arg9[%c330, %c0_195] : memref<400x32xbf16, #tpu.memory_space<vmem>>, vector<9x32xbf16>
    %c321 = arith.constant 321 : index
    %c0_196 = arith.constant 0 : index
    %147 = vector.load %arg9[%c321, %c0_196] : memref<400x32xbf16, #tpu.memory_space<vmem>>, vector<9x32xbf16>
    %c331 = arith.constant 331 : index
    %c0_197 = arith.constant 0 : index
    %148 = vector.load %arg9[%c331, %c0_197] : memref<400x32xbf16, #tpu.memory_space<vmem>>, vector<9x32xbf16>
    %c340 = arith.constant 340 : index
    %c0_198 = arith.constant 0 : index
    %149 = vector.load %arg9[%c340, %c0_198] : memref<400x32xbf16, #tpu.memory_space<vmem>>, vector<9x32xbf16>
    %c350 = arith.constant 350 : index
    %c0_199 = arith.constant 0 : index
    %150 = vector.load %arg9[%c350, %c0_199] : memref<400x32xbf16, #tpu.memory_space<vmem>>, vector<9x32xbf16>
    %c341 = arith.constant 341 : index
    %c0_200 = arith.constant 0 : index
    %151 = vector.load %arg9[%c341, %c0_200] : memref<400x32xbf16, #tpu.memory_space<vmem>>, vector<9x32xbf16>
    %c351 = arith.constant 351 : index
    %c0_201 = arith.constant 0 : index
    %152 = vector.load %arg9[%c351, %c0_201] : memref<400x32xbf16, #tpu.memory_space<vmem>>, vector<9x32xbf16>
    %153 = tpu.concatenate %137, %138, %139, %140, %141, %142, %143, %144, %145, %146, %147, %148, %149, %150, %151, %152 in 1 : vector<9x32xbf16>, vector<9x32xbf16>, vector<9x32xbf16>, vector<9x32xbf16>, vector<9x32xbf16>, vector<9x32xbf16>, vector<9x32xbf16>, vector<9x32xbf16>, vector<9x32xbf16>, vector<9x32xbf16>, vector<9x32xbf16>, vector<9x32xbf16>, vector<9x32xbf16>, vector<9x32xbf16>, vector<9x32xbf16>, vector<9x32xbf16> -> vector<9x512xbf16>
    %c63 = arith.constant 63 : index
    %c0_202 = arith.constant 0 : index
    %154 = vector.load %arg10[%c63, %c0_202] : memref<81x512xbf16, #tpu.memory_space<vmem>>, vector<9x512xbf16>
    tpu.vector_store %arg10[%c63, %c0_202], %153 {strides = array<i32>} : memref<81x512xbf16, #tpu.memory_space<vmem>>, vector<9x512xbf16>,
    %c320_203 = arith.constant 320 : index
    %c0_204 = arith.constant 0 : index
    %155 = vector.load %arg9[%c320_203, %c0_204] : memref<400x32xbf16, #tpu.memory_space<vmem>>, vector<9x32xbf16>
    %c330_205 = arith.constant 330 : index
    %c0_206 = arith.constant 0 : index
    %156 = vector.load %arg9[%c330_205, %c0_206] : memref<400x32xbf16, #tpu.memory_space<vmem>>, vector<9x32xbf16>
    %c321_207 = arith.constant 321 : index
    %c0_208 = arith.constant 0 : index
    %157 = vector.load %arg9[%c321_207, %c0_208] : memref<400x32xbf16, #tpu.memory_space<vmem>>, vector<9x32xbf16>
    %c331_209 = arith.constant 331 : index
    %c0_210 = arith.constant 0 : index
    %158 = vector.load %arg9[%c331_209, %c0_210] : memref<400x32xbf16, #tpu.memory_space<vmem>>, vector<9x32xbf16>
    %c340_211 = arith.constant 340 : index
    %c0_212 = arith.constant 0 : index
    %159 = vector.load %arg9[%c340_211, %c0_212] : memref<400x32xbf16, #tpu.memory_space<vmem>>, vector<9x32xbf16>
    %c350_213 = arith.constant 350 : index
    %c0_214 = arith.constant 0 : index
    %160 = vector.load %arg9[%c350_213, %c0_214] : memref<400x32xbf16, #tpu.memory_space<vmem>>, vector<9x32xbf16>
    %c341_215 = arith.constant 341 : index
    %c0_216 = arith.constant 0 : index
    %161 = vector.load %arg9[%c341_215, %c0_216] : memref<400x32xbf16, #tpu.memory_space<vmem>>, vector<9x32xbf16>
    %c351_217 = arith.constant 351 : index
    %c0_218 = arith.constant 0 : index
    %162 = vector.load %arg9[%c351_217, %c0_218] : memref<400x32xbf16, #tpu.memory_space<vmem>>, vector<9x32xbf16>
    %c360 = arith.constant 360 : index
    %c0_219 = arith.constant 0 : index
    %163 = vector.load %arg9[%c360, %c0_219] : memref<400x32xbf16, #tpu.memory_space<vmem>>, vector<9x32xbf16>
    %c370 = arith.constant 370 : index
    %c0_220 = arith.constant 0 : index
    %164 = vector.load %arg9[%c370, %c0_220] : memref<400x32xbf16, #tpu.memory_space<vmem>>, vector<9x32xbf16>
    %c361 = arith.constant 361 : index
    %c0_221 = arith.constant 0 : index
    %165 = vector.load %arg9[%c361, %c0_221] : memref<400x32xbf16, #tpu.memory_space<vmem>>, vector<9x32xbf16>
    %c371 = arith.constant 371 : index
    %c0_222 = arith.constant 0 : index
    %166 = vector.load %arg9[%c371, %c0_222] : memref<400x32xbf16, #tpu.memory_space<vmem>>, vector<9x32xbf16>
    %c380 = arith.constant 380 : index
    %c0_223 = arith.constant 0 : index
    %167 = vector.load %arg9[%c380, %c0_223] : memref<400x32xbf16, #tpu.memory_space<vmem>>, vector<9x32xbf16>
    %c390 = arith.constant 390 : index
    %c0_224 = arith.constant 0 : index
    %168 = vector.load %arg9[%c390, %c0_224] : memref<400x32xbf16, #tpu.memory_space<vmem>>, vector<9x32xbf16>
    %c381 = arith.constant 381 : index
    %c0_225 = arith.constant 0 : index
    %169 = vector.load %arg9[%c381, %c0_225] : memref<400x32xbf16, #tpu.memory_space<vmem>>, vector<9x32xbf16>
    %c391 = arith.constant 391 : index
    %c0_226 = arith.constant 0 : index
    %170 = vector.load %arg9[%c391, %c0_226] : memref<400x32xbf16, #tpu.memory_space<vmem>>, vector<9x32xbf16>
    %171 = tpu.concatenate %155, %156, %157, %158, %159, %160, %161, %162, %163, %164, %165, %166, %167, %168, %169, %170 in 1 : vector<9x32xbf16>, vector<9x32xbf16>, vector<9x32xbf16>, vector<9x32xbf16>, vector<9x32xbf16>, vector<9x32xbf16>, vector<9x32xbf16>, vector<9x32xbf16>, vector<9x32xbf16>, vector<9x32xbf16>, vector<9x32xbf16>, vector<9x32xbf16>, vector<9x32xbf16>, vector<9x32xbf16>, vector<9x32xbf16>, vector<9x32xbf16> -> vector<9x512xbf16>
    %c72 = arith.constant 72 : index
    %c0_227 = arith.constant 0 : index
    %172 = vector.load %arg10[%c72, %c0_227] : memref<81x512xbf16, #tpu.memory_space<vmem>>, vector<9x512xbf16>
    tpu.vector_store %arg10[%c72, %c0_227], %171 {strides = array<i32>} : memref<81x512xbf16, #tpu.memory_space<vmem>>, vector<9x512xbf16>,
    %c0_228 = arith.constant 0 : index
    %c0_229 = arith.constant 0 : index
    %173 = vector.load %arg10[%c0_228, %c0_229] : memref<81x512xbf16, #tpu.memory_space<vmem>>, vector<81x512xbf16>
    %c0_230 = arith.constant 0 : index
    %c0_231 = arith.constant 0 : index
    %174 = vector.load %arg4[%c0_230, %c0_231] : memref<512x64xbf16, #tpu.memory_space<vmem>>, vector<512x64xbf16>
    %cst_232 = arith.constant dense<0.000000e+00> : vector<81x64xf32>
    %175 = tpu.matmul %173, %174, %cst_232 {dimension_numbers = #tpu.dot_dimension_numbers<[1], [0], [0], [1], [0, 0, 1, 1], [], []>} : vector<81x512xbf16>, vector<512x64xbf16>, vector<81x64xf32> -> vector<81x64xf32>
    %c0_233 = arith.constant 0 : index
    %c0_234 = arith.constant 0 : index
    %176 = vector.load %arg5[%c0_233, %c0_234] : memref<1x64xf32, #tpu.memory_space<vmem>>, vector<1x64xf32>
    %177 = vector.broadcast %176 : vector<1x64xf32> to vector<81x64xf32>
    %178 = arith.addf %175, %177 : vector<81x64xf32>
    %cst_235 = arith.constant 0.000000e+00 : f32
    %179 = vector.broadcast %cst_235 : f32 to vector<81x64xf32>
    %180 = arith.maximumf %178, %179 : vector<81x64xf32>
    %181 = arith.truncf %180 : vector<81x64xf32> to vector<81x64xbf16>
    %c0_236 = arith.constant 0 : index
    %c0_237 = arith.constant 0 : index
    %182 = vector.load %arg11[%c0_236, %c0_237] : memref<81x64xbf16, #tpu.memory_space<vmem>>, vector<81x64xbf16>
    tpu.vector_store %arg11[%c0_236, %c0_237], %181 {strides = array<i32>} : memref<81x64xbf16, #tpu.memory_space<vmem>>, vector<81x64xbf16>,
    %c0_238 = arith.constant 0 : index
    %c0_239 = arith.constant 0 : index
    %183 = vector.load %arg11[%c0_238, %c0_239] : memref<81x64xbf16, #tpu.memory_space<vmem>>, vector<7x64xbf16>
    %c1_240 = arith.constant 1 : index
    %c0_241 = arith.constant 0 : index
    %184 = vector.load %arg11[%c1_240, %c0_241] : memref<81x64xbf16, #tpu.memory_space<vmem>>, vector<7x64xbf16>
    %c2 = arith.constant 2 : index
    %c0_242 = arith.constant 0 : index
    %185 = vector.load %arg11[%c2, %c0_242] : memref<81x64xbf16, #tpu.memory_space<vmem>>, vector<7x64xbf16>
    %c9_243 = arith.constant 9 : index
    %c0_244 = arith.constant 0 : index
    %186 = vector.load %arg11[%c9_243, %c0_244] : memref<81x64xbf16, #tpu.memory_space<vmem>>, vector<7x64xbf16>
    %c10_245 = arith.constant 10 : index
    %c0_246 = arith.constant 0 : index
    %187 = vector.load %arg11[%c10_245, %c0_246] : memref<81x64xbf16, #tpu.memory_space<vmem>>, vector<7x64xbf16>
    %c11_247 = arith.constant 11 : index
    %c0_248 = arith.constant 0 : index
    %188 = vector.load %arg11[%c11_247, %c0_248] : memref<81x64xbf16, #tpu.memory_space<vmem>>, vector<7x64xbf16>
    %c18_249 = arith.constant 18 : index
    %c0_250 = arith.constant 0 : index
    %189 = vector.load %arg11[%c18_249, %c0_250] : memref<81x64xbf16, #tpu.memory_space<vmem>>, vector<7x64xbf16>
    %c19 = arith.constant 19 : index
    %c0_251 = arith.constant 0 : index
    %190 = vector.load %arg11[%c19, %c0_251] : memref<81x64xbf16, #tpu.memory_space<vmem>>, vector<7x64xbf16>
    %c20_252 = arith.constant 20 : index
    %c0_253 = arith.constant 0 : index
    %191 = vector.load %arg11[%c20_252, %c0_253] : memref<81x64xbf16, #tpu.memory_space<vmem>>, vector<7x64xbf16>
    %192 = tpu.concatenate %183, %184, %185, %186, %187, %188, %189, %190, %191 in 1 : vector<7x64xbf16>, vector<7x64xbf16>, vector<7x64xbf16>, vector<7x64xbf16>, vector<7x64xbf16>, vector<7x64xbf16>, vector<7x64xbf16>, vector<7x64xbf16>, vector<7x64xbf16> -> vector<7x576xbf16>
    %c0_254 = arith.constant 0 : index
    %c0_255 = arith.constant 0 : index
    %193 = vector.load %arg12[%c0_254, %c0_255] : memref<49x576xbf16, #tpu.memory_space<vmem>>, vector<7x576xbf16>
    tpu.vector_store %arg12[%c0_254, %c0_255], %192 {strides = array<i32>} : memref<49x576xbf16, #tpu.memory_space<vmem>>, vector<7x576xbf16>,
    %c9_256 = arith.constant 9 : index
    %c0_257 = arith.constant 0 : index
    %194 = vector.load %arg11[%c9_256, %c0_257] : memref<81x64xbf16, #tpu.memory_space<vmem>>, vector<7x64xbf16>
    %c10_258 = arith.constant 10 : index
    %c0_259 = arith.constant 0 : index
    %195 = vector.load %arg11[%c10_258, %c0_259] : memref<81x64xbf16, #tpu.memory_space<vmem>>, vector<7x64xbf16>
    %c11_260 = arith.constant 11 : index
    %c0_261 = arith.constant 0 : index
    %196 = vector.load %arg11[%c11_260, %c0_261] : memref<81x64xbf16, #tpu.memory_space<vmem>>, vector<7x64xbf16>
    %c18_262 = arith.constant 18 : index
    %c0_263 = arith.constant 0 : index
    %197 = vector.load %arg11[%c18_262, %c0_263] : memref<81x64xbf16, #tpu.memory_space<vmem>>, vector<7x64xbf16>
    %c19_264 = arith.constant 19 : index
    %c0_265 = arith.constant 0 : index
    %198 = vector.load %arg11[%c19_264, %c0_265] : memref<81x64xbf16, #tpu.memory_space<vmem>>, vector<7x64xbf16>
    %c20_266 = arith.constant 20 : index
    %c0_267 = arith.constant 0 : index
    %199 = vector.load %arg11[%c20_266, %c0_267] : memref<81x64xbf16, #tpu.memory_space<vmem>>, vector<7x64xbf16>
    %c27_268 = arith.constant 27 : index
    %c0_269 = arith.constant 0 : index
    %200 = vector.load %arg11[%c27_268, %c0_269] : memref<81x64xbf16, #tpu.memory_space<vmem>>, vector<7x64xbf16>
    %c28 = arith.constant 28 : index
    %c0_270 = arith.constant 0 : index
    %201 = vector.load %arg11[%c28, %c0_270] : memref<81x64xbf16, #tpu.memory_space<vmem>>, vector<7x64xbf16>
    %c29 = arith.constant 29 : index
    %c0_271 = arith.constant 0 : index
    %202 = vector.load %arg11[%c29, %c0_271] : memref<81x64xbf16, #tpu.memory_space<vmem>>, vector<7x64xbf16>
    %203 = tpu.concatenate %194, %195, %196, %197, %198, %199, %200, %201, %202 in 1 : vector<7x64xbf16>, vector<7x64xbf16>, vector<7x64xbf16>, vector<7x64xbf16>, vector<7x64xbf16>, vector<7x64xbf16>, vector<7x64xbf16>, vector<7x64xbf16>, vector<7x64xbf16> -> vector<7x576xbf16>
    %c7 = arith.constant 7 : index
    %c0_272 = arith.constant 0 : index
    %204 = vector.load %arg12[%c7, %c0_272] : memref<49x576xbf16, #tpu.memory_space<vmem>>, vector<7x576xbf16>
    tpu.vector_store %arg12[%c7, %c0_272], %203 {strides = array<i32>} : memref<49x576xbf16, #tpu.memory_space<vmem>>, vector<7x576xbf16>,
    %c18_273 = arith.constant 18 : index
    %c0_274 = arith.constant 0 : index
    %205 = vector.load %arg11[%c18_273, %c0_274] : memref<81x64xbf16, #tpu.memory_space<vmem>>, vector<7x64xbf16>
    %c19_275 = arith.constant 19 : index
    %c0_276 = arith.constant 0 : index
    %206 = vector.load %arg11[%c19_275, %c0_276] : memref<81x64xbf16, #tpu.memory_space<vmem>>, vector<7x64xbf16>
    %c20_277 = arith.constant 20 : index
    %c0_278 = arith.constant 0 : index
    %207 = vector.load %arg11[%c20_277, %c0_278] : memref<81x64xbf16, #tpu.memory_space<vmem>>, vector<7x64xbf16>
    %c27_279 = arith.constant 27 : index
    %c0_280 = arith.constant 0 : index
    %208 = vector.load %arg11[%c27_279, %c0_280] : memref<81x64xbf16, #tpu.memory_space<vmem>>, vector<7x64xbf16>
    %c28_281 = arith.constant 28 : index
    %c0_282 = arith.constant 0 : index
    %209 = vector.load %arg11[%c28_281, %c0_282] : memref<81x64xbf16, #tpu.memory_space<vmem>>, vector<7x64xbf16>
    %c29_283 = arith.constant 29 : index
    %c0_284 = arith.constant 0 : index
    %210 = vector.load %arg11[%c29_283, %c0_284] : memref<81x64xbf16, #tpu.memory_space<vmem>>, vector<7x64xbf16>
    %c36_285 = arith.constant 36 : index
    %c0_286 = arith.constant 0 : index
    %211 = vector.load %arg11[%c36_285, %c0_286] : memref<81x64xbf16, #tpu.memory_space<vmem>>, vector<7x64xbf16>
    %c37 = arith.constant 37 : index
    %c0_287 = arith.constant 0 : index
    %212 = vector.load %arg11[%c37, %c0_287] : memref<81x64xbf16, #tpu.memory_space<vmem>>, vector<7x64xbf16>
    %c38 = arith.constant 38 : index
    %c0_288 = arith.constant 0 : index
    %213 = vector.load %arg11[%c38, %c0_288] : memref<81x64xbf16, #tpu.memory_space<vmem>>, vector<7x64xbf16>
    %214 = tpu.concatenate %205, %206, %207, %208, %209, %210, %211, %212, %213 in 1 : vector<7x64xbf16>, vector<7x64xbf16>, vector<7x64xbf16>, vector<7x64xbf16>, vector<7x64xbf16>, vector<7x64xbf16>, vector<7x64xbf16>, vector<7x64xbf16>, vector<7x64xbf16> -> vector<7x576xbf16>
    %c14 = arith.constant 14 : index
    %c0_289 = arith.constant 0 : index
    %215 = vector.load %arg12[%c14, %c0_289] : memref<49x576xbf16, #tpu.memory_space<vmem>>, vector<7x576xbf16>
    tpu.vector_store %arg12[%c14, %c0_289], %214 {strides = array<i32>} : memref<49x576xbf16, #tpu.memory_space<vmem>>, vector<7x576xbf16>,
    %c27_290 = arith.constant 27 : index
    %c0_291 = arith.constant 0 : index
    %216 = vector.load %arg11[%c27_290, %c0_291] : memref<81x64xbf16, #tpu.memory_space<vmem>>, vector<7x64xbf16>
    %c28_292 = arith.constant 28 : index
    %c0_293 = arith.constant 0 : index
    %217 = vector.load %arg11[%c28_292, %c0_293] : memref<81x64xbf16, #tpu.memory_space<vmem>>, vector<7x64xbf16>
    %c29_294 = arith.constant 29 : index
    %c0_295 = arith.constant 0 : index
    %218 = vector.load %arg11[%c29_294, %c0_295] : memref<81x64xbf16, #tpu.memory_space<vmem>>, vector<7x64xbf16>
    %c36_296 = arith.constant 36 : index
    %c0_297 = arith.constant 0 : index
    %219 = vector.load %arg11[%c36_296, %c0_297] : memref<81x64xbf16, #tpu.memory_space<vmem>>, vector<7x64xbf16>
    %c37_298 = arith.constant 37 : index
    %c0_299 = arith.constant 0 : index
    %220 = vector.load %arg11[%c37_298, %c0_299] : memref<81x64xbf16, #tpu.memory_space<vmem>>, vector<7x64xbf16>
    %c38_300 = arith.constant 38 : index
    %c0_301 = arith.constant 0 : index
    %221 = vector.load %arg11[%c38_300, %c0_301] : memref<81x64xbf16, #tpu.memory_space<vmem>>, vector<7x64xbf16>
    %c45_302 = arith.constant 45 : index
    %c0_303 = arith.constant 0 : index
    %222 = vector.load %arg11[%c45_302, %c0_303] : memref<81x64xbf16, #tpu.memory_space<vmem>>, vector<7x64xbf16>
    %c46 = arith.constant 46 : index
    %c0_304 = arith.constant 0 : index
    %223 = vector.load %arg11[%c46, %c0_304] : memref<81x64xbf16, #tpu.memory_space<vmem>>, vector<7x64xbf16>
    %c47 = arith.constant 47 : index
    %c0_305 = arith.constant 0 : index
    %224 = vector.load %arg11[%c47, %c0_305] : memref<81x64xbf16, #tpu.memory_space<vmem>>, vector<7x64xbf16>
    %225 = tpu.concatenate %216, %217, %218, %219, %220, %221, %222, %223, %224 in 1 : vector<7x64xbf16>, vector<7x64xbf16>, vector<7x64xbf16>, vector<7x64xbf16>, vector<7x64xbf16>, vector<7x64xbf16>, vector<7x64xbf16>, vector<7x64xbf16>, vector<7x64xbf16> -> vector<7x576xbf16>
    %c21_306 = arith.constant 21 : index
    %c0_307 = arith.constant 0 : index
    %226 = vector.load %arg12[%c21_306, %c0_307] : memref<49x576xbf16, #tpu.memory_space<vmem>>, vector<7x576xbf16>
    tpu.vector_store %arg12[%c21_306, %c0_307], %225 {strides = array<i32>} : memref<49x576xbf16, #tpu.memory_space<vmem>>, vector<7x576xbf16>,
    %c36_308 = arith.constant 36 : index
    %c0_309 = arith.constant 0 : index
    %227 = vector.load %arg11[%c36_308, %c0_309] : memref<81x64xbf16, #tpu.memory_space<vmem>>, vector<7x64xbf16>
    %c37_310 = arith.constant 37 : index
    %c0_311 = arith.constant 0 : index
    %228 = vector.load %arg11[%c37_310, %c0_311] : memref<81x64xbf16, #tpu.memory_space<vmem>>, vector<7x64xbf16>
    %c38_312 = arith.constant 38 : index
    %c0_313 = arith.constant 0 : index
    %229 = vector.load %arg11[%c38_312, %c0_313] : memref<81x64xbf16, #tpu.memory_space<vmem>>, vector<7x64xbf16>
    %c45_314 = arith.constant 45 : index
    %c0_315 = arith.constant 0 : index
    %230 = vector.load %arg11[%c45_314, %c0_315] : memref<81x64xbf16, #tpu.memory_space<vmem>>, vector<7x64xbf16>
    %c46_316 = arith.constant 46 : index
    %c0_317 = arith.constant 0 : index
    %231 = vector.load %arg11[%c46_316, %c0_317] : memref<81x64xbf16, #tpu.memory_space<vmem>>, vector<7x64xbf16>
    %c47_318 = arith.constant 47 : index
    %c0_319 = arith.constant 0 : index
    %232 = vector.load %arg11[%c47_318, %c0_319] : memref<81x64xbf16, #tpu.memory_space<vmem>>, vector<7x64xbf16>
    %c54_320 = arith.constant 54 : index
    %c0_321 = arith.constant 0 : index
    %233 = vector.load %arg11[%c54_320, %c0_321] : memref<81x64xbf16, #tpu.memory_space<vmem>>, vector<7x64xbf16>
    %c55 = arith.constant 55 : index
    %c0_322 = arith.constant 0 : index
    %234 = vector.load %arg11[%c55, %c0_322] : memref<81x64xbf16, #tpu.memory_space<vmem>>, vector<7x64xbf16>
    %c56 = arith.constant 56 : index
    %c0_323 = arith.constant 0 : index
    %235 = vector.load %arg11[%c56, %c0_323] : memref<81x64xbf16, #tpu.memory_space<vmem>>, vector<7x64xbf16>
    %236 = tpu.concatenate %227, %228, %229, %230, %231, %232, %233, %234, %235 in 1 : vector<7x64xbf16>, vector<7x64xbf16>, vector<7x64xbf16>, vector<7x64xbf16>, vector<7x64xbf16>, vector<7x64xbf16>, vector<7x64xbf16>, vector<7x64xbf16>, vector<7x64xbf16> -> vector<7x576xbf16>
    %c28_324 = arith.constant 28 : index
    %c0_325 = arith.constant 0 : index
    %237 = vector.load %arg12[%c28_324, %c0_325] : memref<49x576xbf16, #tpu.memory_space<vmem>>, vector<7x576xbf16>
    tpu.vector_store %arg12[%c28_324, %c0_325], %236 {strides = array<i32>} : memref<49x576xbf16, #tpu.memory_space<vmem>>, vector<7x576xbf16>,
    %c45_326 = arith.constant 45 : index
    %c0_327 = arith.constant 0 : index
    %238 = vector.load %arg11[%c45_326, %c0_327] : memref<81x64xbf16, #tpu.memory_space<vmem>>, vector<7x64xbf16>
    %c46_328 = arith.constant 46 : index
    %c0_329 = arith.constant 0 : index
    %239 = vector.load %arg11[%c46_328, %c0_329] : memref<81x64xbf16, #tpu.memory_space<vmem>>, vector<7x64xbf16>
    %c47_330 = arith.constant 47 : index
    %c0_331 = arith.constant 0 : index
    %240 = vector.load %arg11[%c47_330, %c0_331] : memref<81x64xbf16, #tpu.memory_space<vmem>>, vector<7x64xbf16>
    %c54_332 = arith.constant 54 : index
    %c0_333 = arith.constant 0 : index
    %241 = vector.load %arg11[%c54_332, %c0_333] : memref<81x64xbf16, #tpu.memory_space<vmem>>, vector<7x64xbf16>
    %c55_334 = arith.constant 55 : index
    %c0_335 = arith.constant 0 : index
    %242 = vector.load %arg11[%c55_334, %c0_335] : memref<81x64xbf16, #tpu.memory_space<vmem>>, vector<7x64xbf16>
    %c56_336 = arith.constant 56 : index
    %c0_337 = arith.constant 0 : index
    %243 = vector.load %arg11[%c56_336, %c0_337] : memref<81x64xbf16, #tpu.memory_space<vmem>>, vector<7x64xbf16>
    %c63_338 = arith.constant 63 : index
    %c0_339 = arith.constant 0 : index
    %244 = vector.load %arg11[%c63_338, %c0_339] : memref<81x64xbf16, #tpu.memory_space<vmem>>, vector<7x64xbf16>
    %c64 = arith.constant 64 : index
    %c0_340 = arith.constant 0 : index
    %245 = vector.load %arg11[%c64, %c0_340] : memref<81x64xbf16, #tpu.memory_space<vmem>>, vector<7x64xbf16>
    %c65 = arith.constant 65 : index
    %c0_341 = arith.constant 0 : index
    %246 = vector.load %arg11[%c65, %c0_341] : memref<81x64xbf16, #tpu.memory_space<vmem>>, vector<7x64xbf16>
    %247 = tpu.concatenate %238, %239, %240, %241, %242, %243, %244, %245, %246 in 1 : vector<7x64xbf16>, vector<7x64xbf16>, vector<7x64xbf16>, vector<7x64xbf16>, vector<7x64xbf16>, vector<7x64xbf16>, vector<7x64xbf16>, vector<7x64xbf16>, vector<7x64xbf16> -> vector<7x576xbf16>
    %c35 = arith.constant 35 : index
    %c0_342 = arith.constant 0 : index
    %248 = vector.load %arg12[%c35, %c0_342] : memref<49x576xbf16, #tpu.memory_space<vmem>>, vector<7x576xbf16>
    tpu.vector_store %arg12[%c35, %c0_342], %247 {strides = array<i32>} : memref<49x576xbf16, #tpu.memory_space<vmem>>, vector<7x576xbf16>,
    %c54_343 = arith.constant 54 : index
    %c0_344 = arith.constant 0 : index
    %249 = vector.load %arg11[%c54_343, %c0_344] : memref<81x64xbf16, #tpu.memory_space<vmem>>, vector<7x64xbf16>
    %c55_345 = arith.constant 55 : index
    %c0_346 = arith.constant 0 : index
    %250 = vector.load %arg11[%c55_345, %c0_346] : memref<81x64xbf16, #tpu.memory_space<vmem>>, vector<7x64xbf16>
    %c56_347 = arith.constant 56 : index
    %c0_348 = arith.constant 0 : index
    %251 = vector.load %arg11[%c56_347, %c0_348] : memref<81x64xbf16, #tpu.memory_space<vmem>>, vector<7x64xbf16>
    %c63_349 = arith.constant 63 : index
    %c0_350 = arith.constant 0 : index
    %252 = vector.load %arg11[%c63_349, %c0_350] : memref<81x64xbf16, #tpu.memory_space<vmem>>, vector<7x64xbf16>
    %c64_351 = arith.constant 64 : index
    %c0_352 = arith.constant 0 : index
    %253 = vector.load %arg11[%c64_351, %c0_352] : memref<81x64xbf16, #tpu.memory_space<vmem>>, vector<7x64xbf16>
    %c65_353 = arith.constant 65 : index
    %c0_354 = arith.constant 0 : index
    %254 = vector.load %arg11[%c65_353, %c0_354] : memref<81x64xbf16, #tpu.memory_space<vmem>>, vector<7x64xbf16>
    %c72_355 = arith.constant 72 : index
    %c0_356 = arith.constant 0 : index
    %255 = vector.load %arg11[%c72_355, %c0_356] : memref<81x64xbf16, #tpu.memory_space<vmem>>, vector<7x64xbf16>
    %c73 = arith.constant 73 : index
    %c0_357 = arith.constant 0 : index
    %256 = vector.load %arg11[%c73, %c0_357] : memref<81x64xbf16, #tpu.memory_space<vmem>>, vector<7x64xbf16>
    %c74 = arith.constant 74 : index
    %c0_358 = arith.constant 0 : index
    %257 = vector.load %arg11[%c74, %c0_358] : memref<81x64xbf16, #tpu.memory_space<vmem>>, vector<7x64xbf16>
    %258 = tpu.concatenate %249, %250, %251, %252, %253, %254, %255, %256, %257 in 1 : vector<7x64xbf16>, vector<7x64xbf16>, vector<7x64xbf16>, vector<7x64xbf16>, vector<7x64xbf16>, vector<7x64xbf16>, vector<7x64xbf16>, vector<7x64xbf16>, vector<7x64xbf16> -> vector<7x576xbf16>
    %c42 = arith.constant 42 : index
    %c0_359 = arith.constant 0 : index
    %259 = vector.load %arg12[%c42, %c0_359] : memref<49x576xbf16, #tpu.memory_space<vmem>>, vector<7x576xbf16>
    tpu.vector_store %arg12[%c42, %c0_359], %258 {strides = array<i32>} : memref<49x576xbf16, #tpu.memory_space<vmem>>, vector<7x576xbf16>,
    %c0_360 = arith.constant 0 : index
    %c0_361 = arith.constant 0 : index
    %260 = vector.load %arg12[%c0_360, %c0_361] : memref<49x576xbf16, #tpu.memory_space<vmem>>, vector<49x576xbf16>
    %c0_362 = arith.constant 0 : index
    %c0_363 = arith.constant 0 : index
    %261 = vector.load %arg6[%c0_362, %c0_363] : memref<576x64xbf16, #tpu.memory_space<vmem>>, vector<576x64xbf16>
    %cst_364 = arith.constant dense<0.000000e+00> : vector<49x64xf32>
    %262 = tpu.matmul %260, %261, %cst_364 {dimension_numbers = #tpu.dot_dimension_numbers<[1], [0], [0], [1], [0, 0, 1, 1], [], []>} : vector<49x576xbf16>, vector<576x64xbf16>, vector<49x64xf32> -> vector<49x64xf32>
    %c0_365 = arith.constant 0 : index
    %c0_366 = arith.constant 0 : index
    %263 = vector.load %arg7[%c0_365, %c0_366] : memref<1x64xf32, #tpu.memory_space<vmem>>, vector<1x64xf32>
    %264 = vector.broadcast %263 : vector<1x64xf32> to vector<49x64xf32>
    %265 = arith.addf %262, %264 : vector<49x64xf32>
    %cst_367 = arith.constant 0.000000e+00 : f32
    %266 = vector.broadcast %cst_367 : f32 to vector<49x64xf32>
    %267 = arith.maximumf %265, %266 : vector<49x64xf32>
    %268 = arith.truncf %267 : vector<49x64xf32> to vector<49x64xbf16>
    %c0_368 = arith.constant 0 : index
    %c0_369 = arith.constant 0 : index
    %c0_370 = arith.constant 0 : index
    %269 = vector.load %arg8[%c0_368, %c0_369, %c0_370] : memref<1x50x64xbf16, #tpu.memory_space<vmem>>, vector<1x49x64xbf16>
    %270 = vector.shape_cast %269 : vector<1x49x64xbf16> to vector<49x64xbf16>
    %271 = vector.shape_cast %268 : vector<49x64xbf16> to vector<1x49x64xbf16>
    tpu.vector_store %arg8[%c0_368, %c0_369, %c0_370], %271 {strides = array<i32>} : memref<1x50x64xbf16, #tpu.memory_space<vmem>>, vector<1x49x64xbf16>,
    %cst_371 = arith.constant 0.000000e+00 : bf16
    %272 = vector.broadcast %cst_371 : bf16 to vector<1x64xbf16>
    %c0_372 = arith.constant 0 : index
    %c49 = arith.constant 49 : index
    %c0_373 = arith.constant 0 : index
    %273 = vector.load %arg8[%c0_372, %c49, %c0_373] : memref<1x50x64xbf16, #tpu.memory_space<vmem>>, vector<1x1x64xbf16>
    %274 = vector.shape_cast %273 : vector<1x1x64xbf16> to vector<1x64xbf16>
    %275 = vector.shape_cast %272 : vector<1x64xbf16> to vector<1x1x64xbf16>
    tpu.vector_store %arg8[%c0_372, %c49, %c0_373], %275 {strides = array<i32>} : memref<1x50x64xbf16, #tpu.memory_space<vmem>>, vector<1x1x64xbf16>,
    return
  }
  func.func @transform_0(%arg0: i32) -> (i32, i32, i32) {
    %c0_i32 = arith.constant 0 : i32
    %c0_i32_0 = arith.constant 0 : i32
    %c0_i32_1 = arith.constant 0 : i32
    return %arg0, %c0_i32, %c0_i32_0 : i32, i32, i32
  }
  func.func @transform_1(%arg0: i32) -> (i32, i32) {
    %c0_i32 = arith.constant 0 : i32
    %c0_i32_0 = arith.constant 0 : i32
    %c0_i32_1 = arith.constant 0 : i32
    return %c0_i32, %c0_i32_0 : i32, i32
  }
  func.func @transform_2(%arg0: i32) -> (i32, i32) {
    %c0_i32 = arith.constant 0 : i32
    %c0_i32_0 = arith.constant 0 : i32
    %c0_i32_1 = arith.constant 0 : i32
    return %c0_i32, %c0_i32_0 : i32, i32
  }
  func.func @transform_3(%arg0: i32) -> (i32, i32) {
    %c0_i32 = arith.constant 0 : i32
    %c0_i32_0 = arith.constant 0 : i32
    %c0_i32_1 = arith.constant 0 : i32
    return %c0_i32, %c0_i32_0 : i32, i32
  }
  func.func @transform_4(%arg0: i32) -> (i32, i32) {
    %c0_i32 = arith.constant 0 : i32
    %c0_i32_0 = arith.constant 0 : i32
    %c0_i32_1 = arith.constant 0 : i32
    return %c0_i32, %c0_i32_0 : i32, i32
  }
  func.func @transform_5(%arg0: i32) -> (i32, i32) {
    %c0_i32 = arith.constant 0 : i32
    %c0_i32_0 = arith.constant 0 : i32
    %c0_i32_1 = arith.constant 0 : i32
    return %c0_i32, %c0_i32_0 : i32, i32
  }
  func.func @transform_6(%arg0: i32) -> (i32, i32) {
    %c0_i32 = arith.constant 0 : i32
    %c0_i32_0 = arith.constant 0 : i32
    %c0_i32_1 = arith.constant 0 : i32
    return %c0_i32, %c0_i32_0 : i32, i32
  }
  func.func @transform_7(%arg0: i32) -> (i32, i32, i32) {
    %c0_i32 = arith.constant 0 : i32
    %c0_i32_0 = arith.constant 0 : i32
    %c0_i32_1 = arith.constant 0 : i32
    return %arg0, %c0_i32, %c0_i32_0 : i32, i32, i32
  }
}

module attributes {stable_mosaic.version = 11 : i64} {
  func.func @_heads_kernel(%arg0: i32, %arg1: memref<2x640xbf16, #tpu.memory_space<vmem>>, %arg2: memref<640x1024xbf16, #tpu.memory_space<vmem>>, %arg3: memref<1x1024xf32, #tpu.memory_space<vmem>>, %arg4: memref<1024x7xbf16, #tpu.memory_space<vmem>>, %arg5: memref<1x7xf32, #tpu.memory_space<vmem>>, %arg6: memref<2x6xf32, #tpu.memory_space<vmem>>, %arg7: memref<2x1024xf32, #tpu.memory_space<vmem>>) attributes {dimension_semantics = [#tpu.dimension_semantics<arbitrary>], iteration_bounds = array<i64: 5>, scalar_prefetch = 0 : i64, scratch_operands = 1 : i64, tpu.core_type = #tpu.core_type<tc>, window_params = [{transform_indices = @transform_0, window_bounds = array<i64: 2, 640>}, {transform_indices = @transform_1, window_bounds = array<i64: 640, 1024>}, {pipeline_mode = #tpu.pipeline_mode<synchronous>, transform_indices = @transform_2, window_bounds = array<i64: 1, 1024>}, {pipeline_mode = #tpu.pipeline_mode<synchronous>, transform_indices = @transform_3, window_bounds = array<i64: 1024, 7>}, {pipeline_mode = #tpu.pipeline_mode<synchronous>, transform_indices = @transform_4, window_bounds = array<i64: 1, 7>}, {pipeline_mode = #tpu.pipeline_mode<synchronous>, transform_indices = @transform_5, window_bounds = array<i64: 2, 6>}]} {
    %c0_i32 = arith.constant 0 : i32
    %0 = arith.cmpi eq, %arg0, %c0_i32 : i32
    %1 = arith.extui %0 : i1 to i32
    %c0_i32_0 = arith.constant 0 : i32
    %2 = arith.cmpi ne, %1, %c0_i32_0 : i32
    scf.if %2 {
      %cst_9 = arith.constant 0.000000e+00 : f32
      %12 = vector.broadcast %cst_9 : f32 to vector<2x1024xf32>
      %c0_10 = arith.constant 0 : index
      %c0_11 = arith.constant 0 : index
      %13 = vector.load %arg7[%c0_10, %c0_11] : memref<2x1024xf32, #tpu.memory_space<vmem>>, vector<2x1024xf32>
      tpu.vector_store %arg7[%c0_10, %c0_11], %12 {strides = array<i32>} : memref<2x1024xf32, #tpu.memory_space<vmem>>, vector<2x1024xf32>,
    } else {
    }
    %c0 = arith.constant 0 : index
    %c0_1 = arith.constant 0 : index
    %3 = vector.load %arg7[%c0, %c0_1] : memref<2x1024xf32, #tpu.memory_space<vmem>>, vector<2x1024xf32>
    %c0_2 = arith.constant 0 : index
    %c0_3 = arith.constant 0 : index
    %4 = vector.load %arg1[%c0_2, %c0_3] : memref<2x640xbf16, #tpu.memory_space<vmem>>, vector<2x640xbf16>
    %c0_4 = arith.constant 0 : index
    %c0_5 = arith.constant 0 : index
    %5 = vector.load %arg2[%c0_4, %c0_5] : memref<640x1024xbf16, #tpu.memory_space<vmem>>, vector<640x1024xbf16>
    %cst = arith.constant dense<0.000000e+00> : vector<2x1024xf32>
    %6 = tpu.matmul %4, %5, %cst {dimension_numbers = #tpu.dot_dimension_numbers<[1], [0], [0], [1], [0, 0, 1, 1], [], []>} : vector<2x640xbf16>, vector<640x1024xbf16>, vector<2x1024xf32> -> vector<2x1024xf32>
    %7 = arith.addf %3, %6 : vector<2x1024xf32>
    %c0_6 = arith.constant 0 : index
    %c0_7 = arith.constant 0 : index
    %8 = vector.load %arg7[%c0_6, %c0_7] : memref<2x1024xf32, #tpu.memory_space<vmem>>, vector<2x1024xf32>
    tpu.vector_store %arg7[%c0_6, %c0_7], %7 {strides = array<i32>} : memref<2x1024xf32, #tpu.memory_space<vmem>>, vector<2x1024xf32>,
    %c4_i32 = arith.constant 4 : i32
    %9 = arith.cmpi eq, %arg0, %c4_i32 : i32
    %10 = arith.extui %9 : i1 to i32
    %c0_i32_8 = arith.constant 0 : i32
    %11 = arith.cmpi ne, %10, %c0_i32_8 : i32
    scf.if %11 {
      %c0_9 = arith.constant 0 : index
      %c0_10 = arith.constant 0 : index
      %12 = vector.load %arg7[%c0_9, %c0_10] : memref<2x1024xf32, #tpu.memory_space<vmem>>, vector<2x1024xf32>
      %c0_11 = arith.constant 0 : index
      %c0_12 = arith.constant 0 : index
      %13 = vector.load %arg3[%c0_11, %c0_12] : memref<1x1024xf32, #tpu.memory_space<vmem>>, vector<1x1024xf32>
      %14 = vector.broadcast %13 : vector<1x1024xf32> to vector<2x1024xf32>
      %15 = arith.addf %12, %14 : vector<2x1024xf32>
      %cst_13 = arith.constant 0.000000e+00 : f32
      %16 = vector.broadcast %cst_13 : f32 to vector<2x1024xf32>
      %17 = arith.maximumf %15, %16 : vector<2x1024xf32>
      %18 = arith.truncf %17 : vector<2x1024xf32> to vector<2x1024xbf16>
      %c0_14 = arith.constant 0 : index
      %c0_15 = arith.constant 0 : index
      %19 = vector.load %arg4[%c0_14, %c0_15] : memref<1024x7xbf16, #tpu.memory_space<vmem>>, vector<1024x7xbf16>
      %cst_16 = arith.constant dense<0.000000e+00> : vector<2x7xf32>
      %20 = tpu.matmul %18, %19, %cst_16 {dimension_numbers = #tpu.dot_dimension_numbers<[1], [0], [0], [1], [0, 0, 1, 1], [], []>} : vector<2x1024xbf16>, vector<1024x7xbf16>, vector<2x7xf32> -> vector<2x7xf32>
      %c0_17 = arith.constant 0 : index
      %c0_18 = arith.constant 0 : index
      %21 = vector.load %arg5[%c0_17, %c0_18] : memref<1x7xf32, #tpu.memory_space<vmem>>, vector<1x7xf32>
      %22 = vector.broadcast %21 : vector<1x7xf32> to vector<2x7xf32>
      %23 = arith.addf %20, %22 : vector<2x7xf32>
      %24 = vector.extract_strided_slice %23 {offsets = [0, 0], sizes = [2, 6], strides = [1, 1]} : vector<2x7xf32> to vector<2x6xf32>
      %25 = vector.extract_strided_slice %23 {offsets = [0, 6], sizes = [2, 1], strides = [1, 1]} : vector<2x7xf32> to vector<2x1xf32>
      %26 = vector.shape_cast %24 : vector<2x6xf32> to vector<1x2x6xf32>
      %cst_19 = arith.constant dense<0.000000e+00> : vector<1xf32>
      %27 = vector.multi_reduction <add>, %26, %cst_19 [1, 2] : vector<1x2x6xf32> to vector<1xf32>
      %28 = vector.shape_cast %27 : vector<1xf32> to vector<1x1x1xf32>
      %29 = vector.extract %28[0, 0, 0] : f32 from vector<1x1x1xf32>
      %cst_20 = arith.constant 0.0833333358 : f32
      %30 = arith.mulf %29, %cst_20 : f32
      %31 = vector.broadcast %30 : f32 to vector<2x6xf32>
      %32 = arith.subf %24, %31 : vector<2x6xf32>
      %33 = vector.broadcast %25 : vector<2x1xf32> to vector<2x6xf32>
      %34 = arith.addf %33, %32 : vector<2x6xf32>
      %c0_21 = arith.constant 0 : index
      %c0_22 = arith.constant 0 : index
      %35 = vector.load %arg6[%c0_21, %c0_22] : memref<2x6xf32, #tpu.memory_space<vmem>>, vector<2x6xf32>
      tpu.vector_store %arg6[%c0_21, %c0_22], %34 {strides = array<i32>} : memref<2x6xf32, #tpu.memory_space<vmem>>, vector<2x6xf32>,
    } else {
    }
    return
  }
  func.func @transform_0(%arg0: i32) -> (i32, i32) {
    %c0_i32 = arith.constant 0 : i32
    %c0_i32_0 = arith.constant 0 : i32
    return %c0_i32, %arg0 : i32, i32
  }
  func.func @transform_1(%arg0: i32) -> (i32, i32) {
    %c0_i32 = arith.constant 0 : i32
    %c0_i32_0 = arith.constant 0 : i32
    return %arg0, %c0_i32 : i32, i32
  }
  func.func @transform_2(%arg0: i32) -> (i32, i32) {
    %c0_i32 = arith.constant 0 : i32
    %c0_i32_0 = arith.constant 0 : i32
    %c0_i32_1 = arith.constant 0 : i32
    return %c0_i32, %c0_i32_0 : i32, i32
  }
  func.func @transform_3(%arg0: i32) -> (i32, i32) {
    %c0_i32 = arith.constant 0 : i32
    %c0_i32_0 = arith.constant 0 : i32
    %c0_i32_1 = arith.constant 0 : i32
    return %c0_i32, %c0_i32_0 : i32, i32
  }
  func.func @transform_4(%arg0: i32) -> (i32, i32) {
    %c0_i32 = arith.constant 0 : i32
    %c0_i32_0 = arith.constant 0 : i32
    %c0_i32_1 = arith.constant 0 : i32
    return %c0_i32, %c0_i32_0 : i32, i32
  }
  func.func @transform_5(%arg0: i32) -> (i32, i32) {
    %c0_i32 = arith.constant 0 : i32
    %c0_i32_0 = arith.constant 0 : i32
    %c0_i32_1 = arith.constant 0 : i32
    return %c0_i32, %c0_i32_0 : i32, i32
  }
}

</mosaic_0001>

<bundles_post_ra>
// kernel: dueling_dqn_forward.3
= control target key start
LH: loop header
LB: loop body
LE: loop exit
PB: predicated region body
PF: predicated region fallthrough
CT: control target
= control target key end

     0   :  { %10 = vsyncpa [#allocation4], 0  ;;  %s4317_s18 = smov 0   ;;  %s4969_s0 = inlined_call_operand.vmem [shape: bf16[2,3200], index: 0, kind: input, shape index: {}]   ;;  %s4970_s1 = inlined_call_operand.vmem [shape: bf16[3200,1024], index: 1, kind: input, shape index: {}]   ;;  %s4971_s2 = inlined_call_operand.vmem [shape: f32[1,1024], index: 2, kind: input, shape index: {}]   ;;  %s4972_s3 = inlined_call_operand.vmem [shape: bf16[1024,7], index: 3, kind: input, shape index: {}]   ;;  %s4973_s4 = inlined_call_operand.vmem [shape: f32[1,7], index: 4, kind: input, shape index: {}]   ;;  %s4974_s5 = inlined_call_operand.hbm [shape: f32[2,6], index: 5, kind: output, shape index: {}]  }
   0x1 LB: > { %s4323_s19 = sadd.s32 4294967295, %s4279_s18   ;;  %p3640_p0 = scmp.ge.s32.totalorder %s4279_s18, 1  ;;  %s4279_s18 = sphi %s4317_s18, %s16_s18  }
   0x2   : > { %p195_p1 = scmp.lt.s32.totalorder %s4279_s18, 6 }
   0x4   : > { %p196_p2 = pnand %p3640_p0, %p195_p1 }
   0x5   : > { %s223_s20 = smul.u32 (!%p196_p2), 5, %s4323_s19  ;;  %p3643_p5 = scmp.ne.s32.totalorder (!%p196_p2), %s4323_s19, 0 }
   0x6   : > { %199 = sbr.rel (%p196_p2) target bundleno = 1061 (0x425), region = 40 }
   0x7   : > { %s228_s21 = smul.u32 (!%p196_p2), 80, %s4323_s19  ;;  %p224_p3 = scmp.lt.s32.totalorder (!%p196_p2), %s223_s20, 24 }
   0x9   : > { %p229_p4 = scmp.lt.s32.totalorder (!%p196_p2), %s228_s21, 399 }
   0xd   : > { %s4976_s20 = smov (!%p224_p3, %s223_s20), 24  ;;  %s4978_s21 = smov (!%p229_p4, %s228_s21), 399 }
   0xe   : > { %s226_s24 = scalar_lea.vmem %s4969_s0, %s4976_s20  ;;  %s4034_s25 = sshll.u32 %s4978_s21, 5  ;;  %v4281_v0 = vmov (!%p3643_p5), 0.0  }
   0xf   : > { %s4338_s28 = scalar_lea.vmem %s4970_s1, %s4034_s25  ;;  %239 = sbr.rel (%p3643_p5) target bundleno = 22 (0x16), region = 44  ;;  %240 = vst [vmem:[#allocation2] sm:$0xff] (!%p3643_p5), %v4281_v0  ;;  %241 = vst [vmem:[#allocation2 + $0x8] sm:$0xff] (!%p3643_p5), %v4281_v0 }
  0x16 PF: > { %v245_v1 = vld [vmem:[%s4338_s28] sm:$0xff]  ;;  %v246_v3 = vld [vmem:[%s4338_s28 + $0x8] sm:$0xff]  ;;  %v4282_v33 = vmov 1966171168   ;;  %v570_v35 = vlaneseq  ;;  %p3964_p6 = scmp.ne.s32.totalorder %s4323_s19, 4 }
  0x17   : > { %v249_v2 = vld [vmem:[%s4338_s28 + $0x20] sm:$0xff]  ;;  %v250_v5 = vld [vmem:[%s4338_s28 + $0x28] sm:$0xff]  ;;  %v568_v34 = vunpack.c.l.s4 %v4282_v33  ;;  %vm3561_vm0 = vcmask (!%p3964_p6), 41984  }
  0x18   : > { %v3645_v4 = vcombine.high %v245_v1, %v249_v2  ;;  %v3644_v6 = vcombine.low %v245_v1, %v249_v2  ;;  %v253_v7 = vld [vmem:[%s4338_s28 + $0x40] sm:$0xff]  ;;  %v3647_v9 = vcombine.high %v246_v3, %v250_v5  ;;  %v3646_v10 = vcombine.low %v246_v3, %v250_v5  ;;  %v254_v12 = vld [vmem:[%s4338_s28 + $0x48] sm:$0xff] }
  0x19   : > { %v257_v8 = vld [vmem:[%s4338_s28 + $0x60] sm:$0xff]  ;;  %v258_v13 = vld [vmem:[%s4338_s28 + $0x68] sm:$0xff]  ;;  %v569_v44 = vunpack.c.0.s8 %v568_v34  ;;  %v4363_v45 = vshrl.u32 %v570_v35, 7 }
  0x1a   : > { %v3653_v11 = vcombine.high %v253_v7, %v257_v8  ;;  %v261_v14 = vld [vmem:[%s4338_s28 + $0x80] sm:$0xff]  ;;  %2210 = vmatprep.subr.bf16.mxu0 %v3645_v4  ;;  %v3655_v15 = vcombine.high %v254_v12, %v258_v13  ;;  %v262_v17 = vld [vmem:[%s4338_s28 + $0x88] sm:$0xff]  ;;  %2333 = vmatprep.subr.bf16.mxu1 %v3647_v9  ;;  %v3652_v19 = vcombine.low %v253_v7, %v257_v8 }
  0x1b   : > { %v265_v16 = vld [vmem:[%s4338_s28 + $0xa0] sm:$0xff]  ;;  %v266_v18 = vld [vmem:[%s4338_s28 + $0xa8] sm:$0xff]  ;;  %2211 = vmatpush1.bf16.msra.mxu0 %v3644_v6  ;;  %2334 = vmatpush1.bf16.msra.mxu1 %v3646_v10  ;;  %v3654_v20 = vcombine.low %v254_v12, %v258_v13  ;;  %v4370_v54 = vsub.s32 %v569_v44, %v4363_v45 }
  0x1c   : > { %2212 = vmatprep.subr.bf16.mxu0 %v3653_v11  ;;  %v3661_v21 = vcombine.high %v261_v14, %v265_v16  ;;  %2335 = vmatprep.subr.bf16.mxu1 %v3655_v15  ;;  %v3663_v22 = vcombine.high %v262_v17, %v266_v18  ;;  %v269_v23 = vld [vmem:[%s4338_s28 + $0xc0] sm:$0xff]  ;;  %v270_v25 = vld [vmem:[%s4338_s28 + $0xc8] sm:$0xff]  ;;  %v3660_v27 = vcombine.low %v261_v14, %v265_v16 }
  0x1d   : > { %v273_v24 = vld [vmem:[%s4338_s28 + $0xe0] sm:$0xff]  ;;  %v274_v26 = vld [vmem:[%s4338_s28 + $0xe8] sm:$0xff]  ;;  %v3662_v28 = vcombine.low %v262_v17, %v266_v18 }
  0x1e   : > { %v3669_v29 = vcombine.high %v269_v23, %v273_v24  ;;  %v3671_v30 = vcombine.high %v270_v25, %v274_v26  ;;  %v277_v31 = vld [vmem:[%s4338_s28 + $0x100] sm:$0xff]  ;;  %v278_v36 = vld [vmem:[%s4338_s28 + $0x108] sm:$0xff]  ;;  %v3668_v38 = vcombine.low %v269_v23, %v273_v24  ;;  %v3670_v39 = vcombine.low %v270_v25, %v274_v26 }
  0x1f   : > { %2213 = vmatpush1.bf16.msra.mxu0 %v3652_v19  ;;  %2336 = vmatpush1.bf16.msra.mxu1 %v3654_v20  ;;  %v281_v32 = vld [vmem:[%s4338_s28 + $0x120] sm:$0xff]  ;;  %v282_v37 = vld [vmem:[%s4338_s28 + $0x128] sm:$0xff] }
  0x20   : > { %2214 = vmatprep.subr.bf16.mxu0 %v3661_v21  ;;  %2337 = vmatprep.subr.bf16.mxu1 %v3663_v22  ;;  %v3677_v40 = vcombine.high %v277_v31, %v281_v32  ;;  %v3679_v41 = vcombine.high %v278_v36, %v282_v37  ;;  %v285_v42 = vld [vmem:[%s4338_s28 + $0x140] sm:$0xff]  ;;  %v286_v46 = vld [vmem:[%s4338_s28 + $0x148] sm:$0xff]  ;;  %v3676_v48 = vcombine.low %v277_v31, %v281_v32 }
  0x21   : > { %v289_v43 = vld [vmem:[%s4338_s28 + $0x160] sm:$0xff]  ;;  %v290_v47 = vld [vmem:[%s4338_s28 + $0x168] sm:$0xff]  ;;  %v3678_v49 = vcombine.low %v278_v36, %v282_v37 }
  0x22   : > { %v3685_v50 = vcombine.high %v285_v42, %v289_v43  ;;  %v3687_v51 = vcombine.high %v286_v46, %v290_v47  ;;  %v293_v52 = vld [vmem:[%s4338_s28 + $0x180] sm:$0xff]  ;;  %v294_v55 = vld [vmem:[%s4338_s28 + $0x188] sm:$0xff]  ;;  %v3684_v57 = vcombine.low %v285_v42, %v289_v43  ;;  %v3686_v58 = vcombine.low %v286_v46, %v290_v47 }
  0x23   : > { %2215 = vmatpush1.bf16.msra.mxu0 %v3660_v27  ;;  %2338 = vmatpush1.bf16.msra.mxu1 %v3662_v28  ;;  %v297_v53 = vld [vmem:[%s4338_s28 + $0x1a0] sm:$0xff]  ;;  %v298_v56 = vld [vmem:[%s4338_s28 + $0x1a8] sm:$0xff] }
  0x24   : > { %2216 = vmatprep.subr.bf16.mxu0 %v3669_v29  ;;  %2339 = vmatprep.subr.bf16.mxu1 %v3671_v30  ;;  %v3693_v59 = vcombine.high %v293_v52, %v297_v53  ;;  %v244_v60 = vld [vmem:[%s226_s24] sm:$0x1f]  ;;  %v3695_v61 = vcombine.high %v294_v55, %v298_v56  ;;  %v302_v1 = vld [vmem:[%s4338_s28 + $0x1c8] sm:$0xff]  ;;  %v3692_v3 = vcombine.low %v293_v52, %v297_v53 }
  0x25   : > { %v301_v62 = vld [vmem:[%s4338_s28 + $0x1c0] sm:$0xff]  ;;  %v4382_v0 = vrot.slane %v244_v60, %v4370_v54  ;;  %v306_v2 = vld [vmem:[%s4338_s28 + $0x1e8] sm:$0xff]  ;;  %v3694_v5 = vcombine.low %v294_v55, %v298_v56  ;;  %v566_v22 = vcombine.high %v244_v60, %v244_v60 }
  0x26   : > { %v305_v63 = vld [vmem:[%s4338_s28 + $0x1e0] sm:$0xff]  ;;  %v3703_v7 = vcombine.high %v302_v1, %v306_v2  ;;  %v310_v11 = vld [vmem:[%s4338_s28 + $0x208] sm:$0xff]  ;;  %v3702_v14 = vcombine.low %v302_v1, %v306_v2 }
  0x27   : > { %2217 = vmatpush1.bf16.msra.mxu0 %v3668_v38  ;;  %2340 = vmatpush1.bf16.msra.mxu1 %v3670_v39  ;;  %v581_v4 = vcombine.high %v4382_v0, %v4382_v0  ;;  %v3701_v6 = vcombine.high %v301_v62, %v305_v63  ;;  %v309_v8 = vld [vmem:[%s4338_s28 + $0x200] sm:$0xff]  ;;  %v314_v12 = vld [vmem:[%s4338_s28 + $0x228] sm:$0xff]  ;;  %v3700_v13 = vcombine.low %v301_v62, %v305_v63 }
  0x28   : > { %2218 = vmatprep.subr.bf16.mxu0 %v3677_v40  ;;  %2341 = vmatprep.subr.bf16.mxu1 %v3679_v41  ;;  %v313_v9 = vld [vmem:[%s4338_s28 + $0x220] sm:$0xff]  ;;  %v3711_v16 = vcombine.high %v310_v11, %v314_v12  ;;  %v318_v19 = vld [vmem:[%s4338_s28 + $0x248] sm:$0xff]  ;;  %v3710_v23 = vcombine.low %v310_v11, %v314_v12  ;;  %v580_v28 = vrot.slane %v566_v22, %v4370_v54 }
  0x29   : > { %v4391_v10 = vrot.slane %v581_v4, %v4370_v54  ;;  %v3709_v15 = vcombine.high %v309_v8, %v313_v9  ;;  %v317_v17 = vld [vmem:[%s4338_s28 + $0x240] sm:$0xff]  ;;  %v322_v20 = vld [vmem:[%s4338_s28 + $0x268] sm:$0xff]  ;;  %v3708_v21 = vcombine.low %v309_v8, %v313_v9 }
  0x2a   : > { %v321_v18 = vld [vmem:[%s4338_s28 + $0x260] sm:$0xff]  ;;  %v3719_v25 = vcombine.high %v318_v19, %v322_v20  ;;  %v326_v29 = vld [vmem:[%s4338_s28 + $0x288] sm:$0xff]  ;;  %v4407_v32 = vrot.slane %v580_v28, %v4370_v54  ;;  %v3718_v33 = vcombine.low %v318_v19, %v322_v20 }
  0x2b   : > { %2219 = vmatpush1.bf16.msra.mxu0 %v3676_v48  ;;  %2342 = vmatpush1.bf16.msra.mxu1 %v3678_v49  ;;  %v3717_v24 = vcombine.high %v317_v17, %v321_v18  ;;  %v325_v26 = vld [vmem:[%s4338_s28 + $0x280] sm:$0xff]  ;;  %v330_v30 = vld [vmem:[%s4338_s28 + $0x2a8] sm:$0xff]  ;;  %v3716_v31 = vcombine.low %v317_v17, %v321_v18 }
  0x2c   : > { %2220 = vmatprep.subr.bf16.mxu0 %v3685_v50  ;;  %2343 = vmatprep.subr.bf16.mxu1 %v3687_v51  ;;  %v329_v27 = vld [vmem:[%s4338_s28 + $0x2a0] sm:$0xff]  ;;  %v3727_v35 = vcombine.high %v326_v29, %v330_v30  ;;  %v334_v38 = vld [vmem:[%s4338_s28 + $0x2c8] sm:$0xff]  ;;  %v3726_v41 = vcombine.low %v326_v29, %v330_v30 }
  0x2d   : > { %2242 = vmatprep.mubr.bf16.mxu0 %v4391_v10  ;;  %2365 = vmatprep.mubr.bf16.mxu1 %v4391_v10  ;;  %v3725_v34 = vcombine.high %v325_v26, %v329_v27  ;;  %v333_v36 = vld [vmem:[%s4338_s28 + $0x2c0] sm:$0xff]  ;;  %v338_v39 = vld [vmem:[%s4338_s28 + $0x2e8] sm:$0xff]  ;;  %v3724_v40 = vcombine.low %v325_v26, %v329_v27  ;;  %v4437_v26 = vrot.slane %v4382_v0, %v4370_v54 }
  0x2e   : > { %v337_v37 = vld [vmem:[%s4338_s28 + $0x2e0] sm:$0xff]  ;;  %v3735_v43 = vcombine.high %v334_v38, %v338_v39  ;;  %v342_v47 = vld [vmem:[%s4338_s28 + $0x308] sm:$0xff]  ;;  %v3734_v50 = vcombine.low %v334_v38, %v338_v39 }
  0x2f   : > { %2221 = vmatpush1.bf16.msra.mxu0 %v3684_v57  ;;  %2344 = vmatpush1.bf16.msra.mxu1 %v3686_v58  ;;  %v3733_v42 = vcombine.high %v333_v36, %v337_v37  ;;  %v341_v44 = vld [vmem:[%s4338_s28 + $0x300] sm:$0xff]  ;;  %v346_v48 = vld [vmem:[%s4338_s28 + $0x328] sm:$0xff]  ;;  %v3732_v49 = vcombine.low %v333_v36, %v337_v37  ;;  %v4445_v36 = vcombine.high %v4391_v10, %v4391_v10 }
  0x30   : > { %2222 = vmatprep.subr.bf16.mxu0 %v3693_v59  ;;  %2345 = vmatprep.subr.bf16.mxu1 %v3695_v61  ;;  %v345_v46 = vld [vmem:[%s4338_s28 + $0x320] sm:$0xff]  ;;  %v3743_v52 = vcombine.high %v342_v47, %v346_v48  ;;  %v350_v56 = vld [vmem:[%s4338_s28 + $0x348] sm:$0xff]  ;;  %v3742_v59 = vcombine.low %v342_v47, %v346_v48 }
  0x31   : > { %v3741_v51 = vcombine.high %v341_v44, %v345_v46  ;;  %v349_v53 = vld [vmem:[%s4338_s28 + $0x340] sm:$0xff]  ;;  %v354_v57 = vld [vmem:[%s4338_s28 + $0x368] sm:$0xff]  ;;  %v3740_v58 = vcombine.low %v341_v44, %v345_v46 }
  0x32   : > { %v353_v55 = vld [vmem:[%s4338_s28 + $0x360] sm:$0xff]  ;;  %v3751_v61 = vcombine.high %v350_v56, %v354_v57  ;;  %v358_v1 = vld [vmem:[%s4338_s28 + $0x388] sm:$0xff]  ;;  %v3750_v4 = vcombine.low %v350_v56, %v354_v57 }
  0x33   : > { %2223 = vmatpush1.bf16.msra.mxu0 %v3692_v3  ;;  %2346 = vmatpush1.bf16.msra.mxu1 %v3694_v5  ;;  %v3749_v60 = vcombine.high %v349_v53, %v353_v55  ;;  %v357_v62 = vld [vmem:[%s4338_s28 + $0x380] sm:$0xff]  ;;  %v362_v2 = vld [vmem:[%s4338_s28 + $0x3a8] sm:$0xff]  ;;  %v3748_v3 = vcombine.low %v349_v53, %v353_v55 }
  0x34   : > { %2224 = vmatprep.subr.bf16.mxu0 %v3701_v6  ;;  %2347 = vmatprep.subr.bf16.mxu1 %v3703_v7  ;;  %v361_v63 = vld [vmem:[%s4338_s28 + $0x3a0] sm:$0xff]  ;;  %v3759_v6 = vcombine.high %v358_v1, %v362_v2  ;;  %v366_v9 = vld [vmem:[%s4338_s28 + $0x3c8] sm:$0xff] }
  0x35   : > { %v3757_v5 = vcombine.high %v357_v62, %v361_v63  ;;  %v365_v7 = vld [vmem:[%s4338_s28 + $0x3c0] sm:$0xff]  ;;  %v370_v11 = vld [vmem:[%s4338_s28 + $0x3e8] sm:$0xff]  ;;  %v3756_v12 = vcombine.low %v357_v62, %v361_v63 }
  0x36   : > { %v369_v8 = vld [vmem:[%s4338_s28 + $0x3e0] sm:$0xff]  ;;  %v374_v18 = vld [vmem:[%s4338_s28 + $0x408] sm:$0xff] }
  0x37   : > { %2225 = vmatpush1.bf16.msra.mxu0 %v3700_v13  ;;  %2348 = vmatpush1.bf16.msra.mxu1 %v3702_v14  ;;  %v3758_v13 = vcombine.low %v358_v1, %v362_v2  ;;  %v3765_v14 = vcombine.high %v365_v7, %v369_v8  ;;  %v377_v17 = vld [vmem:[%s4338_s28 + $0x420] sm:$0xff]  ;;  %v378_v19 = vld [vmem:[%s4338_s28 + $0x428] sm:$0xff]  ;;  %v3764_v20 = vcombine.low %v365_v7, %v369_v8 }
  0x38   : > { %2226 = vmatprep.subr.bf16.mxu0 %v3709_v15  ;;  %2349 = vmatprep.subr.bf16.mxu1 %v3711_v16  ;;  %v3767_v15 = vcombine.high %v366_v9, %v370_v11  ;;  %v373_v16 = vld [vmem:[%s4338_s28 + $0x400] sm:$0xff]  ;;  %v382_v27 = vld [vmem:[%s4338_s28 + $0x448] sm:$0xff]  ;;  %v3774_v30 = vcombine.low %v374_v18, %v378_v19 }
  0x39   : > { %v3773_v22 = vcombine.high %v373_v16, %v377_v17  ;;  %v386_v28 = vld [vmem:[%s4338_s28 + $0x468] sm:$0xff]  ;;  %v3772_v29 = vcombine.low %v373_v16, %v377_v17 }
  0x3a   : > { %v390_v54 = vld [vmem:[%s4338_s28 + $0x488] sm:$0xff]  ;;  %v3782_v38 = vcombine.low %v382_v27, %v386_v28 }
  0x3b   : > { %2227 = vmatpush1.bf16.msra.mxu0 %v3708_v21  ;;  %2350 = vmatpush1.bf16.msra.mxu1 %v3710_v23  ;;  %v3766_v21 = vcombine.low %v366_v9, %v370_v11  ;;  %v3775_v23 = vcombine.high %v374_v18, %v378_v19  ;;  %v394_v0 = vld [vmem:[%s4338_s28 + $0x4a8] sm:$0xff] }
  0x3c   : > { %2228 = vmatprep.subr.bf16.mxu0 %v3717_v24  ;;  %2351 = vmatprep.subr.bf16.mxu1 %v3719_v25  ;;  %v381_v24 = vld [vmem:[%s4338_s28 + $0x440] sm:$0xff]  ;;  %v402_v44 = vld [vmem:[%s4338_s28 + $0x4e8] sm:$0xff]  ;;  %v3790_v47 = vcombine.low %v390_v54, %v394_v0 }
  0x3d   : > { %v385_v25 = vld [vmem:[%s4338_s28 + $0x460] sm:$0xff]  ;;  %v410_v53 = vld [vmem:[%s4338_s28 + $0x528] sm:$0xff] }
  0x3e   : > { %v3780_v37 = vcombine.low %v381_v24, %v385_v25  ;;  %v418_v62 = vld [vmem:[%s4338_s28 + $0x568] sm:$0xff] }
  0x3f   : > { %2229 = vmatpush1.bf16.msra.mxu0 %v3716_v31  ;;  %2352 = vmatpush1.bf16.msra.mxu1 %v3718_v33  ;;  %v3781_v31 = vcombine.high %v381_v24, %v385_v25  ;;  %v3783_v33 = vcombine.high %v382_v27, %v386_v28  ;;  %v426_v7 = vld [vmem:[%s4338_s28 + $0x5a8] sm:$0xff] }
  0x40   : > { %2230 = vmatprep.subr.bf16.mxu0 %v3725_v34  ;;  %2353 = vmatprep.subr.bf16.mxu1 %v3727_v35  ;;  %v389_v34 = vld [vmem:[%s4338_s28 + $0x480] sm:$0xff]  ;;  %v434_v16 = vld [vmem:[%s4338_s28 + $0x5e8] sm:$0xff] }
  0x41   : > { %v393_v35 = vld [vmem:[%s4338_s28 + $0x4a0] sm:$0xff]  ;;  %v442_v24 = vld [vmem:[%s4338_s28 + $0x628] sm:$0xff] }
  0x42   : > { %v3789_v39 = vcombine.high %v389_v34, %v393_v35  ;;  %v3788_v46 = vcombine.low %v389_v34, %v393_v35  ;;  %v450_v34 = vld [vmem:[%s4338_s28 + $0x668] sm:$0xff] }
  0x43   : > { %2231 = vmatpush1.bf16.msra.mxu0 %v3724_v40  ;;  %2354 = vmatpush1.bf16.msra.mxu1 %v3726_v41  ;;  %v3791_v40 = vcombine.high %v390_v54, %v394_v0  ;;  %v397_v41 = vld [vmem:[%s4338_s28 + $0x4c0] sm:$0xff] }
  0x44   : > { %2232 = vmatprep.subr.bf16.mxu0 %v3733_v42  ;;  %2355 = vmatprep.subr.bf16.mxu1 %v3735_v43  ;;  %v401_v42 = vld [vmem:[%s4338_s28 + $0x4e0] sm:$0xff]  ;;  %v398_v43 = vld [vmem:[%s4338_s28 + $0x4c8] sm:$0xff] }
  0x45   : > { %v3797_v48 = vcombine.high %v397_v41, %v401_v42  ;;  %v3796_v55 = vcombine.low %v397_v41, %v401_v42  ;;  %v3798_v56 = vcombine.low %v398_v43, %v402_v44  ;;  %v458_v41 = vld [vmem:[%s4338_s28 + $0x6a8] sm:$0xff] }
  0x47   : > { %2233 = vmatpush1.bf16.msra.mxu0 %v3732_v49  ;;  %2356 = vmatpush1.bf16.msra.mxu1 %v3734_v50  ;;  %v3799_v49 = vcombine.high %v398_v43, %v402_v44  ;;  %v405_v50 = vld [vmem:[%s4338_s28 + $0x500] sm:$0xff] }
  0x48   : > { %2234 = vmatprep.subr.bf16.mxu0 %v3741_v51  ;;  %2357 = vmatprep.subr.bf16.mxu1 %v3743_v52  ;;  %v409_v51 = vld [vmem:[%s4338_s28 + $0x520] sm:$0xff]  ;;  %v406_v52 = vld [vmem:[%s4338_s28 + $0x508] sm:$0xff] }
  0x49   : > { %v3805_v57 = vcombine.high %v405_v50, %v409_v51  ;;  %v3804_v63 = vcombine.low %v405_v50, %v409_v51  ;;  %v3806_v1 = vcombine.low %v406_v52, %v410_v53  ;;  %v466_v50 = vld [vmem:[%s4338_s28 + $0x6e8] sm:$0xff] }
  0x4b   : > { %2235 = vmatpush1.bf16.msra.mxu0 %v3740_v58  ;;  %2358 = vmatpush1.bf16.msra.mxu1 %v3742_v59  ;;  %v3807_v58 = vcombine.high %v406_v52, %v410_v53  ;;  %v413_v59 = vld [vmem:[%s4338_s28 + $0x540] sm:$0xff] }
  0x4c   : > { %2236 = vmatprep.subr.bf16.mxu0 %v3749_v60  ;;  %2359 = vmatprep.subr.bf16.mxu1 %v3751_v61  ;;  %v417_v60 = vld [vmem:[%s4338_s28 + $0x560] sm:$0xff]  ;;  %v414_v61 = vld [vmem:[%s4338_s28 + $0x548] sm:$0xff] }
  0x4d   : > { %v3813_v2 = vcombine.high %v413_v59, %v417_v60  ;;  %v3812_v8 = vcombine.low %v413_v59, %v417_v60  ;;  %v3814_v9 = vcombine.low %v414_v61, %v418_v62  ;;  %v474_v59 = vld [vmem:[%s4338_s28 + $0x728] sm:$0xff] }
  0x4f   : > { %2237 = vmatpush1.bf16.msra.mxu0 %v3748_v3  ;;  %2360 = vmatpush1.bf16.msra.mxu1 %v3750_v4  ;;  %v3815_v3 = vcombine.high %v414_v61, %v418_v62  ;;  %v421_v4 = vld [vmem:[%s4338_s28 + $0x580] sm:$0xff] }
  0x50   : > { %2238 = vmatprep.subr.bf16.mxu0 %v3757_v5  ;;  %2361 = vmatprep.subr.bf16.mxu1 %v3759_v6  ;;  %v425_v5 = vld [vmem:[%s4338_s28 + $0x5a0] sm:$0xff]  ;;  %v422_v6 = vld [vmem:[%s4338_s28 + $0x588] sm:$0xff] }
  0x51   : > { %v3821_v11 = vcombine.high %v421_v4, %v425_v5  ;;  %v3820_v17 = vcombine.low %v421_v4, %v425_v5  ;;  %v3822_v18 = vcombine.low %v422_v6, %v426_v7  ;;  %v482_v4 = vld [vmem:[%s4338_s28 + $0x768] sm:$0xff] }
  0x53   : > { %2239 = vmatpush1.bf16.msra.mxu0 %v3756_v12  ;;  %2362 = vmatpush1.bf16.msra.mxu1 %v3758_v13  ;;  %v3823_v12 = vcombine.high %v422_v6, %v426_v7  ;;  %v429_v13 = vld [vmem:[%s4338_s28 + $0x5c0] sm:$0xff] }
  0x54   : > { %2240 = vmatprep.subr.bf16.mxu0 %v3765_v14  ;;  %2363 = vmatprep.subr.bf16.mxu1 %v3767_v15  ;;  %v433_v14 = vld [vmem:[%s4338_s28 + $0x5e0] sm:$0xff]  ;;  %v430_v15 = vld [vmem:[%s4338_s28 + $0x5c8] sm:$0xff] }
  0x55   : > { %v3829_v19 = vcombine.high %v429_v13, %v433_v14  ;;  %v3828_v25 = vcombine.low %v429_v13, %v433_v14  ;;  %v3830_v27 = vcombine.low %v430_v15, %v434_v16  ;;  %v490_v13 = vld [vmem:[%s4338_s28 + $0x7a8] sm:$0xff] }
  0x57   : > { %2241 = vmatpush1.bf16.msra.mxu0 %v3764_v20  ;;  %2364 = vmatpush1.bf16.msra.mxu1 %v3766_v21  ;;  %v3831_v20 = vcombine.high %v430_v15, %v434_v16  ;;  %v437_v21 = vld [vmem:[%s4338_s28 + $0x600] sm:$0xff] }
  0x58   : > { %2251 = vmatprep.subr.bf16.mxu0 %v3773_v22  ;;  %2374 = vmatprep.subr.bf16.mxu1 %v3775_v23  ;;  %v441_v22 = vld [vmem:[%s4338_s28 + $0x620] sm:$0xff]  ;;  %v438_v23 = vld [vmem:[%s4338_s28 + $0x608] sm:$0xff] }
  0x59   : > { %v3837_v28 = vcombine.high %v437_v21, %v441_v22  ;;  %v3836_v35 = vcombine.low %v437_v21, %v441_v22  ;;  %v3838_v54 = vcombine.low %v438_v23, %v442_v24  ;;  %v498_v21 = vld [vmem:[%s4338_s28 + $0x7e8] sm:$0xff] }
  0x5a   : > { %2243 = vmatmul.mubr.bf16.vlgmr.msra.gmra.mrb[0].mxu0 %v4437_v26  ;;  %2366 = vmatmul.mubr.bf16.vlgmr.msra.gmra.mrb[0].mxu1 %v4437_v26 }
  0x5b   : > { %2252 = vmatpush1.bf16.msra.mxu0 %v3772_v29  ;;  %2375 = vmatpush1.bf16.msra.mxu1 %v3774_v30  ;;  %v3839_v29 = vcombine.high %v438_v23, %v442_v24  ;;  %v445_v30 = vld [vmem:[%s4338_s28 + $0x640] sm:$0xff] }
  0x5c   : > { %2253 = vmatprep.subr.bf16.mxu0 %v3781_v31  ;;  %2376 = vmatprep.subr.bf16.mxu1 %v3783_v33  ;;  %v449_v31 = vld [vmem:[%s4338_s28 + $0x660] sm:$0xff]  ;;  %v446_v33 = vld [vmem:[%s4338_s28 + $0x648] sm:$0xff] }
  0x5d   : > { %2283 = vmatprep.mubr.bf16.mxu0 %v4445_v36  ;;  %2406 = vmatprep.mubr.bf16.mxu1 %v4445_v36  ;;  %v3845_v0 = vcombine.high %v445_v30, %v449_v31  ;;  %v3844_v42 = vcombine.low %v445_v30, %v449_v31  ;;  %v3846_v43 = vcombine.low %v446_v33, %v450_v34  ;;  %v506_v30 = vld [vmem:[%s4338_s28 + $0x828] sm:$0xff] }
  0x5f   : > { %2254 = vmatpush1.bf16.msra.mxu0 %v3780_v37  ;;  %2377 = vmatpush1.bf16.msra.mxu1 %v3782_v38  ;;  %v3847_v37 = vcombine.high %v446_v33, %v450_v34  ;;  %v453_v38 = vld [vmem:[%s4338_s28 + $0x680] sm:$0xff] }
  0x60   : > { %2255 = vmatprep.subr.bf16.mxu0 %v3789_v39  ;;  %2378 = vmatprep.subr.bf16.mxu1 %v3791_v40  ;;  %v457_v39 = vld [vmem:[%s4338_s28 + $0x6a0] sm:$0xff]  ;;  %v454_v40 = vld [vmem:[%s4338_s28 + $0x688] sm:$0xff] }
  0x61   : > { %v3853_v44 = vcombine.high %v453_v38, %v457_v39  ;;  %v3852_v51 = vcombine.low %v453_v38, %v457_v39  ;;  %v3854_v52 = vcombine.low %v454_v40, %v458_v41  ;;  %v510_v38 = vld [vmem:[%s4338_s28 + $0x848] sm:$0xff] }
  0x62   : > { %v514_v39 = vld [vmem:[%s4338_s28 + $0x868] sm:$0xff] }
  0x63   : > { %2256 = vmatpush1.bf16.msra.mxu0 %v3788_v46  ;;  %2379 = vmatpush1.bf16.msra.mxu1 %v3790_v47  ;;  %v3855_v46 = vcombine.high %v454_v40, %v458_v41  ;;  %v461_v47 = vld [vmem:[%s4338_s28 + $0x6c0] sm:$0xff] }
  0x64   : > { %2257 = vmatprep.subr.bf16.mxu0 %v3797_v48  ;;  %2380 = vmatprep.subr.bf16.mxu1 %v3799_v49  ;;  %v465_v48 = vld [vmem:[%s4338_s28 + $0x6e0] sm:$0xff]  ;;  %v462_v49 = vld [vmem:[%s4338_s28 + $0x6c8] sm:$0xff] }
  0x65   : > { %v3861_v53 = vcombine.high %v461_v47, %v465_v48  ;;  %v3860_v60 = vcombine.low %v461_v47, %v465_v48  ;;  %v3862_v61 = vcombine.low %v462_v49, %v466_v50  ;;  %v518_v47 = vld [vmem:[%s4338_s28 + $0x888] sm:$0xff] }
  0x66   : > { %v522_v48 = vld [vmem:[%s4338_s28 + $0x8a8] sm:$0xff] }
  0x67   : > { %2258 = vmatpush1.bf16.msra.mxu0 %v3796_v55  ;;  %2381 = vmatpush1.bf16.msra.mxu1 %v3798_v56  ;;  %v3863_v55 = vcombine.high %v462_v49, %v466_v50  ;;  %v469_v56 = vld [vmem:[%s4338_s28 + $0x700] sm:$0xff]  ;;  %v3910_v50 = vcombine.low %v510_v38, %v514_v39 }
  0x68   : > { %2259 = vmatprep.subr.bf16.mxu0 %v3805_v57  ;;  %2382 = vmatprep.subr.bf16.mxu1 %v3807_v58  ;;  %v473_v57 = vld [vmem:[%s4338_s28 + $0x720] sm:$0xff]  ;;  %v470_v58 = vld [vmem:[%s4338_s28 + $0x708] sm:$0xff] }
  0x69   : > { %v3869_v62 = vcombine.high %v469_v56, %v473_v57  ;;  %v3868_v5 = vcombine.low %v469_v56, %v473_v57  ;;  %v3870_v6 = vcombine.low %v470_v58, %v474_v59  ;;  %v4283_v56 = vmov 0   ;;  %v526_v57 = vld [vmem:[%s4338_s28 + $0x8c8] sm:$0xff] }
  0x6b   : > { %2260 = vmatpush1.bf16.msra.mxu0 %v3804_v63  ;;  %2383 = vmatpush1.bf16.msra.mxu1 %v3806_v1  ;;  %v3871_v63 = vcombine.high %v470_v58, %v474_v59  ;;  %v477_v1 = vld [vmem:[%s4338_s28 + $0x740] sm:$0xff]  ;;  %v530_v58 = vld [vmem:[%s4338_s28 + $0x8e8] sm:$0xff] }
  0x6c   : > { %2261 = vmatprep.subr.bf16.mxu0 %v3813_v2  ;;  %2384 = vmatprep.subr.bf16.mxu1 %v3815_v3  ;;  %v481_v2 = vld [vmem:[%s4338_s28 + $0x760] sm:$0xff]  ;;  %v478_v3 = vld [vmem:[%s4338_s28 + $0x748] sm:$0xff] }
  0x6d   : > { %v3877_v7 = vcombine.high %v477_v1, %v481_v2  ;;  %v3876_v14 = vcombine.low %v477_v1, %v481_v2  ;;  %v3878_v15 = vcombine.low %v478_v3, %v482_v4  ;;  %v537_v1 = vld [vmem:[%s4338_s28 + $0x920] sm:$0xff]  ;;  %v534_v2 = vld [vmem:[%s4338_s28 + $0x908] sm:$0xff] }
  0x6f   : > { %2262 = vmatpush1.bf16.msra.mxu0 %v3812_v8  ;;  %2385 = vmatpush1.bf16.msra.mxu1 %v3814_v9  ;;  %v3879_v8 = vcombine.high %v478_v3, %v482_v4  ;;  %v485_v9 = vld [vmem:[%s4338_s28 + $0x780] sm:$0xff]  ;;  %v538_v3 = vld [vmem:[%s4338_s28 + $0x928] sm:$0xff] }
  0x70   : > { %2263 = vmatprep.subr.bf16.mxu0 %v3821_v11  ;;  %2386 = vmatprep.subr.bf16.mxu1 %v3823_v12  ;;  %v489_v11 = vld [vmem:[%s4338_s28 + $0x7a0] sm:$0xff]  ;;  %v486_v12 = vld [vmem:[%s4338_s28 + $0x788] sm:$0xff] }
  0x71   : > { %v3885_v16 = vcombine.high %v485_v9, %v489_v11  ;;  %v3884_v22 = vcombine.low %v485_v9, %v489_v11  ;;  %v3886_v23 = vcombine.low %v486_v12, %v490_v13  ;;  %v545_v9 = vld [vmem:[%s4338_s28 + $0x960] sm:$0xff]  ;;  %v542_v11 = vld [vmem:[%s4338_s28 + $0x948] sm:$0xff] }
  0x73   : > { %2264 = vmatpush1.bf16.msra.mxu0 %v3820_v17  ;;  %2387 = vmatpush1.bf16.msra.mxu1 %v3822_v18  ;;  %v3887_v17 = vcombine.high %v486_v12, %v490_v13  ;;  %v493_v18 = vld [vmem:[%s4338_s28 + $0x7c0] sm:$0xff]  ;;  %v546_v12 = vld [vmem:[%s4338_s28 + $0x968] sm:$0xff] }
  0x74   : > { %2265 = vmatprep.subr.bf16.mxu0 %v3829_v19  ;;  %2388 = vmatprep.subr.bf16.mxu1 %v3831_v20  ;;  %v497_v19 = vld [vmem:[%s4338_s28 + $0x7e0] sm:$0xff]  ;;  %v494_v20 = vld [vmem:[%s4338_s28 + $0x7c8] sm:$0xff] }
  0x75   : > { %v3893_v24 = vcombine.high %v493_v18, %v497_v19  ;;  %v3892_v31 = vcombine.low %v493_v18, %v497_v19  ;;  %v3894_v33 = vcombine.low %v494_v20, %v498_v21  ;;  %v553_v18 = vld [vmem:[%s4338_s28 + $0x9a0] sm:$0xff]  ;;  %v550_v19 = vld [vmem:[%s4338_s28 + $0x988] sm:$0xff] }
  0x77   : > { %2266 = vmatpush1.bf16.msra.mxu0 %v3828_v25  ;;  %2389 = vmatpush1.bf16.msra.mxu1 %v3830_v27  ;;  %v3895_v25 = vcombine.high %v494_v20, %v498_v21  ;;  %v501_v27 = vld [vmem:[%s4338_s28 + $0x800] sm:$0xff]  ;;  %v554_v20 = vld [vmem:[%s4338_s28 + $0x9a8] sm:$0xff] }
  0x78   : > { %2267 = vmatprep.subr.bf16.mxu0 %v3837_v28  ;;  %2390 = vmatprep.subr.bf16.mxu1 %v3839_v29  ;;  %v505_v28 = vld [vmem:[%s4338_s28 + $0x820] sm:$0xff]  ;;  %v502_v29 = vld [vmem:[%s4338_s28 + $0x808] sm:$0xff] }
  0x79   : > { %v3901_v34 = vcombine.high %v501_v27, %v505_v28  ;;  %v3900_v40 = vcombine.low %v501_v27, %v505_v28  ;;  %v3902_v41 = vcombine.low %v502_v29, %v506_v30  ;;  %v561_v27 = vld [vmem:[%s4338_s28 + $0x9e0] sm:$0xff]  ;;  %v558_v28 = vld [vmem:[%s4338_s28 + $0x9c8] sm:$0xff] }
  0x7b   : > { %2268 = vmatpush1.bf16.msra.mxu0 %v3836_v35  ;;  %2391 = vmatpush1.bf16.msra.mxu1 %v3838_v54  ;;  %v3903_v35 = vcombine.high %v502_v29, %v506_v30  ;;  %v509_v54 = vld [vmem:[%s4338_s28 + $0x840] sm:$0xff]  ;;  %v562_v29 = vld [vmem:[%s4338_s28 + $0x9e8] sm:$0xff] }
  0x7c   : > { %2269 = vmatprep.subr.bf16.mxu0 %v3845_v0  ;;  %2392 = vmatprep.subr.bf16.mxu1 %v3847_v37  ;;  %v513_v0 = vld [vmem:[%s4338_s28 + $0x860] sm:$0xff]  ;;  %v4513_v37 = vcombine.high %v4437_v26, %v4437_v26 }
  0x7d   : > { %v3908_v49 = vcombine.low %v509_v54, %v513_v0 }
  0x7f   : > { %2270 = vmatpush1.bf16.msra.mxu0 %v3844_v42  ;;  %2393 = vmatpush1.bf16.msra.mxu1 %v3846_v43  ;;  %v3909_v42 = vcombine.high %v509_v54, %v513_v0  ;;  %v3911_v43 = vcombine.high %v510_v38, %v514_v39  ;;  %v251_v54 = vld [vmem:[%s4338_s28 + $0x30] sm:$0xff]  ;;  %v248_v0 = vld [vmem:[%s4338_s28 + $0x18] sm:$0xff] }
  0x80   : > { %2271 = vmatprep.subr.bf16.mxu0 %v3853_v44  ;;  %2394 = vmatprep.subr.bf16.mxu1 %v3855_v46  ;;  %v517_v44 = vld [vmem:[%s4338_s28 + $0x880] sm:$0xff]  ;;  %v252_v38 = vld [vmem:[%s4338_s28 + $0x38] sm:$0xff] }
  0x81   : > { %v521_v46 = vld [vmem:[%s4338_s28 + $0x8a0] sm:$0xff] }
  0x82   : > { %v3916_v59 = vcombine.low %v517_v44, %v521_v46 }
  0x83   : > { %2272 = vmatpush1.bf16.msra.mxu0 %v3852_v51  ;;  %2395 = vmatpush1.bf16.msra.mxu1 %v3854_v52  ;;  %v3917_v51 = vcombine.high %v517_v44, %v521_v46  ;;  %v3919_v52 = vcombine.high %v518_v47, %v522_v48  ;;  %v259_v44 = vld [vmem:[%s4338_s28 + $0x70] sm:$0xff]  ;;  %v256_v46 = vld [vmem:[%s4338_s28 + $0x58] sm:$0xff] }
  0x84   : > { %2273 = vmatprep.subr.bf16.mxu0 %v3861_v53  ;;  %2396 = vmatprep.subr.bf16.mxu1 %v3863_v55  ;;  %v525_v53 = vld [vmem:[%s4338_s28 + $0x8c0] sm:$0xff] }
  0x85   : > { %v529_v55 = vld [vmem:[%s4338_s28 + $0x8e0] sm:$0xff] }
  0x86   : > { %v3924_v4 = vcombine.low %v525_v53, %v529_v55 }
  0x87   : > { %2274 = vmatpush1.bf16.msra.mxu0 %v3860_v60  ;;  %2397 = vmatpush1.bf16.msra.mxu1 %v3862_v61  ;;  %v3918_v60 = vcombine.low %v518_v47, %v522_v48  ;;  %v3925_v61 = vcombine.high %v525_v53, %v529_v55  ;;  %v260_v47 = vld [vmem:[%s4338_s28 + $0x78] sm:$0xff]  ;;  %v267_v53 = vld [vmem:[%s4338_s28 + $0xb0] sm:$0xff] }
  0x88   : > { %2275 = vmatprep.subr.bf16.mxu0 %v3869_v62  ;;  %2398 = vmatprep.subr.bf16.mxu1 %v3871_v63  ;;  %v3927_v62 = vcombine.high %v526_v57, %v530_v58  ;;  %v533_v63 = vld [vmem:[%s4338_s28 + $0x900] sm:$0xff]  ;;  %v264_v55 = vld [vmem:[%s4338_s28 + $0x98] sm:$0xff] }
  0x89   : > { %v3932_v13 = vcombine.low %v533_v63, %v537_v1 }
  0x8b   : > { %2276 = vmatpush1.bf16.msra.mxu0 %v3868_v5  ;;  %2399 = vmatpush1.bf16.msra.mxu1 %v3870_v6  ;;  %v3926_v5 = vcombine.low %v526_v57, %v530_v58  ;;  %v3933_v6 = vcombine.high %v533_v63, %v537_v1  ;;  %v268_v57 = vld [vmem:[%s4338_s28 + $0xb8] sm:$0xff]  ;;  %v275_v63 = vld [vmem:[%s4338_s28 + $0xf0] sm:$0xff] }
  0x8c   : > { %2277 = vmatprep.subr.bf16.mxu0 %v3877_v7  ;;  %2400 = vmatprep.subr.bf16.mxu1 %v3879_v8  ;;  %v3935_v7 = vcombine.high %v534_v2, %v538_v3  ;;  %v541_v8 = vld [vmem:[%s4338_s28 + $0x940] sm:$0xff]  ;;  %v272_v1 = vld [vmem:[%s4338_s28 + $0xd8] sm:$0xff] }
  0x8d   : > { %v3940_v21 = vcombine.low %v541_v8, %v545_v9 }
  0x8f   : > { %2278 = vmatpush1.bf16.msra.mxu0 %v3876_v14  ;;  %2401 = vmatpush1.bf16.msra.mxu1 %v3878_v15  ;;  %v3934_v14 = vcombine.low %v534_v2, %v538_v3  ;;  %v3941_v15 = vcombine.high %v541_v8, %v545_v9  ;;  %v276_v2 = vld [vmem:[%s4338_s28 + $0xf8] sm:$0xff]  ;;  %v283_v8 = vld [vmem:[%s4338_s28 + $0x130] sm:$0xff] }
  0x90   : > { %2279 = vmatprep.subr.bf16.mxu0 %v3885_v16  ;;  %2402 = vmatprep.subr.bf16.mxu1 %v3887_v17  ;;  %v3943_v16 = vcombine.high %v542_v11, %v546_v12  ;;  %v549_v17 = vld [vmem:[%s4338_s28 + $0x980] sm:$0xff]  ;;  %v280_v9 = vld [vmem:[%s4338_s28 + $0x118] sm:$0xff] }
  0x91   : > { %v3948_v30 = vcombine.low %v549_v17, %v553_v18 }
  0x93   : > { %2280 = vmatpush1.bf16.msra.mxu0 %v3884_v22  ;;  %2403 = vmatpush1.bf16.msra.mxu1 %v3886_v23  ;;  %v3942_v22 = vcombine.low %v542_v11, %v546_v12  ;;  %v3949_v23 = vcombine.high %v549_v17, %v553_v18  ;;  %v284_v11 = vld [vmem:[%s4338_s28 + $0x138] sm:$0xff] }
  0x94   : > { %2281 = vmatprep.subr.bf16.mxu0 %v3893_v24  ;;  %2404 = vmatprep.subr.bf16.mxu1 %v3895_v25  ;;  %v3951_v24 = vcombine.high %v550_v19, %v554_v20  ;;  %v557_v25 = vld [vmem:[%s4338_s28 + $0x9c0] sm:$0xff]  ;;  %v288_v17 = vld [vmem:[%s4338_s28 + $0x158] sm:$0xff] }
  0x95   : > { %v3956_v39 = vcombine.low %v557_v25, %v561_v27  ;;  %v292_v18 = vld [vmem:[%s4338_s28 + $0x178] sm:$0xff] }
  0x97   : > { %2282 = vmatpush1.bf16.msra.mxu0 %v3892_v31  ;;  %2405 = vmatpush1.bf16.msra.mxu1 %v3894_v33  ;;  %v3950_v31 = vcombine.low %v550_v19, %v554_v20  ;;  %v3957_v33 = vcombine.high %v557_v25, %v561_v27  ;;  %v3682_v20 = vcombine.low %v280_v9, %v284_v11  ;;  %v296_v25 = vld [vmem:[%s4338_s28 + $0x198] sm:$0xff] }
  0x98   : > { %2292 = vmatprep.subr.bf16.mxu0 %v3901_v34  ;;  %2415 = vmatprep.subr.bf16.mxu1 %v3903_v35  ;;  %v3959_v34 = vcombine.high %v558_v28, %v562_v29  ;;  %v247_v35 = vld [vmem:[%s4338_s28 + $0x10] sm:$0xff]  ;;  %v300_v27 = vld [vmem:[%s4338_s28 + $0x1b8] sm:$0xff] }
  0x99   : > { %v3648_v48 = vcombine.low %v247_v35, %v251_v54 }
  0x9a   : > { %2284 = vmatmul.mubr.bf16.vlgmr.msra.gmra.mrb[0].mxu0 %v4513_v37  ;;  %2407 = vmatmul.mubr.bf16.vlgmr.msra.gmra.mrb[0].mxu1 %v4513_v37 }
  0x9b   : > { %2293 = vmatpush1.bf16.msra.mxu0 %v3900_v40  ;;  %2416 = vmatpush1.bf16.msra.mxu1 %v3902_v41  ;;  %v3958_v40 = vcombine.low %v558_v28, %v562_v29  ;;  %v3649_v41 = vcombine.high %v247_v35, %v251_v54  ;;  %v3690_v29 = vcombine.low %v288_v17, %v292_v18  ;;  %v304_v35 = vld [vmem:[%s4338_s28 + $0x1d8] sm:$0xff] }
  0x9c   : > { %2294 = vmatprep.subr.bf16.mxu0 %v3909_v42  ;;  %2417 = vmatprep.subr.bf16.mxu1 %v3911_v43  ;;  %v3651_v42 = vcombine.high %v248_v0, %v252_v38  ;;  %v255_v43 = vld [vmem:[%s4338_s28 + $0x50] sm:$0xff]  ;;  %v308_v54 = vld [vmem:[%s4338_s28 + $0x1f8] sm:$0xff] }
  0x9d   : > { %2324 = vmatprep.mubr.bf16.mxu0 %v4283_v56  ;;  %2447 = vmatprep.mubr.bf16.mxu1 %v4283_v56  ;;  %v3656_v58 = vcombine.low %v255_v43, %v259_v44 }
  0x9f   : > { %2295 = vmatpush1.bf16.msra.mxu0 %v3908_v49  ;;  %2418 = vmatpush1.bf16.msra.mxu1 %v3910_v50  ;;  %v3650_v49 = vcombine.low %v248_v0, %v252_v38  ;;  %v3657_v50 = vcombine.high %v255_v43, %v259_v44  ;;  %v3698_v38 = vcombine.low %v296_v25, %v300_v27  ;;  %v312_v43 = vld [vmem:[%s4338_s28 + $0x218] sm:$0xff] }
  0xa0   : > { %2296 = vmatprep.subr.bf16.mxu0 %v3917_v51  ;;  %2419 = vmatprep.subr.bf16.mxu1 %v3919_v52  ;;  %v3659_v51 = vcombine.high %v256_v46, %v260_v47  ;;  %v263_v52 = vld [vmem:[%s4338_s28 + $0x90] sm:$0xff]  ;;  %v316_v44 = vld [vmem:[%s4338_s28 + $0x238] sm:$0xff] }
  0xa1   : > { %v3664_v3 = vcombine.low %v263_v52, %v267_v53 }
  0xa3   : > { %2297 = vmatpush1.bf16.msra.mxu0 %v3916_v59  ;;  %2420 = vmatpush1.bf16.msra.mxu1 %v3918_v60  ;;  %v3658_v59 = vcombine.low %v256_v46, %v260_v47  ;;  %v3665_v60 = vcombine.high %v263_v52, %v267_v53  ;;  %v3706_v47 = vcombine.low %v304_v35, %v308_v54  ;;  %v320_v52 = vld [vmem:[%s4338_s28 + $0x258] sm:$0xff] }
  0xa4   : > { %2298 = vmatprep.subr.bf16.mxu0 %v3925_v61  ;;  %2421 = vmatprep.subr.bf16.mxu1 %v3927_v62  ;;  %v3667_v61 = vcombine.high %v264_v55, %v268_v57  ;;  %v271_v62 = vld [vmem:[%s4338_s28 + $0xd0] sm:$0xff]  ;;  %v324_v53 = vld [vmem:[%s4338_s28 + $0x278] sm:$0xff] }
  0xa5   : > { %v3672_v12 = vcombine.low %v271_v62, %v275_v63 }
  0xa7   : > { %2299 = vmatpush1.bf16.msra.mxu0 %v3924_v4  ;;  %2422 = vmatpush1.bf16.msra.mxu1 %v3926_v5  ;;  %v3666_v4 = vcombine.low %v264_v55, %v268_v57  ;;  %v3673_v5 = vcombine.high %v271_v62, %v275_v63  ;;  %v3714_v57 = vcombine.low %v312_v43, %v316_v44  ;;  %v328_v62 = vld [vmem:[%s4338_s28 + $0x298] sm:$0xff] }
  0xa8   : > { %2300 = vmatprep.subr.bf16.mxu0 %v3933_v6  ;;  %2423 = vmatprep.subr.bf16.mxu1 %v3935_v7  ;;  %v3675_v6 = vcombine.high %v272_v1, %v276_v2  ;;  %v279_v7 = vld [vmem:[%s4338_s28 + $0x110] sm:$0xff]  ;;  %v332_v63 = vld [vmem:[%s4338_s28 + $0x2b8] sm:$0xff] }
  0xa9   : > { %v3680_v19 = vcombine.low %v279_v7, %v283_v8 }
  0xab   : > { %2301 = vmatpush1.bf16.msra.mxu0 %v3932_v13  ;;  %2424 = vmatpush1.bf16.msra.mxu1 %v3934_v14  ;;  %v3681_v13 = vcombine.high %v279_v7, %v283_v8  ;;  %v3683_v14 = vcombine.high %v280_v9, %v284_v11  ;;  %v336_v7 = vld [vmem:[%s4338_s28 + $0x2d8] sm:$0xff]  ;;  %v3730_v11 = vcombine.low %v328_v62, %v332_v63 }
  0xac   : > { %2302 = vmatprep.subr.bf16.mxu0 %v3941_v15  ;;  %2425 = vmatprep.subr.bf16.mxu1 %v3943_v16  ;;  %v287_v15 = vld [vmem:[%s4338_s28 + $0x150] sm:$0xff]  ;;  %v340_v8 = vld [vmem:[%s4338_s28 + $0x2f8] sm:$0xff] }
  0xad   : > { %v291_v16 = vld [vmem:[%s4338_s28 + $0x170] sm:$0xff] }
  0xae   : > { %v3688_v28 = vcombine.low %v287_v15, %v291_v16 }
  0xaf   : > { %2303 = vmatpush1.bf16.msra.mxu0 %v3940_v21  ;;  %2426 = vmatpush1.bf16.msra.mxu1 %v3942_v22  ;;  %v3689_v21 = vcombine.high %v287_v15, %v291_v16  ;;  %v3691_v22 = vcombine.high %v288_v17, %v292_v18  ;;  %v344_v15 = vld [vmem:[%s4338_s28 + $0x318] sm:$0xff]  ;;  %v3738_v18 = vcombine.low %v336_v7, %v340_v8 }
  0xb0   : > { %2304 = vmatprep.subr.bf16.mxu0 %v3949_v23  ;;  %2427 = vmatprep.subr.bf16.mxu1 %v3951_v24  ;;  %v295_v23 = vld [vmem:[%s4338_s28 + $0x190] sm:$0xff]  ;;  %v348_v16 = vld [vmem:[%s4338_s28 + $0x338] sm:$0xff] }
  0xb1   : > { %v299_v24 = vld [vmem:[%s4338_s28 + $0x1b0] sm:$0xff] }
  0xb2   : > { %v3696_v0 = vcombine.low %v295_v23, %v299_v24 }
  0xb3   : > { %2305 = vmatpush1.bf16.msra.mxu0 %v3948_v30  ;;  %2428 = vmatpush1.bf16.msra.mxu1 %v3950_v31  ;;  %v3697_v30 = vcombine.high %v295_v23, %v299_v24  ;;  %v3699_v31 = vcombine.high %v296_v25, %v300_v27  ;;  %v352_v23 = vld [vmem:[%s4338_s28 + $0x358] sm:$0xff]  ;;  %v3746_v27 = vcombine.low %v344_v15, %v348_v16 }
  0xb4   : > { %2306 = vmatprep.subr.bf16.mxu0 %v3957_v33  ;;  %2429 = vmatprep.subr.bf16.mxu1 %v3959_v34  ;;  %v303_v33 = vld [vmem:[%s4338_s28 + $0x1d0] sm:$0xff]  ;;  %v356_v24 = vld [vmem:[%s4338_s28 + $0x378] sm:$0xff] }
  0xb5   : > { %v307_v34 = vld [vmem:[%s4338_s28 + $0x1f0] sm:$0xff] }
  0xb6   : > { %v3704_v46 = vcombine.low %v303_v33, %v307_v34 }
  0xb7   : > { %2307 = vmatpush1.bf16.msra.mxu0 %v3956_v39  ;;  %2430 = vmatpush1.bf16.msra.mxu1 %v3958_v40  ;;  %v3705_v39 = vcombine.high %v303_v33, %v307_v34  ;;  %v3707_v40 = vcombine.high %v304_v35, %v308_v54  ;;  %v360_v33 = vld [vmem:[%s4338_s28 + $0x398] sm:$0xff]  ;;  %v3754_v54 = vcombine.low %v352_v23, %v356_v24 }
  0xb8   : > { %2456 = vmatprep.subr.bf16.mxu0 %v3649_v41  ;;  %2579 = vmatprep.subr.bf16.mxu1 %v3651_v42  ;;  %v311_v41 = vld [vmem:[%s4338_s28 + $0x210] sm:$0xff]  ;;  %v364_v34 = vld [vmem:[%s4338_s28 + $0x3b8] sm:$0xff] }
  0xb9   : > { %v315_v42 = vld [vmem:[%s4338_s28 + $0x230] sm:$0xff] }
  0xba   : > { %2325 = vmatmul.mubr.bf16.vlgmr.msra.gmra.mrb[0].mxu0 %v4407_v32  ;;  %2448 = vmatmul.mubr.bf16.vlgmr.msra.gmra.mrb[0].mxu1 %v4407_v32  ;;  %v3712_v55 = vcombine.low %v311_v41, %v315_v42 }
  0xbb   : > { %2457 = vmatpush1.bf16.msra.mxu0 %v3648_v48  ;;  %2580 = vmatpush1.bf16.msra.mxu1 %v3650_v49  ;;  %v3713_v48 = vcombine.high %v311_v41, %v315_v42  ;;  %v3715_v49 = vcombine.high %v312_v43, %v316_v44  ;;  %v368_v41 = vld [vmem:[%s4338_s28 + $0x3d8] sm:$0xff]  ;;  %v3762_v44 = vcombine.low %v360_v33, %v364_v34 }
  0xbc   : > { %2458 = vmatprep.subr.bf16.mxu0 %v3657_v50  ;;  %2581 = vmatprep.subr.bf16.mxu1 %v3659_v51  ;;  %v319_v50 = vld [vmem:[%s4338_s28 + $0x250] sm:$0xff]  ;;  %v372_v42 = vld [vmem:[%s4338_s28 + $0x3f8] sm:$0xff] }
  0xbd   : > { %2488 = vmatprep.mubr.bf16.mxu0 %v4391_v10  ;;  %2611 = vmatprep.mubr.bf16.mxu1 %v4391_v10  ;;  %v3674_v10 = vcombine.low %v272_v1, %v276_v2  ;;  %v323_v51 = vld [vmem:[%s4338_s28 + $0x270] sm:$0xff]  ;;  %v3722_v2 = vcombine.low %v320_v52, %v324_v53 }
  0xbe   : > { %v3720_v1 = vcombine.low %v319_v50, %v323_v51 }
  0xbf   : > { %2459 = vmatpush1.bf16.msra.mxu0 %v3656_v58  ;;  %2582 = vmatpush1.bf16.msra.mxu1 %v3658_v59  ;;  %v3721_v58 = vcombine.high %v319_v50, %v323_v51  ;;  %v3723_v59 = vcombine.high %v320_v52, %v324_v53  ;;  %v376_v50 = vld [vmem:[%s4338_s28 + $0x418] sm:$0xff]  ;;  %v3770_v53 = vcombine.low %v368_v41, %v372_v42 }
  0xc0   : > { %2460 = vmatprep.subr.bf16.mxu0 %v3665_v60  ;;  %2583 = vmatprep.subr.bf16.mxu1 %v3667_v61  ;;  %v327_v60 = vld [vmem:[%s4338_s28 + $0x290] sm:$0xff]  ;;  %v380_v51 = vld [vmem:[%s4338_s28 + $0x438] sm:$0xff] }
  0xc1   : > { %v331_v61 = vld [vmem:[%s4338_s28 + $0x2b0] sm:$0xff] }
  0xc2   : > { %v3728_v9 = vcombine.low %v327_v60, %v331_v61 }
  0xc3   : > { %2461 = vmatpush1.bf16.msra.mxu0 %v3664_v3  ;;  %2584 = vmatpush1.bf16.msra.mxu1 %v3666_v4  ;;  %v3729_v3 = vcombine.high %v327_v60, %v331_v61  ;;  %v3731_v4 = vcombine.high %v328_v62, %v332_v63  ;;  %v384_v60 = vld [vmem:[%s4338_s28 + $0x458] sm:$0xff]  ;;  %v3778_v63 = vcombine.low %v376_v50, %v380_v51 }
  0xc4   : > { %2462 = vmatprep.subr.bf16.mxu0 %v3673_v5  ;;  %2585 = vmatprep.subr.bf16.mxu1 %v3675_v6  ;;  %v335_v5 = vld [vmem:[%s4338_s28 + $0x2d0] sm:$0xff]  ;;  %v388_v61 = vld [vmem:[%s4338_s28 + $0x478] sm:$0xff] }
  0xc5   : > { %v339_v6 = vld [vmem:[%s4338_s28 + $0x2f0] sm:$0xff] }
  0xc6   : > { %v3736_v17 = vcombine.low %v335_v5, %v339_v6 }
  0xc7   : > { %2463 = vmatpush1.bf16.msra.mxu0 %v3672_v12  ;;  %2586 = vmatpush1.bf16.msra.mxu1 %v3674_v10  ;;  %v3737_v12 = vcombine.high %v335_v5, %v339_v6  ;;  %v3739_v10 = vcombine.high %v336_v7, %v340_v8  ;;  %v392_v5 = vld [vmem:[%s4338_s28 + $0x498] sm:$0xff]  ;;  %v3786_v8 = vcombine.low %v384_v60, %v388_v61 }
  0xc8   : > { %2464 = vmatprep.subr.bf16.mxu0 %v3681_v13  ;;  %2587 = vmatprep.subr.bf16.mxu1 %v3683_v14  ;;  %v343_v13 = vld [vmem:[%s4338_s28 + $0x310] sm:$0xff]  ;;  %v396_v6 = vld [vmem:[%s4338_s28 + $0x4b8] sm:$0xff] }
  0xc9   : > { %v347_v14 = vld [vmem:[%s4338_s28 + $0x330] sm:$0xff] }
  0xca   : > { %v3744_v25 = vcombine.low %v343_v13, %v347_v14 }
  0xcb   : > { %2465 = vmatpush1.bf16.msra.mxu0 %v3680_v19  ;;  %2588 = vmatpush1.bf16.msra.mxu1 %v3682_v20  ;;  %v3745_v19 = vcombine.high %v343_v13, %v347_v14  ;;  %v3747_v20 = vcombine.high %v344_v15, %v348_v16  ;;  %v400_v13 = vld [vmem:[%s4338_s28 + $0x4d8] sm:$0xff]  ;;  %v3794_v15 = vcombine.low %v392_v5, %v396_v6 }
  0xcc   : > { %2466 = vmatprep.subr.bf16.mxu0 %v3689_v21  ;;  %2589 = vmatprep.subr.bf16.mxu1 %v3691_v22  ;;  %v351_v21 = vld [vmem:[%s4338_s28 + $0x350] sm:$0xff]  ;;  %v404_v14 = vld [vmem:[%s4338_s28 + $0x4f8] sm:$0xff] }
  0xcd   : > { %v355_v22 = vld [vmem:[%s4338_s28 + $0x370] sm:$0xff] }
  0xce   : > { %v3752_v35 = vcombine.low %v351_v21, %v355_v22 }
  0xcf   : > { %2467 = vmatpush1.bf16.msra.mxu0 %v3688_v28  ;;  %2590 = vmatpush1.bf16.msra.mxu1 %v3690_v29  ;;  %v3753_v28 = vcombine.high %v351_v21, %v355_v22  ;;  %v3755_v29 = vcombine.high %v352_v23, %v356_v24  ;;  %v412_v21 = vld [vmem:[%s4338_s28 + $0x538] sm:$0xff] }
  0xd0   : > { %2468 = vmatprep.subr.bf16.mxu0 %v3697_v30  ;;  %2591 = vmatprep.subr.bf16.mxu1 %v3699_v31  ;;  %v359_v30 = vld [vmem:[%s4338_s28 + $0x390] sm:$0xff] }
  0xd1   : > { %v363_v31 = vld [vmem:[%s4338_s28 + $0x3b0] sm:$0xff] }
  0xd2   : > { %v3760_v43 = vcombine.low %v359_v30, %v363_v31 }
  0xd3   : > { %2469 = vmatpush1.bf16.msra.mxu0 %v3696_v0  ;;  %2592 = vmatpush1.bf16.msra.mxu1 %v3698_v38  ;;  %v3761_v0 = vcombine.high %v359_v30, %v363_v31  ;;  %v3763_v38 = vcombine.high %v360_v33, %v364_v34 }
  0xd4   : > { %2470 = vmatprep.subr.bf16.mxu0 %v3705_v39  ;;  %2593 = vmatprep.subr.bf16.mxu1 %v3707_v40  ;;  %v367_v39 = vld [vmem:[%s4338_s28 + $0x3d0] sm:$0xff] }
  0xd5   : > { %v371_v40 = vld [vmem:[%s4338_s28 + $0x3f0] sm:$0xff] }
  0xd6   : > { %v3768_v52 = vcombine.low %v367_v39, %v371_v40 }
  0xd7   : > { %2471 = vmatpush1.bf16.msra.mxu0 %v3704_v46  ;;  %2594 = vmatpush1.bf16.msra.mxu1 %v3706_v47  ;;  %v3769_v46 = vcombine.high %v367_v39, %v371_v40  ;;  %v3771_v47 = vcombine.high %v368_v41, %v372_v42 }
  0xd8   : > { %2472 = vmatprep.subr.bf16.mxu0 %v3713_v48  ;;  %2595 = vmatprep.subr.bf16.mxu1 %v3715_v49  ;;  %v375_v48 = vld [vmem:[%s4338_s28 + $0x410] sm:$0xff] }
  0xd9   : > { %v379_v49 = vld [vmem:[%s4338_s28 + $0x430] sm:$0xff] }
  0xda   : > { %v3776_v62 = vcombine.low %v375_v48, %v379_v49 }
  0xdb   : > { %2473 = vmatpush1.bf16.msra.mxu0 %v3712_v55  ;;  %2596 = vmatpush1.bf16.msra.mxu1 %v3714_v57  ;;  %v3777_v55 = vcombine.high %v375_v48, %v379_v49  ;;  %v3779_v57 = vcombine.high %v376_v50, %v380_v51 }
  0xdc   : > { %2474 = vmatprep.subr.bf16.mxu0 %v3721_v58  ;;  %2597 = vmatprep.subr.bf16.mxu1 %v3723_v59  ;;  %v383_v58 = vld [vmem:[%s4338_s28 + $0x450] sm:$0xff] }
  0xdd   : > { %v387_v59 = vld [vmem:[%s4338_s28 + $0x470] sm:$0xff] }
  0xde   : > { %v3784_v7 = vcombine.low %v383_v58, %v387_v59 }
  0xdf   : > { %2475 = vmatpush1.bf16.msra.mxu0 %v3720_v1  ;;  %2598 = vmatpush1.bf16.msra.mxu1 %v3722_v2  ;;  %v3785_v1 = vcombine.high %v383_v58, %v387_v59  ;;  %v3787_v2 = vcombine.high %v384_v60, %v388_v61 }
  0xe0   : > { %2476 = vmatprep.subr.bf16.mxu0 %v3729_v3  ;;  %2599 = vmatprep.subr.bf16.mxu1 %v3731_v4  ;;  %v391_v3 = vld [vmem:[%s4338_s28 + $0x490] sm:$0xff] }
  0xe1   : > { %v395_v4 = vld [vmem:[%s4338_s28 + $0x4b0] sm:$0xff] }
  0xe3   : > { %2477 = vmatpush1.bf16.msra.mxu0 %v3728_v9  ;;  %2600 = vmatpush1.bf16.msra.mxu1 %v3730_v11  ;;  %v3793_v9 = vcombine.high %v391_v3, %v395_v4  ;;  %v3795_v11 = vcombine.high %v392_v5, %v396_v6 }
  0xe4   : > { %2478 = vmatprep.subr.bf16.mxu0 %v3737_v12  ;;  %2601 = vmatprep.subr.bf16.mxu1 %v3739_v10  ;;  %v399_v12 = vld [vmem:[%s4338_s28 + $0x4d0] sm:$0xff] }
  0xe5   : > { %v403_v10 = vld [vmem:[%s4338_s28 + $0x4f0] sm:$0xff] }
  0xe6   : > { %v3801_v16 = vcombine.high %v399_v12, %v403_v10  ;;  %v3800_v22 = vcombine.low %v399_v12, %v403_v10 }
  0xe7   : > { %2479 = vmatpush1.bf16.msra.mxu0 %v3736_v17  ;;  %2602 = vmatpush1.bf16.msra.mxu1 %v3738_v18  ;;  %v3803_v17 = vcombine.high %v400_v13, %v404_v14  ;;  %v407_v18 = vld [vmem:[%s4338_s28 + $0x510] sm:$0xff] }
  0xe8   : > { %2480 = vmatprep.subr.bf16.mxu0 %v3745_v19  ;;  %2603 = vmatprep.subr.bf16.mxu1 %v3747_v20  ;;  %v411_v19 = vld [vmem:[%s4338_s28 + $0x530] sm:$0xff]  ;;  %v408_v20 = vld [vmem:[%s4338_s28 + $0x518] sm:$0xff] }
  0xe9   : > { %v3809_v23 = vcombine.high %v407_v18, %v411_v19  ;;  %v3811_v24 = vcombine.high %v408_v20, %v412_v21  ;;  %v3808_v30 = vcombine.low %v407_v18, %v411_v19  ;;  %v3810_v31 = vcombine.low %v408_v20, %v412_v21 }
  0xeb   : > { %2481 = vmatpush1.bf16.msra.mxu0 %v3744_v25  ;;  %2604 = vmatpush1.bf16.msra.mxu1 %v3746_v27  ;;  %v415_v25 = vld [vmem:[%s4338_s28 + $0x550] sm:$0xff] }
  0xec   : > { %2482 = vmatprep.subr.bf16.mxu0 %v3753_v28  ;;  %2605 = vmatprep.subr.bf16.mxu1 %v3755_v29  ;;  %v419_v27 = vld [vmem:[%s4338_s28 + $0x570] sm:$0xff]  ;;  %v416_v28 = vld [vmem:[%s4338_s28 + $0x558] sm:$0xff] }
  0xed   : > { %v420_v29 = vld [vmem:[%s4338_s28 + $0x578] sm:$0xff]  ;;  %v3817_v33 = vcombine.high %v415_v25, %v419_v27  ;;  %v3816_v39 = vcombine.low %v415_v25, %v419_v27 }
  0xee   : > { %v3819_v34 = vcombine.high %v416_v28, %v420_v29  ;;  %v3818_v40 = vcombine.low %v416_v28, %v420_v29 }
  0xef   : > { %2483 = vmatpush1.bf16.msra.mxu0 %v3752_v35  ;;  %2606 = vmatpush1.bf16.msra.mxu1 %v3754_v54  ;;  %v423_v35 = vld [vmem:[%s4338_s28 + $0x590] sm:$0xff] }
  0xf0   : > { %2484 = vmatprep.subr.bf16.mxu0 %v3761_v0  ;;  %2607 = vmatprep.subr.bf16.mxu1 %v3763_v38  ;;  %v427_v54 = vld [vmem:[%s4338_s28 + $0x5b0] sm:$0xff]  ;;  %v424_v0 = vld [vmem:[%s4338_s28 + $0x598] sm:$0xff] }
  0xf1   : > { %v428_v38 = vld [vmem:[%s4338_s28 + $0x5b8] sm:$0xff]  ;;  %v3825_v41 = vcombine.high %v423_v35, %v427_v54  ;;  %v3824_v48 = vcombine.low %v423_v35, %v427_v54 }
  0xf2   : > { %v3827_v42 = vcombine.high %v424_v0, %v428_v38  ;;  %v3826_v49 = vcombine.low %v424_v0, %v428_v38 }
  0xf3   : > { %2485 = vmatpush1.bf16.msra.mxu0 %v3760_v43  ;;  %2608 = vmatpush1.bf16.msra.mxu1 %v3762_v44  ;;  %v431_v43 = vld [vmem:[%s4338_s28 + $0x5d0] sm:$0xff] }
  0xf4   : > { %2486 = vmatprep.subr.bf16.mxu0 %v3769_v46  ;;  %2609 = vmatprep.subr.bf16.mxu1 %v3771_v47  ;;  %v435_v44 = vld [vmem:[%s4338_s28 + $0x5f0] sm:$0xff]  ;;  %v432_v46 = vld [vmem:[%s4338_s28 + $0x5d8] sm:$0xff] }
  0xf5   : > { %v436_v47 = vld [vmem:[%s4338_s28 + $0x5f8] sm:$0xff]  ;;  %v3833_v50 = vcombine.high %v431_v43, %v435_v44  ;;  %v3832_v58 = vcombine.low %v431_v43, %v435_v44 }
  0xf6   : > { %v3835_v51 = vcombine.high %v432_v46, %v436_v47  ;;  %v3834_v59 = vcombine.low %v432_v46, %v436_v47 }
  0xf7   : > { %2487 = vmatpush1.bf16.msra.mxu0 %v3768_v52  ;;  %2610 = vmatpush1.bf16.msra.mxu1 %v3770_v53  ;;  %v439_v52 = vld [vmem:[%s4338_s28 + $0x610] sm:$0xff] }
  0xf8   : > { %2497 = vmatprep.subr.bf16.mxu0 %v3777_v55  ;;  %2620 = vmatprep.subr.bf16.mxu1 %v3779_v57  ;;  %v443_v53 = vld [vmem:[%s4338_s28 + $0x630] sm:$0xff]  ;;  %v440_v55 = vld [vmem:[%s4338_s28 + $0x618] sm:$0xff] }
  0xf9   : > { %v444_v57 = vld [vmem:[%s4338_s28 + $0x638] sm:$0xff]  ;;  %v3841_v60 = vcombine.high %v439_v52, %v443_v53 }
  0xfa   : > { %2489 = vmatmul.mubr.bf16.vlgmr.msra.gmra.mrb[4].mxu0 %v4437_v26  ;;  %2612 = vmatmul.mubr.bf16.vlgmr.msra.gmra.mrb[4].mxu1 %v4437_v26  ;;  %v3792_v26 = vcombine.low %v391_v3, %v395_v4  ;;  %v3843_v61 = vcombine.high %v440_v55, %v444_v57  ;;  %v3840_v3 = vcombine.low %v439_v52, %v443_v53 }
  0xfb   : > { %2498 = vmatpush1.bf16.msra.mxu0 %v3776_v62  ;;  %2621 = vmatpush1.bf16.msra.mxu1 %v3778_v63  ;;  %v447_v62 = vld [vmem:[%s4338_s28 + $0x650] sm:$0xff]  ;;  %v3842_v4 = vcombine.low %v440_v55, %v444_v57 }
  0xfc   : > { %2499 = vmatprep.subr.bf16.mxu0 %v3785_v1  ;;  %2622 = vmatprep.subr.bf16.mxu1 %v3787_v2  ;;  %v451_v63 = vld [vmem:[%s4338_s28 + $0x670] sm:$0xff]  ;;  %v448_v1 = vld [vmem:[%s4338_s28 + $0x658] sm:$0xff] }
  0xfd   : > { %2529 = vmatprep.mubr.bf16.mxu0 %v4445_v36  ;;  %2652 = vmatprep.mubr.bf16.mxu1 %v4445_v36  ;;  %v3802_v36 = vcombine.low %v400_v13, %v404_v14  ;;  %v452_v2 = vld [vmem:[%s4338_s28 + $0x678] sm:$0xff]  ;;  %v3849_v5 = vcombine.high %v447_v62, %v451_v63  ;;  %v3848_v12 = vcombine.low %v447_v62, %v451_v63 }
  0xfe   : > { %v3851_v6 = vcombine.high %v448_v1, %v452_v2  ;;  %v3850_v10 = vcombine.low %v448_v1, %v452_v2 }
  0xff   : > { %2500 = vmatpush1.bf16.msra.mxu0 %v3784_v7  ;;  %2623 = vmatpush1.bf16.msra.mxu1 %v3786_v8  ;;  %v455_v7 = vld [vmem:[%s4338_s28 + $0x690] sm:$0xff] }
 0x100   : > { %2501 = vmatprep.subr.bf16.mxu0 %v3793_v9  ;;  %2624 = vmatprep.subr.bf16.mxu1 %v3795_v11  ;;  %v459_v8 = vld [vmem:[%s4338_s28 + $0x6b0] sm:$0xff]  ;;  %v456_v9 = vld [vmem:[%s4338_s28 + $0x698] sm:$0xff] }
 0x101   : > { %v460_v11 = vld [vmem:[%s4338_s28 + $0x6b8] sm:$0xff]  ;;  %v3857_v13 = vcombine.high %v455_v7, %v459_v8  ;;  %v3856_v18 = vcombine.low %v455_v7, %v459_v8 }
 0x102   : > { %v3859_v14 = vcombine.high %v456_v9, %v460_v11  ;;  %v3858_v19 = vcombine.low %v456_v9, %v460_v11 }
 0x103   : > { %2502 = vmatpush1.bf16.msra.mxu0 %v3792_v26  ;;  %2625 = vmatpush1.bf16.msra.mxu1 %v3794_v15  ;;  %v463_v26 = vld [vmem:[%s4338_s28 + $0x6d0] sm:$0xff] }
 0x104   : > { %2503 = vmatprep.subr.bf16.mxu0 %v3801_v16  ;;  %2626 = vmatprep.subr.bf16.mxu1 %v3803_v17  ;;  %v467_v15 = vld [vmem:[%s4338_s28 + $0x6f0] sm:$0xff]  ;;  %v464_v16 = vld [vmem:[%s4338_s28 + $0x6d8] sm:$0xff] }
 0x105   : > { %v468_v17 = vld [vmem:[%s4338_s28 + $0x6f8] sm:$0xff]  ;;  %v3865_v20 = vcombine.high %v463_v26, %v467_v15  ;;  %v3864_v25 = vcombine.low %v463_v26, %v467_v15 }
 0x106   : > { %v3867_v21 = vcombine.high %v464_v16, %v468_v17  ;;  %v3866_v27 = vcombine.low %v464_v16, %v468_v17 }
 0x107   : > { %2504 = vmatpush1.bf16.msra.mxu0 %v3800_v22  ;;  %2627 = vmatpush1.bf16.msra.mxu1 %v3802_v36  ;;  %v471_v22 = vld [vmem:[%s4338_s28 + $0x710] sm:$0xff] }
 0x108   : > { %2505 = vmatprep.subr.bf16.mxu0 %v3809_v23  ;;  %2628 = vmatprep.subr.bf16.mxu1 %v3811_v24  ;;  %v475_v36 = vld [vmem:[%s4338_s28 + $0x730] sm:$0xff]  ;;  %v472_v23 = vld [vmem:[%s4338_s28 + $0x718] sm:$0xff] }
 0x109   : > { %v476_v24 = vld [vmem:[%s4338_s28 + $0x738] sm:$0xff]  ;;  %v3873_v28 = vcombine.high %v471_v22, %v475_v36  ;;  %v3872_v35 = vcombine.low %v471_v22, %v475_v36 }
 0x10a   : > { %v3875_v29 = vcombine.high %v472_v23, %v476_v24  ;;  %v3874_v54 = vcombine.low %v472_v23, %v476_v24  ;;  %v535_v24 = vld [vmem:[%s4338_s28 + $0x910] sm:$0xff] }
 0x10b   : > { %2506 = vmatpush1.bf16.msra.mxu0 %v3808_v30  ;;  %2629 = vmatpush1.bf16.msra.mxu1 %v3810_v31  ;;  %v479_v30 = vld [vmem:[%s4338_s28 + $0x750] sm:$0xff] }
 0x10c   : > { %2507 = vmatprep.subr.bf16.mxu0 %v3817_v33  ;;  %2630 = vmatprep.subr.bf16.mxu1 %v3819_v34  ;;  %v483_v31 = vld [vmem:[%s4338_s28 + $0x770] sm:$0xff]  ;;  %v480_v33 = vld [vmem:[%s4338_s28 + $0x758] sm:$0xff] }
 0x10d   : > { %v484_v34 = vld [vmem:[%s4338_s28 + $0x778] sm:$0xff]  ;;  %v3881_v0 = vcombine.high %v479_v30, %v483_v31  ;;  %v3880_v43 = vcombine.low %v479_v30, %v483_v31 }
 0x10e   : > { %v3883_v38 = vcombine.high %v480_v33, %v484_v34  ;;  %v3882_v44 = vcombine.low %v480_v33, %v484_v34  ;;  %v543_v33 = vld [vmem:[%s4338_s28 + $0x950] sm:$0xff] }
 0x10f   : > { %2508 = vmatpush1.bf16.msra.mxu0 %v3816_v39  ;;  %2631 = vmatpush1.bf16.msra.mxu1 %v3818_v40  ;;  %v487_v39 = vld [vmem:[%s4338_s28 + $0x790] sm:$0xff] }
 0x110   : > { %2509 = vmatprep.subr.bf16.mxu0 %v3825_v41  ;;  %2632 = vmatprep.subr.bf16.mxu1 %v3827_v42  ;;  %v491_v40 = vld [vmem:[%s4338_s28 + $0x7b0] sm:$0xff]  ;;  %v488_v41 = vld [vmem:[%s4338_s28 + $0x798] sm:$0xff] }
 0x111   : > { %v492_v42 = vld [vmem:[%s4338_s28 + $0x7b8] sm:$0xff]  ;;  %v3889_v46 = vcombine.high %v487_v39, %v491_v40  ;;  %v3888_v52 = vcombine.low %v487_v39, %v491_v40  ;;  %v547_v34 = vld [vmem:[%s4338_s28 + $0x970] sm:$0xff] }
 0x112   : > { %v3891_v47 = vcombine.high %v488_v41, %v492_v42  ;;  %v3890_v53 = vcombine.low %v488_v41, %v492_v42  ;;  %v3945_v39 = vcombine.high %v543_v33, %v547_v34  ;;  %v551_v41 = vld [vmem:[%s4338_s28 + $0x990] sm:$0xff] }
 0x113   : > { %2510 = vmatpush1.bf16.msra.mxu0 %v3824_v48  ;;  %2633 = vmatpush1.bf16.msra.mxu1 %v3826_v49  ;;  %v495_v48 = vld [vmem:[%s4338_s28 + $0x7d0] sm:$0xff] }
 0x114   : > { %2511 = vmatprep.subr.bf16.mxu0 %v3833_v50  ;;  %2634 = vmatprep.subr.bf16.mxu1 %v3835_v51  ;;  %v499_v49 = vld [vmem:[%s4338_s28 + $0x7f0] sm:$0xff]  ;;  %v496_v50 = vld [vmem:[%s4338_s28 + $0x7d8] sm:$0xff] }
 0x115   : > { %v500_v51 = vld [vmem:[%s4338_s28 + $0x7f8] sm:$0xff]  ;;  %v3897_v55 = vcombine.high %v495_v48, %v499_v49  ;;  %v3896_v62 = vcombine.low %v495_v48, %v499_v49  ;;  %v555_v42 = vld [vmem:[%s4338_s28 + $0x9b0] sm:$0xff] }
 0x116   : > { %v3899_v57 = vcombine.high %v496_v50, %v500_v51  ;;  %v3898_v63 = vcombine.low %v496_v50, %v500_v51  ;;  %v3953_v48 = vcombine.high %v551_v41, %v555_v42  ;;  %v559_v50 = vld [vmem:[%s4338_s28 + $0x9d0] sm:$0xff] }
 0x117   : > { %2512 = vmatpush1.bf16.msra.mxu0 %v3832_v58  ;;  %2635 = vmatpush1.bf16.msra.mxu1 %v3834_v59  ;;  %v503_v58 = vld [vmem:[%s4338_s28 + $0x810] sm:$0xff] }
 0x118   : > { %2513 = vmatprep.subr.bf16.mxu0 %v3841_v60  ;;  %2636 = vmatprep.subr.bf16.mxu1 %v3843_v61  ;;  %v507_v59 = vld [vmem:[%s4338_s28 + $0x830] sm:$0xff]  ;;  %v504_v60 = vld [vmem:[%s4338_s28 + $0x818] sm:$0xff] }
 0x119   : > { %v508_v61 = vld [vmem:[%s4338_s28 + $0x838] sm:$0xff]  ;;  %v3905_v1 = vcombine.high %v503_v58, %v507_v59  ;;  %v3904_v7 = vcombine.low %v503_v58, %v507_v59  ;;  %v563_v51 = vld [vmem:[%s4338_s28 + $0x9f0] sm:$0xff] }
 0x11a   : > { %v3907_v2 = vcombine.high %v504_v60, %v508_v61  ;;  %v3906_v8 = vcombine.low %v504_v60, %v508_v61  ;;  %v3961_v58 = vcombine.high %v559_v50, %v563_v51  ;;  %v3960_v60 = vcombine.low %v559_v50, %v563_v51  ;;  %v4198_v50 = vld [vmem:[%s4972_s3 + $0xa0] sm:$0xff] (!%p3964_p6)   ;;  %v4199_v51 = vld [vmem:[%s4972_s3 + $0x68] sm:$0xff] (!%p3964_p6)  }
 0x11b   : > { %2514 = vmatpush1.bf16.msra.mxu0 %v3840_v3  ;;  %2637 = vmatpush1.bf16.msra.mxu1 %v3842_v4  ;;  %v511_v3 = vld [vmem:[%s4338_s28 + $0x850] sm:$0xff] }
 0x11c   : > { %2515 = vmatprep.subr.bf16.mxu0 %v3849_v5  ;;  %2638 = vmatprep.subr.bf16.mxu1 %v3851_v6  ;;  %v515_v4 = vld [vmem:[%s4338_s28 + $0x870] sm:$0xff]  ;;  %v512_v5 = vld [vmem:[%s4338_s28 + $0x858] sm:$0xff] }
 0x11d   : > { %v516_v6 = vld [vmem:[%s4338_s28 + $0x878] sm:$0xff]  ;;  %v3913_v9 = vcombine.high %v511_v3, %v515_v4  ;;  %v3912_v26 = vcombine.low %v511_v3, %v515_v4 }
 0x11e   : > { %v3915_v11 = vcombine.high %v512_v5, %v516_v6  ;;  %v3914_v15 = vcombine.low %v512_v5, %v516_v6 }
 0x11f   : > { %2516 = vmatpush1.bf16.msra.mxu0 %v3848_v12  ;;  %2639 = vmatpush1.bf16.msra.mxu1 %v3850_v10  ;;  %v519_v12 = vld [vmem:[%s4338_s28 + $0x890] sm:$0xff] }
 0x120   : > { %2517 = vmatprep.subr.bf16.mxu0 %v3857_v13  ;;  %2640 = vmatprep.subr.bf16.mxu1 %v3859_v14  ;;  %v523_v10 = vld [vmem:[%s4338_s28 + $0x8b0] sm:$0xff]  ;;  %v520_v13 = vld [vmem:[%s4338_s28 + $0x898] sm:$0xff] }
 0x121   : > { %v524_v14 = vld [vmem:[%s4338_s28 + $0x8b8] sm:$0xff]  ;;  %v3921_v16 = vcombine.high %v519_v12, %v523_v10 }
 0x122   : > { %v3923_v17 = vcombine.high %v520_v13, %v524_v14  ;;  %v3922_v22 = vcombine.low %v520_v13, %v524_v14  ;;  %v242_v14 = vld [vmem:[#allocation2] sm:$0xff] }
 0x123   : > { %2518 = vmatpush1.bf16.msra.mxu0 %v3856_v18  ;;  %2641 = vmatpush1.bf16.msra.mxu1 %v3858_v19  ;;  %v527_v18 = vld [vmem:[%s4338_s28 + $0x8d0] sm:$0xff] }
 0x124   : > { %2519 = vmatprep.subr.bf16.mxu0 %v3865_v20  ;;  %2642 = vmatprep.subr.bf16.mxu1 %v3867_v21  ;;  %v531_v19 = vld [vmem:[%s4338_s28 + $0x8f0] sm:$0xff]  ;;  %v528_v20 = vld [vmem:[%s4338_s28 + $0x8d8] sm:$0xff] }
 0x125   : > { %v532_v21 = vld [vmem:[%s4338_s28 + $0x8f8] sm:$0xff]  ;;  %v3929_v36 = vcombine.high %v527_v18, %v531_v19 }
 0x126   : > { %v3931_v23 = vcombine.high %v528_v20, %v532_v21 }
 0x127   : > { %2520 = vmatpush1.bf16.msra.mxu0 %v3864_v25  ;;  %2643 = vmatpush1.bf16.msra.mxu1 %v3866_v27  ;;  %v539_v25 = vld [vmem:[%s4338_s28 + $0x930] sm:$0xff]  ;;  %v536_v27 = vld [vmem:[%s4338_s28 + $0x918] sm:$0xff] }
 0x128   : > { %2521 = vmatprep.subr.bf16.mxu0 %v3873_v28  ;;  %2644 = vmatprep.subr.bf16.mxu1 %v3875_v29  ;;  %v540_v28 = vld [vmem:[%s4338_s28 + $0x938] sm:$0xff]  ;;  %v3928_v29 = vcombine.low %v527_v18, %v531_v19  ;;  %v3937_v30 = vcombine.high %v535_v24, %v539_v25 }
 0x129   : > { %v3939_v31 = vcombine.high %v536_v27, %v540_v28 }
 0x12b   : > { %2522 = vmatpush1.bf16.msra.mxu0 %v3872_v35  ;;  %2645 = vmatpush1.bf16.msra.mxu1 %v3874_v54  ;;  %v544_v35 = vld [vmem:[%s4338_s28 + $0x958] sm:$0xff] }
 0x12c   : > { %2523 = vmatprep.subr.bf16.mxu0 %v3881_v0  ;;  %2646 = vmatprep.subr.bf16.mxu1 %v3883_v38  ;;  %v548_v54 = vld [vmem:[%s4338_s28 + $0x978] sm:$0xff]  ;;  %v3936_v0 = vcombine.low %v535_v24, %v539_v25  ;;  %v3938_v38 = vcombine.low %v536_v27, %v540_v28  ;;  %v243_v27 = vld [vmem:[#allocation2 + $0x8] sm:$0xff] }
 0x12d   : > { %v3947_v40 = vcombine.high %v544_v35, %v548_v54 }
 0x12f   : > { %2524 = vmatpush1.bf16.msra.mxu0 %v3880_v43  ;;  %2647 = vmatpush1.bf16.msra.mxu1 %v3882_v44  ;;  %v552_v43 = vld [vmem:[%s4338_s28 + $0x998] sm:$0xff] }
 0x130   : > { %2525 = vmatprep.subr.bf16.mxu0 %v3889_v46  ;;  %2648 = vmatprep.subr.bf16.mxu1 %v3891_v47  ;;  %v556_v44 = vld [vmem:[%s4338_s28 + $0x9b8] sm:$0xff]  ;;  %v3944_v46 = vcombine.low %v543_v33, %v547_v34  ;;  %v3946_v47 = vcombine.low %v544_v35, %v548_v54  ;;  %v4182_v33 = vld [vmem:[%s4972_s3 + $0x80] sm:$0xff] (!%p3964_p6)   ;;  %v4183_v34 = vld [vmem:[%s4972_s3 + $0x48] sm:$0xff] (!%p3964_p6)  }
 0x131   : > { %v3955_v49 = vcombine.high %v552_v43, %v556_v44  ;;  %v4184_v35 = vld [vmem:[%s4972_s3 + $0xc8] sm:$0xff] (!%p3964_p6)  }
 0x132   : > { %v4185_v54 = vld [vmem:[%s4972_s3 + $0x8] sm:$0xff] (!%p3964_p6)  }
 0x133   : > { %2526 = vmatpush1.bf16.msra.mxu0 %v3888_v52  ;;  %2649 = vmatpush1.bf16.msra.mxu1 %v3890_v53  ;;  %v560_v52 = vld [vmem:[%s4338_s28 + $0x9d8] sm:$0xff] }
 0x134   : > { %2527 = vmatprep.subr.bf16.mxu0 %v3897_v55  ;;  %2650 = vmatprep.subr.bf16.mxu1 %v3899_v57  ;;  %v564_v53 = vld [vmem:[%s4338_s28 + $0x9f8] sm:$0xff]  ;;  %v3952_v55 = vcombine.low %v551_v41, %v555_v42  ;;  %v3954_v57 = vcombine.low %v552_v43, %v556_v44  ;;  %v4190_v41 = vld [vmem:[%s4972_s3 + $0x90] sm:$0xff] (!%p3964_p6)  }
 0x135   : > { %v3963_v59 = vcombine.high %v560_v52, %v564_v53  ;;  %v3962_v61 = vcombine.low %v560_v52, %v564_v53  ;;  %v4191_v42 = vld [vmem:[%s4972_s3 + $0x58] sm:$0xff] (!%p3964_p6)   ;;  %v4200_v52 = vld [vmem:[%s4972_s3 + $0xe8] sm:$0xff] (!%p3964_p6)  }
 0x136   : > { %v4192_v43 = vld [vmem:[%s4972_s3 + $0xd8] sm:$0xff] (!%p3964_p6)   ;;  %v4201_v53 = vld [vmem:[%s4972_s3 + $0x28] sm:$0xff] (!%p3964_p6)  }
 0x137   : > { %2528 = vmatpush1.bf16.msra.mxu0 %v3896_v62  ;;  %2651 = vmatpush1.bf16.msra.mxu1 %v3898_v63  ;;  %v4284_v62 = vmov 1983009808   ;;  %v4193_v44 = vld [vmem:[%s4972_s3 + $0x18] sm:$0xff] (!%p3964_p6)  }
 0x138   : > { %2538 = vmatprep.subr.bf16.mxu0 %v3905_v1  ;;  %2661 = vmatprep.subr.bf16.mxu1 %v3907_v2  ;;  %v2713_v63 = vunpack.c.l.s4 %v4284_v62  ;;  %v2764_v62 = vsub.s32 (!%p3964_p6), 1, %v4363_v45 }
 0x13a   : > { %2530 = vmatmul.mubr.bf16.vlgmr.msra.gmra.mrb[4].mxu0 %v4513_v37  ;;  %2653 = vmatmul.mubr.bf16.vlgmr.msra.gmra.mrb[4].mxu1 %v4513_v37  ;;  %v3920_v37 = vcombine.low %v519_v12, %v523_v10  ;;  %v2714_v1 = vunpack.c.0.s8 %v2713_v63  ;;  %v4207_v63 = vld [vmem:[%s4972_s3 + $0x78] sm:$0xff] (!%p3964_p6)  }
 0x13b   : > { %2539 = vmatpush1.bf16.msra.mxu0 %v3904_v7  ;;  %2662 = vmatpush1.bf16.msra.mxu1 %v3906_v8 }
 0x13c   : > { %2540 = vmatprep.subr.bf16.mxu0 %v3913_v9  ;;  %2663 = vmatprep.subr.bf16.mxu1 %v3915_v11  ;;  %v4720_v3 = vsub.s32 %v2714_v1, %v4363_v45  ;;  %v2768_v1 = vsub.s32 (!%p3964_p6), 2, %v4363_v45 }
 0x13d   : > { %2570 = vmatprep.mubr.bf16.mxu0 %v4283_v56  ;;  %2693 = vmatprep.mubr.bf16.mxu1 %v4283_v56  ;;  %v3930_v56 = vcombine.low %v528_v20, %v532_v21 }
 0x13f   : > { %2541 = vmatpush1.bf16.msra.mxu0 %v3912_v26  ;;  %2664 = vmatpush1.bf16.msra.mxu1 %v3914_v15 }
 0x140   : > { %2542 = vmatprep.subr.bf16.mxu0 %v3921_v16  ;;  %2665 = vmatprep.subr.bf16.mxu1 %v3923_v17 }
 0x143   : > { %2543 = vmatpush1.bf16.msra.mxu0 %v3920_v37  ;;  %2666 = vmatpush1.bf16.msra.mxu1 %v3922_v22 }
 0x144   : > { %2544 = vmatprep.subr.bf16.mxu0 %v3929_v36  ;;  %2667 = vmatprep.subr.bf16.mxu1 %v3931_v23 }
 0x147   : > { %2545 = vmatpush1.bf16.msra.mxu0 %v3928_v29  ;;  %2668 = vmatpush1.bf16.msra.mxu1 %v3930_v56  ;;  %v4179_v56 = vld [vmem:[%s4972_s3 + $0x40] sm:$0xff] (!%p3964_p6)  }
 0x148   : > { %2546 = vmatprep.subr.bf16.mxu0 %v3937_v30  ;;  %2669 = vmatprep.subr.bf16.mxu1 %v3939_v31  ;;  %v4180_v30 = vld [vmem:[%s4972_s3 + $0xc0] sm:$0xff] (!%p3964_p6)  }
 0x149   : > { %v4181_v31 = vld [vmem:[%s4972_s3] sm:$0xff] (!%p3964_p6)  }
 0x14b   : > { %2547 = vmatpush1.bf16.msra.mxu0 %v3936_v0  ;;  %2670 = vmatpush1.bf16.msra.mxu1 %v3938_v38  ;;  %v4186_v0 = vld [vmem:[%s4972_s3 + $0x88] sm:$0xff] (!%p3964_p6)   ;;  %v4187_v38 = vld [vmem:[%s4972_s3 + $0x50] sm:$0xff] (!%p3964_p6)  }
 0x14c   : > { %2548 = vmatprep.subr.bf16.mxu0 %v3945_v39  ;;  %2671 = vmatprep.subr.bf16.mxu1 %v3947_v40  ;;  %v4188_v39 = vld [vmem:[%s4972_s3 + $0xd0] sm:$0xff] (!%p3964_p6)  }
 0x14d   : > { %v4189_v40 = vld [vmem:[%s4972_s3 + $0x10] sm:$0xff] (!%p3964_p6)  }
 0x14f   : > { %2549 = vmatpush1.bf16.msra.mxu0 %v3944_v46  ;;  %2672 = vmatpush1.bf16.msra.mxu1 %v3946_v47  ;;  %v4194_v46 = vld [vmem:[%s4972_s3 + $0x98] sm:$0xff] (!%p3964_p6)   ;;  %v4195_v47 = vld [vmem:[%s4972_s3 + $0x60] sm:$0xff] (!%p3964_p6)  }
 0x150   : > { %2550 = vmatprep.subr.bf16.mxu0 %v3953_v48  ;;  %2673 = vmatprep.subr.bf16.mxu1 %v3955_v49  ;;  %v4196_v48 = vld [vmem:[%s4972_s3 + $0xe0] sm:$0xff] (!%p3964_p6)  }
 0x151   : > { %v4197_v49 = vld [vmem:[%s4972_s3 + $0x20] sm:$0xff] (!%p3964_p6)  }
 0x153   : > { %2551 = vmatpush1.bf16.msra.mxu0 %v3952_v55  ;;  %2674 = vmatpush1.bf16.msra.mxu1 %v3954_v57  ;;  %v4202_v55 = vld [vmem:[%s4972_s3 + $0xa8] sm:$0xff] (!%p3964_p6)   ;;  %v4203_v57 = vld [vmem:[%s4972_s3 + $0x70] sm:$0xff] (!%p3964_p6)  }
 0x154   : > { %2552 = vmatprep.subr.bf16.mxu0 %v3961_v58  ;;  %2675 = vmatprep.subr.bf16.mxu1 %v3963_v59  ;;  %v4204_v58 = vld [vmem:[%s4972_s3 + $0xf0] sm:$0xff] (!%p3964_p6)  }
 0x155   : > { %v4205_v59 = vld [vmem:[%s4972_s3 + $0x30] sm:$0xff] (!%p3964_p6)  }
 0x157   : > { %2553 = vmatpush1.bf16.msra.mxu0 %v3960_v60  ;;  %2676 = vmatpush1.bf16.msra.mxu1 %v3962_v61  ;;  %v2760_v60 = vsub.s32 (!%p3964_p6), 0, %v4363_v45  ;;  %v4206_v61 = vld [vmem:[%s4972_s3 + $0xb0] sm:$0xff] (!%p3964_p6)  }
 0x158   : > { %4035 = vmatprep.subr.bf16.mxu0 (!%p3964_p6), %v4179_v56  ;;  %4057 = vmatprep.subr.bf16.mxu1 (!%p3964_p6), %v4180_v30 }
 0x15a   : > { %2571 = vmatmul.mubr.bf16.vlgmr.msra.gmra.mrb[4].mxu0 %v4407_v32  ;;  %2694 = vmatmul.mubr.bf16.vlgmr.msra.gmra.mrb[4].mxu1 %v4407_v32 }
 0x15b   : > { %4036 = vmatpush3.bf16.msra.mxu0 (!%p3964_p6), %v4181_v31  ;;  %4058 = vmatpush3.bf16.msra.mxu1 (!%p3964_p6), %v4182_v33  ;;  %v4213_v31 = vld [vmem:[%s4972_s3 + $0x100] sm:$0xff] (!%p3964_p6)  }
 0x15c   : > { %4037 = vmatprep.subr.bf16.mxu0 (!%p3964_p6), %v4183_v34  ;;  %4059 = vmatprep.subr.bf16.mxu1 (!%p3964_p6), %v4184_v35 }
 0x15f   : > { %4038 = vmatpush3.bf16.msra.mxu0 (!%p3964_p6), %v4185_v54  ;;  %4060 = vmatpush3.bf16.msra.mxu1 (!%p3964_p6), %v4186_v0  ;;  %v4215_v54 = vld [vmem:[%s4972_s3 + $0x148] sm:$0xff] (!%p3964_p6)   ;;  %v4214_v0 = vld [vmem:[%s4972_s3 + $0x180] sm:$0xff] (!%p3964_p6)  }
 0x160   : > { %4039 = vmatprep.subr.bf16.mxu0 (!%p3964_p6), %v4187_v38  ;;  %4061 = vmatprep.subr.bf16.mxu1 (!%p3964_p6), %v4188_v39  ;;  %v4216_v38 = vld [vmem:[%s4972_s3 + $0x1c8] sm:$0xff] (!%p3964_p6)  }
 0x161   : > { %v4217_v39 = vld [vmem:[%s4972_s3 + $0x108] sm:$0xff] (!%p3964_p6)  }
 0x163   : > { %4040 = vmatpush3.bf16.msra.mxu0 (!%p3964_p6), %v4189_v40  ;;  %4062 = vmatpush3.bf16.msra.mxu1 (!%p3964_p6), %v4190_v41 }
 0x164   : > { %4041 = vmatprep.subr.bf16.mxu0 (!%p3964_p6), %v4191_v42  ;;  %4063 = vmatprep.subr.bf16.mxu1 (!%p3964_p6), %v4192_v43  ;;  %v4219_v42 = vld [vmem:[%s4972_s3 + $0x150] sm:$0xff] (!%p3964_p6)   ;;  %v4218_v43 = vld [vmem:[%s4972_s3 + $0x188] sm:$0xff] (!%p3964_p6)  }
 0x167   : > { %4042 = vmatpush3.bf16.msra.mxu0 (!%p3964_p6), %v4193_v44  ;;  %4064 = vmatpush3.bf16.msra.mxu1 (!%p3964_p6), %v4194_v46  ;;  %v4220_v44 = vld [vmem:[%s4972_s3 + $0x1d0] sm:$0xff] (!%p3964_p6)  }
 0x168   : > { %4043 = vmatprep.subr.bf16.mxu0 (!%p3964_p6), %v4195_v47  ;;  %4065 = vmatprep.subr.bf16.mxu1 (!%p3964_p6), %v4196_v48  ;;  %v4221_v46 = vld [vmem:[%s4972_s3 + $0x110] sm:$0xff] (!%p3964_p6)  }
 0x16b   : > { %4044 = vmatpush3.bf16.msra.mxu0 (!%p3964_p6), %v4197_v49  ;;  %4066 = vmatpush3.bf16.msra.mxu1 (!%p3964_p6), %v4198_v50  ;;  %v4223_v49 = vld [vmem:[%s4972_s3 + $0x158] sm:$0xff] (!%p3964_p6)   ;;  %v4222_v50 = vld [vmem:[%s4972_s3 + $0x190] sm:$0xff] (!%p3964_p6)  }
 0x16c   : > { %4045 = vmatprep.subr.bf16.mxu0 (!%p3964_p6), %v4199_v51  ;;  %4067 = vmatprep.subr.bf16.mxu1 (!%p3964_p6), %v4200_v52  ;;  %v4224_v51 = vld [vmem:[%s4972_s3 + $0x1d8] sm:$0xff] (!%p3964_p6)  }
 0x16d   : > { %v4225_v52 = vld [vmem:[%s4972_s3 + $0x118] sm:$0xff] (!%p3964_p6)  }
 0x16f   : > { %4046 = vmatpush3.bf16.msra.mxu0 (!%p3964_p6), %v4201_v53  ;;  %4068 = vmatpush3.bf16.msra.mxu1 (!%p3964_p6), %v4202_v55  ;;  %v4227_v55 = vld [vmem:[%s4972_s3 + $0x160] sm:$0xff] (!%p3964_p6)  }
 0x170   : > { %4047 = vmatprep.subr.bf16.mxu0 (!%p3964_p6), %v4203_v57  ;;  %4069 = vmatprep.subr.bf16.mxu1 (!%p3964_p6), %v4204_v58  ;;  %v4226_v57 = vld [vmem:[%s4972_s3 + $0x198] sm:$0xff] (!%p3964_p6)   ;;  %v4228_v58 = vld [vmem:[%s4972_s3 + $0x1e0] sm:$0xff] (!%p3964_p6)  }
 0x173   : > { %4048 = vmatpush3.bf16.msra.mxu0 (!%p3964_p6), %v4205_v59  ;;  %4070 = vmatpush3.bf16.msra.mxu1 (!%p3964_p6), %v4206_v61 }
 0x174   : > { %4049 = vmatprep.subr.bf16.mxu0 (!%p3964_p6), %v4207_v63  ;;  %v4230_v63 = vld [vmem:[%s4972_s3 + $0x1a0] sm:$0xff] (!%p3964_p6)  }
 0x18d   : > { %v2326_v2 = vpop.f32.mrb[0].mxu0  ;;  %v2449_v4 = vpop.f32.mrb[0].mxu1 }
 0x18e   : > { %v2328_v5 = vpop.f32.mrb[1].mxu0  ;;  %v2451_v7 = vpop.f32.mrb[1].mxu1 }
 0x18f   : > { %v2710_v6 = vcombine.low %v2326_v2, %v2328_v5  ;;  %v2330_v8 = vpop.f32.mrb[2].mxu0  ;;  %v2711_v9 = vcombine.low %v2449_v4, %v2451_v7  ;;  %v2453_v11 = vpop.f32.mrb[2].mxu1  ;;  %v4208_v2 = vld [vmem:[%s4972_s3 + $0xf8] sm:$0xff] (!%p3964_p6)   ;;  %v2772_v4 = vsub.s32 (!%p3964_p6), 3, %v4363_v45  ;;  %v2756_v7 = vld [vmem:[%s4971_s2] sm:$0xff] (!%p3964_p6) }
 0x190   : > { %v2331_v12 = vpop.f32.mrb[3].mxu0  ;;  %v2454_v13 = vpop.f32.mrb[3].mxu1  ;;  %v4209_v5 = vld [vmem:[%s4972_s3 + $0x38] sm:$0xff] (!%p3964_p6)   ;;  %4071 = vmatprep.subr.bf16.mxu1 (!%p3964_p6), %v4208_v2  ;;  %v2761_v8 = vrot.slane (!%p3964_p6), %v2756_v7, %v2760_v60  ;;  %v2769_v11 = vrot.slane (!%p3964_p6), %v2756_v7, %v2768_v1  ;;  %v4229_v60 = vld [vmem:[%s4972_s3 + $0x120] sm:$0xff] (!%p3964_p6)   ;;  %v4232_v2 = vld [vmem:[%s4972_s3 + $0x1e8] sm:$0xff] (!%p3964_p6)  }
 0x191   : > { %v2718_v10 = vrot.slane %v2710_v6, %v4720_v3  ;;  %v2725_v32 = vrot.slane %v2711_v9, %v4720_v3  ;;  %v4210_v6 = vld [vmem:[%s4972_s3 + $0xb8] sm:$0xff] (!%p3964_p6)   ;;  %4050 = vmatpush3.bf16.msra.mxu0 (!%p3964_p6), %v4209_v5  ;;  %v2765_v9 = vrot.slane (!%p3964_p6), %v2756_v7, %v2764_v62  ;;  %v2773_v12 = vrot.slane (!%p3964_p6), %v2756_v7, %v2772_v4  ;;  %v4212_v13 = vld [vmem:[%s4972_s3 + $0x1c0] sm:$0xff] (!%p3964_p6)   ;;  %v4231_v62 = vld [vmem:[%s4972_s3 + $0x168] sm:$0xff] (!%p3964_p6)  }
 0x192   : > { %4072 = vmatpush3.bf16.msra.mxu1 (!%p3964_p6), %v4210_v6  ;;  %v4233_v4 = vld [vmem:[%s4972_s3 + $0x128] sm:$0xff] (!%p3964_p6)  }
 0x193   : > { %v2726_v26 = vcombine.low %v2718_v10, %v2725_v32  ;;  %v4211_v10 = vld [vmem:[%s4972_s3 + $0x140] sm:$0xff] (!%p3964_p6)   ;;  %v2790_v32 = vcombine.low (!%p3964_p6), %v2761_v8, %v2765_v9  ;;  %4101 = vmatprep.subr.bf16.mxu1 (!%p3964_p6), %v4212_v13  ;;  %v4234_v8 = vld [vmem:[%s4972_s3 + $0x1a8] sm:$0xff] (!%p3964_p6)  }
 0x194   : > { %4079 = vmatprep.subr.bf16.mxu0 (!%p3964_p6), %v4211_v10  ;;  %v4237_v10 = vld [vmem:[%s4972_s3 + $0x130] sm:$0xff] (!%p3964_p6)  }
 0x195   : > { %v2746_v15 = vadd.f32 %v2726_v26, %v242_v14  ;;  %v2791_v14 = vcombine.low (!%p3964_p6), %v2769_v11, %v2773_v12  ;;  %v2798_v26 = vrot.slane (!%p3964_p6), %v2790_v32, %v4720_v3  ;;  %v4236_v12 = vld [vmem:[%s4972_s3 + $0x1f0] sm:$0xff] (!%p3964_p6)  }
 0x197   : > { %2748 = vst [vmem:[#allocation2] sm:$0xff] %v2746_v15  ;;  %v2805_v15 = vrot.slane (!%p3964_p6), %v2791_v14, %v4720_v3  ;;  %v4239_v14 = vld [vmem:[%s4972_s3 + $0x178] sm:$0xff] (!%p3964_p6)  }
 0x22d   : > { %v2572_v16 = vpop.f32.mrb[4].mxu0  ;;  %v2695_v17 = vpop.f32.mrb[4].mxu1 }
 0x22e   : > { %v2574_v18 = vpop.f32.mrb[5].mxu0  ;;  %v2697_v20 = vpop.f32.mrb[5].mxu1 }
 0x22f   : > { %v2727_v19 = vcombine.low %v2572_v16, %v2574_v18  ;;  %v2576_v21 = vpop.f32.mrb[6].mxu0  ;;  %v2728_v37 = vcombine.low %v2695_v17, %v2697_v20  ;;  %v2699_v22 = vpop.f32.mrb[6].mxu1  ;;  %v2754_v16 = vld [vmem:[#allocation2] sm:$0xff] (!%p3964_p6)  ;;  %v2806_v17 = vcombine.low (!%p3964_p6), %v2798_v26, %v2805_v15  ;;  %v2776_v20 = vsub.s32 (!%p3964_p6), 4, %v4363_v45  ;;  %v4240_v15 = vld [vmem:[%s4972_s3 + $0x1f8] sm:$0xff] (!%p3964_p6)  }
 0x230   : > { %v2577_v36 = vpop.f32.mrb[7].mxu0  ;;  %v2700_v24 = vpop.f32.mrb[7].mxu1  ;;  %v2780_v21 = vsub.s32 (!%p3964_p6), 5, %v4363_v45 }
 0x231   : > { %v2735_v23 = vrot.slane %v2727_v19, %v4720_v3  ;;  %v2742_v25 = vrot.slane %v2728_v37, %v4720_v3  ;;  %2753 = sbr.rel (%p3964_p6) target bundleno = 1036 (0x40c), region = 48  ;;  %v2826_v18 = vadd.f32 (!%p3964_p6), %v2806_v17, %v2754_v16  ;;  %v2784_v36 = vsub.s32 (!%p3964_p6), 6, %v4363_v45  ;;  %v4241_v16 = vld [vmem:[%s4972_s3 + $0x138] sm:$0xff] (!%p3964_p6)  }
 0x232   : > { %v4242_v17 = vld [vmem:[%s4972_s3 + $0x1b8] sm:$0xff] (!%p3964_p6)  }
 0x233   : > { %v2743_v28 = vcombine.low %v2735_v23, %v2742_v25  ;;  %v2828_v19 = vmax.f32 (!%p3964_p6), %v2826_v18, 0.0  ;;  %v2788_v23 = vsub.s32 (!%p3964_p6), 7, %v4363_v45  ;;  %v2785_v33 = vrot.slane (!%p3964_p6), %v2756_v7, %v2784_v36 }
 0x235   : > { %v2747_v29 = vadd.f32 %v2743_v28, %v243_v27  ;;  %v2839_v37 = vrot.slane (!%p3964_p6), %v2828_v19, %v4720_v3  ;;  %v2832_v22 = vcombine.high (!%p3964_p6), %v2828_v19, %v2828_v19  ;;  %v2777_v28 = vrot.slane (!%p3964_p6), %v2756_v7, %v2776_v20 }
 0x236   : > { %v2789_v34 = vrot.slane (!%p3964_p6), %v2756_v7, %v2788_v23  ;;  %v4285_v20 = vmov (!%p3964_p6), 6  }
 0x237   : > { %2749 = vst [vmem:[#allocation2 + $0x8] sm:$0xff] %v2747_v29  ;;  %v2847_v24 = vcombine.high (!%p3964_p6), %v2839_v37, %v2839_v37  ;;  %v2846_v25 = vrot.slane (!%p3964_p6), %v2832_v22, %v4720_v3  ;;  %v2874_v27 = vpack.c.bf16 (!%p3964_p6), %v2839_v37, %v2839_v37  ;;  %v2781_v29 = vrot.slane (!%p3964_p6), %v2756_v7, %v2780_v21  ;;  %v4235_v7 = vld [vmem:[%s4972_s3 + $0x170] sm:$0xff] (!%p3964_p6)   ;;  %v3965_v37 = vld [vmem:[%s4973_s4] ss:$0 sm:$0xff] (!%p3964_p6) }
 0x238   : > { %v2808_v41 = vcombine.low %v2785_v33, %v2789_v34  ;;  %4178 = vset.pattern.permute.xlu0 %v4285_v20 }
 0x239   : > { %v2875_v56 = vpack.c.bf16 %v2847_v24, %v2847_v24  ;;  %v2848_v30 = vcombine.high %v2846_v25, %v2846_v25  ;;  %v2876_v35 = vpack.c.bf16 %v2846_v25, %v2846_v25  ;;  %v2807_v40 = vcombine.low %v2777_v28, %v2781_v29 }
 0x23a   : > { %v2822_v48 = vrot.slane %v2808_v41, %v4720_v3 }
 0x23b   : > { %3433 = vmatprep.mubr.bf16.mxu0 %v2875_v56  ;;  %v2877_v45 = vpack.c.bf16 %v2848_v30, %v2848_v30  ;;  %v2815_v47 = vrot.slane %v2807_v40, %v4720_v3 }
 0x23c   : > { %3434 = vmatmul.mubr.bf16.vlgmr.msra.gmra.mrb[0].mxu0 %v2874_v27 }
 0x23d   : > { %3473 = vmatprep.mubr.bf16.mxu1 %v2877_v45  ;;  %4080 = vmatpush3.bf16.msra.mxu0 %v4213_v31  ;;  %v2823_v53 = vcombine.low %v2815_v47, %v2822_v48 }
 0x23e   : > { %3474 = vmatmul.mubr.bf16.vlgmr.msra.gmra.mrb[0].mxu1 %v2876_v35  ;;  %4081 = vmatprep.subr.bf16.mxu0 %v4215_v54  ;;  %v2755_v59 = vld [vmem:[#allocation2 + $0x8] sm:$0xff] }
 0x23f   : > { %4102 = vmatpush3.bf16.msra.mxu1 %v4214_v0  ;;  %v2827_v61 = vadd.f32 %v2823_v53, %v2755_v59 }
 0x240   : > { %4103 = vmatprep.subr.bf16.mxu1 %v4216_v38 }
 0x241   : > { %4082 = vmatpush3.bf16.msra.mxu0 %v4217_v39  ;;  %v2829_v1 = vmax.f32 %v2827_v61, 0.0 }
 0x242   : > { %4083 = vmatprep.subr.bf16.mxu0 %v4219_v42 }
 0x243   : > { %4104 = vmatpush3.bf16.msra.mxu1 %v4218_v43  ;;  %v2856_v5 = vrot.slane %v2829_v1, %v4720_v3  ;;  %v2849_v6 = vcombine.high %v2829_v1, %v2829_v1 }
 0x244   : > { %4105 = vmatprep.subr.bf16.mxu1 %v4220_v44 }
 0x245   : > { %4084 = vmatpush3.bf16.msra.mxu0 %v4221_v46  ;;  %v2864_v9 = vcombine.high %v2856_v5, %v2856_v5  ;;  %v2863_v11 = vrot.slane %v2849_v6, %v4720_v3  ;;  %v4238_v3 = vld [vmem:[%s4972_s3 + $0x1b0] sm:$0xff]   ;;  %v2878_v18 = vpack.c.bf16 %v2856_v5, %v2856_v5 }
 0x246   : > { %4085 = vmatprep.subr.bf16.mxu0 %v4223_v49 }
 0x247   : > { %4106 = vmatpush3.bf16.msra.mxu1 %v4222_v50  ;;  %v2879_v13 = vpack.c.bf16 %v2864_v9, %v2864_v9  ;;  %v2865_v32 = vcombine.high %v2863_v11, %v2863_v11  ;;  %v2880_v19 = vpack.c.bf16 %v2863_v11, %v2863_v11 }
 0x248   : > { %4107 = vmatprep.subr.bf16.mxu1 %v4224_v51 }
 0x249   : > { %4086 = vmatpush3.bf16.msra.mxu0 %v4225_v52  ;;  %3513 = vmatprep.mubr.bf16.mxu0 %v2879_v13  ;;  %v2881_v26 = vpack.c.bf16 %v2865_v32, %v2865_v32 }
 0x24a   : > { %4087 = vmatprep.subr.bf16.mxu0 %v4227_v55 }
 0x24b   : > { %4108 = vmatpush3.bf16.msra.mxu1 %v4226_v57  ;;  %3553 = vmatprep.mubr.bf16.mxu1 %v2881_v26 }
 0x24c   : > { %4109 = vmatprep.subr.bf16.mxu1 %v4228_v58 }
 0x24d   : > { %4088 = vmatpush3.bf16.msra.mxu0 %v4229_v60 }
 0x24e   : > { %4089 = vmatprep.subr.bf16.mxu0 %v4231_v62 }
 0x24f   : > { %4110 = vmatpush3.bf16.msra.mxu1 %v4230_v63 }
 0x250   : > { %4111 = vmatprep.subr.bf16.mxu1 %v4232_v2 }
 0x251   : > { %4090 = vmatpush3.bf16.msra.mxu0 %v4233_v4 }
 0x252   : > { %4091 = vmatprep.subr.bf16.mxu0 %v4235_v7 }
 0x253   : > { %4112 = vmatpush3.bf16.msra.mxu1 %v4234_v8 }
 0x254   : > { %4113 = vmatprep.subr.bf16.mxu1 %v4236_v12 }
 0x255   : > { %4092 = vmatpush3.bf16.msra.mxu0 %v4237_v10 }
 0x256   : > { %4093 = vmatprep.subr.bf16.mxu0 %v4239_v14 }
 0x257   : > { %4114 = vmatpush3.bf16.msra.mxu1 %v4238_v3 }
 0x258   : > { %4115 = vmatprep.subr.bf16.mxu1 %v4240_v15 }
 0x259   : > { %4094 = vmatpush3.bf16.msra.mxu0 %v4241_v16 }
 0x25b   : > { %4116 = vmatpush3.bf16.msra.mxu1 %v4242_v17 }
 0x25c   : > { %3514 = vmatmul.mubr.bf16.vlgmr.msra.gmra.mrb[4].mxu0 %v2878_v18 }
 0x25e   : > { %3554 = vmatmul.mubr.bf16.vlgmr.msra.gmra.mrb[4].mxu1 %v2880_v19 }
 0x30f   : > { %v4051_v21 = vpop.f32.mrb[0].mxu0 }
 0x310   : > { %v4052_v22 = vpop.f32.mrb[1].mxu0 }
 0x311   : > { %v4073_v36 = vpop.f32.mrb[0].mxu1  ;;  %v4053_v23 = vadd.f32 %v4052_v22, %v4051_v21  ;;  %v4054_v24 = vpop.f32.mrb[2].mxu0 }
 0x312   : > { %v4074_v25 = vpop.f32.mrb[1].mxu1  ;;  %v4055_v27 = vpop.f32.mrb[3].mxu0 }
 0x313   : > { %v3436_v28 = vadd.f32 %v4053_v23, %v3965_v37  ;;  %v4075_v29 = vadd.f32 %v4074_v25, %v4073_v36  ;;  %v4076_v56 = vpop.f32.mrb[2].mxu1 }
 0x314   : > { %v4077_v30 = vpop.f32.mrb[3].mxu1 }
 0x315   : > { %v3476_v31 = vadd.f32 %v4075_v29, %v3436_v28 }
 0x32f   : > { %v4095_v33 = vpop.f32.mrb[4].mxu0 }
 0x330   : > { %v4096_v34 = vpop.f32.mrb[5].mxu0 }
 0x331   : > { %v4117_v35 = vpop.f32.mrb[4].mxu1  ;;  %v4097_v54 = vadd.f32 %v4096_v34, %v4095_v33  ;;  %v4098_v45 = vpop.f32.mrb[6].mxu0 }
 0x332   : > { %v4118_v0 = vpop.f32.mrb[5].mxu1  ;;  %v4099_v38 = vpop.f32.mrb[7].mxu0 }
 0x333   : > { %v3516_v39 = vadd.f32 %v4097_v54, %v3476_v31  ;;  %v4119_v40 = vadd.f32 %v4118_v0, %v4117_v35  ;;  %v4120_v41 = vpop.f32.mrb[6].mxu1 }
 0x334   : > { %v4121_v42 = vpop.f32.mrb[7].mxu1 }
 0x335   : > { %v3556_v43 = vadd.f32 %v4119_v40, %v3516_v39 }
 0x337   : > { %v3562_v44 = vsel %vm3561_vm0, %v3556_v43, 0.0 }
 0x338   : > { %3563 = vadd.xlane.f32.xlu0 %v3562_v44 }
 0x34e   : > { %3577 = vperm.xlu0 %4178, %v3556_v43  }
 0x3c5   : > { %v3564_v46 = vpop.xlane.xlu0 %3563 }
 0x3c6   : > { %v3565_v47 = vrot.slane %v3564_v46, 4 }
 0x3c8   : > { %v3566_v48 = vadd.f32 %v3565_v47, %v3564_v46 }
 0x3ca   : > { %v3567_v49 = vrot.slane %v3566_v48, 2 }
 0x3cc   : > { %v3568_v50 = vadd.f32 %v3567_v49, %v3566_v48 }
 0x3cd   : > { %v3578_v57 = vpop.permute.xlu0 %3577 }
 0x3ce   : > { %v3569_v51 = vrot.slane %v3568_v50, 1 }
 0x3d0   : > { %v3570_v52 = vadd.f32 %v3569_v51, %v3568_v50 }
 0x3d2   : > { %4155 = vpush %v3570_v52 }
 0x403   : > { %s4156_s25 = spop %4155 }
 0x404   : > { %s3572_s26 = smul.f32 0.083333336, %s4156_s25 }
 0x406   : > { %v3573_v53 = vstv %s3572_s26 }
 0x407   : > { %v3574_v55 = vsub.f32 %v3556_v43, %v3573_v53 }
 0x409   : > { %v3580_v58 = vadd.f32 %v3578_v57, %v3574_v55 }
 0x40b   : > { %3581 = vst.msk [vmem:[#allocation3] sm:$0x3] %vm3561_vm0, %v3580_v58 }
 0x40c PF: > { %p4161_p7 = scmp.eq.s32.totalorder %s4323_s19, 4  ;;  %s4286_s27 = smov [#allocation3]  }
 0x40d   : > { %s3589_s28 = sshll.u32 %s4286_s27, 4  ;;  %s3590_s28 = int_to_ptr.vmem [resolvable:$true] %s3589_s28 }
 0x40e   : > { %s4243_s29 = scalar_lea.vmem %s3590_s28, 32  ;;  %p4250_p11 = scmp.lt.s32.totalorder %s3590_s28, %s3590_s28 }
 0x40f   : > { %p4244_p8 = scmp.ne.s32.totalorder %s3590_s28, %s4243_s29  ;;  %p4251_p12 = scmp.lt.s32.totalorder %s4243_s29, %s4243_s29 }
 0x411   : > { %p4245_p9 = pnand %p4244_p8, %p4161_p7  ;;  %p4252_p13 = por %p4251_p12, %p4250_p11 }
 0x413   : > { %p4246_p10 = pneg %p4245_p9 }
 0x415   : > { %p4253_p0 = pnand %p4252_p13, %p4246_p10 }
 0x417   : > { %4256 = shalt.err (!%p4253_p0)
}
 0x418   : > { %s4257_s7 = scalar_lea.hbm %s4974_s5, 32 }
 0x419   : > { %p4258_p1 = scmp.ne.s32.totalorder %s4974_s5, %s4257_s7  ;;  %p4263_p4 = scmp.lt.u32.totalorder %s4257_s7, %s4974_s5 }
 0x41b   : > { %p4259_p2 = pnand %p4258_p1, %p4161_p7 }
 0x41d   : > { %p4260_p3 = pneg %p4259_p2 }
 0x41f   : > { %p4265_p5 = pnand %p4263_p4, %p4260_p3 }
 0x421   : > { %4268 = shalt.err (!%p4265_p5)
}
 0x422   : > { %4158 = dma.vmem_to_hbm [thread:$0]  (%p4161_p7), %s3590_s28, 32, %s4974_s5, [#allocation4]  }
 0x423   : > { %4274 = dma.done.wait (%p4161_p7), [#allocation4], 32  }
 0x424   : > { %4276 = vsyncadd (%p4161_p7), [#allocation4], 4294967264 }
 0x425 PF: > { %s16_s18 = sadd.s32 1, %s4279_s18  }
 0x426   : > { %p13_p6 = scmp.ge.s32.totalorder %s16_s18, 7  }
 0x428   :  { %15 = sbr.rel (!%p13_p6) target bundleno = 1 (0x1), region = 78 }
 0x42f   :  { %3602 = vsyncpa [#allocation4], 1 }
 0x430   :  { %3604 = vsyncpa [#allocation4 + $0x1], 1 }

// kernel: dueling_dqn_forward.2
= control target key start
LH: loop header
LB: loop body
LE: loop exit
PB: predicated region body
PF: predicated region fallthrough
CT: control target
= control target key end

     0   :  { %s6538_s24 = smov 0   ;;  %s8604_s0 = inlined_call_operand.vmem [shape: bf16[2,400,256], index: 0, kind: input, shape index: {}]   ;;  %s8605_s1 = inlined_call_operand.vmem [shape: bf16[256,32], index: 1, kind: input, shape index: {}]   ;;  %s8606_s2 = inlined_call_operand.vmem [shape: f32[1,32], index: 2, kind: input, shape index: {}]   ;;  %s8607_s3 = inlined_call_operand.vmem [shape: bf16[512,64], index: 3, kind: input, shape index: {}]   ;;  %s8608_s4 = inlined_call_operand.vmem [shape: f32[1,64], index: 4, kind: input, shape index: {}]   ;;  %s8609_s5 = inlined_call_operand.vmem [shape: bf16[576,64], index: 5, kind: input, shape index: {}]   ;;  %s8610_s6 = inlined_call_operand.vmem [shape: f32[1,64], index: 6, kind: input, shape index: {}]   ;;  %s8611_s7 = inlined_call_operand.vmem [shape: bf16[2,50,64], index: 7, kind: output, shape index: {}]  }
   0x1 LB: > { %s5626_s25 = sadd.s32 4294967295, %s6492_s24   ;;  %p5630_p0 = scmp.ge.s32.totalorder %s6492_s24, 1  ;;  %s6492_s24 = sphi %s6538_s24, %s17_s24  }
   0x2   : > { %p237_p1 = scmp.lt.s32.totalorder %s6492_s24, 3 }
   0x4   : > { %p238_p2 = pnand %p5630_p0, %p237_p1 }
   0x5   : > { %v6197_v0 = vld [vmem:[%s8605_s1] sm:$0xff] (!%p238_p2)   ;;  %v6494_v1 = vmov (!%p238_p2), 0   ;;  %v6198_v2 = vld [vmem:[%s8605_s1 + $0x8] sm:$0xff] (!%p238_p2)   ;;  %p269_p3 = scmp.lt.s32.totalorder (!%p238_p2), %s5626_s25, 1  ;;  %v6199_v3 = vld [vmem:[%s8605_s1 + $0x10] sm:$0xff] (!%p238_p2)   ;;  %vm8642_vm0 = vcmask (!%p238_p2), 261120  }
   0x6   : > { %241 = sbr.rel (%p238_p2) target bundleno = 1389 (0x56d), region = 48  ;;  %715 = vmatprep.subr.bf16.mxu0 (!%p238_p2), %v6494_v1  ;;  %v6200_v4 = vld [vmem:[%s8605_s1 + $0x18] sm:$0xff] (!%p238_p2)   ;;  %v6201_v5 = vld [vmem:[%s8605_s1 + $0x20] sm:$0xff] (!%p238_p2)   ;;  %v6202_v7 = vld [vmem:[%s8605_s1 + $0x28] sm:$0xff] (!%p238_p2)   ;;  %vm8634_vm1 = vcmask (!%p238_p2), 1042432   ;;  %s6496_s21 = smov (!%p238_p2), 32  }
   0x7   : > { %716 = vmatpush1.bf16.msra.mxu0 (!%p238_p2), %v6197_v0  ;;  %v6203_v8 = vld [vmem:[%s8605_s1 + $0x30] sm:$0xff] (!%p238_p2)   ;;  %v6204_v9 = vld [vmem:[%s8605_s1 + $0x38] sm:$0xff] (!%p238_p2)   ;;  %v6205_v10 = vld [vmem:[%s8605_s1 + $0x40] sm:$0xff] (!%p238_p2)   ;;  %vm8626_vm2 = vsmask.f32 (!%p238_p2), 2304  ;;  %vm1102_vm3 = vcmask (!%p238_p2), 1040384  }
   0x8   : > { %717 = vmatprep.subr.bf16.mxu0 (!%p238_p2), %v6494_v1  ;;  %v6206_v11 = vld [vmem:[%s8605_s1 + $0x48] sm:$0xff] (!%p238_p2)   ;;  %v6207_v12 = vld [vmem:[%s8605_s1 + $0x50] sm:$0xff] (!%p238_p2)   ;;  %v6208_v13 = vld [vmem:[%s8605_s1 + $0x58] sm:$0xff] (!%p238_p2)   ;;  %s6497_s22 = smov (!%p238_p2), 96   ;;  %vm8633_vm4 = vsmask.f32 (!%p238_p2), 256 }
   0x9   : > { %v6209_v14 = vld [vmem:[%s8605_s1 + $0x60] sm:$0xff] (!%p238_p2)   ;;  %v6210_v15 = vld [vmem:[%s8605_s1 + $0x68] sm:$0xff] (!%p238_p2)   ;;  %v6211_v16 = vld [vmem:[%s8605_s1 + $0x70] sm:$0xff] (!%p238_p2)   ;;  %vm8620_vm5 = vsmask.f32 (!%p238_p2), 7424  ;;  %vm8631_vm6 = vcmask (!%p238_p2), 1043456  }
   0xa   : > { %v6212_v17 = vld [vmem:[%s8605_s1 + $0x78] sm:$0xff] (!%p238_p2)   ;;  %vm8616_vm7 = vsmask.f32 (!%p238_p2), 3328  ;;  %vm8615_vm8 = vsmask.f32 (!%p238_p2), 5376  ;;  %vm8624_vm10 = vcmask (!%p238_p2), 1046528  }
   0xb   : > { %718 = vmatpush1.bf16.msra.mxu0 (!%p238_p2), %v6198_v2  ;;  %vm8614_vm9 = vsmask.f32 (!%p238_p2), 1280  ;;  %vm8619_vm11 = vcmask (!%p238_p2), 1044480   ;;  %vm8625_vm12 = vsmask.f32 (!%p238_p2), 6400  ;;  %vm8613_vm13 = vcmask (!%p238_p2), 1045504  }
   0xc   : > { %719 = vmatprep.subr.bf16.mxu0 (!%p238_p2), %v6494_v1  ;;  %vm8612_vm14 = vcmask (!%p238_p2), 1041408   ;;  %vm8618_vm15 = vsmask.f32 (!%p238_p2), 4352 }
   0xd   : > { %s8851_s25 = smov (!%p269_p3, %s5626_s25), 1 }
   0xe   : > { %s6183_s11 = smul.u32 400, %s8851_s25 }
   0xf   : > { %720 = vmatpush1.bf16.msra.mxu0 %v6199_v3  ;;  %v6655_v3 = vld [vmem:[%s8606_s2] ss:$0 sm:$0xff]  ;;  %s6184_s8 = smul.u32 28, %s8851_s25 }
  0x10   : > { %721 = vmatprep.subr.bf16.mxu0 %v6494_v1  ;;  %s6567_s16 = scalar_lea.vmem %s8604_s0, %s6183_s11 }
  0x11   : > { %v6215_v6 = vld [vmem:[%s6567_s16 + $0x4] ss:$8 sps:$4 sm:$0xff]   ;;  %v6213_v18 = vld [vmem:[%s6567_s16] ss:$8 sps:$4 sm:$0xff]   ;;  %v6216_v19 = vld [vmem:[%s6567_s16 + $0x14] ss:$8 sps:$4 sm:$0xff]   ;;  %s8579_s10 = scalar_lea.vmem %s8611_s7, %s6184_s8 }
  0x12   : > { %747 = vmatprep.mubr.bf16.mxu0 %v6215_v6  ;;  %v6218_v20 = vld [vmem:[%s6567_s16 + $0x10] ss:$8 sps:$4 sm:$0xff]   ;;  %v6219_v21 = vld [vmem:[%s6567_s16 + $0x24] ss:$8 sps:$4 sm:$0xff]   ;;  %v6221_v22 = vld [vmem:[%s6567_s16 + $0x20] ss:$8 sps:$4 sm:$0xff]  }
  0x13   : > { %722 = vmatpush1.bf16.msra.mxu0 %v6200_v4  ;;  %v6222_v23 = vld [vmem:[%s6567_s16 + $0x34] ss:$8 sps:$4 sm:$0xff]   ;;  %v6224_v24 = vld [vmem:[%s6567_s16 + $0x30] ss:$8 sps:$4 sm:$0xff]   ;;  %v6225_v25 = vld [vmem:[%s6567_s16 + $0x44] ss:$8 sps:$4 sm:$0xff]  }
  0x14   : > { %723 = vmatprep.subr.bf16.mxu0 %v6494_v1  ;;  %v6227_v26 = vld [vmem:[%s6567_s16 + $0x40] ss:$8 sps:$4 sm:$0xff]   ;;  %v6228_v27 = vld [vmem:[%s6567_s16 + $0x54] ss:$8 sps:$4 sm:$0xff]   ;;  %v6230_v28 = vld [vmem:[%s6567_s16 + $0x50] ss:$8 sps:$4 sm:$0xff]  }
  0x15   : > { %v6231_v29 = vld [vmem:[%s6567_s16 + $0x64] ss:$8 sps:$4 sm:$0xff]   ;;  %v6233_v30 = vld [vmem:[%s6567_s16 + $0x60] ss:$8 sps:$4 sm:$0xff]   ;;  %v6234_v31 = vld [vmem:[%s6567_s16 + $0x74] ss:$8 sps:$4 sm:$0xff]  }
  0x16   : > { %v6236_v32 = vld [vmem:[%s6567_s16 + $0x70] ss:$8 sps:$4 sm:$0xff]   ;;  %v6237_v33 = vld [vmem:[%s6567_s16 + $0x84] ss:$8 sps:$4 sm:$0xff]   ;;  %v6239_v34 = vld [vmem:[%s6567_s16 + $0x80] ss:$8 sps:$4 sm:$0xff]  }
  0x17   : > { %724 = vmatpush1.bf16.msra.mxu0 %v6201_v5  ;;  %v6240_v35 = vld [vmem:[%s6567_s16 + $0x94] ss:$8 sps:$4 sm:$0xff]   ;;  %v6242_v36 = vld [vmem:[%s6567_s16 + $0x90] ss:$8 sps:$4 sm:$0xff]   ;;  %v6243_v37 = vld [vmem:[%s6567_s16 + $0xa4] ss:$8 sps:$4 sm:$0xff]  }
  0x18   : > { %725 = vmatprep.subr.bf16.mxu0 %v6494_v1  ;;  %v6245_v38 = vld [vmem:[%s6567_s16 + $0xa0] ss:$8 sps:$4 sm:$0xff]   ;;  %v6246_v39 = vld [vmem:[%s6567_s16 + $0xb4] ss:$8 sps:$4 sm:$0xff]   ;;  %v6248_v40 = vld [vmem:[%s6567_s16 + $0xb0] ss:$8 sps:$4 sm:$0xff]  }
  0x19   : > { %v6249_v41 = vld [vmem:[%s6567_s16 + $0xc4] ss:$8 sps:$4 sm:$0xff]   ;;  %v6251_v42 = vld [vmem:[%s6567_s16 + $0xc0] ss:$8 sps:$4 sm:$0xff]   ;;  %v6252_v43 = vld [vmem:[%s6567_s16 + $0xd4] ss:$8 sps:$4 sm:$0xff]  }
  0x1a   : > { %v6254_v44 = vld [vmem:[%s6567_s16 + $0xd0] ss:$8 sps:$4 sm:$0xff]   ;;  %v6255_v45 = vld [vmem:[%s6567_s16 + $0xe4] ss:$8 sps:$4 sm:$0xff]   ;;  %v6257_v46 = vld [vmem:[%s6567_s16 + $0xe0] ss:$8 sps:$4 sm:$0xff]  }
  0x1b   : > { %726 = vmatpush1.bf16.msra.mxu0 %v6202_v7  ;;  %v6258_v47 = vld [vmem:[%s6567_s16 + $0xf4] ss:$8 sps:$4 sm:$0xff]   ;;  %v6260_v48 = vld [vmem:[%s6567_s16 + $0xf0] ss:$8 sps:$4 sm:$0xff]   ;;  %v6261_v49 = vld [vmem:[%s6567_s16 + $0x104] ss:$8 sps:$4 sm:$0xff]  }
  0x1c   : > { %727 = vmatprep.subr.bf16.mxu0 %v6494_v1  ;;  %v6263_v50 = vld [vmem:[%s6567_s16 + $0x100] ss:$8 sps:$4 sm:$0xff]   ;;  %v6264_v51 = vld [vmem:[%s6567_s16 + $0x114] ss:$8 sps:$4 sm:$0xff]   ;;  %v6266_v52 = vld [vmem:[%s6567_s16 + $0x110] ss:$8 sps:$4 sm:$0xff]  }
  0x1d   : > { %v6267_v53 = vld [vmem:[%s6567_s16 + $0x124] ss:$8 sps:$4 sm:$0xff]   ;;  %v6269_v54 = vld [vmem:[%s6567_s16 + $0x120] ss:$8 sps:$4 sm:$0xff]   ;;  %v6270_v55 = vld [vmem:[%s6567_s16 + $0x134] ss:$8 sps:$4 sm:$0xff]  }
  0x1e   : > { %v6272_v56 = vld [vmem:[%s6567_s16 + $0x130] ss:$8 sps:$4 sm:$0xff]   ;;  %v6273_v57 = vld [vmem:[%s6567_s16 + $0x144] ss:$8 sps:$4 sm:$0xff]   ;;  %v6275_v58 = vld [vmem:[%s6567_s16 + $0x140] ss:$8 sps:$4 sm:$0xff]  }
  0x1f   : > { %728 = vmatpush1.bf16.msra.mxu0 %v6203_v8  ;;  %v6276_v59 = vld [vmem:[%s6567_s16 + $0x154] ss:$8 sps:$4 sm:$0xff]   ;;  %v6278_v60 = vld [vmem:[%s6567_s16 + $0x150] ss:$8 sps:$4 sm:$0xff]   ;;  %v6279_v61 = vld [vmem:[%s6567_s16 + $0x164] ss:$8 sps:$4 sm:$0xff]  }
  0x20   : > { %729 = vmatprep.subr.bf16.mxu0 %v6494_v1  ;;  %v6281_v62 = vld [vmem:[%s6567_s16 + $0x160] ss:$8 sps:$4 sm:$0xff]   ;;  %v6282_v63 = vld [vmem:[%s6567_s16 + $0x174] ss:$8 sps:$4 sm:$0xff]   ;;  %v6284_v0 = vld [vmem:[%s6567_s16 + $0x170] ss:$8 sps:$4 sm:$0xff]  }
  0x21   : > { %v6287_v2 = vld [vmem:[%s6567_s16 + $0x180] ss:$8 sps:$4 sm:$0xff]  }
  0x23   : > { %730 = vmatpush1.bf16.msra.mxu0 %v6204_v9 }
  0x24   : > { %731 = vmatprep.subr.bf16.mxu0 %v6494_v1 }
  0x27   : > { %732 = vmatpush1.bf16.msra.mxu0 %v6205_v10 }
  0x28   : > { %733 = vmatprep.subr.bf16.mxu0 %v6494_v1 }
  0x2b   : > { %734 = vmatpush1.bf16.msra.mxu0 %v6206_v11 }
  0x2c   : > { %735 = vmatprep.subr.bf16.mxu0 %v6494_v1 }
  0x2f   : > { %736 = vmatpush1.bf16.msra.mxu0 %v6207_v12 }
  0x30   : > { %737 = vmatprep.subr.bf16.mxu0 %v6494_v1 }
  0x33   : > { %738 = vmatpush1.bf16.msra.mxu0 %v6208_v13 }
  0x34   : > { %739 = vmatprep.subr.bf16.mxu0 %v6494_v1 }
  0x37   : > { %740 = vmatpush1.bf16.msra.mxu0 %v6209_v14 }
  0x38   : > { %741 = vmatprep.subr.bf16.mxu0 %v6494_v1 }
  0x3b   : > { %742 = vmatpush1.bf16.msra.mxu0 %v6210_v15 }
  0x3c   : > { %743 = vmatprep.subr.bf16.mxu0 %v6494_v1 }
  0x3f   : > { %744 = vmatpush1.bf16.msra.mxu0 %v6211_v16 }
  0x40   : > { %745 = vmatprep.subr.bf16.mxu0 %v6494_v1  ;;  %v6285_v1 = vld [vmem:[%s6567_s16 + $0x184] ss:$8 sps:$4 sm:$0xff]   ;;  %s6495_s16 = smov 64  }
  0x43   : > { %746 = vmatpush1.bf16.msra.mxu0 %v6212_v17 }
  0x46   : > { %748 = vmatmul.mubr.bf16.vlgmr.msra.gmra.mrb[0].mxu0 %v6213_v18 }
  0x47   : > { %755 = vmatprep.mubr.bf16.mxu0 %v6216_v19 }
  0x4e   : > { %756 = vmatmul.mubr.bf16.gmra.mrb[4].mxu0 %v6218_v20 }
  0x4f   : > { %763 = vmatprep.mubr.bf16.mxu0 %v6219_v21 }
  0x56   : > { %764 = vmatmul.mubr.bf16.gmra.mrb[8].mxu0 %v6221_v22 }
  0x57   : > { %771 = vmatprep.mubr.bf16.mxu0 %v6222_v23 }
  0x5e   : > { %772 = vmatmul.mubr.bf16.gmra.mrb[12].mxu0 %v6224_v24 }
  0x5f   : > { %779 = vmatprep.mubr.bf16.mxu0 %v6225_v25 }
  0x66   : > { %780 = vmatmul.mubr.bf16.gmra.mrb[16].mxu0 %v6227_v26 }
  0x67   : > { %787 = vmatprep.mubr.bf16.mxu0 %v6228_v27 }
  0x6e   : > { %788 = vmatmul.mubr.bf16.gmra.mrb[20].mxu0 %v6230_v28 }
  0x6f   : > { %795 = vmatprep.mubr.bf16.mxu0 %v6231_v29 }
  0x76   : > { %796 = vmatmul.mubr.bf16.gmra.mrb[24].mxu0 %v6233_v30 }
  0x77   : > { %803 = vmatprep.mubr.bf16.mxu0 %v6234_v31 }
  0x7e   : > { %804 = vmatmul.mubr.bf16.gmra.mrb[28].mxu0 %v6236_v32 }
  0x7f   : > { %811 = vmatprep.mubr.bf16.mxu0 %v6237_v33 }
  0x86   : > { %812 = vmatmul.mubr.bf16.gmra.mrb[32].mxu0 %v6239_v34 }
  0x87   : > { %819 = vmatprep.mubr.bf16.mxu0 %v6240_v35 }
  0x8e   : > { %820 = vmatmul.mubr.bf16.gmra.mrb[36].mxu0 %v6242_v36 }
  0x8f   : > { %827 = vmatprep.mubr.bf16.mxu0 %v6243_v37 }
  0x96   : > { %828 = vmatmul.mubr.bf16.gmra.mrb[40].mxu0 %v6245_v38 }
  0x97   : > { %835 = vmatprep.mubr.bf16.mxu0 %v6246_v39 }
  0x9e   : > { %836 = vmatmul.mubr.bf16.gmra.mrb[44].mxu0 %v6248_v40 }
  0x9f   : > { %843 = vmatprep.mubr.bf16.mxu0 %v6249_v41 }
  0xa6   : > { %844 = vmatmul.mubr.bf16.gmra.mrb[48].mxu0 %v6251_v42 }
  0xa7   : > { %851 = vmatprep.mubr.bf16.mxu0 %v6252_v43 }
  0xae   : > { %852 = vmatmul.mubr.bf16.gmra.mrb[52].mxu0 %v6254_v44 }
  0xaf   : > { %859 = vmatprep.mubr.bf16.mxu0 %v6255_v45 }
  0xb6   : > { %860 = vmatmul.mubr.bf16.gmra.mrb[56].mxu0 %v6257_v46 }
  0xb7   : > { %867 = vmatprep.mubr.bf16.mxu0 %v6258_v47 }
  0xbe   : > { %868 = vmatmul.mubr.bf16.gmra.mrb[60].mxu0 %v6260_v48 }
  0xbf   : > { %875 = vmatprep.mubr.bf16.mxu0 %v6261_v49 }
  0xc6   : > { %876 = vmatmul.mubr.bf16.gmra.mrb[64].mxu0 %v6263_v50 }
  0xc7   : > { %883 = vmatprep.mubr.bf16.mxu0 %v6264_v51 }
  0xce   : > { %884 = vmatmul.mubr.bf16.gmra.mrb[68].mxu0 %v6266_v52 }
  0xcf   : > { %891 = vmatprep.mubr.bf16.mxu0 %v6267_v53 }
  0xd6   : > { %892 = vmatmul.mubr.bf16.gmra.mrb[72].mxu0 %v6269_v54 }
  0xd7   : > { %899 = vmatprep.mubr.bf16.mxu0 %v6270_v55 }
  0xde   : > { %900 = vmatmul.mubr.bf16.gmra.mrb[76].mxu0 %v6272_v56 }
  0xdf   : > { %907 = vmatprep.mubr.bf16.mxu0 %v6273_v57 }
  0xe6   : > { %908 = vmatmul.mubr.bf16.gmra.mrb[80].mxu0 %v6275_v58 }
  0xe7   : > { %915 = vmatprep.mubr.bf16.mxu0 %v6276_v59 }
  0xee   : > { %916 = vmatmul.mubr.bf16.gmra.mrb[84].mxu0 %v6278_v60 }
  0xef   : > { %923 = vmatprep.mubr.bf16.mxu0 %v6279_v61 }
  0xf6   : > { %924 = vmatmul.mubr.bf16.gmra.mrb[88].mxu0 %v6281_v62 }
  0xf7   : > { %931 = vmatprep.mubr.bf16.mxu0 %v6282_v63 }
  0xfe   : > { %932 = vmatmul.mubr.bf16.gmra.mrb[92].mxu0 %v6284_v0 }
  0xff   : > { %939 = vmatprep.mubr.bf16.mxu0 %v6285_v1 }
 0x106   : > { %940 = vmatmul.mubr.bf16.gmra.mrb[96].mxu0 %v6287_v2 }
 0x119   : > { %v749_v4 = vpop.f32.mrb[0].mxu0 }
 0x11a   : > { %v750_v5 = vadd.f32 %v6655_v3, %v749_v4  ;;  %v751_v6 = vpop.f32.mrb[1].mxu0 }
 0x11b   : > { %v752_v7 = vpop.f32.mrb[2].mxu0 }
 0x11c   : > { %v753_v8 = vadd.f32 %v6655_v3, %v752_v7  ;;  %v754_v9 = vpop.f32.mrb[3].mxu0  ;;  %v948_v10 = vmax.f32 %v750_v5, 0.0 }
 0x11e   : > { %v949_v11 = vmax.f32 %v753_v8, 0.0 }
 0x120   : > { %v998_v12 = vpack.c.bf16 %v949_v11, %v948_v10 }
 0x121   : > { %v757_v13 = vpop.f32.mrb[4].mxu0 }
 0x122   : > { %1024 = vst.msk [vmem:[#allocation2] sm:$0xff] %vm8642_vm0, %v998_v12  ;;  %v758_v14 = vadd.f32 %v6655_v3, %v757_v13  ;;  %v759_v15 = vpop.f32.mrb[5].mxu0 }
 0x123   : > { %v760_v16 = vpop.f32.mrb[6].mxu0 }
 0x124   : > { %v761_v17 = vadd.f32 %v6655_v3, %v760_v16  ;;  %v762_v18 = vpop.f32.mrb[7].mxu0  ;;  %v950_v19 = vmax.f32 %v758_v14, 0.0 }
 0x126   : > { %v951_v20 = vmax.f32 %v761_v17, 0.0 }
 0x128   : > { %v999_v21 = vpack.c.bf16 %v951_v20, %v950_v19 }
 0x129   : > { %v765_v22 = vpop.f32.mrb[8].mxu0  ;;  %v1049_v23 = vld [vmem:[#allocation2] sm:$0x1f]  ;;  %v1050_v32 = vld [vmem:[#allocation2] sm:$0xe0] }
 0x12a   : > { %1025 = vst.msk [vmem:[#allocation2 + $0x8] sm:$0xff] %vm8642_vm0, %v999_v21  ;;  %v766_v24 = vadd.f32 %v6655_v3, %v765_v22  ;;  %v767_v25 = vpop.f32.mrb[9].mxu0  ;;  %v1072_v26 = vshll.u32 %v1049_v23, 16  ;;  %v1070_v30 = vshrl.u32 %v1049_v23, 16  ;;  %v1080_v36 = vshrl.u32 %v1050_v32, 16 }
 0x12b   : > { %v768_v27 = vpop.f32.mrb[10].mxu0  ;;  %v1083_v37 = vshll.u32 %v1050_v32, 16  ;;  %v1064_v41 = vrot.slane %v1050_v32, 5 }
 0x12c   : > { %v769_v28 = vadd.f32 %v6655_v3, %v768_v27  ;;  %v770_v29 = vpop.f32.mrb[11].mxu0  ;;  %v1074_v31 = vrot.slane %v1072_v26, 1  ;;  %v952_v33 = vmax.f32 %v766_v24, 0.0  ;;  %v1082_v49 = vrot.slane %v1080_v36, 5 }
 0x12d   : > { %v1085_v50 = vrot.slane %v1083_v37, 6 }
 0x12e   : > { %v953_v34 = vmax.f32 %v769_v28, 0.0  ;;  %v1075_v35 = vor.u32 %v1074_v31, %v1070_v30 }
 0x12f   : > { %v1086_v0 = vor.u32 %v1085_v50, %v1082_v49 }
 0x130   : > { %v1000_v38 = vpack.c.bf16 %v953_v34, %v952_v33  ;;  %1076 = vrot.lane.b32.xlu1 %v1075_v35, %s6495_s16 }
 0x131   : > { %v773_v39 = vpop.f32.mrb[12].mxu0  ;;  %v1051_v40 = vld [vmem:[#allocation2 + $0x8] sm:$0x3]  ;;  %v1052_v42 = vld [vmem:[#allocation2 + $0x8] sm:$0x7c] }
 0x132   : > { %1026 = vst.msk [vmem:[#allocation2 + $0x10] sm:$0xff] %vm8642_vm0, %v1000_v38  ;;  %v774_v43 = vadd.f32 %v6655_v3, %v773_v39  ;;  %v775_v44 = vpop.f32.mrb[13].mxu0  ;;  %v1065_v45 = vrot.slane %v1051_v40, 5  ;;  %v1109_v46 = vshrl.u32 %v1052_v42, 16  ;;  %v1112_v47 = vshll.u32 %v1052_v42, 16 }
 0x133   : > { %v776_v48 = vpop.f32.mrb[14].mxu0  ;;  %v1088_v51 = vshrl.u32 %v1051_v40, 16  ;;  %v1091_v52 = vshll.u32 %v1051_v40, 16  ;;  %v1053_v62 = vld [vmem:[#allocation2 + $0x8] sm:$0x80] }
 0x134   : > { %v777_v53 = vadd.f32 %v6655_v3, %v776_v48  ;;  %v778_v54 = vpop.f32.mrb[15].mxu0  ;;  %v1066_v55 = vsel %vm8634_vm1, %v1064_v41, %v1065_v45  ;;  %v1111_v56 = vrot.slane %v1109_v46, 2  ;;  %v1114_v57 = vrot.slane %v1112_v47, 3 }
 0x135   : > { %1067 = vrot.lane.b32.xlu0 %v1066_v55, %s6496_s21  ;;  %v1090_v58 = vrot.slane %v1088_v51, 5  ;;  %v1093_v59 = vrot.slane %v1091_v52, 6  ;;  %v954_v60 = vmax.f32 %v774_v43, 0.0  ;;  %v1103_v7 = vrot.slane %v1053_v62, 7 }
 0x136   : > { %v955_v61 = vmax.f32 %v777_v53, 0.0  ;;  %v1115_v63 = vor.u32 %v1114_v57, %v1111_v56  ;;  %v1120_v11 = vshrl.u32 %v1053_v62, 16  ;;  %v6288_v62 = vld [vmem:[%s8607_s3 + $0x40] sm:$0xff]  }
 0x137   : > { %v1094_v1 = vor.u32 %v1093_v59, %v1090_v58  ;;  %5975 = vmatprep.subr.bf16.mxu1 %v6288_v62 }
 0x138   : > { %v1001_v2 = vpack.c.bf16 %v955_v61, %v954_v60  ;;  %1116 = vrot.lane.b32.xlu1 %v1115_v63, %s6495_s16  ;;  %v1122_v21 = vrot.slane %v1120_v11, 7  ;;  %v6289_v63 = vld [vmem:[%s8607_s3] sm:$0xff]  }
 0x139   : > { %v781_v4 = vpop.f32.mrb[16].mxu0  ;;  %v1095_v5 = vsel %vm8626_vm2, %v1086_v0, %v1094_v1  ;;  %v1054_v6 = vld [vmem:[#allocation2 + $0x10] sm:$0xf]  ;;  %v1275_v37 = vld [vmem:[#allocation2 + $0x10] sm:$0xf0]  ;;  %5976 = vmatpush3.bf16.msra.mxu1 %v6289_v63 }
 0x13a   : > { %1027 = vst.msk [vmem:[#allocation2 + $0x18] sm:$0xff] %vm8642_vm0, %v1001_v2  ;;  %v782_v8 = vadd.f32 %v6655_v3, %v781_v4  ;;  %1096 = vrot.lane.b32.xlu0 %v1095_v5, %s6497_s22  ;;  %v783_v9 = vpop.f32.mrb[17].mxu0  ;;  %v1104_v10 = vrot.slane %v1054_v6, 7  ;;  %v1124_v12 = vshrl.u32 %v1054_v6, 16  ;;  %v1127_v18 = vshll.u32 %v1054_v6, 16  ;;  %v6290_v6 = vld [vmem:[%s8607_s3 + $0x48] sm:$0xff]  }
 0x13b   : > { %v784_v13 = vpop.f32.mrb[18].mxu0  ;;  %v1295_v42 = vshll.u32 %v1275_v37, 16  ;;  %v6701_v57 = vld [vmem:[#allocation2 + $0x10] sm:$0xf0]  ;;  %v1293_v0 = vshrl.u32 %v1275_v37, 16  ;;  %5977 = vmatprep.subr.bf16.mxu1 %v6290_v6 }
 0x13c   : > { %v785_v14 = vadd.f32 %v6655_v3, %v784_v13  ;;  %v786_v15 = vpop.f32.mrb[19].mxu0  ;;  %v1105_v16 = vsel %vm1102_vm3, %v1103_v7, %v1104_v10  ;;  %v1126_v17 = vrot.slane %v1124_v12, 7  ;;  %v956_v19 = vmax.f32 %v782_v8, 0.0  ;;  %v6293_v37 = vld [vmem:[%s8607_s3 + $0x10] sm:$0xff]  }
 0x13d   : > { %v1297_v55 = vrot.slane %v1295_v42, 1  ;;  %v1145_v5 = vshrl.u32 %v6701_v57, 16 }
 0x13e   : > { %v957_v20 = vmax.f32 %v785_v14, 0.0  ;;  %1106 = vrot.lane.b32.xlu0 %v1105_v16, %s6496_s21  ;;  %v1129_v22 = vor.u32 %v1127_v18, %v1126_v17  ;;  %v6291_v17 = vld [vmem:[%s8607_s3 + $0x8] sm:$0xff]  }
 0x13f   : > { %v1298_v8 = vor.u32 %v1297_v55, %v1293_v0  ;;  %5978 = vmatpush3.bf16.msra.mxu1 %v6291_v17 }
 0x140   : > { %v1002_v23 = vpack.c.bf16 %v957_v20, %v956_v19  ;;  %v1130_v24 = vsel %vm8633_vm4, %v1122_v21, %v1129_v22  ;;  %v1148_v20 = vshll.u32 %v6701_v57, 16 }
 0x141   : > { %1131 = vrot.lane.b32.xlu1 %v1130_v24, %s6497_s22  ;;  %v1277_v25 = vld [vmem:[#allocation2 + $0x18] sm:$0x3e]  ;;  %v789_v26 = vpop.f32.mrb[20].mxu0  ;;  %v1276_v30 = vld [vmem:[#allocation2 + $0x18] sm:$0x1] }
 0x142   : > { %1028 = vst.msk [vmem:[#allocation2 + $0x20] sm:$0xff] %vm8642_vm0, %v1002_v23  ;;  %v1288_v27 = vrot.slane %v1277_v25, 5  ;;  %v790_v28 = vadd.f32 %v6655_v3, %v789_v26  ;;  %v791_v29 = vpop.f32.mrb[21].mxu0  ;;  %v1304_v35 = vshrl.u32 %v1276_v30, 16  ;;  %v6685_v38 = vld [vmem:[#allocation2 + $0x18] sm:$0x3e] }
 0x143   : > { %v792_v31 = vpop.f32.mrb[22].mxu0  ;;  %v1140_v43 = vrot.slane %v6685_v38, 1  ;;  %v1311_v47 = vshrl.u32 %v1277_v25, 16  ;;  %v1300_v50 = vshll.u32 %v1276_v30, 16  ;;  %v1314_v56 = vshll.u32 %v1277_v25, 16 }
 0x144   : > { %1289 = vrot.lane.b32.xlu0 %v1288_v27, %s6496_s21  ;;  %v958_v32 = vmax.f32 %v790_v28, 0.0  ;;  %v793_v33 = vadd.f32 %v6655_v3, %v792_v31  ;;  %v794_v34 = vpop.f32.mrb[23].mxu0  ;;  %v1056_v4 = vld [vmem:[#allocation2 + $0x18] sm:$0x1]  ;;  %v1164_v10 = vshrl.u32 %v6685_v38, 16  ;;  %v1167_v11 = vshll.u32 %v6685_v38, 16 }
 0x145   : > { %v1313_v59 = vrot.slane %v1311_v47, 5  ;;  %v1302_v1 = vrot.slane %v1300_v50, 1  ;;  %v1316_v9 = vrot.slane %v1314_v56, 6  ;;  %v6724_v16 = vld [vmem:[#allocation2 + $0x18] sm:$0xc0]  ;;  %v1153_v21 = vshrl.u32 %v1056_v4, 16 }
 0x146   : > { %v959_v36 = vmax.f32 %v793_v33, 0.0  ;;  %v1156_v22 = vshll.u32 %v1056_v4, 16  ;;  %v1136_v26 = vrot.slane %v6701_v57, 4  ;;  %v1137_v27 = vrot.slane %v1056_v4, 4 }
 0x147   : > { %v1303_v18 = vsel %vm8620_vm5, %v1298_v8, %v1302_v1  ;;  %v1317_v28 = vor.u32 %v1316_v9, %v1313_v59  ;;  %v1166_v29 = vrot.slane %v1164_v10, 1  ;;  %v1169_v30 = vrot.slane %v1167_v11, 2 }
 0x148   : > { %1308 = vrot.lane.b32.xlu0 %v1304_v35, %s6495_s16  ;;  %v1003_v39 = vpack.c.bf16 %v959_v36, %v958_v32  ;;  %v1334_v31 = vshrl.u32 %v6724_v16, 16  ;;  %v6292_v32 = vld [vmem:[%s8607_s3 + $0x50] sm:$0xff]  }
 0x149   : > { %v6688_v40 = vld [vmem:[#allocation2 + $0x20] sm:$0xf8]  ;;  %v797_v41 = vpop.f32.mrb[24].mxu0  ;;  %v6696_v51 = vld [vmem:[#allocation2 + $0x20] sm:$0x7]  ;;  %5979 = vmatprep.subr.bf16.mxu1 %v6292_v32  ;;  %v1170_v47 = vor.u32 %v1169_v30, %v1166_v29  ;;  %v6294_v29 = vld [vmem:[%s8607_s3 + $0x58] sm:$0xff]  }
 0x14a   : > { %1029 = vst.msk [vmem:[#allocation2 + $0x28] sm:$0xff] %vm8642_vm0, %v1003_v39  ;;  %v1329_v44 = vrot.slane %v6688_v40, 7  ;;  %v798_v45 = vadd.f32 %v6655_v3, %v797_v41  ;;  %v799_v46 = vpop.f32.mrb[25].mxu0  ;;  %v6694_v49 = vld [vmem:[#allocation2 + $0x20] sm:$0xf8]  ;;  %v1342_v61 = vshrl.u32 %v6696_v51, 16  ;;  %5980 = vmatpush3.bf16.msra.mxu1 %v6293_v37 }
 0x14b   : > { %v800_v48 = vpop.f32.mrb[26].mxu0  ;;  %v1180_v60 = vrot.slane %v6694_v49, 3  ;;  %v1355_v15 = vshrl.u32 %v6688_v40, 16  ;;  %v1204_v35 = vshrl.u32 %v6694_v49, 16  ;;  %v1207_v36 = vshll.u32 %v6694_v49, 16  ;;  %5981 = vmatprep.subr.bf16.mxu1 %v6294_v29 }
 0x14c   : > { %1141 = vrot.lane.b32.xlu0 %v1140_v43, %s6496_s21  ;;  %1330 = vrot.lane.b32.xlu1 %v1329_v44, %s6496_s21  ;;  %v960_v52 = vmax.f32 %v798_v45, 0.0  ;;  %v801_v53 = vadd.f32 %v6655_v3, %v800_v48  ;;  %v802_v54 = vpop.f32.mrb[27].mxu0  ;;  %v6721_v14 = vrot.slane %v1342_v61, 2  ;;  %v1345_v38 = vshll.u32 %v6696_v51, 16  ;;  %v6750_v45 = vld [vmem:[#allocation2 + $0x20] sm:$0x7] }
 0x14d   : > { %v1357_v34 = vrot.slane %v1355_v15, 7  ;;  %v1155_v39 = vrot.slane %v1153_v21, 4  ;;  %v1158_v41 = vrot.slane %v1156_v22, 5  ;;  %v1358_v43 = vshll.u32 %v6688_v40, 16 }
 0x14e   : > { %v961_v58 = vmax.f32 %v801_v53, 0.0  ;;  %v1337_v44 = vshll.u32 %v6724_v16, 16  ;;  %v6753_v46 = vsel %vm8631_vm6, %v1136_v26, %v1137_v27  ;;  %v1147_v48 = vrot.slane %v1145_v5, 4  ;;  %v6755_v53 = vld [vmem:[#allocation2 + $0x18] sm:$0xc0] }
 0x14f   : > { %v1150_v49 = vrot.slane %v1148_v20, 5  ;;  %v1360_v54 = vor.u32 %v1358_v43, %v1357_v34  ;;  %v1206_v55 = vrot.slane %v1204_v35, 3  ;;  %v1209_v56 = vrot.slane %v1207_v36, 4  ;;  %v6295_v35 = vld [vmem:[%s8607_s3 + $0x18] sm:$0xff]   ;;  %v6296_v43 = vld [vmem:[%s8607_s3 + $0x60] sm:$0xff]  }
 0x150   : > { %v1004_v2 = vpack.c.bf16 %v961_v58, %v960_v52  ;;  %1320 = vrot.lane.b32.xlu0 %v1313_v59, %s6497_s22  ;;  %1181 = vrot.lane.b32.xlu1 %v1180_v60, %s6496_s21  ;;  %v1336_v52 = vrot.slane %v1334_v31, 2  ;;  %v1347_v59 = vrot.slane %v1345_v38, 3  ;;  %v1159_v60 = vor.u32 %v1158_v41, %v1155_v39 }
 0x151   : > { %v805_v7 = vpop.f32.mrb[28].mxu0  ;;  %v1566_v58 = vld [vmem:[#allocation2 + $0x28] sm:$0x1f]  ;;  %v1193_v63 = vshrl.u32 %v6750_v45, 16  ;;  %v1196_v0 = vshll.u32 %v6750_v45, 16  ;;  %v1185_v5 = vshrl.u32 %v6755_v53, 16  ;;  %v1210_v10 = vor.u32 %v1209_v56, %v1206_v55  ;;  %5982 = vmatpush3.bf16.msra.mxu1 %v6295_v35 }
 0x152   : > { %1030 = vst.msk [vmem:[#allocation2 + $0x30] sm:$0xff] %vm8642_vm0, %v1004_v2  ;;  %v806_v12 = vadd.f32 %v6655_v3, %v805_v7  ;;  %v807_v13 = vpop.f32.mrb[29].mxu0  ;;  %v1281_v61 = vld [vmem:[#allocation2 + $0x28] sm:$0x1f]  ;;  %v1339_v2 = vrot.slane %v1337_v44, 3  ;;  %v1151_v7 = vor.u32 %v1150_v49, %v1147_v48  ;;  %v1588_v8 = vshll.u32 %v1566_v58, 16  ;;  %5983 = vmatprep.subr.bf16.mxu1 %v6296_v43 }
 0x153   : > { %v808_v19 = vpop.f32.mrb[30].mxu0  ;;  %v1188_v9 = vshll.u32 %v6755_v53, 16  ;;  %v1378_v11 = vshrl.u32 %v1281_v61, 16  ;;  %v1348_v13 = vor.u32 %v1347_v59, %v6721_v14  ;;  %v1195_v17 = vrot.slane %v1193_v63, 6  ;;  %v6299_v63 = vld [vmem:[%s8607_s3 + $0x28] sm:$0xff]  }
 0x154   : > { %v962_v23 = vmax.f32 %v806_v12, 0.0  ;;  %1306 = vrot.lane.b32.xlu0 %v1303_v18, %s6495_s16  ;;  %1352 = vrot.lane.b32.xlu1 %v6721_v14, %s6495_s16  ;;  %v809_v24 = vadd.f32 %v6655_v3, %v808_v19  ;;  %v810_v25 = vpop.f32.mrb[31].mxu0  ;;  %v1160_v15 = vsel %vm8616_vm7, %v1151_v7, %v1159_v60  ;;  %v1198_v18 = vrot.slane %v1196_v0, 7 }
 0x155   : > { %v1340_v19 = vor.u32 %v1339_v2, %v1336_v52  ;;  %v1187_v21 = vrot.slane %v1185_v5, 6  ;;  %v1586_v22 = vshrl.u32 %v1566_v58, 16  ;;  %v1381_v25 = vshll.u32 %v1281_v61, 16  ;;  %v6300_v2 = vld [vmem:[%s8607_s3 + $0x70] sm:$0xff]  }
 0x156   : > { %v963_v33 = vmax.f32 %v809_v24, 0.0  ;;  %v1190_v24 = vrot.slane %v1188_v9, 7  ;;  %v1380_v27 = vrot.slane %v1378_v11, 4  ;;  %v1199_v31 = vor.u32 %v1198_v18, %v1195_v17  ;;  %v1282_v18 = vld [vmem:[#allocation2 + $0x28] sm:$0xe0] }
 0x157   : > { %v1349_v30 = vsel %vm8615_vm8, %v1340_v19, %v1348_v13  ;;  %v6301_v13 = vld [vmem:[%s8607_s3 + $0x30] sm:$0xff]   ;;  %v6302_v19 = vld [vmem:[%s8607_s3 + $0x78] sm:$0xff]  }
 0x158   : > { %v1005_v42 = vpack.c.bf16 %v963_v33, %v962_v23  ;;  %1318 = vrot.lane.b32.xlu0 %v1317_v28, %s6497_s22  ;;  %1363 = vrot.lane.b32.xlu1 %v1357_v34, %s6497_s22  ;;  %v1590_v23 = vrot.slane %v1588_v8, 1  ;;  %v1191_v41 = vor.u32 %v1190_v24, %v1187_v21  ;;  %v1370_v24 = vrot.slane %v1282_v18, 1 }
 0x159   : > { %v813_v50 = vpop.f32.mrb[32].mxu0  ;;  %v1284_v32 = vld [vmem:[#allocation2 + $0x30] sm:$0x7c]  ;;  %v6799_v0 = vld [vmem:[#allocation2 + $0x30] sm:$0x3] }
 0x15a   : > { %1031 = vst.msk [vmem:[#allocation2 + $0x38] sm:$0xff] %vm8642_vm0, %v1005_v42  ;;  %v814_v40 = vadd.f32 %v6655_v3, %v813_v50  ;;  %v815_v57 = vpop.f32.mrb[33].mxu0  ;;  %v1569_v33 = vld [vmem:[#allocation2 + $0x30] sm:$0x7c]  ;;  %v1591_v39 = vor.u32 %v1590_v23, %v1586_v22  ;;  %v1383_v42 = vrot.slane %v1381_v25, 5  ;;  %v1424_v44 = vshrl.u32 %v1284_v32, 16 }
 0x15b   : > { %v816_v62 = vpop.f32.mrb[34].mxu0  ;;  %v1626_v48 = vshll.u32 %v1569_v33, 16  ;;  %v6297_v50 = vld [vmem:[%s8607_s3 + $0x20] sm:$0xff]   ;;  %v1200_v52 = vsel %vm8614_vm9, %v1191_v41, %v1199_v31  ;;  %v1568_v5 = vld [vmem:[#allocation2 + $0x30] sm:$0x3]  ;;  %v1371_v9 = vrot.slane %v6799_v0, 1 }
 0x15c   : > { %1171 = vrot.lane.b32.xlu0 %v1170_v47, %s6497_s22  ;;  %1361 = vrot.lane.b32.xlu1 %v1360_v54, %s6497_s22  ;;  %v964_v1 = vmax.f32 %v814_v40, 0.0  ;;  %v817_v4 = vadd.f32 %v6655_v3, %v816_v62  ;;  %v818_v6 = vpop.f32.mrb[35].mxu0  ;;  %v1623_v47 = vshrl.u32 %v1569_v33, 16  ;;  %v6298_v54 = vld [vmem:[%s8607_s3 + $0x68] sm:$0xff]   ;;  %v1384_v56 = vor.u32 %v1383_v42, %v1380_v27 }
 0x15d   : > { %v1427_v40 = vshll.u32 %v1284_v32, 16  ;;  %v1426_v58 = vrot.slane %v1424_v44, 6  ;;  %v1628_v60 = vrot.slane %v1626_v48, 3  ;;  %5984 = vmatpush3.bf16.msra.mxu1 %v6297_v50  ;;  %v1581_v17 = vrot.slane %v1568_v5, 5  ;;  %v6824_v32 = vld [vmem:[#allocation2 + $0x30] sm:$0x80] }
 0x15e   : > { %v965_v12 = vmax.f32 %v817_v4, 0.0  ;;  %v1625_v59 = vrot.slane %v1623_v47, 2  ;;  %5985 = vmatprep.subr.bf16.mxu1 %v6298_v54  ;;  %v1567_v4 = vld [vmem:[#allocation2 + $0x28] sm:$0xe0]  ;;  %v1603_v29 = vshrl.u32 %v1568_v5, 16  ;;  %v1391_v33 = vshrl.u32 %v1282_v18, 16 }
 0x15f   : > { %v1429_v11 = vrot.slane %v1427_v40, 7  ;;  %v1595_v21 = vshrl.u32 %v1567_v4, 16  ;;  %v1598_v25 = vshll.u32 %v1567_v4, 16  ;;  %v1394_v42 = vshll.u32 %v1282_v18, 16 }
 0x160   : > { %1161 = vrot.lane.b32.xlu0 %v1160_v15, %s6495_s16  ;;  %1211 = vrot.lane.b32.xlu1 %v1210_v10, %s6497_s22  ;;  %v1006_v20 = vpack.c.bf16 %v965_v12, %v964_v1  ;;  %v1629_v10 = vor.u32 %v1628_v60, %v1625_v59  ;;  %v1580_v15 = vrot.slane %v1567_v4, 5  ;;  %v1372_v43 = vsel %vm8624_vm10, %v1370_v24, %v1371_v9 }
 0x161   : > { %v821_v26 = vpop.f32.mrb[36].mxu0  ;;  %5986 = vmatpush3.bf16.msra.mxu1 %v6299_v63  ;;  %v1430_v23 = vor.u32 %v1429_v11, %v1426_v58  ;;  %v1597_v41 = vrot.slane %v1595_v21, 5  ;;  %v1571_v47 = vld [vmem:[#allocation2 + $0x38] sm:$0xf]  ;;  %v1600_v48 = vrot.slane %v1598_v25, 6  ;;  %v1617_v50 = vrot.slane %v6824_v32, 7 }
 0x162   : > { %1032 = vst.msk [vmem:[#allocation2 + $0x40] sm:$0xff] %vm8642_vm0, %v1006_v20  ;;  %v822_v14 = vadd.f32 %v6655_v3, %v821_v26  ;;  %v823_v28 = vpop.f32.mrb[37].mxu0  ;;  %5987 = vmatprep.subr.bf16.mxu1 %v6300_v2  ;;  %v1605_v54 = vrot.slane %v1603_v29, 5  ;;  %v1640_v21 = vshll.u32 %v1571_v47, 16 }
 0x163   : > { %v824_v34 = vpop.f32.mrb[38].mxu0  ;;  %v1582_v28 = vsel %vm8634_vm1, %v1580_v15, %v1581_v17  ;;  %v1601_v2 = vor.u32 %v1600_v48, %v1597_v41  ;;  %v1176_v48 = vrot.slane %v6755_v53, 6 }
 0x164   : > { %1387 = vrot.lane.b32.xlu0 %v1380_v27, %s6495_s16  ;;  %1350 = vrot.lane.b32.xlu1 %v1349_v30, %s6495_s16  ;;  %v966_v36 = vmax.f32 %v822_v14, 0.0  ;;  %v825_v37 = vadd.f32 %v6655_v3, %v824_v34  ;;  %v826_v38 = vpop.f32.mrb[39].mxu0  ;;  %v6303_v14 = vld [vmem:[%s8607_s3 + $0x38] sm:$0xff]   ;;  %v1606_v30 = vshll.u32 %v1568_v5, 16  ;;  %v1637_v5 = vshrl.u32 %v1571_v47, 16 }
 0x165   : > { %5988 = vmatpush3.bf16.msra.mxu1 %v6301_v13  ;;  %v1399_v38 = vshrl.u32 %v6799_v0, 16 }
 0x166   : > { %v967_v49 = vmax.f32 %v825_v37, 0.0  ;;  %5989 = vmatprep.subr.bf16.mxu1 %v6302_v19  ;;  %v1286_v37 = vld [vmem:[#allocation2 + $0x38] sm:$0xf]  ;;  %v1633_v19 = vshrl.u32 %v6824_v32, 16 }
 0x167   : > { %v1417_v44 = vrot.slane %v1286_v37, 3  ;;  %v1440_v11 = vshrl.u32 %v1286_v37, 16  ;;  %v1443_v15 = vshll.u32 %v1286_v37, 16  ;;  %v1325_v37 = vrot.slane %v6724_v16, 2 }
 0x168   : > { %1592 = vrot.lane.b32.xlu0 %v1591_v39, %s6495_s16  ;;  %1201 = vrot.lane.b32.xlu1 %v1200_v52, %s6495_s16  ;;  %v1007_v55 = vpack.c.bf16 %v967_v49, %v966_v36  ;;  %v1402_v39 = vshll.u32 %v6799_v0, 16  ;;  %v1618_v52 = vrot.slane %v1571_v47, 7  ;;  %v1790_v47 = vld [vmem:[#allocation2 + $0x38] sm:$0xf0] }
 0x169   : > { %v829_v57 = vpop.f32.mrb[40].mxu0  ;;  %5990 = vmatpush3.bf16.msra.mxu1 %v6303_v14  ;;  %v1442_v25 = vrot.slane %v1440_v11, 3  ;;  %v1326_v14 = vrot.slane %v6696_v51, 2  ;;  %v6851_v29 = vld [vmem:[#allocation2 + $0x40] sm:$0x3e] }
 0x16a   : > { %1033 = vst.msk [vmem:[#allocation2 + $0x48] sm:$0xff] %vm8642_vm0, %v1007_v55  ;;  %v830_v61 = vadd.f32 %v6655_v3, %v829_v57  ;;  %v831_v62 = vpop.f32.mrb[41].mxu0  ;;  %v1608_v55 = vrot.slane %v1606_v30, 6  ;;  %v1401_v57 = vrot.slane %v1399_v38, 1  ;;  %v1635_v30 = vrot.slane %v1633_v19, 7 }
 0x16b   : > { %v832_v1 = vpop.f32.mrb[42].mxu0  ;;  %v1396_v62 = vrot.slane %v1394_v42, 2  ;;  %v1803_v38 = vrot.slane %v6851_v29, 5  ;;  %v6862_v41 = vsel %vm8613_vm13, %v1325_v37, %v1326_v14  ;;  %vm6943_vm13 = vmand %vm1102_vm3, %vm8633_vm4 }
 0x16c   : > { %1385 = vrot.lane.b32.xlu0 %v1384_v56, %s6495_s16  ;;  %1433 = vrot.lane.b32.xlu1 %v1426_v58, %s6495_s16  ;;  %v968_v6 = vmax.f32 %v830_v61, 0.0  ;;  %v833_v7 = vadd.f32 %v6655_v3, %v832_v1  ;;  %v834_v8 = vpop.f32.mrb[43].mxu0  ;;  %v6831_v56 = vld [vmem:[#allocation2 + $0x30] sm:$0x80]  ;;  %v1404_v58 = vrot.slane %v1402_v39, 2  ;;  %v1393_v61 = vrot.slane %v1391_v33, 1 }
 0x16d   : > { %v1416_v60 = vrot.slane %v6831_v56, 3  ;;  %v1619_v1 = vsel %vm1102_vm3, %v1617_v50, %v1618_v52  ;;  %v1609_v4 = vor.u32 %v1608_v55, %v1605_v54  ;;  %v1436_v32 = vshrl.u32 %v6831_v56, 16  ;;  %v1791_v50 = vld [vmem:[#allocation2 + $0x40] sm:$0x1] }
 0x16e   : > { %v969_v12 = vmax.f32 %v833_v7, 0.0  ;;  %v1397_v13 = vor.u32 %v1396_v62, %v1393_v61  ;;  %v1818_v54 = vshrl.u32 %v1791_v50, 16 }
 0x16f   : > { %v1610_v18 = vsel %vm8626_vm2, %v1601_v2, %v1609_v4  ;;  %v1814_v2 = vshll.u32 %v1791_v50, 16 }
 0x170   : > { %1375 = vrot.lane.b32.xlu0 %v1371_v9, %s6496_s21  ;;  %1630 = vrot.lane.b32.xlu1 %v1629_v10, %s6495_s16  ;;  %v1008_v20 = vpack.c.bf16 %v969_v12, %v968_v6  ;;  %v1405_v10 = vor.u32 %v1404_v58, %v1401_v57  ;;  %v1418_v12 = vsel %vm8619_vm11, %v1416_v60, %v1417_v44  ;;  %v1574_v58 = vld [vmem:[#allocation2 + $0x40] sm:$0x3e] }
 0x171   : > { %v837_v22 = vpop.f32.mrb[44].mxu0  ;;  %v6878_v62 = vld [vmem:[#allocation2 + $0x48] sm:$0xf8] }
 0x172   : > { %1034 = vst.msk [vmem:[#allocation2 + $0x50] sm:$0xff] %vm8642_vm0, %v1008_v20  ;;  %v838_v26 = vadd.f32 %v6655_v3, %v837_v22  ;;  %v839_v27 = vpop.f32.mrb[45].mxu0  ;;  %v1639_v20 = vrot.slane %v1637_v5, 7  ;;  %v1406_v24 = vsel %vm8625_vm12, %v1397_v13, %v1405_v10  ;;  %v6882_v5 = vld [vmem:[#allocation2 + $0x48] sm:$0xf8] }
 0x173   : > { %v840_v31 = vpop.f32.mrb[46].mxu0  ;;  %v1572_v10 = vld [vmem:[#allocation2 + $0x38] sm:$0xf0]  ;;  %v1690_v13 = vrot.slane %v6882_v5, 3  ;;  %v1716_v50 = vshll.u32 %v6882_v5, 16 }
 0x174   : > { %1583 = vrot.lane.b32.xlu0 %v1582_v28, %s6496_s21  ;;  %1431 = vrot.lane.b32.xlu1 %v1430_v23, %s6495_s16  ;;  %v970_v34 = vmax.f32 %v838_v26, 0.0  ;;  %v841_v35 = vadd.f32 %v6655_v3, %v840_v31  ;;  %v842_v36 = vpop.f32.mrb[47].mxu0  ;;  %v1445_v28 = vrot.slane %v1443_v15, 4  ;;  %v1642_v31 = vor.u32 %v1640_v21, %v1639_v20 }
 0x175   : > { %v1816_v15 = vrot.slane %v1814_v2, 1  ;;  %v1678_v21 = vshll.u32 %v1574_v58, 16 }
 0x176   : > { %v971_v49 = vmax.f32 %v841_v35, 0.0  ;;  %v1446_v42 = vor.u32 %v1445_v28, %v1442_v25 }
 0x178   : > { %1373 = vrot.lane.b32.xlu0 %v1372_v43, %s6496_s21  ;;  %1421 = vrot.lane.b32.xlu1 %v1417_v44, %s6496_s21  ;;  %v1009_v40 = vpack.c.bf16 %v971_v49, %v970_v34  ;;  %v1643_v43 = vsel %vm8633_vm4, %v1635_v30, %v1642_v31  ;;  %v1438_v44 = vrot.slane %v1436_v32, 3  ;;  %v1177_v49 = vrot.slane %v6750_v45, 6 }
 0x179   : > { %v845_v59 = vpop.f32.mrb[48].mxu0 }
 0x17a   : > { %1035 = vst.msk [vmem:[#allocation2 + $0x58] sm:$0xff] %vm8642_vm0, %v1009_v40  ;;  %v846_v63 = vadd.f32 %v6655_v3, %v845_v59  ;;  %v847_v0 = vpop.f32.mrb[49].mxu0  ;;  %v6872_v40 = vsel %vm8612_vm14, %v1176_v48, %v1177_v49  ;;  %v1809_v59 = vshll.u32 %v1790_v47, 16  ;;  %v1713_v49 = vshrl.u32 %v6882_v5, 16 }
 0x17b   : > { %v848_v6 = vpop.f32.mrb[50].mxu0  ;;  %v1652_v0 = vrot.slane %v1574_v58, 1  ;;  %vm8617_vm14 = vcmask 1044484  }
 0x17c   : > { %1409 = vrot.lane.b32.xlu0 %v1401_v57, %s6497_s22  ;;  %1620 = vrot.lane.b32.xlu1 %v1619_v1, %s6496_s21  ;;  %v972_v7 = vmax.f32 %v846_v63, 0.0  ;;  %v849_v8 = vadd.f32 %v6655_v3, %v848_v6  ;;  %v850_v9 = vpop.f32.mrb[51].mxu0  ;;  %v1447_v57 = vsel %vm8618_vm15, %v1438_v44, %v1446_v42  ;;  %v1825_v63 = vshrl.u32 %v6851_v29, 16  ;;  %v6900_v42 = vld [vmem:[#allocation2 + $0x40] sm:$0xc0] }
 0x17d   : > { %v1842_v1 = vrot.slane %v6878_v62, 7  ;;  %v1807_v6 = vshrl.u32 %v1790_v47, 16  ;;  %v1828_v9 = vshll.u32 %v6851_v29, 16  ;;  %v1867_v29 = vshrl.u32 %v6878_v62, 16 }
 0x17e   : > { %v973_v17 = vmax.f32 %v849_v8, 0.0  ;;  %v6884_v8 = vld [vmem:[#allocation2 + $0x48] sm:$0x7]  ;;  %v1870_v47 = vshll.u32 %v6878_v62, 16 }
 0x17f   : > { %v1857_v44 = vshll.u32 %v6884_v8, 16  ;;  %v1869_v48 = vrot.slane %v1867_v29, 7 }
 0x180   : > { %1611 = vrot.lane.b32.xlu0 %v1610_v18, %s6497_s22  ;;  %1419 = vrot.lane.b32.xlu1 %v1418_v12, %s6496_s21  ;;  %v1010_v22 = vpack.c.bf16 %v973_v17, %v972_v7  ;;  %v1811_v7 = vrot.slane %v1809_v59, 1  ;;  %v1827_v12 = vrot.slane %v1825_v63, 5  ;;  %v1854_v17 = vshrl.u32 %v6884_v8, 16 }
 0x181   : > { %v853_v23 = vpop.f32.mrb[52].mxu0  ;;  %v1675_v18 = vshrl.u32 %v1574_v58, 16  ;;  %v6913_v58 = vld [vmem:[%s8606_s2] ss:$0 sm:$0xff]  ;;  %v1859_v5 = vrot.slane %v1857_v44, 3  ;;  %v1718_v8 = vrot.slane %v1716_v50, 4 }
 0x182   : > { %1036 = vst.msk [vmem:[#allocation2 + $0x60] sm:$0xff] %vm8642_vm0, %v1010_v22  ;;  %v854_v26 = vadd.f32 %v6655_v3, %v853_v23  ;;  %v855_v27 = vpop.f32.mrb[53].mxu0  ;;  %v1812_v20 = vor.u32 %v1811_v7, %v1807_v6  ;;  %v1573_v22 = vld [vmem:[#allocation2 + $0x40] sm:$0x1]  ;;  %v1656_v23 = vshrl.u32 %v1572_v10, 16  ;;  %v1872_v6 = vor.u32 %v1870_v47, %v1869_v48 }
 0x183   : > { %v856_v33 = vpop.f32.mrb[54].mxu0  ;;  %v1659_v27 = vshll.u32 %v1572_v10, 16  ;;  %v1715_v7 = vrot.slane %v1713_v49, 3 }
 0x184   : > { %1407 = vrot.lane.b32.xlu0 %v1406_v24, %s6497_s22  ;;  %1450 = vrot.lane.b32.xlu1 %v1442_v25, %s6497_s22  ;;  %v974_v34 = vmax.f32 %v854_v26, 0.0  ;;  %v857_v35 = vadd.f32 %v6655_v3, %v856_v33  ;;  %v858_v36 = vpop.f32.mrb[55].mxu0  ;;  %v1830_v26 = vrot.slane %v1828_v9, 6  ;;  %v6897_v33 = vrot.slane %v1854_v17, 2 }
 0x185   : > { %v1667_v36 = vshll.u32 %v1573_v22, 16  ;;  %v1817_v37 = vsel %vm8620_vm5, %v1812_v20, %v1816_v15  ;;  %v1796_v15 = vld [vmem:[#allocation2 + $0x50] sm:$0x1f] }
 0x186   : > { %v975_v39 = vmax.f32 %v857_v35, 0.0  ;;  %v1664_v35 = vshrl.u32 %v1573_v22, 16  ;;  %v1860_v22 = vor.u32 %v1859_v5, %v6897_v33  ;;  %v1892_v44 = vshll.u32 %v1796_v15, 16 }
 0x188   : > { %1804 = vrot.lane.b32.xlu0 %v1803_v38, %s6496_s21  ;;  %1644 = vrot.lane.b32.xlu1 %v1643_v43, %s6497_s22  ;;  %v1011_v16 = vpack.c.bf16 %v975_v39, %v974_v34  ;;  %v1677_v34 = vrot.slane %v1675_v18, 1  ;;  %v1680_v38 = vrot.slane %v1678_v21, 2  ;;  %v1658_v39 = vrot.slane %v1656_v23, 4 }
 0x189   : > { %v861_v52 = vpop.f32.mrb[56].mxu0  ;;  %v1719_v23 = vor.u32 %v1718_v8, %v1715_v7 }
 0x18a   : > { %1037 = vst.msk [vmem:[#allocation2 + $0x68] sm:$0xff] %vm8642_vm0, %v1011_v16  ;;  %v862_v55 = vadd.f32 %v6655_v3, %v861_v52  ;;  %v863_v56 = vpop.f32.mrb[57].mxu0  ;;  %v1661_v16 = vrot.slane %v1659_v27, 5  ;;  %v1681_v62 = vor.u32 %v1680_v38, %v1677_v34  ;;  %v1889_v27 = vshrl.u32 %v1796_v15, 16  ;;  %v6447_v15 = vld [vmem:[#allocation2 + $0x8] sm:$0x7c] }
 0x18b   : > { %v864_v60 = vpop.f32.mrb[58].mxu0  ;;  %v1669_v56 = vrot.slane %v1667_v36, 5 }
 0x18c   : > { %1822 = vrot.lane.b32.xlu0 %v1818_v54, %s6495_s16  ;;  %1448 = vrot.lane.b32.xlu1 %v1447_v57, %s6497_s22  ;;  %v976_v45 = vmax.f32 %v862_v55, 0.0  ;;  %v865_v53 = vadd.f32 %v6655_v3, %v864_v60  ;;  %v866_v61 = vpop.f32.mrb[59].mxu0  ;;  %v1666_v55 = vrot.slane %v1664_v35, 4  ;;  %v1846_v57 = vshrl.u32 %v6900_v42, 16 }
 0x18d   : > { %v1662_v63 = vor.u32 %v1661_v16, %v1658_v39 }
 0x18e   : > { %v977_v4 = vmax.f32 %v865_v53, 0.0  ;;  %v1575_v53 = vld [vmem:[#allocation2 + $0x40] sm:$0xc0]  ;;  %v1670_v9 = vor.u32 %v1669_v56, %v1666_v55  ;;  %v1848_v10 = vrot.slane %v1846_v57, 2  ;;  %v1894_v57 = vrot.slane %v1892_v44, 5 }
 0x18f   : > { %v1697_v18 = vshll.u32 %v1575_v53, 16 }
 0x190   : > { %1653 = vrot.lane.b32.xlu0 %v1652_v0, %s6496_s21  ;;  %1843 = vrot.lane.b32.xlu1 %v1842_v1, %s6496_s21  ;;  %v1012_v11 = vpack.c.bf16 %v977_v4, %v976_v45  ;;  %v1849_v45 = vshll.u32 %v6900_v42, 16  ;;  %v1576_v0 = vld [vmem:[#allocation2 + $0x48] sm:$0x7] }
 0x191   : > { %v869_v19 = vpop.f32.mrb[60].mxu0  ;;  %v1705_v20 = vshll.u32 %v1576_v0, 16 }
 0x192   : > { %1038 = vst.msk [vmem:[#allocation2 + $0x70] sm:$0xff] %vm8642_vm0, %v1012_v11  ;;  %v870_v24 = vadd.f32 %v6655_v3, %v869_v19  ;;  %v871_v25 = vpop.f32.mrb[61].mxu0  ;;  %v2080_v11 = vld [vmem:[#allocation2 + $0x50] sm:$0x1f]  ;;  %v1851_v17 = vrot.slane %v1849_v45, 3  ;;  %v1702_v19 = vshrl.u32 %v1576_v0, 16 }
 0x193   : > { %v872_v28 = vpop.f32.mrb[62].mxu0  ;;  %v1707_v35 = vrot.slane %v1705_v20, 7  ;;  %v2100_v39 = vshrl.u32 %v2080_v11, 16  ;;  %v6448_v20 = vld [vmem:[#allocation2] sm:$0x1f] }
 0x194   : > { %1834 = vrot.lane.b32.xlu0 %v1827_v12, %s6497_s22  ;;  %1691 = vrot.lane.b32.xlu1 %v1690_v13, %s6496_s21  ;;  %v978_v30 = vmax.f32 %v870_v24, 0.0  ;;  %v873_v31 = vadd.f32 %v6655_v3, %v872_v28  ;;  %v874_v32 = vpop.f32.mrb[63].mxu0  ;;  %v1831_v3 = vor.u32 %v1830_v26, %v1827_v12  ;;  %v1694_v12 = vshrl.u32 %v1575_v53, 16 }
 0x195   : > { %v2102_v24 = vshll.u32 %v2080_v11, 16  ;;  %v1671_v26 = vsel %vm8616_vm7, %v1662_v63, %v1670_v9  ;;  %v1699_v32 = vrot.slane %v1697_v18, 7  ;;  %v1704_v34 = vrot.slane %v1702_v19, 6  ;;  %v6939_v18 = vld [vmem:[#allocation2 + $0x58] sm:$0x3] }
 0x196   : > { %v979_v43 = vmax.f32 %v873_v31, 0.0  ;;  %v1696_v28 = vrot.slane %v1694_v12, 6  ;;  %v1852_v31 = vor.u32 %v1851_v17, %v1848_v10  ;;  %v1099_v17 = vrot.slane %v6447_v15, 2 }
 0x197   : > { %v1708_v50 = vor.u32 %v1707_v35, %v1704_v34  ;;  %vm8647_vm7 = vcmask 785408  }
 0x198   : > { %1820 = vrot.lane.b32.xlu0 %v1817_v37, %s6495_s16  ;;  %1864 = vrot.lane.b32.xlu1 %v6897_v33, %s6495_s16  ;;  %v1013_v52 = vpack.c.bf16 %v979_v43, %v978_v30  ;;  %v2104_v43 = vrot.slane %v2102_v24, 1  ;;  %v1700_v49 = vor.u32 %v1699_v32, %v1696_v28  ;;  %v2082_v24 = vld [vmem:[#allocation2 + $0x58] sm:$0x3]  ;;  %v6958_v32 = vld [vmem:[#allocation2 + $0x50] sm:$0xe0] }
 0x199   : > { %v877_v54 = vpop.f32.mrb[64].mxu0 }
 0x19a   : > { %v878_v59 = vadd.f32 %v6913_v58, %v877_v54  ;;  %v879_v60 = vpop.f32.mrb[65].mxu0  ;;  %1039 = vst.msk [vmem:[#allocation2 + $0x78] sm:$0xff] %vm8642_vm0, %v1013_v52  ;;  %v1799_v52 = vld [vmem:[#allocation2 + $0x58] sm:$0x7c]  ;;  %v2105_v56 = vor.u32 %v2104_v43, %v2100_v39  ;;  %v1709_v0 = vsel %vm8614_vm9, %v1700_v49, %v1708_v50  ;;  %vm8637_vm9 = vcmask 523264  }
 0x19b   : > { %v880_v61 = vpop.f32.mrb[66].mxu0  ;;  %v2083_v54 = vld [vmem:[#allocation2 + $0x58] sm:$0x7c]  ;;  %v1933_v60 = vshrl.u32 %v1799_v52, 16  ;;  %v1936_v8 = vshll.u32 %v1799_v52, 16  ;;  %v2095_v39 = vrot.slane %v2082_v24, 5 }
 0x19c   : > { %1832 = vrot.lane.b32.xlu0 %v1831_v3, %s6497_s22  ;;  %1875 = vrot.lane.b32.xlu1 %v1869_v48, %s6497_s22  ;;  %v980_v1 = vmax.f32 %v878_v59, 0.0  ;;  %v881_v2 = vadd.f32 %v6913_v58, %v880_v61  ;;  %v882_v4 = vpop.f32.mrb[67].mxu0  ;;  %v1891_v3 = vrot.slane %v1889_v27, 4  ;;  %v1861_v48 = vsel %vm8615_vm8, %v1852_v31, %v1860_v22  ;;  %vm6952_vm8 = vmand %vm8617_vm14, %vm8618_vm15 }
 0x19d   : > { %v2137_v45 = vshrl.u32 %v2083_v54, 16  ;;  %v2140_v53 = vshll.u32 %v2083_v54, 16  ;;  %v1935_v9 = vrot.slane %v1933_v60, 6  ;;  %v1938_v31 = vrot.slane %v1936_v8, 7  ;;  %vm6968_vm14 = vmor %vm6952_vm8, %vm6943_vm13 }
 0x19e   : > { %v981_v13 = vmax.f32 %v881_v2, 0.0  ;;  %v1895_v7 = vor.u32 %v1894_v57, %v1891_v3  ;;  %vm8622_vm8 = vcmask 1047556   ;;  %vm1555_vm13 = vsmask.f32 7954 }
 0x19f   : > { %v2139_v10 = vrot.slane %v2137_v45, 2  ;;  %v2142_v11 = vrot.slane %v2140_v53, 3  ;;  %v1939_v57 = vor.u32 %v1938_v31, %v1935_v9 }
 0x1a0   : > { %1682 = vrot.lane.b32.xlu0 %v1681_v62, %s6497_s22  ;;  %1873 = vrot.lane.b32.xlu1 %v1872_v6, %s6497_s22  ;;  %v1014_v21 = vpack.c.bf16 %v981_v13, %v980_v1 }
 0x1a1   : > { %v885_v25 = vpop.f32.mrb[68].mxu0 }
 0x1a2   : > { %1040 = vst.msk [vmem:[#allocation2 + $0x80] sm:$0xff] %vm8642_vm0, %v1014_v21  ;;  %v886_v29 = vadd.f32 %v6913_v58, %v885_v25  ;;  %v887_v30 = vpop.f32.mrb[69].mxu0  ;;  %v1077_v63 = vpop.permute.xlu1 %1076 }
 0x1a3   : > { %v888_v36 = vpop.f32.mrb[70].mxu0  ;;  %v2143_v30 = vor.u32 %v2142_v11, %v2139_v10 }
 0x1a4   : > { %1672 = vrot.lane.b32.xlu0 %v1671_v26, %s6495_s16  ;;  %1720 = vrot.lane.b32.xlu1 %v1719_v23, %s6497_s22  ;;  %v982_v33 = vmax.f32 %v886_v29, 0.0  ;;  %v889_v37 = vadd.f32 %v6913_v58, %v888_v36  ;;  %v890_v38 = vpop.f32.mrb[71].mxu0  ;;  %v2081_v23 = vld [vmem:[#allocation2 + $0x50] sm:$0xe0]  ;;  %v1882_v29 = vrot.slane %v6939_v18, 1 }
 0x1a5   : > { %v2094_v38 = vrot.slane %v2081_v23, 5  ;;  %v2109_v60 = vshrl.u32 %v2081_v23, 16  ;;  %v2112_v45 = vshll.u32 %v2081_v23, 16 }
 0x1a6   : > { %v983_v47 = vmax.f32 %v889_v37, 0.0 }
 0x1a7   : > { %v1068_v16 = vpop.permute.xlu0 %1067  ;;  %v2114_v15 = vrot.slane %v2112_v45, 6 }
 0x1a8   : > { %1898 = vrot.lane.b32.xlu0 %v1891_v3, %s6495_s16  ;;  %1862 = vrot.lane.b32.xlu1 %v1861_v48, %s6495_s16  ;;  %v1015_v55 = vpack.c.bf16 %v983_v47, %v982_v33  ;;  %v1214_v21 = vsel %vm8642_vm0, %v6448_v20, %v1068_v16  ;;  %v1269_v47 = vld [vmem:[#allocation3 + $0x10] sm:$0x11] }
 0x1a9   : > { %v893_v59 = vpop.f32.mrb[72].mxu0  ;;  %v1217_v36 = vsel %vm8637_vm9, %v1214_v21, %v1077_v63  ;;  %v2117_v63 = vshrl.u32 %v2082_v24, 16 }
 0x1aa   : > { %1041 = vst.msk [vmem:[#allocation2 + $0x88] sm:$0xff] %vm8642_vm0, %v1015_v55  ;;  %v894_v61 = vadd.f32 %v6913_v58, %v893_v59  ;;  %v895_v62 = vpop.f32.mrb[73].mxu0  ;;  %v1117_v13 = vpop.permute.xlu1 %1116  ;;  %v1881_v55 = vrot.slane %v6958_v32, 1  ;;  %v6988_v59 = vld [vmem:[#allocation2 + $0x58] sm:$0x80] }
 0x1ab   : > { %v896_v1 = vpop.f32.mrb[74].mxu0  ;;  %v2096_v62 = vsel %vm8634_vm1, %v2094_v38, %v2095_v39  ;;  %v2119_v20 = vrot.slane %v2117_v63, 5 }
 0x1ac   : > { %v1097_v2 = vpop.permute.xlu0 %1096  ;;  %2106 = vrot.lane.b32.xlu0 %v2105_v56, %s6495_s16  ;;  %1710 = vrot.lane.b32.xlu1 %v1709_v0, %s6495_s16  ;;  %v984_v4 = vmax.f32 %v894_v61, 0.0  ;;  %v897_v5 = vadd.f32 %v6913_v58, %v896_v1  ;;  %v898_v6 = vpop.f32.mrb[75].mxu0  ;;  %v2120_v0 = vshll.u32 %v2082_v24, 16  ;;  %v1909_v1 = vshrl.u32 %v6939_v18, 16 }
 0x1ad   : > { %v6973_v3 = vsel %vm8647_vm7, %v1217_v36, %v1097_v2  ;;  %v6996_v2 = vld [vmem:[#allocation2 + $0x60] sm:$0xf]  ;;  %v1912_v6 = vshll.u32 %v6939_v18, 16  ;;  %v1883_v11 = vsel %vm8624_vm10, %v1881_v55, %v1882_v29  ;;  %v1901_v18 = vshrl.u32 %v6958_v32, 16 }
 0x1ae   : > { %v985_v12 = vmax.f32 %v897_v5, 0.0  ;;  %v1801_v5 = vld [vmem:[#allocation2 + $0x60] sm:$0xf]  ;;  %v2132_v8 = vrot.slane %v6996_v2, 7  ;;  %v2122_v21 = vrot.slane %v2120_v0, 6  ;;  %v1911_v26 = vrot.slane %v1909_v1, 1 }
 0x1af   : > { %v2151_v38 = vshrl.u32 %v6996_v2, 16  ;;  %v1949_v39 = vshrl.u32 %v1801_v5, 16  ;;  %v2154_v63 = vshll.u32 %v6996_v2, 16  ;;  %v2304_v0 = vld [vmem:[#allocation2 + $0x60] sm:$0xf0] }
 0x1b0   : > { %v1107_v22 = vpop.permute.xlu0 %1106  ;;  %1896 = vrot.lane.b32.xlu0 %v1895_v7, %s6495_s16  ;;  %1942 = vrot.lane.b32.xlu1 %v1935_v9, %s6495_s16  ;;  %v1016_v25 = vpack.c.bf16 %v985_v12, %v984_v4  ;;  %v2131_v7 = vrot.slane %v6988_v59, 7  ;;  %v1926_v12 = vrot.slane %v1801_v5, 3  ;;  %v2123_v36 = vor.u32 %v2122_v21, %v2119_v20  ;;  %v2305_v21 = vld [vmem:[#allocation2 + $0x68] sm:$0x1] }
 0x1b1   : > { %v1223_v27 = vsel %vm8642_vm0, %v1099_v17, %v1107_v22  ;;  %v901_v28 = vpop.f32.mrb[76].mxu0  ;;  %v7004_v17 = vld [vmem:[#allocation2 + $0x58] sm:$0x80]  ;;  %v1904_v22 = vshll.u32 %v6958_v32, 16 }
 0x1b2   : > { %1042 = vst.msk [vmem:[#allocation2 + $0x90] sm:$0xff] %vm8642_vm0, %v1016_v25  ;;  %v902_v34 = vadd.f32 %v6913_v58, %v901_v28  ;;  %v903_v35 = vpop.f32.mrb[77].mxu0  ;;  %v1225_v33 = vsel %vm8637_vm9, %v1223_v27, %v1117_v13  ;;  %v2111_v13 = vrot.slane %v2109_v60, 5  ;;  %v1914_v27 = vrot.slane %v1912_v6, 2  ;;  %v2306_v6 = vld [vmem:[#allocation2 + $0x68] sm:$0x3e] }
 0x1b3   : > { %v1132_v37 = vpop.permute.xlu1 %1131  ;;  %v904_v43 = vpop.f32.mrb[78].mxu0  ;;  %v2133_v28 = vsel %vm1102_vm3, %v2131_v7, %v2132_v8  ;;  %v1945_v7 = vshrl.u32 %v7004_v17, 16 }
 0x1b4   : > { %v6976_v16 = vsel %vm8647_vm7, %v1225_v33, %v1132_v37  ;;  %1886 = vrot.lane.b32.xlu0 %v1882_v29, %s6496_s21  ;;  %2144 = vrot.lane.b32.xlu1 %v2143_v30, %s6495_s16  ;;  %v986_v48 = vmax.f32 %v902_v34, 0.0  ;;  %v905_v49 = vadd.f32 %v6913_v58, %v904_v43  ;;  %v906_v50 = vpop.f32.mrb[79].mxu0  ;;  %v2115_v31 = vor.u32 %v2114_v15, %v2111_v13 }
 0x1b5   : > { %v5700_v52 = vcombine.low %v6973_v3, %v6976_v16  ;;  %v5702_v54 = vcombine.high %v6973_v3, %v6976_v16  ;;  %v1925_v34 = vrot.slane %v7004_v17, 3  ;;  %v1903_v33 = vrot.slane %v1901_v18, 1 }
 0x1b6   : > { %v6986_v56 = vpop.permute.xlu0 %1289  ;;  %v987_v53 = vmax.f32 %v905_v49, 0.0  ;;  %v1906_v37 = vrot.slane %v1904_v22, 2  ;;  %v2323_v13 = vshll.u32 %v2304_v0, 16  ;;  %v2317_v17 = vrot.slane %v2306_v6, 5 }
 0x1b7   : > { %v1270_v61 = vsel %vm6968_vm14, %v5702_v54, %v1269_v47  ;;  %v1915_v47 = vor.u32 %v1914_v27, %v1911_v26  ;;  %v1927_v55 = vsel %vm8619_vm11, %v1925_v34, %v1926_v12  ;;  %v2088_v34 = vld [vmem:[#allocation2 + $0x68] sm:$0x3e]  ;;  %vm1522_vm11 = vsmask.f32 4368 }
 0x1b8   : > { %1271 = vst [vmem:[#allocation3 + $0x10] sm:$0x11] %v1270_v61  ;;  %2097 = vrot.lane.b32.xlu0 %v2096_v62, %s6496_s21  ;;  %1940 = vrot.lane.b32.xlu1 %v1939_v57, %s6495_s16  ;;  %v1017_v4 = vpack.c.bf16 %v987_v53, %v986_v48  ;;  %v1952_v48 = vshll.u32 %v1801_v5, 16  ;;  %v2147_v57 = vshrl.u32 %v6988_v59, 16  ;;  %v2124_v53 = vsel %vm8626_vm2, %v2115_v31, %v2123_v36 }
 0x1b9   : > { %v909_v9 = vpop.f32.mrb[80].mxu0  ;;  %v1907_v61 = vor.u32 %v1906_v37, %v1903_v33  ;;  %v2153_v62 = vrot.slane %v2151_v38, 7  ;;  %v2328_v36 = vshll.u32 %v2305_v21, 16  ;;  %v2342_v38 = vshll.u32 %v2306_v6, 16 }
 0x1ba   : > { %v7001_v10 = vpop.permute.xlu0 %1308  ;;  %1043 = vst.msk [vmem:[#allocation2 + $0x98] sm:$0xff] %vm8642_vm0, %v1017_v4  ;;  %v911_v19 = vpop.f32.mrb[81].mxu0  ;;  %v910_v24 = vadd.f32 %v6913_v58, %v909_v9  ;;  %v1951_v4 = vrot.slane %v1949_v39, 3  ;;  %v1954_v59 = vrot.slane %v1952_v48, 4 }
 0x1bb   : > { %v912_v23 = vpop.f32.mrb[82].mxu0  ;;  %v1916_v15 = vsel %vm8625_vm12, %v1907_v61, %v1915_v47  ;;  %v2149_v19 = vrot.slane %v2147_v57, 7  ;;  %v2156_v20 = vor.u32 %v2154_v63, %v2153_v62  ;;  %v2308_v47 = vld [vmem:[#allocation2 + $0x70] sm:$0x7]  ;;  %v2166_v57 = vrot.slane %v2088_v34, 1 }
 0x1bc   : > { %1884 = vrot.lane.b32.xlu0 %v1883_v11, %s6496_s21  ;;  %1930 = vrot.lane.b32.xlu1 %v1926_v12, %s6496_s21  ;;  %v914_v25 = vpop.f32.mrb[83].mxu0  ;;  %v988_v32 = vmax.f32 %v910_v24, 0.0  ;;  %v913_v35 = vadd.f32 %v6913_v58, %v912_v23  ;;  %v1955_v22 = vor.u32 %v1954_v59, %v1951_v4  ;;  %v1947_v23 = vrot.slane %v1945_v7, 3  ;;  %v7043_v24 = vld [vmem:[#allocation2 + $0x70] sm:$0xf8] }
 0x1bd   : > { %v2339_v25 = vshrl.u32 %v2306_v6, 16  ;;  %v2157_v37 = vsel %vm8633_vm4, %v2149_v19, %v2156_v20  ;;  %v2381_v48 = vshrl.u32 %v7043_v24, 16  ;;  %v7063_v59 = vld [vmem:[#allocation2 + $0x70] sm:$0xf8]  ;;  %v2368_v6 = vshrl.u32 %v2308_v47, 16 }
 0x1be   : > { %v7013_v29 = vpop.permute.xlu0 %1141  ;;  %v7015_v30 = vpop.permute.xlu1 %1330  ;;  %v989_v43 = vmax.f32 %v913_v35, 0.0  ;;  %v2325_v35 = vrot.slane %v2323_v13, 1  ;;  %v2371_v7 = vshll.u32 %v2308_v47, 16  ;;  %v2192_v13 = vshll.u32 %v2088_v34, 16  ;;  %v7072_v19 = vld [vmem:[#allocation2 + $0x68] sm:$0x1] }
 0x1bf   : > { %v2181_v47 = vshll.u32 %v7072_v19, 16 }
 0x1c0   : > { %1919 = vrot.lane.b32.xlu0 %v1911_v26, %s6497_s22  ;;  %2134 = vrot.lane.b32.xlu1 %v2133_v28, %s6496_s21  ;;  %v1018_v60 = vpack.c.bf16 %v989_v43, %v988_v32  ;;  %v2321_v32 = vshrl.u32 %v2304_v0, 16  ;;  %v2332_v43 = vshrl.u32 %v2305_v21, 16  ;;  %v7061_v0 = vrot.slane %v2339_v25, 5 }
 0x1c1   : > { %v917_v49 = vpop.f32.mrb[84].mxu0  ;;  %v2356_v21 = vrot.slane %v7043_v24, 7 }
 0x1c2   : > { %v7022_v50 = vpop.permute.xlu0 %1320  ;;  %v7024_v54 = vpop.permute.xlu1 %1181  ;;  %v918_v45 = vadd.f32 %v6913_v58, %v917_v49  ;;  %1044 = vst.msk [vmem:[#allocation2 + $0xa0] sm:$0xff] %vm8642_vm0, %v1018_v60  ;;  %v2086_v60 = vld [vmem:[#allocation2 + $0x60] sm:$0xf0] }
 0x1c3   : > { %v919_v1 = vpop.f32.mrb[85].mxu0  ;;  %v2170_v20 = vshrl.u32 %v2086_v60, 16 }
 0x1c4   : > { %2125 = vrot.lane.b32.xlu0 %v2124_v53, %s6497_s22  ;;  %1928 = vrot.lane.b32.xlu1 %v1927_v55, %s6496_s21  ;;  %v920_v5 = vpop.f32.mrb[86].mxu0  ;;  %v990_v8 = vmax.f32 %v918_v45, 0.0  ;;  %v1956_v55 = vsel %vm8618_vm15, %v1947_v23, %v1955_v22  ;;  %v2326_v1 = vor.u32 %v2325_v35, %v2321_v32  ;;  %vm8621_vm15 = vsmask.f32 7938 }
 0x1c5   : > { %v921_v9 = vadd.f32 %v6913_v58, %v920_v5  ;;  %v922_v11 = vpop.f32.mrb[87].mxu0  ;;  %v2189_v5 = vshrl.u32 %v2088_v34, 16  ;;  %v7084_v35 = vrot.slane %v2368_v6, 2  ;;  %v1467_v6 = vsel %vm8642_vm0, %v1326_v14, %v7015_v30 }
 0x1c6   : > { %v7036_v12 = vpop.permute.xlu0 %1306  ;;  %v7038_v2 = vpop.permute.xlu1 %1352  ;;  %v7069_v11 = vrot.slane %v2381_v48, 7 }
 0x1c7   : > { %v991_v18 = vmax.f32 %v921_v9, 0.0  ;;  %v7081_v34 = vrot.slane %v2189_v5, 1  ;;  %v1465_v5 = vsel %vm8642_vm0, %v6862_v41, %v7015_v30 }
 0x1c8   : > { %1917 = vrot.lane.b32.xlu0 %v1916_v15, %s6497_s22  ;;  %1959 = vrot.lane.b32.xlu1 %v1951_v4, %s6497_s22  ;;  %v2330_v4 = vrot.slane %v2328_v36, 1  ;;  %v2384_v15 = vshll.u32 %v7043_v24, 16  ;;  %v7086_v24 = vrot.slane %v2371_v7, 3 }
 0x1c9   : > { %v1019_v26 = vpack.c.bf16 %v991_v18, %v990_v8  ;;  %v925_v27 = vpop.f32.mrb[88].mxu0  ;;  %v7065_v8 = vrot.slane %v2342_v38, 6  ;;  %v2173_v18 = vshll.u32 %v2086_v60, 16  ;;  %v7094_v38 = vrot.slane %v2192_v13, 2 }
 0x1ca   : > { %v7045_v28 = vpop.permute.xlu0 %1318  ;;  %v7047_v31 = vpop.permute.xlu1 %1363  ;;  %v926_v33 = vadd.f32 %v6913_v58, %v925_v27  ;;  %v7079_v27 = vsel %vm8620_vm5, %v2326_v1, %v2330_v4  ;;  %v1230_v4 = vsel %vm8642_vm0, %v6753_v46, %v7013_v29  ;;  %v2307_v29 = vld [vmem:[#allocation2 + $0x68] sm:$0xc0]  ;;  %vm7144_vm5 = vmand %vm8622_vm8, %vm1555_vm13 }
 0x1cb   : > { %1045 = vst.msk [vmem:[#allocation2 + $0xa8] sm:$0xff] %vm8642_vm0, %v1019_v26  ;;  %v927_v39 = vpop.f32.mrb[89].mxu0  ;;  %v2204_v26 = vrot.slane %v7063_v59, 3  ;;  %v2345_v36 = vor.u32 %v7065_v8, %v7061_v0  ;;  %v7104_v60 = vrot.slane %v2173_v18, 5  ;;  %vm7158_vm13 = vmand %vm8631_vm6, %vm8621_vm15 }
 0x1cc   : > { %2318 = vrot.lane.b32.xlu0 %v2317_v17, %s6496_s21  ;;  %2158 = vrot.lane.b32.xlu1 %v2157_v37, %s6497_s22  ;;  %v928_v49 = vpop.f32.mrb[90].mxu0  ;;  %v992_v45 = vmax.f32 %v926_v33, 0.0  ;;  %v2178_v33 = vshrl.u32 %v7072_v19, 16  ;;  %v7097_v39 = vor.u32 %v2384_v15, %v7069_v11  ;;  %vm7182_vm15 = vmor %vm8633_vm4, %vm1522_vm11  ;;  %vm8664_vm11 = vsmask.f32 3328 }
 0x1cd   : > { %v929_v53 = vadd.f32 %v6913_v58, %v928_v49  ;;  %v930_v61 = vpop.f32.mrb[91].mxu0  ;;  %v6449_v49 = vld [vmem:[#allocation2 + $0x10] sm:$0xf0]  ;;  %vm8623_vm8 = vmor %vm7144_vm5, %vm7158_vm13 }
 0x1ce   : > { %v7057_v62 = vpop.permute.xlu0 %1171  ;;  %v7059_v63 = vpop.permute.xlu1 %1361  ;;  %v6450_v61 = vld [vmem:[#allocation2 + $0x18] sm:$0x1]  ;;  %v7135_v30 = vrot.slane %v2178_v33, 4  ;;  %v2195_v33 = vor.u32 %v7094_v38, %v7081_v34  ;;  %v7176_v34 = vrot.slane %v2181_v47, 5  ;;  %v2363_v38 = vshll.u32 %v2307_v29, 16 }
 0x1cf   : > { %v993_v9 = vmax.f32 %v929_v53, 0.0  ;;  %v1454_v1 = vsel %vm8642_vm0, %v6450_v61, %v6986_v56 }
 0x1d0   : > { %2336 = vrot.lane.b32.xlu0 %v2332_v43, %s6495_s16  ;;  %1957 = vrot.lane.b32.xlu1 %v1956_v55, %s6497_s22  ;;  %v7099_v43 = vrot.slane %v2170_v20, 4  ;;  %v1453_v55 = vsel %vm8642_vm0, %v6449_v49, %v6986_v56  ;;  %v1471_v56 = vsel %vm8637_vm9, %v1467_v6, %v7038_v2  ;;  %v1272_v49 = vld [vmem:[#allocation3 + $0x18] sm:$0x11] }
 0x1d1   : > { %v1020_v17 = vpack.c.bf16 %v993_v9, %v992_v45  ;;  %v933_v22 = vpop.f32.mrb[92].mxu0  ;;  %v1456_v13 = vsel %vm8637_vm9, %v1453_v55, %v7036_v12  ;;  %v1475_v51 = vsel %vm8647_vm7, %v1471_v56, %v7047_v31  ;;  %v1458_v12 = vsel %vm8637_vm9, %v1454_v1, %v7001_v10  ;;  %v2089_v1 = vld [vmem:[#allocation2 + $0x68] sm:$0xc0]  ;;  %v2090_v56 = vld [vmem:[#allocation2 + $0x70] sm:$0x7] }
 0x1d2   : > { %v1162_v23 = vpop.permute.xlu0 %1161  ;;  %v7075_v25 = vpop.permute.xlu1 %1211  ;;  %v934_v32 = vadd.f32 %v6913_v58, %v933_v22  ;;  %v1460_v41 = vsel %vm8647_vm7, %v1456_v13, %v7045_v28  ;;  %v2360_v22 = vshrl.u32 %v2307_v29, 16 }
 0x1d3   : > { %1046 = vst.msk [vmem:[#allocation2 + $0xb0] sm:$0xff] %vm8642_vm0, %v1020_v17  ;;  %v935_v37 = vpop.f32.mrb[93].mxu0  ;;  %v1232_v2 = vsel %vm8637_vm9, %v1230_v4, %v1162_v23  ;;  %v2227_v17 = vshrl.u32 %v7063_v59, 16 }
 0x1d4   : > { %2167 = vrot.lane.b32.xlu0 %v2166_v57, %s6496_s21  ;;  %2357 = vrot.lane.b32.xlu1 %v2356_v21, %s6496_s21  ;;  %v936_v48 = vpop.f32.mrb[94].mxu0  ;;  %v994_v45 = vmax.f32 %v934_v32, 0.0  ;;  %v1237_v21 = vsel %vm8642_vm0, %v6872_v40, %v7024_v54  ;;  %v7165_v40 = vld [vmem:[#allocation2 + $0x78] sm:$0x1f] }
 0x1d5   : > { %v937_v57 = vadd.f32 %v6913_v58, %v936_v48  ;;  %v938_v53 = vpop.f32.mrb[95].mxu0  ;;  %v2310_v54 = vld [vmem:[#allocation2 + $0x78] sm:$0x1f]  ;;  %v1234_v48 = vsel %vm8647_vm7, %v1232_v2, %v7057_v62  ;;  %v2616_v6 = vshll.u32 %v7165_v40, 16  ;;  %v2211_v2 = vshll.u32 %v2089_v1, 16 }
 0x1d6   : > { %v7119_v7 = vpop.permute.xlu0 %1387  ;;  %v1351_v9 = vpop.permute.xlu1 %1350  ;;  %v2403_v13 = vshrl.u32 %v2310_v54, 16 }
 0x1d7   : > { %v1469_v46 = vsel %vm8637_vm9, %v1465_v5, %v1351_v9  ;;  %v995_v15 = vmax.f32 %v937_v57, 0.0  ;;  %v2230_v5 = vshll.u32 %v7063_v59, 16  ;;  %v2362_v9 = vrot.slane %v2360_v22, 2 }
 0x1d8   : > { %v1473_v14 = vsel %vm8647_vm7, %v1469_v46, %v7059_v63  ;;  %2348 = vrot.lane.b32.xlu0 %v7061_v0, %s6497_s22  ;;  %2205 = vrot.lane.b32.xlu1 %v2204_v26, %s6496_s21  ;;  %v1462_v63 = vsel %vm8647_vm7, %v1458_v12, %v7022_v50  ;;  %v2365_v59 = vrot.slane %v2363_v38, 3  ;;  %v2208_v12 = vshrl.u32 %v2089_v1, 16 }
 0x1d9   : > { %v5704_v19 = vcombine.high %v1460_v41, %v1473_v14  ;;  %v1021_v28 = vpack.c.bf16 %v995_v15, %v994_v45  ;;  %v7140_v20 = vpop.f32.mrb[96].mxu0  ;;  %v5706_v23 = vcombine.low %v1462_v63, %v1475_v51  ;;  %v1558_v51 = vld [vmem:[#allocation3 + $0x10] sm:$0xff]  ;;  %v2406_v14 = vshll.u32 %v2310_v54, 16 }
 0x1da   : > { %v7153_v10 = vpop.permute.xlu0 %1592  ;;  %v1202_v18 = vpop.permute.xlu1 %1201  ;;  %v2216_v63 = vshrl.u32 %v2090_v56, 16  ;;  %v2614_v54 = vshrl.u32 %v7165_v40, 16 }
 0x1db   : > { %v1525_v32 = vshrl.u32 %v5704_v19, 16  ;;  %v1239_v50 = vsel %vm8637_vm9, %v1237_v21, %v1202_v18  ;;  %1047 = vst.msk [vmem:[#allocation2 + $0xb8] sm:$0xff] %vm8642_vm0, %v1021_v28  ;;  %v943_v37 = vpop.f32.mrb[97].mxu0  ;;  %v1528_v53 = vshll.u32 %v5704_v19, 16  ;;  %v1540_v46 = vshll.u32 %v5706_v23, 16 }
 0x1dc   : > { %v1241_v55 = vsel %vm8647_vm7, %v1239_v50, %v7075_v25  ;;  %2334 = vrot.lane.b32.xlu0 %v7079_v27, %s6495_s16  ;;  %2378 = vrot.lane.b32.xlu1 %v7084_v35, %s6495_s16  ;;  %v7178_v45 = vpop.f32.mrb[98].mxu0  ;;  %v2219_v21 = vshll.u32 %v2090_v56, 16  ;;  %v2374_v23 = vor.u32 %v7086_v24, %v7084_v35  ;;  %v2184_v50 = vor.u32 %v7176_v34, %v7135_v30 }
 0x1dd   : > { %v1527_v62 = vrot.slane %v1525_v32, 7  ;;  %v5701_v25 = vcombine.low %v1234_v48, %v1241_v55  ;;  %v5703_v61 = vcombine.high %v1234_v48, %v1241_v55  ;;  %v946_v27 = vpop.f32.mrb[99].mxu0  ;;  %v2176_v32 = vor.u32 %v7104_v60, %v7099_v43  ;;  %v2597_v60 = vld [vmem:[#allocation2 + $0x80] sm:$0x7c]  ;;  %v7236_v55 = vld [vmem:[#allocation2 + $0x28] sm:$0x1f] }
 0x1de   : > { %v7190_v47 = vpop.permute.xlu0 %1385  ;;  %v7192_v4 = vpop.permute.xlu1 %1433  ;;  %v2366_v37 = vor.u32 %v2365_v59, %v2362_v9  ;;  %v2408_v16 = vrot.slane %v2406_v14, 5  ;;  %v2213_v35 = vrot.slane %v2211_v2, 7  ;;  %v2218_v24 = vrot.slane %v2216_v63, 6 }
 0x1df   : > { %v1530_v29 = vor.u32 %v1528_v53, %v1527_v62  ;;  %v1538_v15 = vrot.slane %v1527_v62, 4  ;;  %1263 = vst [vmem:[#allocation3 + $0x8] sm:$0xff] %v5701_v25  ;;  %v1273_v41 = vsel %vm6968_vm14, %v5703_v61, %v1272_v49  ;;  %v2221_v43 = vrot.slane %v2219_v21, 7  ;;  %v2596_v49 = vld [vmem:[#allocation2 + $0x80] sm:$0x3] }
 0x1e0   : > { %1274 = vst [vmem:[#allocation3 + $0x18] sm:$0x11] %v1273_v41  ;;  %2346 = vrot.lane.b32.xlu0 %v2345_v36, %s6497_s22  ;;  %2389 = vrot.lane.b32.xlu1 %v7069_v11, %s6497_s22  ;;  %v2229_v11 = vrot.slane %v2227_v17, 3  ;;  %v2232_v36 = vrot.slane %v2230_v5, 4  ;;  %v2618_v17 = vrot.slane %v2616_v6, 1  ;;  %v1366_v34 = vrot.slane %v7236_v55, 4 }
 0x1e1   : > { %v1542_v19 = vsel %vm7182_vm15, %v1538_v15, %v1540_v46  ;;  %v1559_v28 = vsel %vm8623_vm8, %v1530_v29, %v1558_v51  ;;  %vm8665_vm8 = vsmask.f32 5376  ;;  %v2651_v53 = vshrl.u32 %v2597_v60, 16  ;;  %v7242_v25 = vld [vmem:[#allocation2 + $0x78] sm:$0xe0] }
 0x1e2   : > { %1560 = vst [vmem:[#allocation3 + $0x10] sm:$0xff] %v1559_v28  ;;  %1564 = vst [vmem:[#allocation3 + $0x20] sm:$0x11] %v1542_v19  ;;  %v7211_v0 = vpop.permute.xlu0 %1375  ;;  %v7213_v8 = vpop.permute.xlu1 %1630  ;;  %v6483_v18 = vcombine.low %v6973_v3, %v1559_v28  ;;  %v5738_v22 = vcombine.high %v5700_v52, %v1559_v28  ;;  %v7229_v3 = vrot.slane %v2403_v13, 4  ;;  %v2210_v52 = vrot.slane %v2208_v12, 6 }
 0x1e3   : > { %v2233_v40 = vor.u32 %v2232_v36, %v2229_v11  ;;  %v2619_v38 = vor.u32 %v2618_v17, %v2614_v54  ;;  %v2375_v62 = vsel %vm8665_vm8, %v2366_v37, %v2374_v23  ;;  %v2222_v27 = vor.u32 %v2221_v43, %v2218_v24  ;;  %v7245_v6 = vld [vmem:[#allocation2 + $0x80] sm:$0x3]  ;;  %v2313_v29 = vld [vmem:[#allocation2 + $0x80] sm:$0x7c] }
 0x1e4   : > { %2196 = vrot.lane.b32.xlu0 %v2195_v33, %s6497_s22  ;;  %2387 = vrot.lane.b32.xlu1 %v7097_v39, %s6497_s22  ;;  %v2185_v33 = vsel %vm8664_vm11, %v2176_v32, %v2184_v50  ;;  %v2595_v39 = vld [vmem:[#allocation2 + $0x78] sm:$0xe0]  ;;  %v2409_v61 = vor.u32 %v2408_v16, %v7229_v3  ;;  %v2214_v1 = vor.u32 %v2213_v35, %v2210_v52  ;;  %v2654_v5 = vshll.u32 %v2597_v60, 16  ;;  %v7265_v52 = vld [vmem:[#allocation2 + $0x80] sm:$0x80] }
 0x1e5   : > { %3749 = vmatprep.mubr.bf16.mxu1 %v5738_v22  ;;  %v2608_v56 = vrot.slane %v2595_v39, 5  ;;  %v2609_v46 = vrot.slane %v2596_v49, 5  ;;  %v2623_v15 = vshrl.u32 %v2595_v39, 16  ;;  %v2626_v41 = vshll.u32 %v2595_v39, 16 }
 0x1e6   : > { %v7231_v48 = vpop.permute.xlu0 %1583  ;;  %v7233_v30 = vpop.permute.xlu1 %1431  ;;  %3750 = vmatmul.mubr.bf16.vlgmr.msra.gmra.mrb[0].mxu1 %v6483_v18  ;;  %v2631_v51 = vshrl.u32 %v2596_v49, 16  ;;  %v2634_v59 = vshll.u32 %v2596_v49, 16  ;;  %v2415_v14 = vshrl.u32 %v7242_v25, 16  ;;  %v2418_v12 = vshll.u32 %v7242_v25, 16 }
 0x1e7   : > { %v2653_v2 = vrot.slane %v2651_v53, 2  ;;  %v2395_v19 = vrot.slane %v7242_v25, 1  ;;  %v2423_v28 = vshrl.u32 %v7245_v6, 16  ;;  %v2426_v63 = vshll.u32 %v7245_v6, 16 }
 0x1e8   : > { %2186 = vrot.lane.b32.xlu0 %v2185_v33, %s6495_s16  ;;  %2234 = vrot.lane.b32.xlu1 %v2233_v40, %s6497_s22  ;;  %vm8666_vm8 = vsmask.f32 1280  ;;  %v2656_v11 = vrot.slane %v2654_v5, 3  ;;  %v2447_v36 = vshrl.u32 %v2313_v29, 16  ;;  %v2450_v18 = vshll.u32 %v2313_v29, 16 }
 0x1e9   : > { %v2223_v21 = vsel %vm8666_vm8, %v2214_v1, %v2222_v27  ;;  %v2625_v32 = vrot.slane %v2623_v15, 5  ;;  %v2628_v50 = vrot.slane %v2626_v41, 6  ;;  %v942_v54 = vadd.f32 %v6913_v58, %v7140_v20  ;;  %v7271_v40 = vld [vmem:[#allocation2 + $0x80] sm:$0x80]  ;;  %v7280_v27 = vld [vmem:[#allocation2 + $0x88] sm:$0xf] }
 0x1ea   : > { %v7247_v9 = vpop.permute.xlu0 %1373  ;;  %v7249_v13 = vpop.permute.xlu1 %1421  ;;  %v945_v17 = vadd.f32 %v6913_v58, %v7178_v45  ;;  %v2633_v37 = vrot.slane %v2631_v51, 5  ;;  %v2636_v16 = vrot.slane %v2634_v59, 6  ;;  %v2417_v35 = vrot.slane %v2415_v14, 1  ;;  %v6452_v59 = vld [vmem:[#allocation2 + $0x38] sm:$0xf0] }
 0x1eb   : > { %v2420_v24 = vrot.slane %v2418_v12, 2  ;;  %v7269_v43 = vrot.slane %v2423_v28, 1  ;;  %v2428_v60 = vrot.slane %v2426_v63, 2  ;;  %v996_v33 = vmax.f32 %v942_v54, 0.0  ;;  %v6453_v12 = vld [vmem:[#allocation2 + $0x40] sm:$0x1] }
 0x1ec   : > { %2620 = vrot.lane.b32.xlu0 %v2619_v38, %s6495_s16  ;;  %2376 = vrot.lane.b32.xlu1 %v2375_v62, %s6495_s16  ;;  %v997_v20 = vmax.f32 %v945_v17, 0.0  ;;  %vm8627_vm11 = vcmask 1045508   ;;  %v2610_v58 = vsel %vm8634_vm1, %v2608_v56, %v2609_v46  ;;  %v2657_v45 = vor.u32 %v2656_v11, %v2653_v2  ;;  %v6454_v28 = vld [vmem:[#allocation2 + $0x30] sm:$0x7c]  ;;  %v7290_v11 = vld [vmem:[#allocation2 + $0x48] sm:$0x7] }
 0x1ed   : > { %v8629_v39 = vrot.slane %v7245_v6, 1  ;;  %v7275_v49 = vrot.slane %v2447_v36, 6  ;;  %v2452_v53 = vrot.slane %v2450_v18, 7  ;;  %v2629_v25 = vor.u32 %v2628_v50, %v2625_v32  ;;  %v6456_v32 = vld [vmem:[#allocation2 + $0x30] sm:$0x7c] }
 0x1ee   : > { %v7259_v22 = vpop.permute.xlu0 %1409  ;;  %v1621_v23 = vpop.permute.xlu1 %1620  ;;  %v2645_v1 = vrot.slane %v7265_v52, 7  ;;  %v1022_v5 = vpack.c.bf16 %v997_v20, %v996_v33  ;;  %v2637_v29 = vor.u32 %v2636_v16, %v2633_v37  ;;  %v2439_v56 = vrot.slane %v7271_v40, 3 }
 0x1ef   : > { %v8628_v46 = vrot.slane %v7280_v27, 3  ;;  %v2421_v41 = vor.u32 %v2420_v24, %v2417_v35  ;;  %v2429_v51 = vor.u32 %v2428_v60, %v7269_v43  ;;  %v1648_v14 = vrot.slane %v6452_v59, 4  ;;  %v6457_v24 = vld [vmem:[#allocation2 + $0x28] sm:$0x1f] }
 0x1f0   : > { %2410 = vrot.lane.b32.xlu0 %v2409_v61, %s6495_s16  ;;  %2224 = vrot.lane.b32.xlu1 %v2223_v21, %s6495_s16  ;;  %v7277_v61 = vld [vmem:[#allocation2 + $0x88] sm:$0xf]  ;;  %v1649_v2 = vrot.slane %v6453_v12, 4  ;;  %1048 = vst.msk [vmem:[#allocation2 + $0xc0] sm:$0xff] %vm8642_vm0, %v1022_v5  ;;  %v1614_v63 = vrot.slane %v6454_v28, 2  ;;  %v1838_v21 = vrot.slane %v6900_v42, 2  ;;  %v2397_v37 = vsel %vm8624_vm10, %v2395_v19, %v8629_v39 }
 0x1f1   : > { %v2646_v15 = vrot.slane %v7277_v61, 7  ;;  %v8630_v36 = vrot.slane %v7290_v11, 2  ;;  %v2665_v18 = vshrl.u32 %v7277_v61, 16  ;;  %v1412_v50 = vrot.slane %v6456_v32, 6  ;;  %v6459_v28 = vld [vmem:[#allocation2 + $0x48] sm:$0x7] }
 0x1f2   : > { %v1612_v38 = vpop.permute.xlu0 %1611  ;;  %v1420_v62 = vpop.permute.xlu1 %1419  ;;  %v2453_v16 = vor.u32 %v2452_v53, %v7275_v49  ;;  %v2661_v35 = vshrl.u32 %v7265_v52, 16  ;;  %v1723_v42 = vsel %vm8642_vm0, %v6457_v24, %v7231_v48  ;;  %v1730_v60 = vsel %vm8642_vm0, %v1614_v63, %v1621_v23 }
 0x1f3   : > { %v2638_v33 = vsel %vm8626_vm2, %v2629_v25, %v2637_v29  ;;  %v2647_v20 = vsel %vm1102_vm3, %v2645_v1, %v2646_v15  ;;  %v2430_v19 = vsel %vm8625_vm12, %v2421_v41, %v2429_v51  ;;  %vm8667_vm8 = vcmask 1044480  }
 0x1f4   : > { %2611 = vrot.lane.b32.xlu0 %v2610_v58, %s6496_s21  ;;  %2658 = vrot.lane.b32.xlu1 %v2657_v45, %s6495_s16  ;;  %v2441_v52 = vsel %vm8667_vm8, %v2439_v56, %v8628_v46  ;;  %v2459_v58 = vshrl.u32 %v7271_v40, 16  ;;  %v7312_v48 = vsel %vm8631_vm6, %v1648_v14, %v1649_v2  ;;  %vm8668_vm10 = vcmask 1045504  }
 0x1f5   : > { %v7317_v23 = vsel %vm8668_vm10, %v1838_v21, %v8630_v36  ;;  %v2667_v45 = vrot.slane %v2665_v18, 7  ;;  %v2668_v53 = vshll.u32 %v7277_v61, 16  ;;  %v2463_v25 = vshrl.u32 %v7280_v27, 16  ;;  %v7493_v36 = vld [vmem:[#allocation2 + $0xa8] sm:$0x3] }
 0x1f6   : > { %v1408_v54 = vpop.permute.xlu0 %1407  ;;  %v1451_v17 = vpop.permute.xlu1 %1450  ;;  %v1478_v1 = vsel %vm8642_vm0, %v1366_v34, %v7247_v9  ;;  %v1725_v40 = vsel %vm8637_vm9, %v1723_v42, %v7153_v10  ;;  %v1732_v29 = vsel %vm8637_vm9, %v1730_v60, %v7213_v8  ;;  %v2466_v56 = vshll.u32 %v7280_v27, 16 }
 0x1f7   : > { %v1493_v61 = vsel %vm8642_vm0, %v1412_v50, %v7249_v13  ;;  %v1727_v41 = vsel %vm8647_vm7, %v1725_v40, %v1612_v38  ;;  %v1491_v51 = vsel %vm8642_vm0, %v1412_v50, %v1420_v62  ;;  %vm8669_vm10 = vsmask.f32 5376  ;;  %v6458_v13 = vld [vmem:[#allocation2 + $0x40] sm:$0xc0]  ;;  %v7393_v40 = vld [vmem:[#allocation2 + $0x90] sm:$0x3e] }
 0x1f8   : > { %2398 = vrot.lane.b32.xlu0 %v2397_v37, %s6496_s21  ;;  %2454 = vrot.lane.b32.xlu1 %v2453_v16, %s6495_s16  ;;  %vm7339_vm8 = vmand %vm8627_vm11, %vm8669_vm10  ;;  %v2663_v14 = vrot.slane %v2661_v35, 7  ;;  %v1686_v12 = vrot.slane %v6458_v13, 6  ;;  %v1480_v38 = vsel %vm8642_vm0, %v1366_v34, %v7211_v0  ;;  %vm8672_vm12 = vsmask.f32 1280  ;;  %v7365_v37 = vld [vmem:[#allocation2 + $0x90] sm:$0x3e] }
 0x1f9   : > { %vm8673_vm2 = vcmask 1041408   ;;  %v2670_v2 = vor.u32 %v2668_v53, %v2667_v45  ;;  %v1687_v63 = vrot.slane %v6459_v28, 6  ;;  %v7355_v21 = vrot.slane %v2463_v25, 3  ;;  %v7388_v45 = vld [vmem:[#allocation2 + $0x88] sm:$0xf0] }
 0x1fa   : > { %v7327_v5 = vpop.permute.xlu0 %1804  ;;  %v1645_v15 = vpop.permute.xlu1 %1644  ;;  %vm7351_vm10 = vmand %vm8673_vm2, %vm8672_vm12  ;;  %v1482_v18 = vsel %vm8637_vm9, %v1478_v1, %v7190_v47  ;;  %v1497_v32 = vsel %vm8637_vm9, %v1493_v61, %v7192_v4  ;;  %v1495_v0 = vsel %vm8637_vm9, %v1491_v51, %v7233_v30  ;;  %vm8676_vm2 = vcmask 1044484   ;;  %v1784_v4 = vld [vmem:[#allocation3 + $0x30] sm:$0x33] }
 0x1fb   : > { %v1734_v9 = vsel %vm8647_vm7, %v1732_v29, %v1645_v15  ;;  %v1486_v16 = vsel %vm8647_vm7, %v1482_v18, %v1408_v54  ;;  %v1501_v35 = vsel %vm8647_vm7, %v1497_v32, %v1451_v17  ;;  %vm7371_vm12 = vmor %vm1102_vm3, %vm8676_vm2  ;;  %v8677_v47 = vmov 0  ;;  %v2601_v18 = vld [vmem:[#allocation2 + $0x90] sm:$0x1] }
 0x1fc   : > { %v5708_v59 = vcombine.low %v1727_v41, %v1734_v9  ;;  %v5710_v8 = vcombine.high %v1727_v41, %v1734_v9  ;;  %2639 = vrot.lane.b32.xlu0 %v2638_v33, %s6497_s22  ;;  %2648 = vrot.lane.b32.xlu1 %v2647_v20, %s6496_s21  ;;  %v8678_v47 = vsel %vm7371_vm12, 4294967295, %v8677_v47  ;;  %v2468_v42 = vrot.slane %v2466_v56, 4  ;;  %vm7382_vm11 = vmor %vm7339_vm8, %vm7351_vm10  ;;  %v2818_v20 = vld [vmem:[#allocation2 + $0x90] sm:$0x1]  ;;  %v7404_v41 = vld [vmem:[#allocation2 + $0x98] sm:$0xf8] }
 0x1fd   : > { %v1484_v30 = vsel %vm8637_vm9, %v1480_v38, %v7119_v7  ;;  %v8679_v54 = vmov 0  ;;  %v2830_v53 = vrot.slane %v7365_v37, 5  ;;  %v2845_v25 = vshrl.u32 %v2818_v20, 16  ;;  %v7410_v9 = vld [vmem:[#allocation2 + $0x98] sm:$0xf8]  ;;  %vm8683_vm2 = vmor %vm7144_vm5, %vm7158_vm13 }
 0x1fe   : > { %v1766_v55 = vrot.slane %v5708_v59, 7  ;;  %v7361_v50 = vpop.permute.xlu0 %1822  ;;  %v1449_v34 = vpop.permute.xlu1 %1448  ;;  %v8680_v54 = vsel %vm7382_vm11, 4294967295, %v8679_v54  ;;  %v1769_v60 = vrot.slane %v5710_v8, 7  ;;  %v1488_v7 = vsel %vm8647_vm7, %v1484_v30, %v7259_v22  ;;  %v7413_v59 = vld [vmem:[#allocation2 + $0x98] sm:$0x7] }
 0x1ff   : > { %v1499_v24 = vsel %vm8647_vm7, %v1495_v0, %v1449_v34  ;;  %v2461_v1 = vrot.slane %v2459_v58, 3  ;;  %v5707_v29 = vcombine.low %v1488_v7, %v1501_v35  ;;  %vm8681_vm8 = vcmask 1041408  }
 0x200   : > { %v1768_v17 = vrot.slane %v1766_v55, 4  ;;  %1778 = vst [vmem:[#allocation3 + $0x20] sm:$0xee] %v1766_v55  ;;  %v5705_v33 = vcombine.high %v1486_v16, %v1499_v24  ;;  %2431 = vrot.lane.b32.xlu0 %v2430_v19, %s6497_s22  ;;  %2442 = vrot.lane.b32.xlu1 %v2441_v52, %s6496_s21  ;;  %v7402_v61 = vsel %vm8681_vm8, %v1686_v12, %v1687_v63  ;;  %v2836_v10 = vshll.u32 %v7388_v45, 16  ;;  %v1561_v24 = vld [vmem:[#allocation3 + $0x18] sm:$0xff]  ;;  %vm8684_vm5 = vmmov %vm8681_vm8 }
 0x201   : > { %v2671_v58 = vsel %vm8633_vm4, %v2663_v14, %v2670_v2  ;;  %v2469_v51 = vor.u32 %v2468_v42, %v7355_v21  ;;  %v2680_v12 = vrot.slane %v7393_v40, 1  ;;  %v2869_v38 = vrot.slane %v7410_v9, 7  ;;  %v2600_v14 = vld [vmem:[#allocation2 + $0x88] sm:$0xf0] }
 0x202   : > { %v1770_v15 = vsel %vm7371_vm12, %v1768_v17, %v1769_v60  ;;  %v1532_v56 = vshrl.u32 %v5705_v33, 16  ;;  %v7397_v19 = vpop.permute.xlu0 %1653  ;;  %v7399_v52 = vpop.permute.xlu1 %1843  ;;  %v1535_v13 = vshll.u32 %v5705_v33, 16  ;;  %v2852_v62 = vshrl.u32 %v7365_v37, 16 }
 0x203   : > { %v1785_v22 = vsel %vm7382_vm11, %v1770_v15, %v1784_v4  ;;  %v2718_v2 = vrot.slane %v7404_v41, 3  ;;  %v2834_v28 = vshrl.u32 %v7388_v45, 16  ;;  %v2841_v63 = vshll.u32 %v2818_v20, 16  ;;  %v2820_v4 = vld [vmem:[#allocation2 + $0x90] sm:$0xc0] }
 0x204   : > { %1786 = vst [vmem:[#allocation3 + $0x30] sm:$0x33] %v1785_v22  ;;  %v1534_v8 = vrot.slane %v1532_v56, 7  ;;  %2831 = vrot.lane.b32.xlu0 %v2830_v53, %s6496_s21  ;;  %2672 = vrot.lane.b32.xlu1 %v2671_v58, %s6497_s22  ;;  %v1545_v32 = vshll.u32 %v5707_v29, 16  ;;  %v2881_v35 = vshrl.u32 %v7413_v59, 16  ;;  %v2838_v30 = vrot.slane %v2836_v10, 1 }
 0x205   : > { %vm8682_vm10 = vsmask.f32 4352  ;;  %v2684_v17 = vshrl.u32 %v2600_v14, 16  ;;  %v2687_v60 = vshll.u32 %v2600_v14, 16  ;;  %v2692_v45 = vshrl.u32 %v2601_v18, 16 }
 0x206   : > { %v1537_v55 = vor.u32 %v1535_v13, %v1534_v8  ;;  %v1543_v0 = vrot.slane %v1534_v8, 4  ;;  %v7422_v34 = vpop.permute.xlu0 %1834  ;;  %v7424_v16 = vpop.permute.xlu1 %1691  ;;  %v2470_v42 = vsel %vm8682_vm10, %v2461_v1, %v2469_v51  ;;  %v2695_v7 = vshll.u32 %v2601_v18, 16  ;;  %v7437_v53 = vld [vmem:[#allocation2 + $0xa0] sm:$0x1f]  ;;  %v2603_v15 = vld [vmem:[#allocation2 + $0x90] sm:$0xc0] }
 0x207   : > { %v7439_v1 = vrot.slane %v2852_v62, 5  ;;  %v2855_v57 = vshll.u32 %v7365_v37, 16  ;;  %v2873_v29 = vshrl.u32 %v2820_v4, 16  ;;  %v2876_v31 = vshll.u32 %v2820_v4, 16  ;;  %v2604_v51 = vld [vmem:[#allocation2 + $0x98] sm:$0x7] }
 0x208   : > { %v1547_v33 = vsel %vm7182_vm15, %v1543_v0, %v1545_v32  ;;  %v1562_v20 = vsel %vm8683_vm2, %v1537_v55, %v1561_v24  ;;  %2849 = vrot.lane.b32.xlu0 %v2845_v25, %s6495_s16  ;;  %2471 = vrot.lane.b32.xlu1 %v2470_v42, %s6497_s22  ;;  %v2843_v25 = vrot.slane %v2841_v63, 1  ;;  %v2894_v22 = vshrl.u32 %v7410_v9, 16  ;;  %v7455_v0 = vld [vmem:[#allocation2 + $0xb0] sm:$0xf0] }
 0x209   : > { %1563 = vst [vmem:[#allocation3 + $0x18] sm:$0xff] %v1562_v20  ;;  %1565 = vst [vmem:[#allocation3 + $0x28] sm:$0x11] %v1547_v33  ;;  %v2884_v58 = vshll.u32 %v7413_v59, 16  ;;  %v2676_v10 = vrot.slane %v2600_v14, 4  ;;  %v2839_v8 = vor.u32 %v2838_v30, %v2834_v28  ;;  %v7448_v13 = vrot.slane %v2881_v35, 2 }
 0x20a   : > { %v7442_v26 = vpop.permute.xlu0 %1820  ;;  %v7444_v56 = vpop.permute.xlu1 %1864  ;;  %v7450_v62 = vrot.slane %v2684_v17, 4  ;;  %v3129_v37 = vshll.u32 %v7437_v53, 16  ;;  %v2689_v32 = vrot.slane %v2687_v60, 5  ;;  %v2694_v55 = vrot.slane %v2692_v45, 4  ;;  %v7457_v14 = vld [vmem:[#allocation2 + $0xb8] sm:$0x1] }
 0x20b   : > { %v2697_v63 = vrot.slane %v2695_v7, 5  ;;  %v2677_v4 = vrot.slane %v2601_v18, 4  ;;  %v2875_v59 = vrot.slane %v2873_v29, 2  ;;  %v2878_v24 = vrot.slane %v2876_v31, 3 }
 0x20c   : > { %2681 = vrot.lane.b32.xlu0 %v2680_v12, %s6496_s21  ;;  %2870 = vrot.lane.b32.xlu1 %v2869_v38, %s6496_s21  ;;  %v2714_v28 = vrot.slane %v2603_v15, 6  ;;  %v2715_v35 = vrot.slane %v2604_v51, 6  ;;  %v2886_v17 = vrot.slane %v2884_v58, 3  ;;  %v2722_v12 = vshrl.u32 %v2603_v15, 16  ;;  %v6311_v58 = vld [vmem:[%s8607_s3 + $0x80] sm:$0xff]  }
 0x20d   : > { %v2725_v33 = vshll.u32 %v2603_v15, 16  ;;  %v7464_v38 = vsel %vm8631_vm6, %v2676_v10, %v2677_v4  ;;  %v2730_v60 = vshrl.u32 %v2604_v51, 16  ;;  %v2733_v20 = vshll.u32 %v2604_v51, 16  ;;  %v6310_v15 = vld [vmem:[%s8607_s3 + $0xc0] sm:$0xff]  }
 0x20e   : > { %v7459_v42 = vpop.permute.xlu0 %1832  ;;  %v7461_v30 = vpop.permute.xlu1 %1875  ;;  %v7467_v18 = vsel %vm8684_vm5, %v2714_v28, %v2715_v35  ;;  %v3189_v45 = vrot.slane %v7455_v0, 4  ;;  %vm8685_vm15 = vsmask.f32 7424  ;;  %v2857_v29 = vrot.slane %v2855_v57, 6  ;;  %6027 = vmatprep.subr.bf16.mxu1 %v6310_v15 }
 0x20f   : > { %v2844_v7 = vsel %vm8685_vm15, %v2839_v8, %v2843_v25  ;;  %v2896_v31 = vrot.slane %v2894_v22, 7  ;;  %v3190_v51 = vrot.slane %v7457_v14, 4  ;;  %v2690_v10 = vor.u32 %v2689_v32, %v7450_v62  ;;  %v7486_v25 = vld [vmem:[#allocation2 + $0xa0] sm:$0xe0]  ;;  %6028 = vmatpush3.bf16.msra.mxu1 %v6311_v58 }
 0x210   : > { %2861 = vrot.lane.b32.xlu0 %v7439_v1, %s6497_s22  ;;  %2719 = vrot.lane.b32.xlu1 %v2718_v2, %s6496_s21  ;;  %v2897_v4 = vshll.u32 %v7410_v9, 16  ;;  %v3127_v2 = vshrl.u32 %v7437_v53, 16  ;;  %v3131_v28 = vrot.slane %v3129_v37, 1  ;;  %v2698_v8 = vor.u32 %v2697_v63, %v2694_v55 }
 0x211   : > { %v2879_v35 = vor.u32 %v2878_v24, %v2875_v59  ;;  %v2887_v46 = vor.u32 %v2886_v17, %v7448_v13  ;;  %v7491_v39 = vrot.slane %v2722_v12, 6  ;;  %v7495_v62 = vrot.slane %v2725_v33, 7 }
 0x212   : > { %v7488_v57 = vpop.permute.xlu0 %1682  ;;  %v1874_v22 = vpop.permute.xlu1 %1873  ;;  %v7497_v9 = vrot.slane %v2730_v60, 6  ;;  %v7499_v53 = vrot.slane %v2733_v20, 7  ;;  %v7502_v37 = vsel %vm8631_vm6, %v3189_v45, %v3190_v51  ;;  %v2858_v32 = vor.u32 %v2857_v29, %v7439_v1  ;;  %v7513_v20 = vld [vmem:[#allocation2 + $0xa8] sm:$0x7c] }
 0x213   : > { %vm2065_vm13 = vcmask 1043457   ;;  %v3136_v55 = vshrl.u32 %v7486_v25, 16  ;;  %v3139_v63 = vshll.u32 %v7486_v25, 16  ;;  %vm8632_vm8 = vsmask.f32 7942 }
 0x214   : > { %2847 = vrot.lane.b32.xlu0 %v2844_v7, %s6495_s16  ;;  %2891 = vrot.lane.b32.xlu1 %v7448_v13, %s6495_s16  ;;  %vm2068_vm10 = vcmask 1047557   ;;  %vm2069_vm2 = vsmask.f32 7958  ;;  %v2899_v59 = vor.u32 %v2897_v4, %v2896_v31  ;;  %vm8686_vm5 = vsmask.f32 3328 }
 0x215   : > { %v2699_v12 = vsel %vm8686_vm5, %v2690_v10, %v2698_v8  ;;  %v3132_v33 = vor.u32 %v3131_v28, %v3127_v2  ;;  %v3121_v60 = vrot.slane %v7486_v25, 5  ;;  %v3122_v13 = vrot.slane %v7493_v36, 5  ;;  %v6461_v8 = vld [vmem:[#allocation2 + $0x38] sm:$0xf0]  ;;  %vm7589_vm6 = vmand %vm2068_vm10, %vm2069_vm2 }
 0x216   : > { %v1673_v24 = vpop.permute.xlu0 %1672  ;;  %v1721_v17 = vpop.permute.xlu1 %1720  ;;  %v8687_v1 = vrot.slane %v7290_v11, 2  ;;  %vm8688_vm15 = vsmask.f32 5376  ;;  %v2728_v29 = vor.u32 %v7495_v62, %v7491_v39  ;;  %v2736_v15 = vor.u32 %v7499_v53, %v7497_v9  ;;  %v2072_v9 = vld [vmem:[#allocation3 + $0x30] sm:$0xee] }
 0x217   : > { %v2888_v7 = vsel %vm8688_vm15, %v2879_v35, %v2887_v46  ;;  %v7528_v51 = vrot.slane %v3136_v55, 5  ;;  %v7530_v11 = vrot.slane %v3139_v63, 6  ;;  %v3144_v10 = vshrl.u32 %v7493_v36, 16  ;;  %v6460_v46 = vld [vmem:[#allocation2 + $0x40] sm:$0x1]  ;;  %vm7578_vm15 = vmand %vm2065_vm13, %vm8632_vm8 }
 0x218   : > { %v1976_v45 = vsel %vm8642_vm0, %v8687_v1, %v7399_v52  ;;  %2859 = vrot.lane.b32.xlu0 %v2858_v32, %s6497_s22  ;;  %2902 = vrot.lane.b32.xlu1 %v2896_v31, %s6497_s22  ;;  %v1963_v4 = vsel %vm8642_vm0, %v6460_v46, %v7327_v5  ;;  %vm2031_vm5 = vsmask.f32 5392  ;;  %v3164_v28 = vshrl.u32 %v7513_v20, 16  ;;  %vm7617_vm10 = vmor %vm7589_vm6, %vm7578_vm15 }
 0x219   : > { %v1980_v58 = vsel %vm8637_vm9, %v1976_v45, %v7444_v56  ;;  %v3147_v56 = vshll.u32 %v7493_v36, 16  ;;  %v1962_v31 = vsel %vm8642_vm0, %v6461_v8, %v7327_v5  ;;  %v1967_v35 = vsel %vm8637_vm9, %v1963_v4, %v7361_v50 }
 0x21a   : > { %v1984_v2 = vsel %vm8647_vm7, %v1980_v58, %v7461_v30  ;;  %v1974_v32 = vsel %vm8642_vm0, %v7317_v23, %v7399_v52  ;;  %v7546_v55 = vpop.permute.xlu0 %1898  ;;  %v1863_v63 = vpop.permute.xlu1 %1862  ;;  %v3167_v30 = vshll.u32 %v7513_v20, 16  ;;  %v1737_v1 = vsel %vm8642_vm0, %v7312_v48, %v7397_v19  ;;  %v7557_v58 = vld [vmem:[#allocation2 + $0xb8] sm:$0xc0]  ;;  %v7559_v23 = vld [vmem:[#allocation2 + $0xc0] sm:$0x7] }
 0x21b   : > { %v1971_v45 = vsel %vm8647_vm7, %v1967_v35, %v7422_v34  ;;  %v1965_v5 = vsel %vm8637_vm9, %v1962_v31, %v7442_v26  ;;  %v1978_v50 = vsel %vm8637_vm9, %v1974_v32, %v1863_v63  ;;  %v7566_v48 = vrot.slane %v3144_v10, 5 }
 0x21c   : > { %v1969_v52 = vsel %vm8647_vm7, %v1965_v5, %v7459_v42  ;;  %v5714_v46 = vcombine.low %v1971_v45, %v1984_v2  ;;  %v1982_v4 = vsel %vm8647_vm7, %v1978_v50, %v1874_v22  ;;  %2700 = vrot.lane.b32.xlu0 %v2699_v12, %s6495_s16  ;;  %2900 = vrot.lane.b32.xlu1 %v2899_v59, %s6497_s22  ;;  %v7569_v26 = vrot.slane %v3147_v56, 6  ;;  %v6312_v45 = vld [vmem:[%s8607_s3 + $0xc8] sm:$0xff]  }
 0x21d   : > { %v1739_v19 = vsel %vm8637_vm9, %v1737_v1, %v1673_v24  ;;  %v5712_v34 = vcombine.high %v1969_v52, %v1982_v4  ;;  %v7571_v8 = vrot.slane %v3164_v28, 2  ;;  %v1744_v42 = vsel %vm8642_vm0, %v7402_v61, %v7424_v16  ;;  %v7599_v1 = vld [vmem:[#allocation2 + $0xb0] sm:$0xf]  ;;  %6029 = vmatprep.subr.bf16.mxu1 %v6312_v45  ;;  %v6317_v45 = vld [vmem:[%s8607_s3 + $0x98] sm:$0xff]  }
 0x21e   : > { %v7582_v59 = vpop.permute.xlu0 %2106  ;;  %v1711_v12 = vpop.permute.xlu1 %1710  ;;  %v2703_v24 = vshrl.u32 %v7393_v40, 16  ;;  %v3227_v10 = vrot.slane %v7557_v58, 6  ;;  %v3228_v2 = vrot.slane %v7559_v23, 6  ;;  %v3169_v31 = vrot.slane %v3167_v30, 3  ;;  %v6313_v30 = vld [vmem:[%s8607_s3 + $0x88] sm:$0xff]  }
 0x21f   : > { %v2034_v61 = vshrl.u32 %v5712_v34, 16  ;;  %v2037_v16 = vshll.u32 %v5712_v34, 16  ;;  %v1746_v28 = vsel %vm8637_vm9, %v1744_v42, %v1711_v12  ;;  %v2051_v35 = vshll.u32 %v5714_v46, 16  ;;  %6030 = vmatpush3.bf16.msra.mxu1 %v6313_v30 }
 0x220   : > { %v1741_v32 = vsel %vm8647_vm7, %v1739_v19, %v7488_v57  ;;  %v1748_v63 = vsel %vm8647_vm7, %v1746_v28, %v1721_v17  ;;  %3133 = vrot.lane.b32.xlu0 %v3132_v33, %s6495_s16  ;;  %2889 = vrot.lane.b32.xlu1 %v2888_v7, %s6495_s16  ;;  %vm8693_vm13 = vcmask 1041408   ;;  %v3111_v33 = vld [vmem:[#allocation2 + $0xa8] sm:$0x80]  ;;  %v6314_v7 = vld [vmem:[%s8607_s3 + $0xd0] sm:$0xff]   ;;  %v8694_v46 = vmov 0 }
 0x221   : > { %v7608_v5 = vsel %vm8693_vm13, %v3227_v10, %v3228_v2  ;;  %v2036_v57 = vrot.slane %v2034_v61, 6  ;;  %v2039_v50 = vrot.slane %v2037_v16, 7  ;;  %v5709_v17 = vcombine.low %v1741_v32, %v1748_v63  ;;  %6031 = vmatprep.subr.bf16.mxu1 %v6314_v7 }
 0x222   : > { %v5711_v52 = vcombine.high %v1741_v32, %v1748_v63  ;;  %v8695_v46 = vsel %vm7617_vm10, 4294967295, %v8694_v46  ;;  %v7621_v4 = vpop.permute.xlu0 %1896  ;;  %v7623_v19 = vpop.permute.xlu1 %1942  ;;  %v3123_v34 = vsel %vm8634_vm1, %v3121_v60, %v3122_v13  ;;  %v3142_v42 = vor.u32 %v7530_v11, %v7528_v51  ;;  %v6315_v60 = vld [vmem:[%s8607_s3 + $0x90] sm:$0xff]   ;;  %v1787_v51 = vld [vmem:[#allocation3 + $0x38] sm:$0x33] }
 0x223   : > { %v3150_v22 = vor.u32 %v7569_v26, %v7566_v48  ;;  %v2706_v12 = vshll.u32 %v7393_v40, 16  ;;  %v2040_v10 = vor.u32 %v2039_v50, %v2036_v57  ;;  %v1767_v2 = vrot.slane %v5709_v17, 7  ;;  %v6316_v26 = vld [vmem:[%s8607_s3 + $0xd8] sm:$0xff]   ;;  %6032 = vmatpush3.bf16.msra.mxu1 %v6315_v60 }
 0x224   : > { %vm8696_vm6 = vsmask.f32 1280  ;;  %v3178_v25 = vshrl.u32 %v7599_v1, 16  ;;  %v2053_v13 = vrot.slane %v2051_v35, 7  ;;  %3124 = vrot.lane.b32.xlu0 %v3123_v34, %s6496_s21  ;;  %v3170_v39 = vor.u32 %v3169_v31, %v7571_v8  ;;  %6033 = vmatprep.subr.bf16.mxu1 %v6316_v26 }
 0x225   : > { %v2737_v36 = vsel %vm8696_vm6, %v2728_v29, %v2736_v15  ;;  %vm8697_vm2 = vmmov %vm8696_vm6  ;;  %v2705_v62 = vrot.slane %v2703_v24, 1  ;;  %v3158_v53 = vrot.slane %v3111_v33, 7  ;;  %v2049_v29 = vrot.slane %v2040_v10, 4  ;;  %1779 = vst [vmem:[#allocation3 + $0x28] sm:$0xee] %v1767_v2 }
 0x226   : > { %vm7648_vm15 = vmor %vm8697_vm2, %vm2031_vm5  ;;  %2738 = vrot.lane.b32.xlu1 %v2737_v36, %s6495_s16  ;;  %v2073_v15 = vsel %vm7617_vm10, %v2040_v10, %v2072_v9  ;;  %v1771_v11 = vrot.slane %v1767_v2, 4  ;;  %v1772_v48 = vrot.slane %v5711_v52, 7  ;;  %v7660_v56 = vpop.permute.xlu0 %1886  ;;  %v7662_v61 = vpop.permute.xlu1 %2144  ;;  %vm8700_vm5 = vsmask.f32 2304 }
 0x227   : > { %2074 = vst [vmem:[#allocation3 + $0x30] sm:$0xee] %v2073_v15  ;;  %v3151_v8 = vsel %vm8700_vm5, %v3142_v42, %v3150_v22  ;;  %v2708_v24 = vrot.slane %v2706_v12, 2  ;;  %v3159_v16 = vrot.slane %v7599_v1, 7  ;;  %v3174_v28 = vshrl.u32 %v3111_v33, 16  ;;  %6034 = vmatpush3.bf16.msra.mxu1 %v6317_v45  ;;  %v6323_v15 = vld [vmem:[%s8607_s3 + $0xe8] sm:$0xff]  }
 0x228   : > { %v2054_v31 = vsel %vm7648_vm15, %v2049_v29, %v2053_v13  ;;  %v1773_v35 = vsel %vm7371_vm12, %v1771_v11, %v1772_v48  ;;  %v3180_v32 = vrot.slane %v3178_v25, 7  ;;  %v3181_v63 = vshll.u32 %v7599_v1, 16  ;;  %3152 = vrot.lane.b32.xlu0 %v3151_v8, %s6497_s22  ;;  %v2824_v42 = vld [vmem:[#allocation2 + $0xa0] sm:$0xe0]  ;;  %v7687_v22 = vld [vmem:[#allocation2 + $0xa8] sm:$0x3] }
 0x229   : > { %2078 = vst [vmem:[#allocation3 + $0x40] sm:$0x33] %v2054_v31  ;;  %v1788_v30 = vsel %vm7382_vm11, %v1773_v35, %v1787_v51  ;;  %v2709_v1 = vor.u32 %v2708_v24, %v2705_v62  ;;  %v2741_v17 = vshrl.u32 %v7404_v41, 16  ;;  %v2744_v52 = vshll.u32 %v7404_v41, 16  ;;  %v6322_v29 = vld [vmem:[%s8607_s3 + $0xa0] sm:$0xff]   ;;  %v6324_v24 = vld [vmem:[%s8607_s3 + $0xa8] sm:$0xff]  }
 0x22a   : > { %3171 = vrot.lane.b32.xlu1 %v3170_v39, %s6495_s16  ;;  %1789 = vst [vmem:[#allocation3 + $0x38] sm:$0x33] %v1788_v30  ;;  %v7678_v57 = vpop.permute.xlu0 %2097  ;;  %v7680_v50 = vpop.permute.xlu1 %1940  ;;  %v3160_v33 = vsel %vm1102_vm3, %v3158_v53, %v3159_v16  ;;  %v3176_v7 = vrot.slane %v3174_v28, 7  ;;  %v3183_v34 = vor.u32 %v3181_v63, %v3180_v32  ;;  %v2908_v13 = vrot.slane %v2824_v42, 1  ;;  %v7695_v39 = vld [vmem:[#allocation2 + $0xa0] sm:$0x1f] }
 0x22b   : > { %v2743_v25 = vrot.slane %v2741_v17, 3  ;;  %v2746_v41 = vrot.slane %v2744_v52, 4  ;;  %v2909_v9 = vrot.slane %v7687_v22, 1  ;;  %v8701_v62 = vrot.slane %v7245_v6, 1  ;;  %v6321_v53 = vld [vmem:[%s8607_s3 + $0xe0] sm:$0xff]   ;;  %v6326_v32 = vld [vmem:[%s8607_s3 + $0xf0] sm:$0xff]  }
 0x22c   : > { %2710 = vrot.lane.b32.xlu0 %v2709_v1, %s6497_s22  ;;  %v3184_v60 = vsel %vm8633_vm4, %v3176_v7, %v3183_v34  ;;  %v2916_v48 = vshrl.u32 %v7695_v39, 16  ;;  %v2919_v26 = vshll.u32 %v7695_v39, 16  ;;  %6035 = vmatprep.subr.bf16.mxu1 %v6321_v53  ;;  %vm8702_vm3 = vcmask 1046528   ;;  %v7722_v16 = vld [vmem:[#allocation2 + $0xa8] sm:$0x80] }
 0x22d   : > { %v2747_v6 = vor.u32 %v2746_v41, %v2743_v25  ;;  %v2910_v8 = vsel %vm8702_vm3, %v2908_v13, %v2909_v9  ;;  %6036 = vmatpush3.bf16.msra.mxu1 %v6322_v29  ;;  %v2928_v28 = vshrl.u32 %v2824_v42, 16  ;;  %v2931_v31 = vshll.u32 %v2824_v42, 16  ;;  %v7724_v35 = vld [vmem:[#allocation2 + $0xa8] sm:$0x7c]  ;;  %v7731_v17 = vld [vmem:[#allocation2 + $0xb0] sm:$0xf] }
 0x22e   : > { %3161 = vrot.lane.b32.xlu1 %v3160_v33, %s6496_s21  ;;  %v6304_v12 = vld [vmem:[#allocation3 + $0x24] ss:$16 sps:$4 sm:$0xff]   ;;  %v6306_v10 = vld [vmem:[#allocation3 + $0x20] ss:$16 sps:$4 sm:$0xff]   ;;  %v7689_v2 = vpop.permute.xlu0 %1884  ;;  %v7691_v36 = vpop.permute.xlu1 %1930  ;;  %6037 = vmatprep.subr.bf16.mxu1 %v6323_v15  ;;  %v7729_v30 = vrot.slane %v2916_v48, 4  ;;  %v2921_v1 = vrot.slane %v2919_v26, 5 }
 0x22f   : > { %3757 = vmatprep.mubr.bf16.mxu1 %v6304_v12  ;;  %v2936_v52 = vshrl.u32 %v7687_v22, 16  ;;  %v2939_v33 = vshll.u32 %v7687_v22, 16  ;;  %v2952_v7 = vrot.slane %v7722_v16, 3  ;;  %v2953_v34 = vrot.slane %v7731_v17, 3  ;;  %v6327_v42 = vld [vmem:[%s8607_s3 + $0xb0] sm:$0xff]  }
 0x230   : > { %2400 = vrot.lane.b32.xlu0 %v8701_v62, %s6496_s21  ;;  %3758 = vmatmul.mubr.bf16.gmra.mrb[4].mxu1 %v6306_v10  ;;  %v6462_v12 = vld [vmem:[#allocation2 + $0x58] sm:$0x7c]  ;;  %v8703_v25 = vrot.slane %v7280_v27, 3  ;;  %v2930_v41 = vrot.slane %v2928_v28, 1  ;;  %v2960_v13 = vshrl.u32 %v7724_v35, 16  ;;  %v2963_v62 = vshll.u32 %v7724_v35, 16 }
 0x231   : > { %6038 = vmatpush3.bf16.msra.mxu1 %v6324_v24  ;;  %v2128_v10 = vrot.slane %v6462_v12, 2  ;;  %v2922_v15 = vor.u32 %v2921_v1, %v7729_v30  ;;  %v2941_v48 = vrot.slane %v2939_v33, 2  ;;  %v6463_v26 = vld [vmem:[#allocation2 + $0x50] sm:$0x1f]  ;;  %v6464_v27 = vld [vmem:[#allocation2 + $0x58] sm:$0x7c] }
 0x232   : > { %3185 = vrot.lane.b32.xlu1 %v3184_v60, %s6497_s22  ;;  %v7710_v51 = vpop.permute.xlu0 %1919  ;;  %v2135_v11 = vpop.permute.xlu1 %2134  ;;  %v2933_v60 = vrot.slane %v2931_v31, 2  ;;  %6039 = vmatprep.subr.bf16.mxu1 %v6326_v32  ;;  %vm8704_vm13 = vcmask 1044480   ;;  %v6329_v31 = vld [vmem:[%s8607_s3 + $0xf8] sm:$0xff]   ;;  %vm8635_vm6 = vcmask 1046532   ;;  %v6465_v32 = vld [vmem:[#allocation2 + $0x50] sm:$0x1f] }
 0x233   : > { %v2244_v24 = vsel %vm8642_vm0, %v2128_v10, %v2135_v11  ;;  %v2954_v28 = vsel %vm8704_vm13, %v2952_v7, %v2953_v34  ;;  %v1878_v1 = vrot.slane %v6465_v32, 4  ;;  %v2965_v33 = vrot.slane %v2963_v62, 7 }
 0x234   : > { %2911 = vrot.lane.b32.xlu0 %v2910_v8, %s6496_s21  ;;  %v1922_v8 = vrot.slane %v6464_v27, 6  ;;  %v2934_v11 = vor.u32 %v2933_v60, %v2930_v41  ;;  %v2246_v10 = vsel %vm8637_vm9, %v2244_v24, %v7662_v61  ;;  %vm8705_vm2 = vsmask.f32 6400 }
 0x235   : > { %6040 = vmatpush3.bf16.msra.mxu1 %v6327_v42  ;;  %v1989_v7 = vsel %vm8642_vm0, %v1878_v1, %v7660_v56  ;;  %vm7781_vm5 = vmand %vm8635_vm6, %vm8705_vm2  ;;  %vm8708_vm3 = vsmask.f32 2304  ;;  %vm8711_vm2 = vcmask 1045508   ;;  %vm8715_vm4 = vsmask.f32 6400 }
 0x236   : > { %2748 = vrot.lane.b32.xlu1 %v2747_v6, %s6497_s22  ;;  %v2126_v63 = vpop.permute.xlu0 %2125  ;;  %v1929_v45 = vpop.permute.xlu1 %1928  ;;  %v7748_v6 = vrot.slane %v2936_v52, 1  ;;  %v7763_v52 = vrot.slane %v2960_v13, 6  ;;  %6041 = vmatprep.subr.bf16.mxu1 %v6329_v31  ;;  %vm7794_vm13 = vmand %vm8634_vm1, %vm8708_vm3  ;;  %vm8712_vm3 = vcmask 1041408  }
 0x237   : > { %v2000_v60 = vsel %vm8642_vm0, %v1922_v8, %v1929_v45  ;;  %vm7809_vm8 = vmor %vm8712_vm3, %vm8711_vm2  ;;  %vm2579_vm3 = vcmask 1043458  }
 0x238   : > { %2412 = vrot.lane.b32.xlu0 %v7229_v3, %s6495_s16  ;;  %v2237_v3 = vsel %vm8642_vm0, %v6463_v26, %v7678_v57  ;;  %v2002_v57 = vsel %vm8642_vm0, %v1922_v8, %v7691_v36  ;;  %v1987_v36 = vsel %vm8642_vm0, %v1878_v1, %v7689_v2  ;;  %v2966_v45 = vor.u32 %v2965_v33, %v7763_v52  ;;  %vm7825_vm2 = vmor %vm7781_vm5, %vm7794_vm13 }
 0x239   : > { %v2239_v42 = vsel %vm8637_vm9, %v2237_v3, %v7582_v59  ;;  %v2006_v61 = vsel %vm8637_vm9, %v2002_v57, %v7623_v19  ;;  %v1993_v19 = vsel %vm8637_vm9, %v1989_v7, %v7546_v55  ;;  %v8713_v3 = vmov 0 }
 0x23a   : > { %2444 = vrot.lane.b32.xlu1 %v8703_v25, %s6496_s21  ;;  %v1918_v53 = vpop.permute.xlu0 %1917  ;;  %v1960_v29 = vpop.permute.xlu1 %1959  ;;  %v2241_v41 = vsel %vm8647_vm7, %v2239_v42, %v2126_v63  ;;  %v8714_v3 = vsel %vm7809_vm8, 4294967295, %v8713_v3  ;;  %v1997_v27 = vsel %vm8647_vm7, %v1993_v19, %v7710_v51  ;;  %v2298_v51 = vld [vmem:[#allocation3 + $0x50] sm:$0x77]  ;;  %v2075_v63 = vld [vmem:[#allocation3 + $0x38] sm:$0xee]  ;;  %vm8720_vm5 = vcmask 1043456  }
 0x23b   : > { %v2010_v2 = vsel %vm8647_vm7, %v2006_v61, %v1960_v29  ;;  %vm8721_vm13 = vcmask 1045504  }
 0x23c   : > { %2923 = vrot.lane.b32.xlu0 %v2922_v15, %s6495_s16  ;;  %v2942_v15 = vor.u32 %v2941_v48, %v7748_v6  ;;  %v1991_v48 = vsel %vm8637_vm9, %v1987_v36, %v7621_v4  ;;  %v5715_v24 = vcombine.low %v1997_v27, %v2010_v2  ;;  %v3205_v2 = vshrl.u32 %v7457_v14, 16 }
 0x23d   : > { %v1995_v55 = vsel %vm8647_vm7, %v1991_v48, %v1918_v53 }
 0x23e   : > { %2955 = vrot.lane.b32.xlu1 %v2954_v28, %s6496_s21  ;;  %v7769_v12 = vpop.permute.xlu0 %2318  ;;  %v2159_v25 = vpop.permute.xlu1 %2158  ;;  %v2943_v8 = vsel %vm8715_vm4, %v2934_v11, %v2942_v15  ;;  %v8716_v28 = vmov 0  ;;  %v2057_v15 = vshll.u32 %v5715_v24, 16  ;;  %v3235_v24 = vshrl.u32 %v7557_v58, 16 }
 0x23f   : > { %v2248_v56 = vsel %vm8647_vm7, %v2246_v10, %v2159_v25  ;;  %v8717_v28 = vsel %vm7825_vm2, 4294967295, %v8716_v28  ;;  %v2976_v10 = vshrl.u32 %v7731_v17, 16  ;;  %v2979_v25 = vshll.u32 %v7731_v17, 16 }
 0x240   : > { %v5716_v13 = vcombine.low %v2241_v41, %v2248_v56  ;;  %v5718_v62 = vcombine.high %v2241_v41, %v2248_v56  ;;  %2433 = vrot.lane.b32.xlu0 %v7269_v43, %s6497_s22  ;;  %v2059_v19 = vrot.slane %v2057_v15, 7  ;;  %vm8718_vm4 = vsmask.f32 4352  ;;  %v3118_v15 = vld [vmem:[#allocation2 + $0xc0] sm:$0xf8] }
 0x241   : > { %v2981_v22 = vrot.slane %v2979_v25, 4 }
 0x242   : > { %2456 = vrot.lane.b32.xlu1 %v7275_v49, %s6495_s16  ;;  %v2280_v43 = vrot.slane %v5716_v13, 6  ;;  %v7803_v26 = vpop.permute.xlu0 %2336  ;;  %v2004_v49 = vsel %vm8637_vm9, %v2000_v60, %v7680_v50  ;;  %v1958_v29 = vpop.permute.xlu1 %1957  ;;  %v6333_v50 = vld [vmem:[%s8607_s3 + $0xb8] sm:$0xff]   ;;  %v2283_v53 = vrot.slane %v5718_v62, 6  ;;  %v2972_v60 = vshrl.u32 %v7722_v16, 16 }
 0x243   : > { %v2008_v4 = vsel %vm8647_vm7, %v2004_v49, %v1958_v29  ;;  %6042 = vmatpush3.bf16.msra.mxu1 %v6333_v50  ;;  %v3197_v13 = vshrl.u32 %v7455_v0, 16  ;;  %v3200_v62 = vshll.u32 %v7455_v0, 16  ;;  %v3115_v0 = vld [vmem:[#allocation2 + $0xb8] sm:$0x3e] }
 0x244   : > { %v2282_v31 = vrot.slane %v2280_v43, 4  ;;  %2292 = vst [vmem:[#allocation3 + $0x40] sm:$0xcc] %v2280_v43  ;;  %v5713_v32 = vcombine.high %v1995_v55, %v2008_v4  ;;  %2944 = vrot.lane.b32.xlu0 %v2943_v8, %s6497_s22  ;;  %v2974_v49 = vrot.slane %v2972_v60, 3  ;;  %v3207_v4 = vrot.slane %v3205_v2, 4 }
 0x245   : > { %v3199_v29 = vrot.slane %v3197_v13, 4  ;;  %v3202_v55 = vrot.slane %v3200_v62, 5  ;;  %v3216_v17 = vshrl.u32 %v3115_v0, 16  ;;  %v3219_v40 = vshll.u32 %v3115_v0, 16 }
 0x246   : > { %2967 = vrot.lane.b32.xlu1 %v2966_v45, %s6495_s16  ;;  %v2284_v1 = vsel %vm7809_vm8, %v2282_v31, %v2283_v53  ;;  %v2042_v57 = vshrl.u32 %v5713_v32, 16  ;;  %v2045_v11 = vshll.u32 %v5713_v32, 16  ;;  %v7833_v33 = vpop.permute.xlu0 %2167  ;;  %v7835_v7 = vpop.permute.xlu1 %2357  ;;  %v2978_v45 = vrot.slane %v2976_v10, 3  ;;  %v6467_v10 = vld [vmem:[#allocation2 + $0x68] sm:$0x1] }
 0x247   : > { %v2299_v42 = vsel %vm7825_vm2, %v2284_v1, %v2298_v51  ;;  %v3238_v51 = vshll.u32 %v7557_v58, 16  ;;  %v3243_v31 = vshrl.u32 %v7559_v23, 16  ;;  %v3246_v53 = vshll.u32 %v7559_v23, 16 }
 0x248   : > { %2300 = vst [vmem:[#allocation3 + $0x50] sm:$0x77] %v2299_v42  ;;  %v2044_v36 = vrot.slane %v2042_v57, 6  ;;  %v2047_v41 = vrot.slane %v2045_v11, 7  ;;  %2913 = vrot.lane.b32.xlu0 %v2909_v9, %s6496_s21  ;;  %v3208_v9 = vshll.u32 %v7457_v14, 16  ;;  %v2982_v27 = vor.u32 %v2981_v22, %v2978_v45 }
 0x249   : > { %v3221_v57 = vrot.slane %v3219_v40, 2  ;;  %v6466_v11 = vld [vmem:[#allocation2 + $0x60] sm:$0xf0]  ;;  %v2163_v25 = vrot.slane %v6467_v10, 4  ;;  %v3240_v23 = vrot.slane %v3238_v51, 7  ;;  %v3245_v60 = vrot.slane %v3243_v31, 6 }
 0x24a   : > { %2473 = vrot.lane.b32.xlu1 %v7355_v21, %s6497_s22  ;;  %v2048_v56 = vor.u32 %v2047_v41, %v2044_v36  ;;  %v7847_v59 = vpop.permute.xlu0 %2348  ;;  %v7849_v61 = vpop.permute.xlu1 %2205  ;;  %v3210_v8 = vrot.slane %v3208_v9, 5  ;;  %v2983_v32 = vsel %vm8718_vm4, %v2974_v49, %v2982_v27  ;;  %v2162_v42 = vrot.slane %v6466_v11, 4  ;;  %v6469_v9 = vld [vmem:[#allocation2 + $0x70] sm:$0x7]  ;;  %v6472_v31 = vld [vmem:[#allocation2 + $0x68] sm:$0x1] }
 0x24b   : > { %v3237_v41 = vrot.slane %v3235_v24, 6  ;;  %v3254_v62 = vshrl.u32 %v3118_v15, 16  ;;  %v3257_v2 = vshll.u32 %v3118_v15, 16  ;;  %vm8636_vm4 = vsmask.f32 7946 }
 0x24c   : > { %v2055_v21 = vrot.slane %v2048_v56, 4  ;;  %v2076_v16 = vsel %vm7617_vm10, %v2048_v56, %v2075_v63  ;;  %2925 = vrot.lane.b32.xlu0 %v7729_v30, %s6495_s16  ;;  %v3193_v30 = vrot.slane %v3115_v0, 1  ;;  %v3211_v1 = vor.u32 %v3210_v8, %v3207_v4  ;;  %v6468_v63 = vld [vmem:[#allocation2 + $0x68] sm:$0xc0]  ;;  %vm7920_vm1 = vmand %vm2579_vm3, %vm8636_vm4 }
 0x24d   : > { %2077 = vst [vmem:[#allocation3 + $0x38] sm:$0xee] %v2076_v16  ;;  %v3248_v56 = vrot.slane %v3246_v53, 7  ;;  %v2352_v22 = vrot.slane %v6468_v63, 2  ;;  %v3231_v16 = vrot.slane %v3118_v15, 3  ;;  %v2164_v0 = vsel %vm8720_vm5, %v2162_v42, %v2163_v25 }
 0x24e   : > { %2957 = vrot.lane.b32.xlu1 %v2953_v34, %s6496_s21  ;;  %v2060_v48 = vsel %vm7648_vm15, %v2055_v21, %v2059_v19  ;;  %v7864_v43 = vpop.permute.xlu0 %2334  ;;  %v2379_v14 = vpop.permute.xlu1 %2378  ;;  %vm8719_vm15 = vsmask.f32 3328  ;;  %v2353_v19 = vrot.slane %v6469_v9, 2  ;;  %v3256_v40 = vrot.slane %v3254_v62, 3 }
 0x24f   : > { %2079 = vst [vmem:[#allocation3 + $0x48] sm:$0x33] %v2060_v48  ;;  %v6470_v48 = vld [vmem:[#allocation2 + $0x68] sm:$0xc0]  ;;  %v3249_v4 = vor.u32 %v3248_v56, %v3245_v60  ;;  %v3259_v24 = vrot.slane %v3257_v2, 4  ;;  %v2477_v53 = vsel %vm8642_vm0, %v6472_v31, %v7769_v12  ;;  %vm8734_vm4 = vcmask 1043456  }
 0x250   : > { %2946 = vrot.lane.b32.xlu0 %v7748_v6, %s6497_s22  ;;  %v3203_v6 = vor.u32 %v3202_v55, %v3199_v29  ;;  %v2200_v49 = vrot.slane %v6470_v48, 6  ;;  %v3241_v55 = vor.u32 %v3240_v23, %v3237_v41  ;;  %v2490_v8 = vsel %vm8642_vm0, %v2353_v19, %v7835_v7 }
 0x251   : > { %v2354_v51 = vsel %vm8721_vm13, %v2352_v22, %v2353_v19  ;;  %vm2583_vm5 = vsmask.f32 7962  ;;  %vm8722_vm13 = vsmask.f32 1280  ;;  %vm8735_vm10 = vcmask 523264  }
 0x252   : > { %2969 = vrot.lane.b32.xlu1 %v7763_v52, %s6495_s16  ;;  %v7870_v34 = vpop.permute.xlu0 %2346  ;;  %v2390_v50 = vpop.permute.xlu1 %2389  ;;  %v3218_v52 = vrot.slane %v3216_v17, 1  ;;  %v3212_v13 = vsel %vm8719_vm15, %v3203_v6, %v3211_v1  ;;  %vm2582_vm15 = vcmask 1047558   ;;  %v6473_v6 = vld [vmem:[#allocation2 + $0x60] sm:$0xf0]  ;;  %v3250_v42 = vsel %vm8722_vm13, %v3241_v55, %v3249_v4  ;;  %v2586_v55 = vld [vmem:[#allocation3 + $0x50] sm:$0xcc]  ;;  %vm8736_vm11 = vmmov %vm8735_vm10 }
 0x253   : > { %v2476_v1 = vsel %vm8642_vm0, %v6473_v6, %v7769_v12  ;;  %v3260_v12 = vor.u32 %v3259_v24, %v3256_v40  ;;  %vm8723_vm13 = vcmask 1041408   ;;  %vm2584_vm6 = vmand %vm2582_vm15, %vm2583_vm5  ;;  %vm8728_vm15 = vsmask.f32 2304 }
 0x254   : > { %3194 = vrot.lane.b32.xlu0 %v3193_v30, %s6496_s21  ;;  %v3222_v21 = vor.u32 %v3221_v57, %v3218_v52  ;;  %v6471_v30 = vld [vmem:[#allocation2 + $0x70] sm:$0x7]  ;;  %v2488_v52 = vsel %vm8642_vm0, %v2354_v51, %v7835_v7  ;;  %v2479_v10 = vsel %vm8637_vm9, %v2476_v1, %v7864_v43  ;;  %vm7935_vm3 = vmor %vm2584_vm6, %vm7920_vm1  ;;  %v6474_v1 = vld [vmem:[#allocation2 + $0x80] sm:$0x7c]  ;;  %vm8731_vm1 = vsmask.f32 7424 }
 0x255   : > { %v2201_v17 = vrot.slane %v6471_v30, 6  ;;  %v2483_v7 = vsel %vm8647_vm7, %v2479_v10, %v7870_v34  ;;  %v2301_v30 = vld [vmem:[#allocation3 + $0x58] sm:$0x77]  ;;  %v6475_v10 = vld [vmem:[#allocation2 + $0x78] sm:$0x1f]  ;;  %vm8732_vm6 = vcmask 1047556  }
 0x256   : > { %2984 = vrot.lane.b32.xlu1 %v2983_v32, %s6497_s22  ;;  %v7879_v58 = vpop.permute.xlu0 %2196  ;;  %v2388_v36 = vpop.permute.xlu1 %2387 }
 0x257   : > { %v2202_v23 = vsel %vm8723_vm13, %v2200_v49, %v2201_v17  ;;  %vm2545_vm13 = vsmask.f32 6416 }
 0x258   : > { %3213 = vrot.lane.b32.xlu0 %v3212_v13, %s6495_s16  ;;  %v2258_v43 = vsel %vm8642_vm0, %v2202_v23, %v7849_v61  ;;  %vm7940_vm5 = vmor %vm8728_vm15, %vm2545_vm13  ;;  %vm8733_vm15 = vsmask.f32 3328 }
 0x259   : > { %vm2809_vm13 = vmand %vm8732_vm6, %vm8731_vm1 }
 0x25a   : > { %2986 = vrot.lane.b32.xlu1 %v2978_v45, %s6497_s22  ;;  %v2187_v29 = vpop.permute.xlu0 %2186  ;;  %v2235_v27 = vpop.permute.xlu1 %2234  ;;  %v2494_v45 = vsel %vm8637_vm9, %v2490_v8, %v2379_v14  ;;  %v2481_v14 = vsel %vm8637_vm9, %v2477_v53, %v7803_v26  ;;  %v2251_v26 = vsel %vm8642_vm0, %v2164_v0, %v7833_v33 }
 0x25b   : > { %v2498_v32 = vsel %vm8647_vm7, %v2494_v45, %v2390_v50  ;;  %v2485_v50 = vsel %vm8647_vm7, %v2481_v14, %v7847_v59  ;;  %v2253_v59 = vsel %vm8637_vm9, %v2251_v26, %v2187_v29  ;;  %v2642_v14 = vrot.slane %v6474_v1, 2  ;;  %v7954_v26 = vld [vmem:[#allocation2 + $0x78] sm:$0x1f] }
 0x25c   : > { %3223 = vrot.lane.b32.xlu0 %v3222_v21, %s6497_s22  ;;  %v5722_v15 = vcombine.low %v2485_v50, %v2498_v32  ;;  %v2255_v61 = vsel %vm8647_vm7, %v2253_v59, %v7879_v58 }
 0x25e   : > { %3232 = vrot.lane.b32.xlu1 %v3231_v16, %s6496_s21  ;;  %v7900_v57 = vpop.permute.xlu0 %2620  ;;  %v2377_v11 = vpop.permute.xlu1 %2376  ;;  %v2565_v2 = vshll.u32 %v5722_v15, 16  ;;  %v8726_v16 = vmov 0  ;;  %v7957_v15 = vld [vmem:[#allocation2 + $0x80] sm:$0x7c] }
 0x25f   : > { %v2492_v25 = vsel %vm8637_vm9, %v2488_v52, %v2377_v11  ;;  %v8727_v16 = vsel %vm7935_vm3, 4294967295, %v8726_v16 }
 0x260   : > { %v2496_v41 = vsel %vm8647_vm7, %v2492_v25, %v2388_v36  ;;  %v2567_v58 = vrot.slane %v2565_v2, 6 }
 0x261   : > { %v5720_v60 = vcombine.high %v2483_v7, %v2496_v41  ;;  %v2392_v7 = vrot.slane %v7954_v26, 4  ;;  %v2436_v41 = vrot.slane %v7957_v15, 6  ;;  %v6334_v15 = vld [vmem:[#allocation3 + $0x2c] ss:$16 sps:$4 sm:$0xff]  }
 0x262   : > { %3251 = vrot.lane.b32.xlu1 %v3250_v42, %s6495_s16  ;;  %v7924_v34 = vpop.permute.xlu0 %2410  ;;  %v2225_v56 = vpop.permute.xlu1 %2224 }
 0x263   : > { %v2548_v36 = vshrl.u32 %v5720_v60, 16  ;;  %v2551_v13 = vshll.u32 %v5720_v60, 16  ;;  %v2260_v62 = vsel %vm8637_vm9, %v2258_v43, %v2225_v56 }
 0x264   : > { %v2262_v63 = vsel %vm8647_vm7, %v2260_v62, %v2235_v27 }
 0x265   : > { %v2550_v22 = vrot.slane %v2548_v36, 5  ;;  %v2553_v9 = vrot.slane %v2551_v13, 6  ;;  %v5717_v19 = vcombine.low %v2255_v61, %v2262_v63  ;;  %v5719_v21 = vcombine.high %v2255_v61, %v2262_v63 }
 0x266   : > { %3261 = vrot.lane.b32.xlu1 %v3260_v12, %s6497_s22  ;;  %v2612_v0 = vpop.permute.xlu0 %2611  ;;  %v2659_v48 = vpop.permute.xlu1 %2658 }
 0x267   : > { %v2554_v49 = vor.u32 %v2553_v9, %v2550_v22  ;;  %v2281_v29 = vrot.slane %v5717_v19, 6  ;;  %v2286_v40 = vrot.slane %v5719_v21, 6  ;;  %v2751_v25 = vsel %vm8642_vm0, %v6475_v10, %v2612_v0  ;;  %v6479_v10 = vld [vmem:[#allocation2 + $0x98] sm:$0x7] }
 0x268   : > { %v2753_v23 = vsel %vm8637_vm9, %v2751_v25, %v7900_v57  ;;  %v2866_v25 = vrot.slane %v6479_v10, 2 }
 0x269   : > { %v2563_v4 = vrot.slane %v2554_v49, 4  ;;  %v2587_v8 = vsel %vm7935_vm3, %v2554_v49, %v2586_v55  ;;  %v2285_v17 = vrot.slane %v2281_v29, 4  ;;  %2293 = vst [vmem:[#allocation3 + $0x48] sm:$0xcc] %v2281_v29 }
 0x26a   : > { %2588 = vst [vmem:[#allocation3 + $0x50] sm:$0xcc] %v2587_v8  ;;  %v2399_v24 = vpop.permute.xlu0 %2398  ;;  %v2455_v51 = vpop.permute.xlu1 %2454 }
 0x26b   : > { %v2568_v45 = vsel %vm7940_vm5, %v2563_v4, %v2567_v58  ;;  %v2287_v31 = vsel %vm7809_vm8, %v2285_v17, %v2286_v40  ;;  %v2501_v33 = vsel %vm8642_vm0, %v2392_v7, %v2399_v24 }
 0x26c   : > { %2592 = vst [vmem:[#allocation3 + $0x60] sm:$0x77] %v2568_v45  ;;  %v2302_v53 = vsel %vm7825_vm2, %v2287_v31, %v2301_v30  ;;  %v2505_v2 = vsel %vm8735_vm10, %v2501_v33, %v7924_v34  ;;  %vm8738_vm2 = vcmask 1042432   ;;  %v2811_v34 = vld [vmem:[#allocation3 + $0x70] sm:$0xff] }
 0x26d   : > { %2303 = vst [vmem:[#allocation3 + $0x58] sm:$0x77] %v2302_v53 }
 0x26e   : > { %v2640_v32 = vpop.permute.xlu0 %2639  ;;  %v2649_v6 = vpop.permute.xlu1 %2648 }
 0x26f   : > { %v2758_v12 = vsel %vm8642_vm0, %v2642_v14, %v2649_v6  ;;  %v2755_v56 = vsel %vm8647_vm7, %v2753_v23, %v2640_v32 }
 0x270   : > { %v2760_v60 = vsel %vm8637_vm9, %v2758_v12, %v2659_v48  ;;  %vm2808_vm9 = vmand %vm8734_vm4, %vm8733_vm15 }
 0x271   : > { %v6307_v52 = vld [vmem:[#allocation3 + $0x44] ss:$16 sps:$4 sm:$0xff]   ;;  %v6309_v11 = vld [vmem:[#allocation3 + $0x40] ss:$16 sps:$4 sm:$0xff]   ;;  %vm7986_vm1 = vmor %vm2809_vm13, %vm2808_vm9  ;;  %vm8744_vm9 = vcmask 261120  }
 0x272   : > { %v2432_v42 = vpop.permute.xlu0 %2431  ;;  %v2443_v50 = vpop.permute.xlu1 %2442  ;;  %3765 = vmatprep.mubr.bf16.mxu1 %v6307_v52  ;;  %vm8745_vm13 = vmmov %vm8744_vm9 }
 0x273   : > { %3766 = vmatmul.mubr.bf16.gmra.mrb[8].mxu1 %v6309_v11  ;;  %v2514_v36 = vsel %vm8642_vm0, %v2436_v41, %v2443_v50  ;;  %v2509_v19 = vsel %vm8647_vm7, %v2505_v2, %v2432_v42  ;;  %vm8737_vm0 = vcmask 1046532   ;;  %v6478_v42 = vld [vmem:[#allocation2 + $0x90] sm:$0xc0]  ;;  %vm8746_vm15 = vmmov %vm8744_vm9 }
 0x274   : > { %v2518_v22 = vsel %vm8736_vm11, %v2514_v36, %v2455_v51  ;;  %vm7981_vm12 = vmor %vm8738_vm2, %vm8737_vm0  ;;  %v2589_v32 = vld [vmem:[#allocation3 + $0x58] sm:$0xcc]  ;;  %v2865_v50 = vrot.slane %v6478_v42, 2  ;;  %vm8743_vm0 = vcmask 1045504   ;;  %vm3092_vm11 = vcmask 1043459  }
 0x275   : > { %vm3093_vm2 = vsmask.f32 7950 }
 0x276   : > { %v2832_v59 = vpop.permute.xlu0 %2831  ;;  %v2673_v43 = vpop.permute.xlu1 %2672 }
 0x277   : > { %v2762_v13 = vsel %vm8647_vm7, %v2760_v60, %v2673_v43  ;;  %v2867_v60 = vsel %vm8743_vm0, %v2865_v50, %v2866_v25  ;;  %vm8749_vm0 = vmmov %vm8735_vm10  ;;  %v3155_v50 = vrot.slane %v7513_v20, 2 }
 0x278   : > { %v5724_v57 = vcombine.low %v2755_v56, %v2762_v13  ;;  %v5726_v62 = vcombine.high %v2755_v56, %v2762_v13  ;;  %v6480_v56 = vld [vmem:[#allocation2 + $0x88] sm:$0xf0]  ;;  %v6481_v13 = vld [vmem:[#allocation2 + $0x90] sm:$0x1] }
 0x279   : > { %v2989_v36 = vsel %vm8745_vm13, %v6480_v56, %v2832_v59  ;;  %vm3094_vm13 = vmand %vm3092_vm11, %vm3093_vm2  ;;  %vm8759_vm11 = vsmask.f32 3328 }
 0x27a   : > { %v2794_v61 = vrot.slane %v5724_v57, 5  ;;  %v2850_v63 = vpop.permute.xlu0 %2849  ;;  %v2472_v9 = vpop.permute.xlu1 %2471  ;;  %v2797_v29 = vrot.slane %v5726_v62, 5  ;;  %v2990_v57 = vsel %vm8746_vm15, %v6481_v13, %v2832_v59 }
 0x27b   : > { %v2522_v0 = vsel %vm8647_vm7, %v2518_v22, %v2472_v9  ;;  %vm8747_vm7 = vmmov %vm8744_vm9  ;;  %v2994_v9 = vsel %vm8749_vm0, %v2990_v57, %v2850_v63  ;;  %v3312_v57 = vld [vmem:[#allocation3 + $0xa0] sm:$0x11] }
 0x27c   : > { %v2796_v49 = vrot.slane %v2794_v61, 4  ;;  %2806 = vst [vmem:[#allocation3 + $0x60] sm:$0x88] %v2794_v61  ;;  %v5721_v58 = vcombine.high %v2509_v19, %v2522_v0 }
 0x27e   : > { %v2798_v55 = vsel %vm7981_vm12, %v2796_v49, %v2797_v29  ;;  %v2556_v4 = vshrl.u32 %v5721_v58, 16  ;;  %v2559_v8 = vshll.u32 %v5721_v58, 16  ;;  %v7992_v30 = vpop.permute.xlu0 %2681  ;;  %v2871_v17 = vpop.permute.xlu1 %2870 }
 0x27f   : > { %v2812_v40 = vsel %vm7986_vm1, %v2798_v55, %v2811_v34  ;;  %v3003_v43 = vsel %vm8744_vm9, %v2866_v25, %v2871_v17  ;;  %v3001_v62 = vsel %vm8747_vm7, %v2867_v60, %v2871_v17  ;;  %vm8750_vm9 = vmmov %vm8749_vm0  ;;  %vm8755_vm7 = vsmask.f32 7966  ;;  %v6482_v60 = vld [vmem:[#allocation2 + $0xa0] sm:$0x1f] }
 0x280   : > { %2813 = vst [vmem:[#allocation3 + $0x70] sm:$0xff] %v2812_v40  ;;  %v2558_v24 = vrot.slane %v2556_v4, 5  ;;  %v2561_v51 = vrot.slane %v2559_v8, 6 }
 0x282   : > { %v7996_v45 = vor.u32 %v2561_v51, %v2558_v24  ;;  %v2862_v31 = vpop.permute.xlu0 %2861  ;;  %v7998_v53 = vpop.permute.xlu1 %2719 }
 0x284   : > { %v2590_v6 = vsel %vm7935_vm3, %v7996_v45, %v2589_v32  ;;  %vm8748_vm3 = vcmask 785408  }
 0x285   : > { %2591 = vst [vmem:[#allocation3 + $0x58] sm:$0xcc] %v2590_v6  ;;  %vm8752_vm4 = vmmov %vm8748_vm3 }
 0x286   : > { %v2848_v1 = vpop.permute.xlu0 %2847  ;;  %v2892_v14 = vpop.permute.xlu1 %2891  ;;  %v2998_v34 = vsel %vm8752_vm4, %v2994_v9, %v2862_v31  ;;  %vm8753_vm6 = vmmov %vm8748_vm3  ;;  %vm3058_vm4 = vsmask.f32 7440 }
 0x287   : > { %v3007_v33 = vsel %vm8735_vm10, %v3003_v43, %v2892_v14  ;;  %v2992_v19 = vsel %vm8750_vm9, %v2989_v36, %v2848_v1  ;;  %vm8751_vm10 = vmmov %vm8749_vm0  ;;  %v3099_v31 = vld [vmem:[#allocation3 + $0x70] sm:$0x88] }
 0x288   : > { %vm8754_vm15 = vmmov %vm8748_vm3 }
 0x28a   : > { %v2860_v52 = vpop.permute.xlu0 %2859  ;;  %v2903_v11 = vpop.permute.xlu1 %2902 }
 0x28b   : > { %v3011_v2 = vsel %vm8748_vm3, %v3007_v33, %v2903_v11  ;;  %v2996_v49 = vsel %vm8753_vm6, %v2992_v19, %v2860_v52  ;;  %vm8756_vm3 = vcmask 1047559   ;;  %vm8029_vm6 = vmor %vm8759_vm11, %vm3058_vm4 }
 0x28c   : > { %v5730_v29 = vcombine.low %v2998_v34, %v3011_v2  ;;  %vm3097_vm8 = vmand %vm8756_vm3, %vm8755_vm7 }
 0x28d   : > { %vm8022_vm0 = vmor %vm3097_vm8, %vm3094_vm13  ;;  %vm8762_vm8 = vcmask 261120  }
 0x28e   : > { %v8003_v12 = vpop.permute.xlu0 %2700  ;;  %v2901_v23 = vpop.permute.xlu1 %2900  ;;  %v3074_v40 = vshll.u32 %v5730_v29, 16  ;;  %vm8763_vm9 = vmmov %vm8762_vm8 }
 0x28f   : > { %vm8764_vm13 = vmmov %vm8751_vm10 }
 0x290   : > { %v3076_v11 = vrot.slane %v3074_v40, 5  ;;  %vm8765_vm7 = vmmov %vm8754_vm15 }
 0x291   : > { %vm8766_vm3 = vmmov %vm8762_vm8 }
 0x292   : > { %v3134_v61 = vpop.permute.xlu0 %3133  ;;  %v2890_v22 = vpop.permute.xlu1 %2889  ;;  %v2765_v19 = vsel %vm8766_vm3, %v7464_v38, %v7992_v30  ;;  %vm8767_vm4 = vmmov %vm8766_vm3 }
 0x293   : > { %v3005_v0 = vsel %vm8751_vm10, %v3001_v62, %v2890_v22  ;;  %vm8768_vm11 = vmmov %vm8751_vm10 }
 0x294   : > { %v3009_v59 = vsel %vm8754_vm15, %v3005_v0, %v2901_v23 }
 0x295   : > { %v5728_v58 = vcombine.high %v2996_v49, %v3009_v59  ;;  %v2767_v49 = vsel %vm8768_vm11, %v2765_v19, %v8003_v12 }
 0x296   : > { %v3125_v55 = vpop.permute.xlu0 %3124 }
 0x297   : > { %v3061_v4 = vshll.u32 %v5728_v58, 16  ;;  %v3068_v8 = vshrl.u32 %v5728_v58, 16  ;;  %v3264_v43 = vsel %vm8762_vm8, %v6482_v60, %v3125_v55  ;;  %vm8769_vm8 = vmmov %vm8751_vm10 }
 0x298   : > { %v2739_v63 = vpop.permute.xlu1 %2738  ;;  %v3266_v56 = vsel %vm8751_vm10, %v3264_v43, %v3134_v61  ;;  %v2772_v61 = vsel %vm8767_vm4, %v7467_v18, %v7998_v53  ;;  %vm8771_vm10 = vmmov %vm8765_vm7 }
 0x299   : > { %v3063_v24 = vrot.slane %v3061_v4, 5  ;;  %v3070_v51 = vrot.slane %v3068_v8, 4  ;;  %v2774_v59 = vsel %vm8769_vm8, %v2772_v61, %v2739_v63 }
 0x29a   : > { %v3153_v32 = vpop.permute.xlu0 %3152 }
 0x29b   : > { %v3071_v1 = vor.u32 %v3070_v51, %v3063_v24  ;;  %v3100_v14 = vsel %vm8022_vm0, %v3063_v24, %v3099_v31  ;;  %v3268_v2 = vsel %vm8754_vm15, %v3266_v56, %v3153_v32  ;;  %v2814_v24 = vld [vmem:[#allocation3 + $0x78] sm:$0xff]  ;;  %vm8773_vm15 = vmmov %vm8766_vm3 }
 0x29c   : > { %v3172_v6 = vpop.permute.xlu1 %3171  ;;  %3101 = vst [vmem:[#allocation3 + $0x70] sm:$0x88] %v3100_v14 }
 0x29d   : > { %v3072_v42 = vrot.slane %v3071_v1, 4 }
 0x29e   : > { %v2711_v10 = vpop.permute.xlu0 %2710 }
 0x29f   : > { %v3077_v23 = vsel %vm8029_vm6, %v3072_v42, %v3076_v11 }
 0x2a0   : > { %v3162_v25 = vpop.permute.xlu1 %3161  ;;  %v6484_v30 = vcombine.low %v3077_v23, %v3268_v2 }
 0x2a1   : > { %v3271_v33 = vsel %vm8763_vm9, %v3155_v50, %v3162_v25  ;;  %vm8770_vm9 = vmmov %vm8765_vm7 }
 0x2a2   : > { %v2401_v36 = vpop.permute.xlu0 %2400  ;;  %v3273_v13 = vsel %vm8764_vm13, %v3271_v33, %v3172_v6  ;;  %v2769_v4 = vsel %vm8770_vm9, %v2767_v49, %v2711_v10  ;;  %vm8772_vm13 = vmmov %vm8766_vm3 }
 0x2a3   : > { %v6318_v22 = vld [vmem:[#allocation3 + $0x64] ss:$16 sps:$4 sm:$0xff]   ;;  %v6320_v9 = vld [vmem:[#allocation3 + $0x60] ss:$16 sps:$4 sm:$0xff]   ;;  %v2503_v33 = vsel %vm8772_vm13, %v2392_v7, %v2401_v36  ;;  %vm8776_vm4 = vmmov %vm8770_vm9 }
 0x2a4   : > { %v3186_v62 = vpop.permute.xlu1 %3185  ;;  %3773 = vmatprep.mubr.bf16.mxu1 %v6318_v22  ;;  %vm8777_vm11 = vmmov %vm8776_vm4 }
 0x2a5   : > { %v3275_v20 = vsel %vm8765_vm7, %v3273_v13, %v3186_v62  ;;  %3774 = vmatmul.mubr.bf16.gmra.mrb[12].mxu1 %v6320_v9  ;;  %vm8774_vm7 = vmmov %vm8769_vm8 }
 0x2a6   : > { %v5732_v0 = vcombine.low %v3268_v2, %v3275_v20  ;;  %v5734_v34 = vcombine.high %v3268_v2, %v3275_v20  ;;  %v8053_v58 = vpop.permute.xlu0 %2911  ;;  %vm8775_vm3 = vmmov %vm8774_vm7 }
 0x2a7   : > { %vm8778_vm8 = vmmov %vm8772_vm13 }
 0x2a8   : > { %v3313_v29 = vsel %vm6968_vm14, %v5734_v34, %v3312_v57  ;;  %v2749_v55 = vpop.permute.xlu1 %2748  ;;  %v5754_v38 = vcombine.high %v3077_v23, %v5732_v0  ;;  %v6332_v23 = vld [vmem:[#allocation3 + $0xc] ss:$16 sps:$4 sm:$0xff]   ;;  %v6330_v0 = vld [vmem:[#allocation3 + $0x8] ss:$16 sps:$4 sm:$0xff]   ;;  %vm8779_vm9 = vmmov %vm8778_vm8 }
 0x2a9   : > { %3314 = vst [vmem:[#allocation3 + $0xa0] sm:$0x11] %v3313_v29  ;;  %v2776_v18 = vsel %vm8771_vm10, %v2774_v59, %v2749_v55  ;;  %v2569_v29 = vrot.slane %v7996_v45, 4  ;;  %vm8780_vm10 = vmmov %vm8775_vm3 }
 0x2aa   : > { %v5725_v53 = vcombine.low %v2769_v4, %v2776_v18  ;;  %v5727_v8 = vcombine.high %v2769_v4, %v2776_v18  ;;  %3781 = vmatprep.mubr.bf16.mxu1 %v5754_v38  ;;  %v2413_v40 = vpop.permute.xlu0 %2412  ;;  %v2905_v18 = vrot.slane %v7695_v39, 4  ;;  %vm8781_vm13 = vmmov %vm8775_vm3 }
 0x2ab   : > { %v2507_v57 = vsel %vm8774_vm7, %v2503_v33, %v2413_v40  ;;  %vm8784_vm7 = vmmov %vm8778_vm8 }
 0x2ac   : > { %v2795_v12 = vrot.slane %v5725_v53, 5  ;;  %v2445_v63 = vpop.permute.xlu1 %2444  ;;  %v2800_v31 = vrot.slane %v5727_v8, 5  ;;  %v2949_v53 = vrot.slane %v7724_v35, 6  ;;  %v6336_v8 = vld [vmem:[#allocation3 + $0x28] ss:$16 sps:$4 sm:$0xff]  }
 0x2ad   : > { %3782 = vmatmul.mubr.bf16.gmra.mrb[16].mxu1 %v6484_v30  ;;  %v2516_v56 = vsel %vm8773_vm15, %v2436_v41, %v2445_v63  ;;  %v6337_v63 = vld [vmem:[#allocation3 + $0x4c] ss:$16 sps:$4 sm:$0xff]   ;;  %vm8783_vm15 = vmmov %vm8776_vm4 }
 0x2ae   : > { %v2799_v51 = vrot.slane %v2795_v12, 4  ;;  %2807 = vst [vmem:[#allocation3 + $0x68] sm:$0x88] %v2795_v12  ;;  %v2924_v6 = vpop.permute.xlu0 %2923  ;;  %v3014_v12 = vsel %vm8778_vm8, %v2905_v18, %v8053_v58 }
 0x2af   : > { %v3018_v45 = vsel %vm8780_vm10, %v3014_v12, %v2924_v6 }
 0x2b0   : > { %v2801_v32 = vsel %vm7981_vm12, %v2799_v51, %v2800_v31  ;;  %v2956_v1 = vpop.permute.xlu1 %2955  ;;  %v3338_v14 = vld [vmem:[#allocation3 + $0xa0] sm:$0x11] }
 0x2b1   : > { %v2815_v11 = vsel %vm7986_vm1, %v2801_v32, %v2814_v24  ;;  %v5758_v42 = vcombine.high %v3338_v14, %v3338_v14  ;;  %v5757_v25 = vcombine.low %v3338_v14, %v3338_v14  ;;  %v3027_v40 = vsel %vm8779_vm9, %v2949_v53, %v2956_v1 }
 0x2b2   : > { %2816 = vst [vmem:[#allocation3 + $0x78] sm:$0xff] %v2815_v11  ;;  %v2434_v50 = vpop.permute.xlu0 %2433 }
 0x2b3   : > { %3789 = vmatprep.mubr.bf16.mxu1 %v5758_v42  ;;  %v2511_v22 = vsel %vm8776_vm4, %v2507_v57, %v2434_v50 }
 0x2b4   : > { %v2457_v10 = vpop.permute.xlu1 %2456 }
 0x2b5   : > { %3790 = vmatmul.mubr.bf16.gmra.mrb[20].mxu1 %v5757_v25  ;;  %v2520_v62 = vsel %vm8775_vm3, %v2516_v56, %v2457_v10  ;;  %vm8785_vm3 = vmmov %vm8784_vm7 }
 0x2b6   : > { %v2945_v60 = vpop.permute.xlu0 %2944  ;;  %3829 = vmatprep.mubr.bf16.mxu1 %v6332_v23 }
 0x2b8   : > { %v2968_v43 = vpop.permute.xlu1 %2967 }
 0x2b9   : > { %v5991_v13 = vpop.f32.mrb[0].mxu1  ;;  %v3031_v24 = vsel %vm8781_vm13, %v3027_v40, %v2968_v43  ;;  %v6339_v43 = vld [vmem:[#allocation3 + $0x48] ss:$16 sps:$4 sm:$0xff]   ;;  %vm8791_vm13 = vmmov %vm8785_vm3 }
 0x2ba   : > { %v2914_v2 = vpop.permute.xlu0 %2913  ;;  %v5992_v19 = vpop.f32.mrb[1].mxu1  ;;  %v3102_v33 = vld [vmem:[#allocation3 + $0x78] sm:$0x88] }
 0x2bb   : > { %v8071_v34 = vadd.f32 %v5992_v19, %v5991_v13  ;;  %v5994_v7 = vpop.f32.mrb[2].mxu1  ;;  %v3016_v32 = vsel %vm8784_vm7, %v2905_v18, %v2914_v2 }
 0x2bc   : > { %v2474_v20 = vpop.permute.xlu1 %2473  ;;  %v5995_v36 = vpop.f32.mrb[3].mxu1 }
 0x2bd   : > { %v2524_v9 = vsel %vm8777_vm11, %v2520_v62, %v2474_v20  ;;  %3830 = vmatmul.mubr.bf16.vlgmr.msra.gmra.mrb[24].mxu1 %v6330_v0  ;;  %v8073_v59 = vadd.f32 %v5995_v36, %v5994_v7 }
 0x2be   : > { %v5723_v26 = vcombine.low %v2511_v22, %v2524_v9  ;;  %v2926_v61 = vpop.permute.xlu0 %2925  ;;  %3837 = vmatprep.mubr.bf16.mxu1 %v6334_v15 }
 0x2c0   : > { %v2571_v41 = vshll.u32 %v5723_v26, 16  ;;  %v2958_v49 = vpop.permute.xlu1 %2957 }
 0x2c1   : > { %v3029_v58 = vsel %vm8785_vm3, %v2949_v53, %v2958_v49 }
 0x2c2   : > { %v2573_v55 = vrot.slane %v2571_v41, 6  ;;  %v2947_v30 = vpop.permute.xlu0 %2946 }
 0x2c4   : > { %v2574_v38 = vsel %vm7940_vm5, %v2569_v29, %v2573_v55  ;;  %v2970_v4 = vpop.permute.xlu1 %2969  ;;  %vm8782_vm5 = vmmov %vm8776_vm4  ;;  %v3315_v55 = vld [vmem:[#allocation3 + $0xa8] sm:$0x11] }
 0x2c5   : > { %2593 = vst [vmem:[#allocation3 + $0x68] sm:$0x77] %v2574_v38  ;;  %3838 = vmatmul.mubr.bf16.gmra.mrb[28].mxu1 %v6336_v8  ;;  %v3022_v51 = vsel %vm8782_vm5, %v3018_v45, %v2945_v60  ;;  %vm8786_vm4 = vmmov %vm8780_vm10 }
 0x2c6   : > { %3845 = vmatprep.mubr.bf16.mxu1 %v6337_v63  ;;  %v3195_v35 = vpop.permute.xlu0 %3194  ;;  %v3020_v1 = vsel %vm8786_vm4, %v3016_v32, %v2926_v61  ;;  %vm8787_vm11 = vmmov %vm8786_vm4 }
 0x2c7   : > { %v3033_v14 = vsel %vm8787_vm11, %v3029_v58, %v2970_v4  ;;  %vm8788_vm8 = vmmov %vm8782_vm5 }
 0x2c8   : > { %v2985_v27 = vpop.permute.xlu1 %2984  ;;  %v3024_v50 = vsel %vm8788_vm8, %v3020_v1, %v2947_v30  ;;  %vm8789_vm9 = vmmov %vm8782_vm5  ;;  %v6375_v1 = vld [vmem:[%s8609_s5 + $0x40] sm:$0xff]  }
 0x2c9   : > { %v3035_v39 = vsel %vm8783_vm15, %v3031_v24, %v2985_v27  ;;  %vm8790_vm10 = vmmov %vm8785_vm3  ;;  %6079 = vmatprep.subr.bf16.mxu1 %v6375_v1 }
 0x2ca   : > { %v5729_v31 = vcombine.high %v3022_v51, %v3035_v39  ;;  %v3214_v57 = vpop.permute.xlu0 %3213  ;;  %v3278_v26 = vsel %vm8790_vm10, %v7502_v37, %v3195_v35  ;;  %vm8792_vm5 = vmmov %vm8786_vm4  ;;  %vm8799_vm10 = vsmask.f32 256 }
 0x2cb   : > { %v3280_v15 = vsel %vm8792_vm5, %v3278_v26, %v3214_v57  ;;  %vm8793_vm15 = vmmov %vm8786_vm4  ;;  %vm8796_vm4 = vsmask.f32 3328  ;;  %vm4192_vm5 = vcmask 518144  }
 0x2cc   : > { %v3065_v6 = vshll.u32 %v5729_v31, 16  ;;  %v3078_v11 = vshrl.u32 %v5729_v31, 16  ;;  %v2987_v42 = vpop.permute.xlu1 %2986  ;;  %vm8794_vm7 = vmmov %vm8788_vm8  ;;  %vm3944_vm8 = vcmask 516096  }
 0x2cd   : > { %v3037_v10 = vsel %vm8789_vm9, %v3033_v14, %v2987_v42  ;;  %3846 = vmatmul.mubr.bf16.gmra.mrb[32].mxu1 %v6339_v43  ;;  %vm8795_vm3 = vmmov %vm8794_vm7  ;;  %v6376_v14 = vld [vmem:[%s8609_s5] sm:$0xff]   ;;  %vm4185_vm9 = vcmask 519171  }
 0x2ce   : > { %v3067_v25 = vrot.slane %v3065_v6, 5  ;;  %v3080_v23 = vrot.slane %v3078_v11, 4  ;;  %v5731_v60 = vcombine.low %v3024_v50, %v3037_v10  ;;  %v3224_v0 = vpop.permute.xlu0 %3223  ;;  %v6377_v6 = vld [vmem:[%s8609_s5 + $0x48] sm:$0xff]   ;;  %6080 = vmatpush3.bf16.msra.mxu1 %v6376_v14 }
 0x2cf   : > { %v3282_v29 = vsel %vm8794_vm7, %v3280_v15, %v3224_v0  ;;  %v6378_v11 = vld [vmem:[%s8609_s5 + $0x8] sm:$0xff]   ;;  %6081 = vmatprep.subr.bf16.mxu1 %v6377_v6  ;;  %v8136_v0 = vld [vmem:[%s8608_s4] ss:$0 sm:$0xff]  ;;  %vm4489_vm7 = vcmask 517120  }
 0x2d0   : > { %v3081_v56 = vor.u32 %v3080_v23, %v3067_v25  ;;  %v3103_v13 = vsel %vm8022_vm0, %v3067_v25, %v3102_v33  ;;  %v3084_v62 = vshll.u32 %v5731_v60, 16  ;;  %v3233_v2 = vpop.permute.xlu1 %3232  ;;  %v3752_v15 = vadd.f32 %v8071_v34, %v8136_v0 }
 0x2d1   : > { %3104 = vst [vmem:[#allocation3 + $0x78] sm:$0x88] %v3103_v13  ;;  %v3285_v7 = vsel %vm8791_vm13, %v7608_v5, %v3233_v2  ;;  %vm8261_vm13 = vmand %vm3944_vm8, %vm8799_vm10 }
 0x2d2   : > { %v3082_v20 = vrot.slane %v3081_v56, 4  ;;  %v3086_v22 = vrot.slane %v3084_v62, 5  ;;  %6082 = vmatpush3.bf16.msra.mxu1 %v6378_v11  ;;  %vm8349_vm10 = vmand %vm4185_vm9, %vm3093_vm2  ;;  %vm8808_vm2 = vsmask.f32 1280 }
 0x2d4   : > { %v3087_v9 = vsel %vm8029_vm6, %v3082_v20, %v3086_v22  ;;  %v3252_v19 = vpop.permute.xlu1 %3251  ;;  %vm3933_vm6 = vcmask 519168  }
 0x2d5   : > { %v3287_v36 = vsel %vm8793_vm15, %v3285_v7, %v3252_v19  ;;  %v6485_v4 = vcombine.low %v3087_v9, %v3282_v29  ;;  %vm8195_vm11 = vmand %vm3933_vm6, %vm8796_vm4  ;;  %vm4482_vm15 = vcmask 519170   ;;  %vm8802_vm4 = vsmask.f32 2304 }
 0x2d8   : > { %v3262_v41 = vpop.permute.xlu1 %3261  ;;  %v6340_v61 = vld [vmem:[#allocation3 + $0x6c] ss:$16 sps:$4 sm:$0xff]   ;;  %v6342_v49 = vld [vmem:[#allocation3 + $0x68] ss:$16 sps:$4 sm:$0xff]  }
 0x2d9   : > { %v3289_v52 = vsel %vm8795_vm3, %v3287_v36, %v3262_v41  ;;  %3853 = vmatprep.mubr.bf16.mxu1 %v6340_v61  ;;  %vm4761_vm3 = vcmask 519169  }
 0x2da   : > { %v5733_v38 = vcombine.low %v3282_v29, %v3289_v52  ;;  %v5735_v30 = vcombine.high %v3282_v29, %v3289_v52  ;;  %3854 = vmatmul.mubr.bf16.gmra.mrb[36].mxu1 %v6342_v49  ;;  %v3755_v49 = vadd.f32 %v8073_v59, %v8136_v0 }
 0x2dc   : > { %v3316_v37 = vsel %vm6968_vm14, %v5735_v30, %v3315_v55  ;;  %v5756_v5 = vcombine.high %v3087_v9, %v5733_v38 }
 0x2dd   : > { %3317 = vst [vmem:[#allocation3 + $0xa8] sm:$0x11] %v3316_v37 }
 0x2de   : > { %3861 = vmatprep.mubr.bf16.mxu1 %v5756_v5 }
 0x2e2   : > { %3862 = vmatmul.mubr.bf16.gmra.mrb[40].mxu1 %v6485_v4 }
 0x2e4   : > { %v3339_v18 = vld [vmem:[#allocation3 + $0xa8] sm:$0x11] }
 0x2e5   : > { %v5760_v53 = vcombine.high %v3339_v18, %v3339_v18  ;;  %v5759_v8 = vcombine.low %v3339_v18, %v3339_v18 }
 0x2e7   : > { %3869 = vmatprep.mubr.bf16.mxu1 %v5760_v53 }
 0x2ea   : > { %3870 = vmatmul.mubr.bf16.gmra.mrb[44].mxu1 %v5759_v8 }
 0x303   : > { %v5997_v12 = vpop.f32.mrb[4].mxu1 }
 0x304   : > { %v5998_v40 = vpop.f32.mrb[5].mxu1 }
 0x305   : > { %v5999_v63 = vadd.f32 %v5998_v40, %v5997_v12  ;;  %v6000_v45 = vpop.f32.mrb[6].mxu1 }
 0x306   : > { %v6001_v24 = vpop.f32.mrb[7].mxu1 }
 0x307   : > { %v6002_v27 = vadd.f32 %v6001_v24, %v6000_v45  ;;  %v3760_v18 = vadd.f32 %v5999_v63, %v8136_v0  ;;  %v6379_v24 = vld [vmem:[%s8609_s5 + $0x50] sm:$0xff]  }
 0x308   : > { %6083 = vmatprep.subr.bf16.mxu1 %v6379_v24 }
 0x309   : > { %v3763_v40 = vadd.f32 %v6002_v27, %v8136_v0 }
 0x346   : > { %v6003_v51 = vpop.f32.mrb[8].mxu1 }
 0x347   : > { %v6004_v39 = vpop.f32.mrb[9].mxu1 }
 0x348   : > { %v8107_v35 = vadd.f32 %v6004_v39, %v6003_v51  ;;  %v6006_v31 = vpop.f32.mrb[10].mxu1 }
 0x349   : > { %v6007_v32 = vpop.f32.mrb[11].mxu1 }
 0x34a   : > { %v8109_v58 = vadd.f32 %v6007_v32, %v6006_v31  ;;  %v3768_v27 = vadd.f32 %v8107_v35, %v8136_v0 }
 0x34c   : > { %v3771_v35 = vadd.f32 %v8109_v58, %v8136_v0  ;;  %v6384_v58 = vld [vmem:[%s8609_s5 + $0x60] sm:$0xff]  }
 0x378   : > { %v6009_v42 = vpop.f32.mrb[12].mxu1 }
 0x379   : > { %v6010_v50 = vpop.f32.mrb[13].mxu1 }
 0x37a   : > { %v8123_v10 = vadd.f32 %v6010_v50, %v6009_v42  ;;  %v6012_v25 = vpop.f32.mrb[14].mxu1 }
 0x37b   : > { %v6013_v23 = vpop.f32.mrb[15].mxu1 }
 0x37c   : > { %v8125_v60 = vadd.f32 %v6013_v23, %v6012_v25  ;;  %v6381_v25 = vld [vmem:[%s8609_s5 + $0x10] sm:$0xff]   ;;  %v6382_v23 = vld [vmem:[%s8609_s5 + $0x58] sm:$0xff]  }
 0x37d   : > { %6084 = vmatpush3.bf16.msra.mxu1 %v6381_v25  ;;  %v4062_v25 = vld [vmem:[#allocation5 + $0x10] sm:$0xf] }
 0x37e   : > { %6085 = vmatprep.subr.bf16.mxu1 %v6382_v23 }
 0x380   : > { %v6015_v43 = vpop.f32.mrb[16].mxu1 }
 0x381   : > { %v6016_v33 = vpop.f32.mrb[17].mxu1 }
 0x382   : > { %v8127_v56 = vadd.f32 %v6016_v33, %v6015_v43  ;;  %v6018_v13 = vpop.f32.mrb[18].mxu1 }
 0x383   : > { %v6019_v57 = vpop.f32.mrb[19].mxu1 }
 0x384   : > { %v8129_v62 = vadd.f32 %v6019_v57, %v6018_v13 }
 0x388   : > { %v6021_v2 = vpop.f32.mrb[20].mxu1 }
 0x389   : > { %v6022_v20 = vpop.f32.mrb[21].mxu1 }
 0x38a   : > { %v8131_v22 = vadd.f32 %v6022_v20, %v6021_v2  ;;  %v6024_v9 = vpop.f32.mrb[22].mxu1  ;;  %v6383_v20 = vld [vmem:[%s8609_s5 + $0x18] sm:$0xff]  }
 0x38b   : > { %v6025_v19 = vpop.f32.mrb[23].mxu1  ;;  %6086 = vmatpush3.bf16.msra.mxu1 %v6383_v20 }
 0x38c   : > { %6087 = vmatprep.subr.bf16.mxu1 %v6384_v58 }
 0x390   : > { %v6043_v26 = vpop.f32.mrb[24].mxu1 }
 0x391   : > { %v6044_v7 = vpop.f32.mrb[25].mxu1 }
 0x392   : > { %v6045_v36 = vadd.f32 %v6044_v7, %v6043_v26  ;;  %v6046_v41 = vpop.f32.mrb[26].mxu1 }
 0x393   : > { %v6047_v61 = vpop.f32.mrb[27].mxu1 }
 0x394   : > { %v3832_v29 = vadd.f32 %v6045_v36, %v3752_v15  ;;  %v6048_v55 = vadd.f32 %v6047_v61, %v6046_v41 }
 0x396   : > { %v3877_v52 = vmax.f32 %v3832_v29, 0.0  ;;  %v3835_v38 = vadd.f32 %v6048_v55, %v3755_v49 }
 0x398   : > { %v5957_v30 = vpack.c.bf16 %v3877_v52, %v3877_v52  ;;  %v3878_v37 = vmax.f32 %v3835_v38, 0.0  ;;  %v6049_v5 = vpop.f32.mrb[28].mxu1 }
 0x399   : > { %v6050_v4 = vpop.f32.mrb[29].mxu1 }
 0x39a   : > { %3934 = vst.msk [vmem:[#allocation4] sm:$0xf] %vm3933_vm6, %v5957_v30  ;;  %v5958_v34 = vpack.c.bf16 %v3878_v37, %v3878_v37  ;;  %v6051_v53 = vadd.f32 %v6050_v4, %v6049_v5  ;;  %v6052_v8 = vpop.f32.mrb[30].mxu1  ;;  %v6385_v4 = vld [vmem:[%s8609_s5 + $0x20] sm:$0xff]  }
 0x39b   : > { %v6053_v12 = vpop.f32.mrb[31].mxu1  ;;  %6088 = vmatpush3.bf16.msra.mxu1 %v6385_v4 }
 0x39c   : > { %3935 = vst.msk [vmem:[#allocation4 + $0x4] sm:$0xf] %vm3933_vm6, %v5958_v34  ;;  %v3840_v59 = vadd.f32 %v6051_v53, %v3760_v18  ;;  %v6054_v45 = vadd.f32 %v6053_v12, %v6052_v8  ;;  %v3776_v8 = vadd.f32 %v8123_v10, %v8136_v0 }
 0x39e   : > { %v3879_v51 = vmax.f32 %v3840_v59, 0.0  ;;  %v3843_v39 = vadd.f32 %v6054_v45, %v3763_v40 }
 0x3a0   : > { %v5959_v63 = vpack.c.bf16 %v3879_v51, %v3879_v51  ;;  %v3880_v31 = vmax.f32 %v3843_v39, 0.0  ;;  %v6055_v32 = vpop.f32.mrb[32].mxu1  ;;  %v3779_v39 = vadd.f32 %v8125_v60, %v8136_v0  ;;  %v3784_v60 = vadd.f32 %v8127_v56, %v8136_v0 }
 0x3a1   : > { %v6056_v1 = vpop.f32.mrb[33].mxu1  ;;  %v8149_v14 = vld [vmem:[#allocation4] sm:$0xf] }
 0x3a2   : > { %3936 = vst.msk [vmem:[#allocation4 + $0x8] sm:$0xf] %vm3933_vm6, %v5959_v63  ;;  %v5960_v6 = vpack.c.bf16 %v3880_v31, %v3880_v31  ;;  %v6057_v11 = vadd.f32 %v6056_v1, %v6055_v32  ;;  %v6058_v42 = vpop.f32.mrb[34].mxu1  ;;  %v5804_v50 = vcombine.low %v8149_v14, %v8149_v14 }
 0x3a3   : > { %v6059_v43 = vpop.f32.mrb[35].mxu1  ;;  %v6346_v33 = vld [vmem:[#allocation4 + $0x4] ss:$0 sps:$4 sm:$0xff]  }
 0x3a4   : > { %3937 = vst.msk [vmem:[#allocation4 + $0xc] sm:$0xf] %vm3933_vm6, %v5960_v6  ;;  %v3848_v13 = vadd.f32 %v6057_v11, %v3768_v27  ;;  %v6060_v57 = vadd.f32 %v6059_v43, %v6058_v42  ;;  %v3965_v2 = vshll.u32 %v5804_v50, 16  ;;  %v3983_v9 = vshll.u32 %v6346_v33, 16 }
 0x3a5   : > { %v3963_v7 = vshrl.u32 %v5804_v50, 16  ;;  %v3981_v36 = vshrl.u32 %v6346_v33, 16 }
 0x3a6   : > { %v3881_v19 = vmax.f32 %v3848_v13, 0.0  ;;  %v3851_v26 = vadd.f32 %v6060_v57, %v3771_v35  ;;  %v3967_v15 = vrot.slane %v3965_v2, 1  ;;  %v3985_v41 = vrot.slane %v3983_v9, 1 }
 0x3a8   : > { %v5961_v61 = vpack.c.bf16 %v3881_v19, %v3881_v19  ;;  %v3882_v49 = vmax.f32 %v3851_v26, 0.0  ;;  %v3968_v29 = vor.u32 %v3967_v15, %v3963_v7  ;;  %v3986_v52 = vor.u32 %v3985_v41, %v3981_v36 }
 0x3a9   : > { %v3957_v55 = vld [vmem:[#allocation4 + $0x8] sm:$0xc]  ;;  %v8173_v30 = vld [vmem:[#allocation4 + $0x4] sm:$0x1e]  }
 0x3aa   : > { %3938 = vst.msk [vmem:[#allocation4 + $0x10] sm:$0xf] %vm3933_vm6, %v5961_v61  ;;  %v5962_v38 = vpack.c.bf16 %v3882_v49, %v3882_v49  ;;  %3969 = vrot.lane.b32.xlu0 %v3968_v29, %s6495_s16  ;;  %3987 = vrot.lane.b32.xlu1 %v3986_v52, %s6495_s16  ;;  %v4084_v59 = vshll.u32 %v8173_v30, 16  ;;  %v8191_v1 = vld [vmem:[#allocation4 + $0x4] sm:$0x1e]   ;;  %v4082_v20 = vshrl.u32 %v8173_v30, 16 }
 0x3ab   : > { %v3958_v37 = vld [vmem:[#allocation4 + $0xc] sm:$0x3]  ;;  %v3996_v15 = vshrl.u32 %v8191_v1, 16  ;;  %v3999_v6 = vshll.u32 %v8191_v1, 16 }
 0x3ac   : > { %v5809_v18 = vcombine.low %v3957_v55, %v3958_v37  ;;  %3939 = vst.msk [vmem:[#allocation4 + $0x14] sm:$0xf] %vm3933_vm6, %v5962_v38  ;;  %v8180_v53 = vld [vmem:[#allocation4 + $0x8] sm:$0x1e]   ;;  %v4086_v50 = vrot.slane %v4084_v59, 1 }
 0x3ad   : > { %v6061_v5 = vpop.f32.mrb[36].mxu1  ;;  %v4212_v24 = vshrl.u32 %v8180_v53, 16  ;;  %v4214_v51 = vshll.u32 %v8180_v53, 16  ;;  %v8189_v32 = vld [vmem:[#allocation4 + $0x8] sm:$0x1e]  }
 0x3ae   : > { %v6062_v34 = vpop.f32.mrb[37].mxu1  ;;  %v4026_v27 = vrot.slane %v5809_v18, 2  ;;  %v4097_v9 = vshrl.u32 %v8189_v32, 16  ;;  %v4099_v56 = vshll.u32 %v8189_v32, 16  ;;  %v4087_v52 = vor.u32 %v4086_v50, %v4082_v20 }
 0x3af   : > { %v6063_v12 = vadd.f32 %v6062_v34, %v6061_v5  ;;  %v6064_v40 = vpop.f32.mrb[38].mxu1  ;;  %v4216_v10 = vrot.slane %v4214_v51, 1  ;;  %v3787_v18 = vadd.f32 %v8129_v62, %v8136_v0  ;;  %v6388_v62 = vld [vmem:[%s8609_s5 + $0x68] sm:$0xff]   ;;  %v3792_v20 = vadd.f32 %v8131_v22, %v8136_v0 }
 0x3b0   : > { %v6065_v45 = vpop.f32.mrb[39].mxu1  ;;  %v5812_v35 = vcombine.low %v4026_v27, %v4026_v27  ;;  %6089 = vmatprep.subr.bf16.mxu1 %v6388_v62  ;;  %v4105_v48 = vrot.slane %v8189_v32, 1 }
 0x3b1   : > { %v3856_v63 = vadd.f32 %v6063_v12, %v3776_v8  ;;  %v6066_v31 = vadd.f32 %v6065_v45, %v6064_v40  ;;  %v4217_v23 = vor.u32 %v4216_v10, %v4212_v24  ;;  %v6350_v43 = vld [vmem:[#allocation4 + $0xc] sm:$0x1e]   ;;  %v4204_v34 = vld [vmem:[#allocation4 + $0x10] sm:$0x8]  ;;  %v4101_v45 = vrot.slane %v4099_v56, 1 }
 0x3b2   : > { %v8201_v33 = vld [vmem:[#allocation4 + $0xc] sm:$0x3c]   ;;  %v4234_v26 = vshll.u32 %v6350_v43, 16  ;;  %v4232_v49 = vshrl.u32 %v6350_v43, 16  ;;  %v4063_v29 = vsel %vm8195_vm11, %v5812_v35, %v4062_v25  ;;  %vm8343_vm11 = vmand %vm4192_vm5, %vm8802_vm4  ;;  %vm8807_vm4 = vnez %v8714_v3  ;;  %v6440_v3 = vld [vmem:[%s8609_s5 + $0x118] sm:$0xff]  }
 0x3b3   : > { %v3883_v11 = vmax.f32 %v3856_v63, 0.0  ;;  %v3859_v42 = vadd.f32 %v6066_v31, %v3779_v39  ;;  %4218 = vrot.lane.b32.xlu0 %v4217_v23, %s6495_s16  ;;  %v4367_v7 = vshll.u32 %v8201_v33, 16  ;;  %v4205_v36 = vld [vmem:[#allocation4 + $0x14] sm:$0x7]  ;;  %v4365_v37 = vshrl.u32 %v8201_v33, 16 }
 0x3b4   : > { %v4236_v38 = vrot.slane %v4234_v26, 1  ;;  %v8213_v4 = vld [vmem:[#allocation4 + $0x10] sm:$0x3c]   ;;  %4064 = vst [vmem:[#allocation5 + $0x10] sm:$0xf] %v4063_v29  ;;  %v8223_v31 = vrot.slane %v3996_v15, 1 }
 0x3b5   : > { %v5963_v13 = vpack.c.bf16 %v3883_v11, %v3883_v11  ;;  %v3884_v57 = vmax.f32 %v3859_v42, 0.0  ;;  %v6067_v2 = vpop.f32.mrb[40].mxu1  ;;  %v4369_v5 = vrot.slane %v4367_v7, 1  ;;  %v8218_v40 = vld [vmem:[#allocation4 + $0x10] sm:$0x3c]   ;;  %v4510_v24 = vshll.u32 %v8213_v4, 16 }
 0x3b6   : > { %v6068_v19 = vpop.f32.mrb[41].mxu1  ;;  %v4237_v59 = vor.u32 %v4236_v38, %v4232_v49  ;;  %v4382_v63 = vshll.u32 %v8218_v40, 16  ;;  %v8230_v11 = vld [vmem:[#allocation4 + $0xc] sm:$0x3c]   ;;  %v5826_v42 = vcombine.low %v4204_v34, %v4205_v36  ;;  %v4508_v23 = vshrl.u32 %v8213_v4, 16 }
 0x3b7   : > { %3940 = vst.msk [vmem:[#allocation4 + $0x18] sm:$0xf] %vm3933_vm6, %v5963_v13  ;;  %v5964_v41 = vpack.c.bf16 %v3884_v57, %v3884_v57  ;;  %v6069_v58 = vadd.f32 %v6068_v19, %v6067_v2  ;;  %v6070_v61 = vpop.f32.mrb[42].mxu1  ;;  %4088 = vrot.lane.b32.xlu0 %v4087_v52, %s6495_s16  ;;  %v4370_v10 = vor.u32 %v4369_v5, %v4365_v37  ;;  %v4512_v27 = vrot.slane %v4510_v24, 1  ;;  %v6389_v52 = vld [vmem:[%s8609_s5 + $0x28] sm:$0xff]  }
 0x3b8   : > { %v6071_v55 = vpop.f32.mrb[43].mxu1  ;;  %4238 = vrot.lane.b32.xlu1 %v4237_v59, %s6495_s16  ;;  %v4380_v43 = vshrl.u32 %v8218_v40, 16  ;;  %v4102_v13 = vor.u32 %v4101_v45, %v4097_v9  ;;  %v4384_v57 = vrot.slane %v4382_v63, 1  ;;  %v4247_v15 = vshrl.u32 %v8230_v11, 16  ;;  %v3946_v38 = vld [vmem:[#allocation4 + $0x28] sm:$0x1]  ;;  %6090 = vmatpush3.bf16.msra.mxu1 %v6389_v52 }
 0x3b9   : > { %3941 = vst.msk [vmem:[#allocation4 + $0x1c] sm:$0xf] %vm3933_vm6, %v5964_v41  ;;  %v3864_v8 = vadd.f32 %v6069_v58, %v3784_v60  ;;  %v6072_v12 = vadd.f32 %v6071_v55, %v6070_v61  ;;  %v4513_v41 = vor.u32 %v4512_v27, %v4508_v23  ;;  %v8243_v58 = vrot.slane %v3999_v6, 2  ;;  %v8245_v61 = vld [vmem:[#allocation4 + $0x8] sm:$0x1e]  }
 0x3ba   : > { %v8247_v49 = vrot.slane %v5826_v42, 2  ;;  %v4385_v37 = vor.u32 %v4384_v57, %v4380_v43  ;;  %v4250_v27 = vshll.u32 %v8230_v11, 16  ;;  %v6364_v6 = vld [vmem:[#allocation4 + $0x8] sm:$0x3c]   ;;  %v6390_v42 = vld [vmem:[%s8609_s5 + $0x70] sm:$0xff]   ;;  %v4012_v23 = vshrl.u32 %v8245_v61, 16 }
 0x3bb   : > { %v3885_v51 = vmax.f32 %v3864_v8, 0.0  ;;  %v3867_v39 = vadd.f32 %v6072_v12, %v3787_v18  ;;  %4371 = vrot.lane.b32.xlu0 %v4370_v10, %s6495_s16  ;;  %v8257_v12 = vrot.slane %v4247_v15, 1  ;;  %v4015_v57 = vshll.u32 %v8245_v61, 16  ;;  %6091 = vmatprep.subr.bf16.mxu1 %v6390_v42  ;;  %v6394_v15 = vld [vmem:[%s8609_s5 + $0x78] sm:$0xff]  }
 0x3bc   : > { %4103 = vrot.lane.b32.xlu1 %v4102_v13, %s6495_s16  ;;  %v8282_v13 = vrot.slane %v4250_v27, 2  ;;  %v5832_v27 = vcombine.high %v8247_v49, %v8247_v49 }
 0x3bd   : > { %v5965_v50 = vpack.c.bf16 %v3885_v51, %v3885_v51  ;;  %v3886_v25 = vmax.f32 %v3867_v39, 0.0  ;;  %v6073_v60 = vpop.f32.mrb[44].mxu1  ;;  %v5829_v39 = vcombine.low %v8247_v49, %v8247_v49 }
 0x3be   : > { %v6074_v35 = vpop.f32.mrb[45].mxu1  ;;  %v8235_v2 = vld [vmem:[#allocation4 + $0x14] sm:$0x78]  }
 0x3bf   : > { %3942 = vst.msk [vmem:[#allocation4 + $0x20] sm:$0xf] %vm3933_vm6, %v5965_v50  ;;  %v5966_v19 = vpack.c.bf16 %v3886_v25, %v3886_v25  ;;  %v6075_v26 = vadd.f32 %v6074_v35, %v6073_v60  ;;  %v6076_v7 = vpop.f32.mrb[46].mxu1  ;;  %v6357_v56 = vld [vmem:[#allocation4 + $0x14] sm:$0x3c]   ;;  %v4645_v9 = vshrl.u32 %v8235_v2, 16  ;;  %4514 = vrot.lane.b32.xlu0 %v4513_v41, %s6495_s16 }
 0x3c0   : > { %v6077_v36 = vpop.f32.mrb[47].mxu1  ;;  %v4647_v0 = vshll.u32 %v8235_v2, 16  ;;  %v4528_v29 = vshrl.u32 %v6357_v56, 16  ;;  %v4530_v55 = vshll.u32 %v6357_v56, 16  ;;  %v8255_v5 = vld [vmem:[#allocation4 + $0x18] sm:$0x78]   ;;  %4386 = vrot.lane.b32.xlu1 %v4385_v37, %s6495_s16 }
 0x3c1   : > { %3943 = vst.msk [vmem:[#allocation4 + $0x24] sm:$0xf] %vm3933_vm6, %v5966_v19  ;;  %v3872_v22 = vadd.f32 %v6075_v26, %v3792_v20  ;;  %v4785_v45 = vshrl.u32 %v8255_v5, 16  ;;  %v4787_v24 = vshll.u32 %v8255_v5, 16  ;;  %v8268_v51 = vld [vmem:[#allocation4 + $0x18] sm:$0x78]  }
 0x3c2   : > { %v4649_v34 = vrot.slane %v4647_v0, 1  ;;  %v4532_v8 = vrot.slane %v4530_v55, 1  ;;  %v4660_v25 = vshrl.u32 %v8268_v51, 16  ;;  %v4662_v60 = vshll.u32 %v8268_v51, 16  ;;  %v6392_v19 = vld [vmem:[%s8609_s5 + $0x30] sm:$0xff]   ;;  %v6395_v0 = vld [vmem:[%s8609_s5 + $0x38] sm:$0xff]  }
 0x3c3   : > { %v3887_v18 = vmax.f32 %v3872_v22, 0.0  ;;  %v4789_v50 = vrot.slane %v4787_v24, 1  ;;  %v4112_v20 = vshrl.u32 %v6364_v6, 16  ;;  %v8289_v7 = vrot.slane %v4012_v23, 1  ;;  %6092 = vmatpush3.bf16.msra.mxu1 %v6392_v19  ;;  %v6347_v24 = vld [vmem:[#allocation4 + $0x1c] ss:$0 sps:$4 sm:$0xff]  }
 0x3c4   : > { %v4650_v62 = vor.u32 %v4649_v34, %v4645_v9  ;;  %v4533_v10 = vor.u32 %v4532_v8, %v4528_v29  ;;  %v4664_v26 = vrot.slane %v4662_v60, 1  ;;  %v4115_v56 = vshll.u32 %v6364_v6, 16  ;;  %6093 = vmatprep.subr.bf16.mxu1 %v6394_v15  ;;  %v8337_v15 = vld [vmem:[#allocation4 + $0x14] sm:$0x78]  }
 0x3c5   : > { %v5967_v63 = vpack.c.bf16 %v3887_v18, %v3887_v18  ;;  %v4790_v36 = vor.u32 %v4789_v50, %v4785_v45  ;;  %v8294_v22 = vrot.slane %v4015_v57, 2  ;;  %v8299_v55 = vrot.slane %v4112_v20, 1  ;;  %v6366_v45 = vld [vmem:[#allocation4 + $0x10] sm:$0x78]   ;;  %v4339_v20 = vld [vmem:[#allocation5 + $0x38] sm:$0x7] }
 0x3c6   : > { %4651 = vrot.lane.b32.xlu0 %v4650_v62, %s6495_s16  ;;  %v6361_v35 = vld [vmem:[#allocation4 + $0x1c] sm:$0x78]   ;;  %4534 = vrot.lane.b32.xlu1 %v4533_v10, %s6495_s16  ;;  %v4665_v29 = vor.u32 %v4664_v26, %v4660_v25  ;;  %v8301_v52 = vrot.slane %v4115_v56, 2  ;;  %v4311_v18 = vrot.slane %v5829_v39, 6  ;;  %v6367_v10 = vld [vmem:[#allocation4 + $0xc] sm:$0x3c]  }
 0x3c7   : > { %v3947_v43 = vsel %vm8261_vm13, %v5967_v63, %v3946_v38  ;;  %v4803_v41 = vshrl.u32 %v6361_v35, 16  ;;  %v4805_v9 = vshll.u32 %v6361_v35, 16  ;;  %v8303_v38 = vld [vmem:[#allocation4 + $0x10] sm:$0x3c]   ;;  %v4002_v63 = vor.u32 %v8243_v58, %v8223_v31  ;;  %6094 = vmatpush3.bf16.msra.mxu1 %v6395_v0 }
 0x3c8   : > { %3948 = vst [vmem:[#allocation4 + $0x28] sm:$0x1] %v3947_v43  ;;  %v4263_v34 = vshrl.u32 %v8303_v38, 16  ;;  %v4266_v8 = vshll.u32 %v8303_v38, 16  ;;  %4330 = vst.msk [vmem:[#allocation5 + $0x24] sm:$0x8] %vm4185_vm9, %v4311_v18  ;;  %v4253_v31 = vor.u32 %v8282_v13, %v8257_v12  ;;  %v4018_v58 = vor.u32 %v8294_v22, %v8289_v7 }
 0x3c9   : > { %v4807_v37 = vrot.slane %v4805_v9, 1  ;;  %v4395_v42 = vshrl.u32 %v6366_v45, 16  ;;  %v4398_v50 = vshll.u32 %v6366_v45, 16  ;;  %v4133_v49 = vshrl.u32 %v6367_v10, 16  ;;  %v6397_v12 = vld [vmem:[%s8609_s5 + $0xc0] sm:$0xff]   ;;  %vm8373_vm9 = vmand %vm4489_vm7, %vm8808_vm2 }
 0x3ca   : > { %4791 = vrot.lane.b32.xlu0 %v4790_v36, %s6495_s16  ;;  %4666 = vrot.lane.b32.xlu1 %v4665_v29, %s6495_s16  ;;  %v8314_v39 = vrot.slane %v4263_v34, 1  ;;  %v8316_v6 = vrot.slane %v4266_v8, 2  ;;  %v4136_v60 = vshll.u32 %v6367_v10, 16  ;;  %v4118_v23 = vor.u32 %v8301_v52, %v8299_v55  ;;  %v4187_v7 = vld [vmem:[#allocation5 + $0x10] sm:$0x8] }
 0x3cb   : > { %v4808_v62 = vor.u32 %v4807_v37, %v4803_v41  ;;  %v8326_v43 = vrot.slane %v4395_v42, 1  ;;  %v8328_v35 = vrot.slane %v4398_v50, 2  ;;  %v4142_v57 = vrot.slane %v6367_v10, 2  ;;  %6119 = vmatprep.subr.bf16.mxu1 %v6397_v12  ;;  %v6369_v34 = vld [vmem:[#allocation4 + $0x14] sm:$0x78]  }
 0x3cc   : > { %v8333_v19 = vrot.slane %v4133_v49, 1  ;;  %v8335_v26 = vrot.slane %v4136_v60, 2  ;;  %v4318_v56 = vrot.slane %v4311_v18, 4  ;;  %v4269_v36 = vor.u32 %v8316_v6, %v8314_v39  ;;  %v4907_v8 = vld [vmem:[#allocation5 + $0x88] sm:$0x1] }
 0x3cd   : > { %v5820_v41 = vcombine.low %v4142_v57, %v4142_v57  ;;  %v4319_v9 = vrot.slane %v5832_v27, 6  ;;  %v4571_v0 = vrot.slane %v6347_v24, 6  ;;  %v4401_v37 = vor.u32 %v8328_v35, %v8326_v43  ;;  %v6370_v10 = vld [vmem:[#allocation4 + $0x1c] ss:$0 sps:$4 sm:$0xff]   ;;  %v4621_v50 = vld [vmem:[#allocation5 + $0x60] sm:$0x3] }
 0x3ce   : > { %4003 = vrot.lane.b32.xlu0 %v4002_v63, %s6495_s16  ;;  %4809 = vrot.lane.b32.xlu1 %v4808_v62, %s6495_s16  ;;  %v4543_v18 = vshrl.u32 %v8337_v15, 16  ;;  %v4546_v63 = vshll.u32 %v8337_v15, 16  ;;  %v4416_v49 = vshrl.u32 %v6369_v34, 16  ;;  %v8366_v60 = vld [vmem:[#allocation4 + $0x18] sm:$0x78]   ;;  %v4419_v57 = vshll.u32 %v6369_v34, 16 }
 0x3cf   : > { %v6352_v25 = vld [vmem:[#allocation4 + $0x24] sm:$0x1e]   ;;  %v4169_v45 = vrot.slane %v5820_v41, 5  ;;  %v4320_v24 = vsel %vm8807_vm4, %v4318_v56, %v4319_v9  ;;  %v5853_v62 = vcombine.low %v4571_v0, %v4571_v0  ;;  %v4673_v56 = vshrl.u32 %v6370_v10, 16  ;;  %v8382_v41 = vld [vmem:[#allocation4 + $0x20] ss:$0 sps:$4 sm:$0xff]  }
 0x3d0   : > { %v4844_v13 = vrot.slane %v6352_v25, 6  ;;  %v4340_v6 = vsel %vm8343_vm11, %v4320_v24, %v4339_v20  ;;  %v4545_v42 = vrot.slane %v4543_v18, 1  ;;  %v4425_v20 = vrot.slane %v6369_v34, 2 }
 0x3d1   : > { %v4172_v25 = vrot.slane %v4169_v45, 4  ;;  %4341 = vst [vmem:[#allocation5 + $0x38] sm:$0x7] %v4340_v6  ;;  %4612 = vst.msk [vmem:[#allocation5 + $0x4c] sm:$0xc] %vm4482_vm15, %v5853_v62  ;;  %v4418_v22 = vrot.slane %v4416_v49, 1 }
 0x3d2   : > { %v5880_v55 = vcombine.low %v4844_v13, %v4844_v13  ;;  %v5883_v52 = vcombine.high %v4844_v13, %v4844_v13  ;;  %4254 = vrot.lane.b32.xlu0 %v4253_v31, %s6495_s16  ;;  %4019 = vrot.lane.b32.xlu1 %v4018_v58, %s6495_s16  ;;  %v4188_v31 = vsel %vm8349_vm10, %v4169_v45, %v4187_v7  ;;  %v4548_v58 = vrot.slane %v4546_v63, 2 }
 0x3d3   : > { %4189 = vst [vmem:[#allocation5 + $0x10] sm:$0x8] %v4188_v31  ;;  %v4139_v13 = vor.u32 %v8335_v26, %v8333_v19  ;;  %4193 = vst.msk [vmem:[#allocation5 + $0x24] sm:$0x7] %vm4192_vm5, %v4172_v25  ;;  %v5841_v29 = vcombine.low %v4425_v20, %v4425_v20  ;;  %v4421_v18 = vrot.slane %v4419_v57, 2  ;;  %v4676_v19 = vshll.u32 %v6370_v10, 16 }
 0x3d4   : > { %v5886_v27 = vrot.slane %v5880_v55, 10  ;;  %v4886_v39 = vrot.slane %v5883_v52, 6  ;;  %v4549_v7 = vor.u32 %v4548_v58, %v4545_v42  ;;  %v5844_v55 = vcombine.high %v4425_v20, %v4425_v20  ;;  %v6373_v52 = vld [vmem:[#allocation4 + $0x20] ss:$0 sps:$4 sm:$0xff]   ;;  %v8402_v58 = vld [vmem:[#allocation4 + $0x24] ss:$0 sps:$4 sm:$0xff]  }
 0x3d5   : > { %v4559_v26 = vshrl.u32 %v8366_v60, 16  ;;  %vm8811_vm5 = vsmask.f32 7946  ;;  %v4460_v34 = vrot.slane %v5841_v29, 7  ;;  %v4675_v45 = vrot.slane %v4673_v56, 5 }
 0x3d6   : > { %v4887_v43 = vsel %vm8807_vm4, %v5886_v27, %v4886_v39  ;;  %v4890_v35 = vrot.slane %v4886_v39, 4  ;;  %4119 = vrot.lane.b32.xlu0 %v4118_v23, %s6495_s16  ;;  %4270 = vrot.lane.b32.xlu1 %v4269_v36, %s6495_s16  ;;  %v5856_v23 = vcombine.high %v4571_v0, %v4571_v0  ;;  %vm8391_vm11 = vmand %vm4482_vm15, %vm8811_vm5  ;;  %v4562_v24 = vshll.u32 %v8366_v60, 16 }
 0x3d7   : > { %4900 = vst.msk [vmem:[#allocation5 + $0x74] sm:$0xe] %vm4761_vm3, %v4887_v43  ;;  %v4678_v63 = vrot.slane %v4676_v19, 6  ;;  %v4561_v62 = vrot.slane %v4559_v26, 1  ;;  %v4816_v10 = vshrl.u32 %v8382_v41, 16  ;;  %v4819_v27 = vshll.u32 %v8382_v41, 16 }
 0x3d8   : > { %v4908_v9 = vsel %vm8261_vm13, %v4890_v35, %v4907_v8  ;;  %v4622_v36 = vsel %vm8373_vm9, %v5856_v23, %v4621_v50  ;;  %v4468_v8 = vrot.slane %v5844_v55, 7  ;;  %v4467_v39 = vrot.slane %v4460_v34, 4  ;;  %v4484_v6 = vld [vmem:[#allocation5 + $0x38] sm:$0xc] }
 0x3d9   : > { %4909 = vst [vmem:[#allocation5 + $0x88] sm:$0x1] %v4908_v9  ;;  %4623 = vst [vmem:[#allocation5 + $0x60] sm:$0x3] %v4622_v36  ;;  %v4564_v42 = vrot.slane %v4562_v24, 2  ;;  %v4692_v50 = vshrl.u32 %v6373_v52, 16  ;;  %v4485_v31 = vsel %vm8391_vm11, %v4460_v34, %v4484_v6  ;;  %vm8814_vm15 = vnez %v8678_v47 }
 0x3da   : > { %4402 = vrot.lane.b32.xlu0 %v4401_v37, %s6495_s16  ;;  %4140 = vrot.lane.b32.xlu1 %v4139_v13, %s6495_s16  ;;  %v4695_v25 = vshll.u32 %v6373_v52, 16  ;;  %v4422_v37 = vor.u32 %v4421_v18, %v4418_v22  ;;  %v4469_v49 = vsel %vm8814_vm15, %v4467_v39, %v4468_v8  ;;  %4486 = vst [vmem:[#allocation5 + $0x38] sm:$0xc] %v4485_v31  ;;  %v4818_v43 = vrot.slane %v4816_v10, 5  ;;  %v6380_v24 = vld [vmem:[#allocation4] sm:$0x1e]  }
 0x3db   : > { %4490 = vst.msk [vmem:[#allocation5 + $0x4c] sm:$0x3] %vm4489_vm7, %v4469_v49  ;;  %v4821_v35 = vrot.slane %v4819_v27, 6  ;;  %v4701_v57 = vrot.slane %v6373_v52, 6  ;;  %v4679_v20 = vor.u32 %v4678_v63, %v4675_v45  ;;  %v4565_v12 = vor.u32 %v4564_v42, %v4561_v62  ;;  %v4054_v39 = vld [vmem:[#allocation5] sm:$0xff] }
 0x3dc   : > { %v4694_v13 = vrot.slane %v4692_v50, 5  ;;  %v4697_v23 = vrot.slane %v4695_v25, 6  ;;  %v4830_v22 = vshrl.u32 %v8402_v58, 16  ;;  %vm8815_vm10 = vsmask.f32 7942 }
 0x3dd   : > { %v5865_v56 = vcombine.low %v4701_v57, %v4701_v57  ;;  %v5868_v9 = vcombine.high %v4701_v57, %v4701_v57  ;;  %vm4762_vm7 = vmand %vm4761_vm3, %vm8815_vm10  ;;  %v4822_v18 = vor.u32 %v4821_v35, %v4818_v43  ;;  %v3976_v62 = vrot.slane %v6380_v24, 1 }
 0x3de   : > { %4550 = vrot.lane.b32.xlu0 %v4549_v7, %s6495_s16  ;;  %4423 = vrot.lane.b32.xlu1 %v4422_v37, %s6495_s16  ;;  %v4833_v7 = vshll.u32 %v8402_v58, 16  ;;  %v4698_v36 = vor.u32 %v4697_v23, %v4694_v13  ;;  %v4832_v0 = vrot.slane %v4830_v22, 5  ;;  %vm8816_vm3 = vcmask 523264   ;;  %v6386_v37 = vld [vmem:[#allocation4 + $0x8] sm:$0x3c]  }
 0x3df   : > { %v5871_v29 = vrot.slane %v5865_v56, 9  ;;  %v4744_v55 = vrot.slane %v5868_v9, 5  ;;  %vm8817_vm2 = vmmov %vm8816_vm3  ;;  %v4225_v49 = vrot.slane %v6386_v37, 1  ;;  %v4090_v13 = vrot.slane %v8173_v30, 1  ;;  %v4065_v23 = vld [vmem:[#allocation4 + $0x4] sm:$0xf] }
 0x3e0   : > { %v4763_v52 = vld [vmem:[#allocation5 + $0x60] sm:$0xe]  ;;  %v4835_v34 = vrot.slane %v4833_v7, 6  ;;  %vm8818_vm9 = vmmov %vm8817_vm2  ;;  %v4613_v37 = vld [vmem:[#allocation5 + $0x50] sm:$0x33] }
 0x3e1   : > { %v4745_v19 = vsel %vm7981_vm12, %v5871_v29, %v4744_v55  ;;  %v4748_v26 = vrot.slane %v4744_v55, 4  ;;  %vm8819_vm5 = vmmov %vm8817_vm2  ;;  %v4331_v29 = vld [vmem:[#allocation5 + $0x28] sm:$0x77] }
 0x3e2   : > { %4680 = vrot.lane.b32.xlu0 %v4679_v20, %s6495_s16  ;;  %4566 = vrot.lane.b32.xlu1 %v4565_v12, %s6495_s16  ;;  %v4764_v8 = vsel %vm4762_vm7, %v4745_v19, %v4763_v52  ;;  %v4836_v45 = vor.u32 %v4835_v34, %v4832_v0  ;;  %vm8820_vm11 = vmmov %vm8817_vm2  ;;  %v4373_v19 = vrot.slane %v8201_v33, 1  ;;  %vm8822_vm7 = vnez %v8717_v28 }
 0x3e3   : > { %4765 = vst [vmem:[#allocation5 + $0x60] sm:$0xe] %v4764_v8  ;;  %4769 = vst.msk [vmem:[#allocation5 + $0x74] sm:$0x1] %vm3944_vm8, %v4748_v26  ;;  %v6393_v26 = vld [vmem:[#allocation4 + $0x10] sm:$0x78]  }
 0x3e4   : > { %vm8821_vm10 = vmmov %vm8817_vm2  ;;  %v4557_v28 = vrot.slane %v8366_v60, 1 }
 0x3e6   : > { %4823 = vrot.lane.b32.xlu0 %v4822_v18, %s6495_s16  ;;  %4699 = vrot.lane.b32.xlu1 %v4698_v36, %s6495_s16  ;;  %v6387_v36 = vld [vmem:[#allocation4 + $0xc] sm:$0x1e]  }
 0x3ea   : > { %4837 = vrot.lane.b32.xlu1 %v4836_v45, %s6495_s16 }
 0x41c   : > { %v3970_v63 = vpop.permute.xlu0 %3969  ;;  %v3988_v27 = vpop.permute.xlu1 %3987 }
 0x41d   : > { %v4029_v10 = vsel %vm8816_vm3, %v8149_v14, %v3970_v63  ;;  %v4032_v6 = vsel %vm8817_vm2, %v3976_v62, %v3988_v27  ;;  %vm8823_vm3 = vmmov %vm8817_vm2 }
 0x41e   : > { %v5810_v42 = vcombine.low %v4029_v10, %v4032_v6  ;;  %v4521_v6 = vrot.slane %v6393_v26, 1 }
 0x420   : > { %v4055_v50 = vsel %vm7986_vm1, %v5810_v42, %v4054_v39 }
 0x421   : > { %4056 = vst [vmem:[#allocation5] sm:$0xff] %v4055_v50 }
 0x425   : > { %v4219_v25 = vpop.permute.xlu0 %4218 }
 0x426   : > { %v4279_v35 = vsel %vm8818_vm9, %v8180_v53, %v4219_v25  ;;  %vm8824_vm9 = vmmov %vm8817_vm2 }
 0x428   : > { %v4179_v24 = vld [vmem:[#allocation5] sm:$0x88] }
 0x429   : > { %v4089_v31 = vpop.permute.xlu0 %4088 }
 0x42a   : > { %v4239_v43 = vpop.permute.xlu1 %4238  ;;  %v4145_v22 = vsel %vm8820_vm11, %v4065_v23, %v4089_v31  ;;  %vm8826_vm11 = vnez %v8680_v54 }
 0x42b   : > { %v4282_v57 = vsel %vm8819_vm5, %v4225_v49, %v4239_v43  ;;  %vm8825_vm5 = vmmov %vm8817_vm2 }
 0x42c   : > { %v5827_v14 = vcombine.low %v4279_v35, %v4282_v57  ;;  %v5830_v20 = vcombine.high %v4279_v35, %v4282_v57 }
 0x42d   : > { %v4372_v12 = vpop.permute.xlu0 %4371 }
 0x42e   : > { %v4309_v56 = vrot.slane %v5827_v14, 6  ;;  %v4104_v9 = vpop.permute.xlu1 %4103  ;;  %v4313_v52 = vrot.slane %v5830_v20, 6  ;;  %v4428_v45 = vsel %vm8823_vm3, %v6387_v36, %v4372_v12  ;;  %v6391_v14 = vld [vmem:[#allocation4 + $0x14] sm:$0x3c]   ;;  %v4653_v12 = vrot.slane %v8235_v2, 1  ;;  %vm8828_vm3 = vmmov %vm8817_vm2 }
 0x42f   : > { %v4148_v7 = vsel %vm8821_vm10, %v4090_v13, %v4104_v9  ;;  %v6396_v13 = vld [vmem:[#allocation4 + $0x1c] ss:$0 sps:$4 sm:$0xff]   ;;  %vm8827_vm10 = vmmov %vm8817_vm2 }
 0x430   : > { %v4312_v55 = vrot.slane %v4309_v56, 4  ;;  %4327 = vst [vmem:[#allocation5 + $0x14] sm:$0x88] %v4309_v56  ;;  %v5818_v18 = vcombine.low %v4145_v22, %v4148_v7 }
 0x431   : > { %v4515_v53 = vpop.permute.xlu0 %4514 }
 0x432   : > { %v4314_v30 = vsel %vm8807_vm4, %v4312_v55, %v4313_v52  ;;  %v4167_v0 = vrot.slane %v5818_v18, 5  ;;  %v4387_v34 = vpop.permute.xlu1 %4386  ;;  %v4573_v25 = vsel %vm8824_vm9, %v8213_v4, %v4515_v53  ;;  %v6401_v52 = vld [vmem:[%s8609_s5 + $0x80] sm:$0xff]   ;;  %v4796_v53 = vrot.slane %v6396_v13, 5  ;;  %vm8830_vm9 = vmmov %vm8828_vm3 }
 0x433   : > { %v4332_v8 = vsel %vm8822_vm7, %v4314_v30, %v4331_v29  ;;  %v4431_v63 = vsel %vm8817_vm2, %v4373_v19, %v4387_v34  ;;  %vm8829_vm2 = vnez %v8727_v16  ;;  %v6402_v34 = vld [vmem:[%s8609_s5 + $0xc8] sm:$0xff]   ;;  %v6430_v16 = vld [vmem:[%s8609_s5 + $0x100] sm:$0xff]  }
 0x434   : > { %4333 = vst [vmem:[#allocation5 + $0x28] sm:$0x77] %v4332_v8  ;;  %v4170_v62 = vrot.slane %v4167_v0, 4  ;;  %v4180_v10 = vsel %vm8022_vm0, %v4167_v0, %v4179_v24  ;;  %v5839_v33 = vcombine.low %v4428_v45, %v4431_v63  ;;  %v5842_v27 = vcombine.high %v4428_v45, %v4431_v63 }
 0x435   : > { %4181 = vst [vmem:[#allocation5] sm:$0x88] %v4180_v10  ;;  %v3994_v10 = vrot.slane %v8191_v1, 1  ;;  %v6406_v1 = vld [vmem:[%s8609_s5 + $0xd0] sm:$0xff]  }
 0x436   : > { %4190 = vst [vmem:[#allocation5 + $0x14] sm:$0x77] %v4170_v62  ;;  %v4458_v42 = vrot.slane %v5839_v33, 7  ;;  %v4462_v43 = vrot.slane %v5842_v27, 7  ;;  %v4010_v27 = vrot.slane %v8245_v61, 1 }
 0x438   : > { %v4652_v39 = vpop.permute.xlu0 %4651  ;;  %v4535_v50 = vpop.permute.xlu1 %4534  ;;  %v4461_v49 = vrot.slane %v4458_v42, 4 }
 0x439   : > { %v4576_v31 = vsel %vm8825_vm5, %v4521_v6, %v4535_v50  ;;  %v4704_v22 = vsel %vm8827_vm10, %v6391_v14, %v4652_v39  ;;  %vm8831_vm5 = vmmov %vm8828_vm3  ;;  %v6403_v39 = vld [vmem:[%s8609_s5 + $0x88] sm:$0xff]   ;;  %vm8832_vm10 = vnez %v8695_v46  ;;  %v6437_v46 = vld [vmem:[%s8609_s5 + $0x110] sm:$0xff]  }
 0x43a   : > { %v5851_v35 = vcombine.low %v4573_v25, %v4576_v31  ;;  %v5854_v57 = vcombine.high %v4573_v25, %v4576_v31  ;;  %v4463_v23 = vsel %vm8814_vm15, %v4461_v49, %v4462_v43  ;;  %v4901_v31 = vld [vmem:[#allocation5 + $0x78] sm:$0x11]  ;;  %v4057_v49 = vld [vmem:[#allocation5 + $0x8] sm:$0xff] }
 0x43b   : > { %v4476_v9 = vld [vmem:[#allocation5 + $0x28] sm:$0xcc]  ;;  %4487 = vst [vmem:[#allocation5 + $0x3c] sm:$0x33] %v4463_v23  ;;  %v4261_v23 = vrot.slane %v8303_v38, 1 }
 0x43c   : > { %v4792_v20 = vpop.permute.xlu0 %4791  ;;  %4609 = vst [vmem:[#allocation5 + $0x3c] sm:$0xcc] %v5851_v35  ;;  %v4614_v56 = vsel %vm8826_vm11, %v5854_v57, %v4613_v37  ;;  %v4667_v4 = vpop.permute.xlu1 %4666  ;;  %v4477_v29 = vsel %vm8829_vm2, %v4458_v42, %v4476_v9 }
 0x43d   : > { %4615 = vst [vmem:[#allocation5 + $0x50] sm:$0x33] %v4614_v56  ;;  %v4707_v7 = vsel %vm8828_vm3, %v4653_v12, %v4667_v4  ;;  %4478 = vst [vmem:[#allocation5 + $0x28] sm:$0xcc] %v4477_v29  ;;  %v6398_v36 = vld [vmem:[#allocation5] ss:$20 sps:$4 sm:$0xff]   ;;  %v4846_v8 = vsel %vm8830_vm9, %v8255_v5, %v4792_v20 }
 0x43e   : > { %v5863_v2 = vcombine.low %v4704_v22, %v4707_v7  ;;  %v5866_v55 = vcombine.high %v4704_v22, %v4707_v7  ;;  %v6400_v19 = vld [vmem:[#allocation5 + $0x4] ss:$20 sps:$4 sm:$0xff]   ;;  %vm8833_vm9 = vmmov %vm8828_vm3  ;;  %v4245_v12 = vrot.slane %v8230_v11, 1  ;;  %v6408_v56 = vld [vmem:[%s8609_s5 + $0x90] sm:$0xff]  }
 0x43f   : > { %5362 = vmatprep.mubr.bf16.mxu1 %v6400_v19  ;;  %v6409_v4 = vld [vmem:[#allocation4 + $0xc] sm:$0x1e]   ;;  %v6410_v11 = vld [vmem:[%s8609_s5 + $0xd8] sm:$0xff]   ;;  %v6412_v19 = vld [vmem:[#allocation4 + $0x14] sm:$0x3c]  }
 0x440   : > { %v4004_v18 = vpop.permute.xlu0 %4003  ;;  %v5869_v26 = vrot.slane %v5863_v2, 9  ;;  %v4736_v30 = vrot.slane %v5866_v55, 5  ;;  %v4810_v0 = vpop.permute.xlu1 %4809  ;;  %5363 = vmatmul.mubr.bf16.vlgmr.msra.gmra.mrb[48].mxu1 %v6398_v36  ;;  %v6411_v36 = vld [vmem:[%s8609_s5 + $0x98] sm:$0xff]  }
 0x441   : > { %v4849_v45 = vsel %vm8831_vm5, %v4796_v53, %v4810_v0  ;;  %6120 = vmatpush3.bf16.msra.mxu1 %v6401_v52  ;;  %v4035_v37 = vsel %vm8828_vm3, %v3994_v10, %v4004_v18  ;;  %vm8834_vm5 = vmmov %vm8828_vm3  ;;  %v4126_v53 = vrot.slane %v6409_v4, 1  ;;  %v6415_v0 = vld [vmem:[%s8609_s5 + $0xe0] sm:$0xff]   ;;  %v4388_v10 = vrot.slane %v8218_v40, 1  ;;  %v6419_v40 = vld [vmem:[%s8609_s5 + $0xe8] sm:$0xff]  }
 0x442   : > { %v4746_v24 = vrot.slane %v4736_v30, 4  ;;  %v5878_v63 = vcombine.low %v4846_v8, %v4849_v45  ;;  %v5881_v62 = vcombine.high %v4846_v8, %v4849_v45  ;;  %v4737_v5 = vsel %vm7981_vm12, %v5869_v26, %v4736_v30  ;;  %6121 = vmatprep.subr.bf16.mxu1 %v6402_v34  ;;  %v4334_v8 = vld [vmem:[#allocation5 + $0x30] sm:$0x77] }
 0x443   : > { %v6422_v4 = vld [vmem:[%s8609_s5 + $0xf0] sm:$0xff]  }
 0x444   : > { %v4255_v33 = vpop.permute.xlu0 %4254  ;;  %v4755_v6 = vld [vmem:[#allocation5 + $0x50] sm:$0xee]  ;;  %4766 = vst [vmem:[#allocation5 + $0x64] sm:$0x11] %v4746_v24  ;;  %v5884_v42 = vrot.slane %v5878_v63, 10  ;;  %v4878_v50 = vrot.slane %v5881_v62, 6  ;;  %v4020_v25 = vpop.permute.xlu1 %4019 }
 0x445   : > { %v4756_v61 = vsel %vm8832_vm10, %v4737_v5, %v4755_v6  ;;  %v4038_v43 = vsel %vm8833_vm9, %v4010_v27, %v4020_v25  ;;  %v6404_v20 = vld [vmem:[#allocation5 + $0x2c] ss:$20 sps:$4 sm:$0xff]   ;;  %6122 = vmatpush3.bf16.msra.mxu1 %v6403_v39  ;;  %v6407_v29 = vld [vmem:[#allocation5 + $0x28] ss:$20 sps:$4 sm:$0xff]   ;;  %v4285_v38 = vsel %vm8834_vm5, %v4245_v12, %v4255_v33  ;;  %v4409_v27 = vrot.slane %v6412_v19, 1 }
 0x446   : > { %4757 = vst [vmem:[#allocation5 + $0x50] sm:$0xee] %v4756_v61  ;;  %v4879_v35 = vsel %vm8807_vm4, %v5884_v42, %v4878_v50  ;;  %v4888_v57 = vrot.slane %v4878_v50, 4  ;;  %v5811_v14 = vcombine.low %v4035_v37, %v4038_v43  ;;  %5370 = vmatprep.mubr.bf16.mxu1 %v6404_v20  ;;  %6123 = vmatprep.subr.bf16.mxu1 %v6406_v1  ;;  %v6417_v6 = vld [vmem:[%s8609_s5 + $0xa0] sm:$0xff]   ;;  %v4541_v20 = vrot.slane %v8337_v15, 1  ;;  %v6420_v12 = vld [vmem:[%s8609_s5 + $0xa8] sm:$0xff]  }
 0x447   : > { %4897 = vst [vmem:[#allocation5 + $0x64] sm:$0xee] %v4879_v35 }
 0x448   : > { %v4120_v13 = vpop.permute.xlu0 %4119  ;;  %v4902_v9 = vsel %vm6968_vm14, %v4888_v57, %v4901_v31  ;;  %v4058_v22 = vsel %vm7986_vm1, %v5811_v14, %v4057_v49  ;;  %v4271_v7 = vpop.permute.xlu1 %4270  ;;  %5371 = vmatmul.mubr.bf16.gmra.mrb[52].mxu1 %v6407_v29  ;;  %vm8835_vm1 = vmmov %vm8828_vm3 }
 0x449   : > { %4903 = vst [vmem:[#allocation5 + $0x78] sm:$0x11] %v4902_v9  ;;  %4059 = vst [vmem:[#allocation5 + $0x8] sm:$0xff] %v4058_v22  ;;  %v4288_v2 = vsel %vm8828_vm3, %v4261_v23, %v4271_v7  ;;  %6124 = vmatpush3.bf16.msra.mxu1 %v6408_v56  ;;  %v4151_v34 = vsel %vm8835_vm1, %v4105_v48, %v4120_v13  ;;  %v6421_v13 = vld [vmem:[#allocation4 + $0x1c] sm:$0x78]  }
 0x44a   : > { %v5828_v55 = vcombine.low %v4285_v38, %v4288_v2  ;;  %v5831_v52 = vcombine.high %v4285_v38, %v4288_v2  ;;  %6125 = vmatprep.subr.bf16.mxu1 %v6410_v11  ;;  %vm8836_vm9 = vmmov %vm8835_vm1  ;;  %v4616_v9 = vld [vmem:[#allocation5 + $0x58] sm:$0x33]  ;;  %v4668_v38 = vrot.slane %v8268_v51, 1  ;;  %v4687_v2 = vrot.slane %v6421_v13, 1 }
 0x44b   : > { %vm8837_vm5 = vmmov %vm8835_vm1  ;;  %v6425_v51 = vld [vmem:[%s8609_s5 + $0xf8] sm:$0xff]   ;;  %v6445_v13 = vld [vmem:[#allocation5 + $0x88] ss:$0 sps:$4 sm:$0x11]  }
 0x44c   : > { %v4403_v18 = vpop.permute.xlu0 %4402  ;;  %v4310_v26 = vrot.slane %v5828_v55, 6  ;;  %v4141_v30 = vpop.permute.xlu1 %4140  ;;  %v4316_v24 = vrot.slane %v5831_v52, 6  ;;  %vm8838_vm3 = vmmov %vm8835_vm1  ;;  %v6424_v55 = vld [vmem:[%s8609_s5 + $0xb0] sm:$0xff]  }
 0x44d   : > { %v4154_v32 = vsel %vm8836_vm9, %v4126_v53, %v4141_v30  ;;  %6126 = vmatpush3.bf16.msra.mxu1 %v6411_v36  ;;  %v4434_v37 = vsel %vm8837_vm5, %v4388_v10, %v4403_v18 }
 0x44e   : > { %v4315_v45 = vrot.slane %v4310_v26, 4  ;;  %4328 = vst [vmem:[#allocation5 + $0x1c] sm:$0x88] %v4310_v26  ;;  %v5819_v63 = vcombine.low %v4151_v34, %v4154_v32  ;;  %v6413_v62 = vld [vmem:[#allocation5 + $0x54] ss:$20 sps:$4 sm:$0xff]   ;;  %6127 = vmatprep.subr.bf16.mxu1 %v6415_v0  ;;  %v4814_v34 = vrot.slane %v8382_v41, 5 }
 0x44f   : > { %v6416_v39 = vld [vmem:[#allocation5 + $0x50] ss:$20 sps:$4 sm:$0xff]   ;;  %5378 = vmatprep.mubr.bf16.mxu1 %v6413_v62 }
 0x450   : > { %v4551_v33 = vpop.permute.xlu0 %4550  ;;  %v4317_v5 = vsel %vm8807_vm4, %v4315_v45, %v4316_v24  ;;  %v4182_v42 = vld [vmem:[#allocation5 + $0x8] sm:$0x88]  ;;  %v4168_v50 = vrot.slane %v5819_v63, 5  ;;  %v4424_v25 = vpop.permute.xlu1 %4423  ;;  %v4928_v1 = vld [vmem:[#allocation5 + $0x78] sm:$0x11]  ;;  %5379 = vmatmul.mubr.bf16.gmra.mrb[56].mxu1 %v6416_v39 }
 0x451   : > { %v4335_v61 = vsel %vm8822_vm7, %v4317_v5, %v4334_v8  ;;  %v4437_v31 = vsel %vm8838_vm3, %v4409_v27, %v4424_v25  ;;  %v5904_v49 = vcombine.high %v4928_v1, %v4928_v1  ;;  %6128 = vmatpush3.bf16.msra.mxu1 %v6417_v6  ;;  %v5903_v53 = vcombine.low %v4928_v1, %v4928_v1  ;;  %v6429_v45 = vld [vmem:[%s8609_s5 + $0xb8] sm:$0xff]   ;;  %v6433_v25 = vld [vmem:[%s8609_s5 + $0x108] sm:$0xff]  }
 0x452   : > { %4336 = vst [vmem:[#allocation5 + $0x30] sm:$0x77] %v4335_v61  ;;  %v4171_v43 = vrot.slane %v4168_v50, 4  ;;  %v4183_v35 = vsel %vm8022_vm0, %v4168_v50, %v4182_v42  ;;  %v5840_v57 = vcombine.low %v4434_v37, %v4437_v31  ;;  %v5843_v14 = vcombine.high %v4434_v37, %v4437_v31  ;;  %6129 = vmatprep.subr.bf16.mxu1 %v6419_v40  ;;  %vm8839_vm0 = vmmov %vm8835_vm1  ;;  %v4904_v40 = vld [vmem:[#allocation5 + $0x80] sm:$0x11] }
 0x453   : > { %4184 = vst [vmem:[#allocation5 + $0x8] sm:$0x88] %v4183_v35  ;;  %5386 = vmatprep.mubr.bf16.mxu1 %v5904_v49  ;;  %v4579_v15 = vsel %vm8839_vm0, %v4541_v20, %v4551_v33  ;;  %vm8840_vm7 = vmmov %vm8839_vm0  ;;  %v4828_v8 = vrot.slane %v8402_v58, 5  ;;  %v6442_v20 = vld [vmem:[#allocation5 + $0x10] ss:$20 sps:$4 sm:$0xff]  }
 0x454   : > { %4191 = vst [vmem:[#allocation5 + $0x1c] sm:$0x77] %v4171_v43  ;;  %v4459_v23 = vrot.slane %v5840_v57, 7  ;;  %v4681_v56 = vpop.permute.xlu0 %4680  ;;  %v4567_v17 = vpop.permute.xlu1 %4566  ;;  %v4465_v7 = vrot.slane %v5843_v14, 7  ;;  %vm8841_vm1 = vmmov %vm8839_vm0 }
 0x455   : > { %v4582_v22 = vsel %vm8840_vm7, %v4557_v28, %v4567_v17  ;;  %6130 = vmatpush3.bf16.msra.mxu1 %v6420_v12  ;;  %v4710_v19 = vsel %vm8841_vm1, %v4668_v38, %v4681_v56  ;;  %vm8842_vm9 = vmmov %vm8839_vm0  ;;  %v6443_v28 = vld [vmem:[#allocation5 + $0x38] ss:$20 sps:$4 sm:$0xff]   ;;  %v6444_v12 = vld [vmem:[#allocation5 + $0x60] ss:$20 sps:$4 sm:$0xff]  }
 0x456   : > { %v4464_v60 = vrot.slane %v4459_v23, 4  ;;  %v5852_v29 = vcombine.low %v4579_v15, %v4582_v22  ;;  %v5855_v11 = vcombine.high %v4579_v15, %v4582_v22  ;;  %6131 = vmatprep.subr.bf16.mxu1 %v6422_v4 }
 0x458   : > { %v4466_v52 = vsel %vm8814_vm15, %v4464_v60, %v4465_v7  ;;  %4610 = vst [vmem:[#allocation5 + $0x44] sm:$0xcc] %v5852_v29  ;;  %v4617_v48 = vsel %vm8826_vm11, %v5855_v11, %v4616_v9  ;;  %v4700_v18 = vpop.permute.xlu1 %4699  ;;  %v4824_v30 = vpop.permute.xlu0 %4823  ;;  %5387 = vmatmul.mubr.bf16.gmra.mrb[60].mxu1 %v5903_v53  ;;  %vm8843_vm15 = vmmov %vm8839_vm0 }
 0x459   : > { %v4479_v36 = vld [vmem:[#allocation5 + $0x30] sm:$0xcc]  ;;  %4488 = vst [vmem:[#allocation5 + $0x44] sm:$0x33] %v4466_v52  ;;  %4618 = vst [vmem:[#allocation5 + $0x58] sm:$0x33] %v4617_v48  ;;  %v4713_v26 = vsel %vm8842_vm9, %v4687_v2, %v4700_v18  ;;  %6132 = vmatpush3.bf16.msra.mxu1 %v6424_v55  ;;  %v4852_v10 = vsel %vm8843_vm15, %v4814_v34, %v4824_v30 }
 0x45a   : > { %v4480_v47 = vsel %vm8829_vm2, %v4459_v23, %v4479_v36  ;;  %v5864_v54 = vcombine.low %v4710_v19, %v4713_v26  ;;  %v5867_v0 = vcombine.high %v4710_v19, %v4713_v26  ;;  %6133 = vmatprep.subr.bf16.mxu1 %v6425_v51  ;;  %vm8844_vm11 = vmmov %vm8839_vm0  ;;  %v5887_v30 = vld [vmem:[%s8610_s6] ss:$0 sm:$0xff] }
 0x45b   : > { %4481 = vst [vmem:[#allocation5 + $0x30] sm:$0xcc] %v4480_v47  ;;  %v6428_v32 = vld [vmem:[#allocation5 + $0xc] ss:$20 sps:$4 sm:$0xff]   ;;  %v6426_v39 = vld [vmem:[#allocation5 + $0x8] ss:$20 sps:$4 sm:$0xff]   ;;  %vm8848_vm2 = vmmov %vm8839_vm0 }
 0x45c   : > { %v5870_v24 = vrot.slane %v5864_v54, 9  ;;  %v4740_v63 = vrot.slane %v5867_v0, 5  ;;  %v4838_v62 = vpop.permute.xlu1 %4837  ;;  %5426 = vmatprep.mubr.bf16.mxu1 %v6428_v32 }
 0x45d   : > { %v4855_v41 = vsel %vm8844_vm11, %v4828_v8, %v4838_v62  ;;  %6134 = vmatpush3.bf16.msra.mxu1 %v6429_v45 }
 0x45e   : > { %v4747_v33 = vrot.slane %v4740_v63, 4  ;;  %v5879_v58 = vcombine.low %v4852_v10, %v4855_v41  ;;  %v5882_v27 = vcombine.high %v4852_v10, %v4855_v41  ;;  %v4741_v5 = vsel %vm7981_vm12, %v5870_v24, %v4740_v63  ;;  %6167 = vmatprep.subr.bf16.mxu1 %v6430_v16  ;;  %vm8846_vm12 = vmmov %vm8839_vm0 }
 0x460   : > { %v4758_v6 = vld [vmem:[#allocation5 + $0x58] sm:$0xee]  ;;  %4767 = vst [vmem:[#allocation5 + $0x6c] sm:$0x11] %v4747_v33  ;;  %v5885_v42 = vrot.slane %v5879_v58, 10  ;;  %v4882_v50 = vrot.slane %v5882_v27, 6  ;;  %5427 = vmatmul.mubr.bf16.vlgmr.msra.gmra.mrb[64].mxu1 %v6426_v39 }
 0x461   : > { %v4759_v1 = vsel %vm8832_vm10, %v4741_v5, %v4758_v6  ;;  %6168 = vmatpush3.bf16.msra.mxu1 %v6430_v16  ;;  %vm8849_vm10 = vsmask.f32 7938 }
 0x462   : > { %4760 = vst [vmem:[#allocation5 + $0x58] sm:$0xee] %v4759_v1  ;;  %v4883_v61 = vsel %vm8807_vm4, %v5885_v42, %v4882_v50  ;;  %v4889_v37 = vrot.slane %v4882_v50, 4  ;;  %v6431_v21 = vld [vmem:[#allocation5 + $0x34] ss:$20 sps:$4 sm:$0xff]   ;;  %6169 = vmatprep.subr.bf16.mxu1 %v6433_v25  ;;  %vm8847_vm4 = vmmov %vm8839_vm0 }
 0x463   : > { %4898 = vst [vmem:[#allocation5 + $0x6c] sm:$0xee] %v4883_v61  ;;  %5434 = vmatprep.mubr.bf16.mxu1 %v6431_v21  ;;  %v6434_v49 = vld [vmem:[#allocation5 + $0x30] ss:$20 sps:$4 sm:$0xff]   ;;  %vm5567_vm5 = vmand %vm3944_vm8, %vm8849_vm10 }
 0x464   : > { %v4905_v31 = vsel %vm6968_vm14, %v4889_v37, %v4904_v40  ;;  %vm8845_vm14 = vmmov %vm8839_vm0 }
 0x465   : > { %4906 = vst [vmem:[#allocation5 + $0x80] sm:$0x11] %v4905_v31  ;;  %6170 = vmatpush3.bf16.msra.mxu1 %v6433_v25 }
 0x466   : > { %6171 = vmatprep.subr.bf16.mxu1 %v6437_v46 }
 0x468   : > { %5435 = vmatmul.mubr.bf16.gmra.mrb[68].mxu1 %v6434_v49 }
 0x469   : > { %6172 = vmatpush3.bf16.msra.mxu1 %v6437_v46 }
 0x46a   : > { %v6435_v43 = vld [vmem:[#allocation5 + $0x5c] ss:$20 sps:$4 sm:$0xff]   ;;  %6173 = vmatprep.subr.bf16.mxu1 %v6440_v3  ;;  %v6438_v35 = vld [vmem:[#allocation5 + $0x58] ss:$20 sps:$4 sm:$0xff]  }
 0x46b   : > { %5442 = vmatprep.mubr.bf16.mxu1 %v6435_v43 }
 0x46c   : > { %v4929_v44 = vld [vmem:[#allocation5 + $0x80] sm:$0x11] }
 0x46d   : > { %6174 = vmatpush3.bf16.msra.mxu1 %v6440_v3  ;;  %v5906_v57 = vcombine.high %v4929_v44, %v4929_v44  ;;  %v5905_v14 = vcombine.low %v4929_v44, %v4929_v44 }
 0x470   : > { %5443 = vmatmul.mubr.bf16.gmra.mrb[72].mxu1 %v6438_v35 }
 0x471   : > { %5450 = vmatprep.mubr.bf16.mxu1 %v5906_v57 }
 0x478   : > { %5451 = vmatmul.mubr.bf16.gmra.mrb[76].mxu1 %v5905_v14 }
 0x479   : > { %6175 = vmatprep.mubr.msk.bf16.mxu1 %vm8845_vm14, %v6442_v20 }
 0x480   : > { %6176 = vmatmul.mubr.msk.bf16.vlgmr.msra.gmra.mrb[80].mxu1 %vm8846_vm12, %v6443_v28 }
 0x481   : > { %6179 = vmatprep.mubr.msk.bf16.mxu1 %vm8847_vm4, %v6444_v12 }
 0x488   : > { %6180 = vmatmul.mubr.msk.bf16.gmra.mrb[84].mxu1 %vm8848_vm2, %v6445_v13 }
 0x513   : > { %v6095_v23 = vpop.f32.mrb[48].mxu1 }
 0x514   : > { %v6096_v56 = vpop.f32.mrb[49].mxu1 }
 0x515   : > { %v6097_v17 = vadd.f32 %v6096_v56, %v6095_v23  ;;  %v6098_v4 = vpop.f32.mrb[50].mxu1 }
 0x516   : > { %v6099_v15 = vpop.f32.mrb[51].mxu1 }
 0x517   : > { %v6100_v9 = vadd.f32 %v6099_v15, %v6098_v4  ;;  %v5365_v34 = vadd.f32 %v6097_v17, %v5887_v30 }
 0x519   : > { %v5368_v24 = vadd.f32 %v6100_v9, %v5887_v30 }
 0x51b   : > { %v6101_v22 = vpop.f32.mrb[52].mxu1 }
 0x51c   : > { %v6102_v60 = vpop.f32.mrb[53].mxu1 }
 0x51d   : > { %v6103_v7 = vadd.f32 %v6102_v60, %v6101_v22  ;;  %v6104_v29 = vpop.f32.mrb[54].mxu1 }
 0x51e   : > { %v6105_v11 = vpop.f32.mrb[55].mxu1 }
 0x51f   : > { %v6106_v38 = vadd.f32 %v6105_v11, %v6104_v29  ;;  %v5373_v33 = vadd.f32 %v6103_v7, %v5887_v30 }
 0x521   : > { %v5376_v6 = vadd.f32 %v6106_v38, %v5887_v30 }
 0x523   : > { %v6107_v2 = vpop.f32.mrb[56].mxu1 }
 0x524   : > { %v6108_v55 = vpop.f32.mrb[57].mxu1 }
 0x525   : > { %v6109_v52 = vadd.f32 %v6108_v55, %v6107_v2  ;;  %v6110_v48 = vpop.f32.mrb[58].mxu1 }
 0x526   : > { %v6111_v18 = vpop.f32.mrb[59].mxu1 }
 0x527   : > { %v6112_v53 = vadd.f32 %v6111_v18, %v6110_v48  ;;  %v5381_v40 = vadd.f32 %v6109_v52, %v5887_v30 }
 0x529   : > { %v5384_v31 = vadd.f32 %v6112_v53, %v5887_v30 }
 0x52b   : > { %v6113_v51 = vpop.f32.mrb[60].mxu1 }
 0x52c   : > { %v6114_v36 = vpop.f32.mrb[61].mxu1 }
 0x52d   : > { %v6115_v19 = vadd.f32 %v6114_v36, %v6113_v51  ;;  %v6116_v26 = vpop.f32.mrb[62].mxu1 }
 0x52e   : > { %v6117_v47 = vpop.f32.mrb[63].mxu1  ;;  %v5564_v26 = vld [vmem:[%s8579_s10 + $0x18] sm:$0x1] }
 0x52f   : > { %v5389_v35 = vadd.f32 %v6115_v19, %v5887_v30 }
 0x533   : > { %v6135_v54 = vpop.f32.mrb[64].mxu1 }
 0x534   : > { %v6136_v0 = vpop.f32.mrb[65].mxu1 }
 0x535   : > { %v6137_v8 = vadd.f32 %v6136_v0, %v6135_v54  ;;  %v6138_v32 = vpop.f32.mrb[66].mxu1 }
 0x536   : > { %v6139_v45 = vpop.f32.mrb[67].mxu1 }
 0x537   : > { %v6140_v63 = vadd.f32 %v6139_v45, %v6138_v32  ;;  %v5429_v62 = vadd.f32 %v6137_v8, %v5365_v34 }
 0x539   : > { %v5432_v16 = vadd.f32 %v6140_v63, %v5368_v24 }
 0x53b   : > { %v6141_v10 = vpop.f32.mrb[68].mxu1 }
 0x53c   : > { %v6142_v41 = vpop.f32.mrb[69].mxu1 }
 0x53d   : > { %v6143_v58 = vadd.f32 %v6142_v41, %v6141_v10  ;;  %v6144_v27 = vpop.f32.mrb[70].mxu1 }
 0x53e   : > { %v6145_v39 = vpop.f32.mrb[71].mxu1 }
 0x53f   : > { %v6146_v5 = vadd.f32 %v6145_v39, %v6144_v27  ;;  %v5437_v42 = vadd.f32 %v6143_v58, %v5373_v33 }
 0x541   : > { %v5440_v50 = vadd.f32 %v6146_v5, %v5376_v6 }
 0x543   : > { %v6147_v25 = vpop.f32.mrb[72].mxu1 }
 0x544   : > { %v6148_v1 = vpop.f32.mrb[73].mxu1 }
 0x545   : > { %v6149_v61 = vadd.f32 %v6148_v1, %v6147_v25  ;;  %v6150_v37 = vpop.f32.mrb[74].mxu1 }
 0x546   : > { %v6151_v21 = vpop.f32.mrb[75].mxu1 }
 0x547   : > { %v6152_v46 = vadd.f32 %v6151_v21, %v6150_v37  ;;  %v5445_v49 = vadd.f32 %v6149_v61, %v5381_v40 }
 0x549   : > { %v5448_v3 = vadd.f32 %v6152_v46, %v5384_v31 }
 0x54b   : > { %v6153_v43 = vpop.f32.mrb[76].mxu1 }
 0x54c   : > { %v6154_v44 = vpop.f32.mrb[77].mxu1 }
 0x54d   : > { %v6155_v57 = vadd.f32 %v6154_v44, %v6153_v43  ;;  %v6156_v14 = vpop.f32.mrb[78].mxu1 }
 0x54e   : > { %v6157_v20 = vpop.f32.mrb[79].mxu1 }
 0x54f   : > { %v5453_v28 = vadd.f32 %v6155_v57, %v5389_v35 }
 0x553   : > { %v6177_v12 = vpop.f32.mrb[80].mxu1 }
 0x554   : > { %v5501_v13 = vadd.f32 %v6177_v12, %v5437_v42  ;;  %v5492_v23 = vpop.f32.mrb[81].mxu1 }
 0x555   : > { %v5493_v56 = vadd.f32 %v5492_v23, %v5429_v62  ;;  %v6178_v17 = vpop.f32.mrb[82].mxu1 }
 0x556   : > { %v5524_v4 = vmax.f32 %v5501_v13, 0.0  ;;  %v5504_v15 = vadd.f32 %v6178_v17, %v5440_v50  ;;  %v5495_v9 = vpop.f32.mrb[83].mxu1 }
 0x557   : > { %v5522_v22 = vmax.f32 %v5493_v56, 0.0  ;;  %v5496_v60 = vadd.f32 %v5495_v9, %v5432_v16 }
 0x558   : > { %v5970_v7 = vpack.c.bf16 %v5524_v4, %v5524_v4  ;;  %v5525_v29 = vmax.f32 %v5504_v15, 0.0 }
 0x559   : > { %v5968_v11 = vpack.c.bf16 %v5522_v22, %v5522_v22  ;;  %v5523_v38 = vmax.f32 %v5496_v60, 0.0 }
 0x55a   : > { %5560 = vst.msk [vmem:[%s8579_s10 + $0x8] sm:$0xf] %vm3933_vm6, %v5970_v7  ;;  %v5971_v2 = vpack.c.bf16 %v5525_v29, %v5525_v29 }
 0x55b   : > { %5558 = vst.msk [vmem:[%s8579_s10] sm:$0xf] %vm3933_vm6, %v5968_v11  ;;  %v5969_v55 = vpack.c.bf16 %v5523_v38, %v5523_v38  ;;  %v6181_v52 = vpop.f32.mrb[84].mxu1 }
 0x55c   : > { %5561 = vst.msk [vmem:[%s8579_s10 + $0xc] sm:$0xf] %vm3933_vm6, %v5971_v2  ;;  %v5517_v48 = vadd.f32 %v6181_v52, %v5453_v28  ;;  %v5508_v18 = vpop.f32.mrb[85].mxu1 }
 0x55d   : > { %5559 = vst.msk [vmem:[%s8579_s10 + $0x4] sm:$0xf] %vm3933_vm6, %v5969_v55  ;;  %v5509_v53 = vadd.f32 %v5508_v18, %v5445_v49  ;;  %v6182_v51 = vpop.f32.mrb[86].mxu1 }
 0x55e   : > { %v5528_v36 = vmax.f32 %v5517_v48, 0.0  ;;  %v5511_v19 = vpop.f32.mrb[87].mxu1 }
 0x55f   : > { %v5526_v47 = vmax.f32 %v5509_v53, 0.0  ;;  %v5512_v30 = vadd.f32 %v5511_v19, %v5448_v3 }
 0x560   : > { %v5974_v54 = vpack.c.bf16 %v5528_v36, %v5528_v36 }
 0x561   : > { %v5972_v0 = vpack.c.bf16 %v5526_v47, %v5526_v47  ;;  %v5527_v34 = vmax.f32 %v5512_v30, 0.0 }
 0x562   : > { %v5565_v8 = vsel %vm8261_vm13, %v5974_v54, %v5564_v26 }
 0x563   : > { %5566 = vst [vmem:[%s8579_s10 + $0x18] sm:$0x1] %v5565_v8  ;;  %5562 = vst.msk [vmem:[%s8579_s10 + $0x10] sm:$0xf] %vm3933_vm6, %v5972_v0  ;;  %v5973_v32 = vpack.c.bf16 %v5527_v34, %v5527_v34 }
 0x565   : > { %5563 = vst.msk [vmem:[%s8579_s10 + $0x14] sm:$0xf] %vm3933_vm6, %v5973_v32 }
 0x56a   : > { %v5568_v45 = vld [vmem:[%s8579_s10 + $0x18] sm:$0x1] }
 0x56b   : > { %v5569_v24 = vsel %vm5567_vm5, 0, %v5568_v45 }
 0x56c   : > { %5570 = vst [vmem:[%s8579_s10 + $0x18] sm:$0x1] %v5569_v24 }
 0x56d PF: > { %s17_s24 = sadd.s32 1, %s6492_s24  }
 0x56e   : > { %p14_p4 = scmp.ge.s32.totalorder %s17_s24, 4  }
 0x570   :  { %16 = sbr.rel (!%p14_p4) target bundleno = 1 (0x1), region = 78 }

</bundles_post_ra>
